<compile_context>
chip_gen: v6e
topology: v6e:2x2x1
jax: 0.10.0
libtpu: 0.0.40
codegen_flags: <defaults>
</compile_context>

<pallas_src>
import functools

import jax
import jax.numpy as jnp
from jax.experimental import pallas as pl
from jax.experimental.pallas import tpu as pltpu


def _round_up(x, m):
    return ((x + m - 1) // m) * m


def _cdiv(a, b):
    return (a + b - 1) // b


def _vmem_limit_bytes():
    """Per-generation scoped-VMEM budget (raise on v5e/v6e, cap on v7x)."""
    try:
        kind = jax.devices()[0].device_kind.lower()
    except Exception:
        kind = ""
    if "v7" in kind or "7x" in kind:
        return 48 * 1024 * 1024   # v7x: 64 MiB physical per core -> leave headroom
    if "v5" in kind or "v6" in kind:
        return 96 * 1024 * 1024   # 128 MiB physical
    return 32 * 1024 * 1024       # conservative default for unknown parts


_VMEM_LIMIT = _vmem_limit_bytes()
_TARGET_BLOCK_PIXELS = 2048       # output rows*cols per grid block (fused 3x3 path)


# ----------------------------------------------------------------------------
# Fused 3x3 / stride-2 conv kernel: per-tap matmuls, in-kernel patch extraction
# ----------------------------------------------------------------------------
def _conv3x3_tap_kernel(x_ref, w_ref, o_ref, acc_ref, *, th, wo, relu):
    """One (th, wo) output-row block of a 3x3/stride-2 conv, all Cout channels.

    x_ref  : (4, th+1, wo+1, cin)  stride-parity-split input block (+1 halo row/col)
    w_ref  : (9, cin, coutp)       VMEM-resident weights, tap-major
    o_ref  : (th, wo, coutp)
    acc_ref: (th*wo, coutp) f32 scratch
    """
    cin = x_ref.shape[-1]
    acc_ref[...] = jnp.zeros_like(acc_ref)
    for i in range(3):
        for j in range(3):
            plane = (i % 2) * 2 + (j % 2)          # parity plane of this tap
            a = x_ref[plane, pl.ds(i // 2, th), pl.ds(j // 2, wo), :]
            a = a.reshape(th * wo, cin)
            acc_ref[...] += jnp.dot(
                a, w_ref[i * 3 + j], preferred_element_type=jnp.float32
            )
    out = acc_ref[...]
    if relu:
        out = jnp.maximum(out, 0.0)
    o_ref[...] = out.reshape(th, wo, o_ref.shape[-1]).astype(o_ref.dtype)


def _conv3x3_s2_fused(x_nhwc, layer, *, out_dtype):
    """3x3 / stride-2 / pad-1 conv (bias=False); patch extraction inside the kernel."""
    n, h, w, cin = x_nhwc.shape
    cout, coutp = layer["cout"], layer["n_pad"]
    ho = (h + 2 - 3) // 2 + 1
    wo = (w + 2 - 3) // 2 + 1

    # Row-block size: big enough to amortize per-step overhead, but keep >= 2 grid
    # blocks whenever possible so megacore (v7x) has parallel work to shard.
    th = max(1, min(ho, _TARGET_BLOCK_PIXELS // max(wo, 1)))
    if n * _cdiv(ho, th) < 2 and ho >= 2:
        th = _cdiv(ho, 2)
    r = _cdiv(ho, th)
    ho_p = r * th

    # Pad so both row/col parity planes have (ho_p + 1, wo + 1) extent (zero pad).
    hp = 2 * ho_p + 2
    wp = 2 * wo + 2
    xp = jnp.pad(x_nhwc, ((0, 0), (1, hp - 1 - h), (1, wp - 1 - w), (0, 0)))

    # Space-to-depth by the stride: xs[n, a*2+b, hh, ww, c] = xp[n, 2*hh+a, 2*ww+b, c]
    xs = xp.reshape(n, ho_p + 1, 2, wo + 1, 2, cin)
    xs = xs.transpose(0, 2, 4, 1, 3, 5).reshape(n, 4, ho_p + 1, wo + 1, cin)

    # Row blocks of th output rows with a 1-row halo (duplicates one row per block).
    body = xs[:, :, : r * th].reshape(n, 4, r, th, wo + 1, cin)
    halo = xs[:, :, th : r * th + 1 : th].reshape(n, 4, r, 1, wo + 1, cin)
    xb = jnp.concatenate([body, halo], axis=3)                 # (n, 4, r, th+1, wo+1, cin)
    xb = xb.transpose(0, 2, 1, 3, 4, 5).reshape(n * r, 4, th + 1, wo + 1, cin)

    flops = 2 * (n * r) * th * wo * (9 * cin) * coutp
    bytes_accessed = (
        xb.size * 2
        + layer["wtap"].size * 2
        + (n * r) * th * wo * coutp * jnp.dtype(out_dtype).itemsize
    )

    out = pl.pallas_call(
        functools.partial(_conv3x3_tap_kernel, th=th, wo=wo, relu=layer["relu"]),
        out_shape=jax.ShapeDtypeStruct((n * r, th, wo, coutp), out_dtype),
        grid=(n * r,),
        in_specs=[
            pl.BlockSpec((None, 4, th + 1, wo + 1, cin), lambda g: (g, 0, 0, 0, 0)),
            pl.BlockSpec((9, cin, coutp), lambda g: (0, 0, 0)),  # weights resident in VMEM
        ],
        out_specs=pl.BlockSpec((None, th, wo, coutp), lambda g: (g, 0, 0, 0)),
        scratch_shapes=[pltpu.VMEM((th * wo, coutp), jnp.float32)],
        compiler_params=pltpu.CompilerParams(
            dimension_semantics=("parallel",),
            vmem_limit_bytes=_VMEM_LIMIT,
        ),
        cost_estimate=pl.CostEstimate(
            flops=flops, transcendentals=0, bytes_accessed=bytes_accessed
        ),
    )(xb, layer["wtap"])

    return out.reshape(n, r * th, wo, coutp)[:, :ho, :, :cout]


# ----------------------------------------------------------------------------
# 7x7 stem: JAX im2col + resident-B Pallas matmul (single dot, fused ReLU)
# ----------------------------------------------------------------------------
def _matmul_relu_kernel(a_ref, b_ref, o_ref, *, relu):
    out = jnp.dot(a_ref[...], b_ref[...], preferred_element_type=jnp.float32)
    if relu:
        out = jnp.maximum(out, 0.0)
    o_ref[...] = out.astype(o_ref.dtype)


def _conv_im2col(x_nhwc, layer, *, out_dtype):
    n, h, w, cin = x_nhwc.shape
    kh, kw, stride, pad = layer["kh"], layer["kw"], layer["stride"], layer["pad"]
    cout, k_pad, n_pad = layer["cout"], layer["k_pad"], layer["n_pad"]
    k_true = kh * kw * cin
    ho = (h + 2 * pad - kh) // stride + 1
    wo = (w + 2 * pad - kw) // stride + 1

    xp = jnp.pad(x_nhwc, ((0, 0), (pad, pad), (pad, pad), (0, 0)))
    patches = jnp.stack(
        [
            jnp.stack(
                [
                    xp[:, i : i + stride * ho : stride, j : j + stride * wo : stride, :]
                    for j in range(kw)
                ],
                axis=3,
            )
            for i in range(kh)
        ],
        axis=3,
    )  # (n, ho, wo, kh, kw, cin)
    m = n * ho * wo
    patches = patches.reshape(m, k_true).astype(jnp.bfloat16)

    tm = min(1024, _round_up(m, 8))
    mp = _round_up(m, tm)
    patches = jnp.pad(patches, ((0, mp - m), (0, k_pad - k_true)))

    flops = 2 * mp * k_pad * n_pad
    bytes_accessed = (
        mp * k_pad * 2 + k_pad * n_pad * 2 + mp * n_pad * jnp.dtype(out_dtype).itemsize
    )

    out = pl.pallas_call(
        functools.partial(_matmul_relu_kernel, relu=layer["relu"]),
        out_shape=jax.ShapeDtypeStruct((mp, n_pad), out_dtype),
        grid=(mp // tm,),
        in_specs=[
            pl.BlockSpec((tm, k_pad), lambda i: (i, 0)),
            pl.BlockSpec((k_pad, n_pad), lambda i: (0, 0)),      # B resident in VMEM
        ],
        out_specs=pl.BlockSpec((tm, n_pad), lambda i: (i, 0)),
        compiler_params=pltpu.CompilerParams(
            dimension_semantics=("parallel",),
            vmem_limit_bytes=_VMEM_LIMIT,
        ),
        cost_estimate=pl.CostEstimate(
            flops=flops, transcendentals=0, bytes_accessed=bytes_accessed
        ),
    )(patches, layer["wmat"])
    return out[:m, :cout].reshape(n, ho, wo, cout)


# ----------------------------------------------------------------------------
# Parameter prep (once, outside the hot path) and forward pass
# ----------------------------------------------------------------------------
_LAYER_CFGS = (
    dict(kh=7, kw=7, stride=2, pad=3, relu=True),    # Conv2d(3,   64, 7, 2, 3) + ReLU
    dict(kh=3, kw=3, stride=2, pad=1, relu=True),    # Conv2d(64, 128, 3, 2, 1) + ReLU
    dict(kh=3, kw=3, stride=2, pad=1, relu=True),    # Conv2d(128,256, 3, 2, 1) + ReLU
    dict(kh=3, kw=3, stride=2, pad=1, relu=False),   # Conv2d(256,768, 3, 2, 1)
)


def prepare_params(raw_params):
    layers = []
    for w_oihw, cfg in zip(raw_params, _LAYER_CFGS):
        cout, cin, kh, kw = w_oihw.shape
        n_pad = _round_up(cout, 128)
        entry = dict(cfg)
        entry.update(cout=cout, n_pad=n_pad)
        w_t = jnp.transpose(w_oihw, (2, 3, 1, 0))                # (kh, kw, cin, cout)
        if kh == 3 and kw == 3 and cfg["stride"] == 2 and cfg["pad"] == 1:
            wtap = w_t.reshape(kh * kw, cin, cout)
            wtap = jnp.pad(wtap, ((0, 0), (0, 0), (0, n_pad - cout)))
            entry["wtap"] = wtap.astype(jnp.bfloat16)
        else:
            k = kh * kw * cin
            k_pad = _round_up(k, 128)
            wmat = w_t.reshape(k, cout)
            wmat = jnp.pad(wmat, ((0, k_pad - k), (0, n_pad - cout)))
            entry.update(wmat=wmat.astype(jnp.bfloat16), k_pad=k_pad)
        layers.append(entry)
    return layers


def scale_embedding_forward(x_nchw, layers):
    """Matches PyTorch Scale_Embedding.forward (NCHW in / NCHW out)."""
    x = jnp.transpose(x_nchw, (0, 2, 3, 1)).astype(jnp.bfloat16)  # NCHW -> NHWC
    for idx, layer in enumerate(layers):
        out_dtype = jnp.float32 if idx == len(layers) - 1 else jnp.bfloat16
        if "wtap" in layer:
            x = _conv3x3_s2_fused(x, layer, out_dtype=out_dtype)
        else:
            x = _conv_im2col(x, layer, out_dtype=out_dtype)
    return jnp.transpose(x, (0, 3, 1, 2))                          # NHWC -> NCHW


def init_params(key):
    """Deterministic synthetic weights with PyTorch Conv2d weight shapes."""
    shapes = [(64, 3, 7, 7), (128, 64, 3, 3), (256, 128, 3, 3), (768, 256, 3, 3)]
    params = []
    for i, s in enumerate(shapes):
        k = jax.random.fold_in(key, i)
        fan_in = s[1] * s[2] * s[3]
        params.append(jax.random.normal(k, s, jnp.float32) * (1.0 / fan_in) ** 0.5)
    return params


# ----------------------------------------------------------------------------
# Pure-XLA reference (lax conv) with matching bf16 quantization points
# ----------------------------------------------------------------------------
def _reference_forward(x_nchw, raw_params):
    x = x_nchw.astype(jnp.bfloat16)
    for idx, (w, cfg) in enumerate(zip(raw_params, _LAYER_CFGS)):
        y = jax.lax.conv_general_dilated(
            x.astype(jnp.float32),
            w.astype(jnp.bfloat16).astype(jnp.float32),
            window_strides=(cfg["stride"], cfg["stride"]),
            padding=[(cfg["pad"], cfg["pad"]), (cfg["pad"], cfg["pad"])],
            dimension_numbers=("NCHW", "OIHW", "NCHW"),
        )
        if cfg["relu"]:
            y = jnp.maximum(y, 0.0)
        x = y if idx == len(raw_params) - 1 else y.astype(jnp.bfloat16)
    return x


if __name__ == "__main__":
    key = jax.random.PRNGKey(0)
    k_x, k_w = jax.random.split(key)

    # Small input consistent with the module: N=2, C=3 (required), 16x16 spatial.
    x = jax.random.normal(k_x, (2, 3, 16, 16), jnp.float32)
    raw_params = init_params(k_w)
    layers = prepare_params(raw_params)

    fwd = jax.jit(lambda inp: scale_embedding_forward(inp, layers))
    out = jax.block_until_ready(fwd(x))
    assert out.shape == (2, 768, 1, 1), out.shape
    assert out.dtype == jnp.float32, out.dtype

    ref = jax.block_until_ready(_reference_forward(x, raw_params))
    err = float(jnp.max(jnp.abs(out - ref)))
    assert jnp.allclose(out, ref, atol=5e-2, rtol=5e-2), f"mismatch vs reference: {err}"

    print("KERNEL_OK")
</pallas_src>

<mosaic_0001>
module attributes {stable_mosaic.version = 11 : i64} {
  func.func @_matmul_relu_kernel(%arg0: i32, %arg1: memref<128x256xbf16, #tpu.memory_space<vmem>>, %arg2: memref<256x128xbf16, #tpu.memory_space<vmem>>, %arg3: memref<128x128xbf16, #tpu.memory_space<vmem>>) attributes {dimension_semantics = [#tpu.dimension_semantics<parallel>], iteration_bounds = array<i64: 1>, scalar_prefetch = 0 : i64, scratch_operands = 0 : i64, tpu.core_type = #tpu.core_type<tc>, window_params = [{transform_indices = @transform_0, window_bounds = array<i64: 128, 256>}, {pipeline_mode = #tpu.pipeline_mode<synchronous>, transform_indices = @transform_1, window_bounds = array<i64: 256, 128>}, {transform_indices = @transform_2, window_bounds = array<i64: 128, 128>}]} {
    %c0 = arith.constant 0 : index
    %c0_0 = arith.constant 0 : index
    %0 = vector.load %arg1[%c0, %c0_0] : memref<128x256xbf16, #tpu.memory_space<vmem>>, vector<128x256xbf16>
    %c0_1 = arith.constant 0 : index
    %c0_2 = arith.constant 0 : index
    %1 = vector.load %arg2[%c0_1, %c0_2] : memref<256x128xbf16, #tpu.memory_space<vmem>>, vector<256x128xbf16>
    %cst = arith.constant dense<0.000000e+00> : vector<128x128xf32>
    %2 = tpu.matmul %0, %1, %cst {dimension_numbers = #tpu.dot_dimension_numbers<[1], [0], [0], [1], [0, 0, 1, 1], [], []>} : vector<128x256xbf16>, vector<256x128xbf16>, vector<128x128xf32> -> vector<128x128xf32>
    %cst_3 = arith.constant 0.000000e+00 : f32
    %3 = vector.broadcast %cst_3 : f32 to vector<128x128xf32>
    %4 = arith.maximumf %2, %3 : vector<128x128xf32>
    %5 = arith.truncf %4 : vector<128x128xf32> to vector<128x128xbf16>
    %c0_4 = arith.constant 0 : index
    %c0_5 = arith.constant 0 : index
    %6 = vector.load %arg3[%c0_4, %c0_5] : memref<128x128xbf16, #tpu.memory_space<vmem>>, vector<128x128xbf16>
    tpu.vector_store %arg3[%c0_4, %c0_5], %5 {strides = array<i32>} : memref<128x128xbf16, #tpu.memory_space<vmem>>, vector<128x128xbf16>,
    return
  }
  func.func @transform_0(%arg0: i32) -> (i32, i32) {
    %c0_i32 = arith.constant 0 : i32
    %c0_i32_0 = arith.constant 0 : i32
    return %arg0, %c0_i32 : i32, i32
  }
  func.func @transform_1(%arg0: i32) -> (i32, i32) {
    %c0_i32 = arith.constant 0 : i32
    %c0_i32_0 = arith.constant 0 : i32
    %c0_i32_1 = arith.constant 0 : i32
    return %c0_i32, %c0_i32_0 : i32, i32
  }
  func.func @transform_2(%arg0: i32) -> (i32, i32) {
    %c0_i32 = arith.constant 0 : i32
    %c0_i32_0 = arith.constant 0 : i32
    return %arg0, %c0_i32 : i32, i32
  }
}

module attributes {stable_mosaic.version = 11 : i64} {
  func.func @_conv3x3_tap_kernel(%arg0: i32, %arg1: memref<1x4x5x5x64xbf16, #tpu.memory_space<vmem>>, %arg2: memref<9x64x128xbf16, #tpu.memory_space<vmem>>, %arg3: memref<1x4x4x128xbf16, #tpu.memory_space<vmem>>, %arg4: memref<16x128xf32, #tpu.memory_space<vmem>>) attributes {dimension_semantics = [#tpu.dimension_semantics<parallel>], iteration_bounds = array<i64: 2>, scalar_prefetch = 0 : i64, scratch_operands = 1 : i64, tpu.core_type = #tpu.core_type<tc>, window_params = [{transform_indices = @transform_0, window_bounds = array<i64: 1, 4, 5, 5, 64>}, {pipeline_mode = #tpu.pipeline_mode<synchronous>, transform_indices = @transform_1, window_bounds = array<i64: 9, 64, 128>}, {transform_indices = @transform_2, window_bounds = array<i64: 1, 4, 4, 128>}]} {
    %cst = arith.constant 0.000000e+00 : f32
    %0 = vector.broadcast %cst : f32 to vector<16x128xf32>
    %c0 = arith.constant 0 : index
    %c0_0 = arith.constant 0 : index
    %1 = vector.load %arg4[%c0, %c0_0] : memref<16x128xf32, #tpu.memory_space<vmem>>, vector<16x128xf32>
    tpu.vector_store %arg4[%c0, %c0_0], %0 {strides = array<i32>} : memref<16x128xf32, #tpu.memory_space<vmem>>, vector<16x128xf32>,
    %c0_1 = arith.constant 0 : index
    %c0_2 = arith.constant 0 : index
    %c0_3 = arith.constant 0 : index
    %c0_4 = arith.constant 0 : index
    %c0_5 = arith.constant 0 : index
    %2 = vector.load %arg1[%c0_1, %c0_2, %c0_3, %c0_4, %c0_5] : memref<1x4x5x5x64xbf16, #tpu.memory_space<vmem>>, vector<1x1x4x4x64xbf16>
    %3 = vector.shape_cast %2 : vector<1x1x4x4x64xbf16> to vector<4x4x64xbf16>
    %4 = vector.shape_cast %3 : vector<4x4x64xbf16> to vector<16x64xbf16>
    %c0_6 = arith.constant 0 : index
    %c0_7 = arith.constant 0 : index
    %5 = vector.load %arg4[%c0_6, %c0_7] : memref<16x128xf32, #tpu.memory_space<vmem>>, vector<16x128xf32>
    %c0_8 = arith.constant 0 : index
    %c0_9 = arith.constant 0 : index
    %c0_10 = arith.constant 0 : index
    %6 = vector.load %arg2[%c0_8, %c0_9, %c0_10] : memref<9x64x128xbf16, #tpu.memory_space<vmem>>, vector<1x64x128xbf16>
    %7 = vector.shape_cast %6 : vector<1x64x128xbf16> to vector<64x128xbf16>
    %cst_11 = arith.constant dense<0.000000e+00> : vector<16x128xf32>
    %8 = tpu.matmul %4, %7, %cst_11 {dimension_numbers = #tpu.dot_dimension_numbers<[1], [0], [0], [1], [0, 0, 1, 1], [], []>} : vector<16x64xbf16>, vector<64x128xbf16>, vector<16x128xf32> -> vector<16x128xf32>
    %9 = arith.addf %5, %8 : vector<16x128xf32>
    %c0_12 = arith.constant 0 : index
    %c0_13 = arith.constant 0 : index
    %10 = vector.load %arg4[%c0_12, %c0_13] : memref<16x128xf32, #tpu.memory_space<vmem>>, vector<16x128xf32>
    tpu.vector_store %arg4[%c0_12, %c0_13], %9 {strides = array<i32>} : memref<16x128xf32, #tpu.memory_space<vmem>>, vector<16x128xf32>,
    %c0_14 = arith.constant 0 : index
    %c1 = arith.constant 1 : index
    %c0_15 = arith.constant 0 : index
    %c0_16 = arith.constant 0 : index
    %c0_17 = arith.constant 0 : index
    %11 = vector.load %arg1[%c0_14, %c1, %c0_15, %c0_16, %c0_17] : memref<1x4x5x5x64xbf16, #tpu.memory_space<vmem>>, vector<1x1x4x4x64xbf16>
    %12 = vector.shape_cast %11 : vector<1x1x4x4x64xbf16> to vector<4x4x64xbf16>
    %13 = vector.shape_cast %12 : vector<4x4x64xbf16> to vector<16x64xbf16>
    %c0_18 = arith.constant 0 : index
    %c0_19 = arith.constant 0 : index
    %14 = vector.load %arg4[%c0_18, %c0_19] : memref<16x128xf32, #tpu.memory_space<vmem>>, vector<16x128xf32>
    %c1_20 = arith.constant 1 : index
    %c0_21 = arith.constant 0 : index
    %c0_22 = arith.constant 0 : index
    %15 = vector.load %arg2[%c1_20, %c0_21, %c0_22] : memref<9x64x128xbf16, #tpu.memory_space<vmem>>, vector<1x64x128xbf16>
    %16 = vector.shape_cast %15 : vector<1x64x128xbf16> to vector<64x128xbf16>
    %cst_23 = arith.constant dense<0.000000e+00> : vector<16x128xf32>
    %17 = tpu.matmul %13, %16, %cst_23 {dimension_numbers = #tpu.dot_dimension_numbers<[1], [0], [0], [1], [0, 0, 1, 1], [], []>} : vector<16x64xbf16>, vector<64x128xbf16>, vector<16x128xf32> -> vector<16x128xf32>
    %18 = arith.addf %14, %17 : vector<16x128xf32>
    %c0_24 = arith.constant 0 : index
    %c0_25 = arith.constant 0 : index
    %19 = vector.load %arg4[%c0_24, %c0_25] : memref<16x128xf32, #tpu.memory_space<vmem>>, vector<16x128xf32>
    tpu.vector_store %arg4[%c0_24, %c0_25], %18 {strides = array<i32>} : memref<16x128xf32, #tpu.memory_space<vmem>>, vector<16x128xf32>,
    %c0_26 = arith.constant 0 : index
    %c0_27 = arith.constant 0 : index
    %c0_28 = arith.constant 0 : index
    %c1_29 = arith.constant 1 : index
    %c0_30 = arith.constant 0 : index
    %20 = vector.load %arg1[%c0_26, %c0_27, %c0_28, %c1_29, %c0_30] : memref<1x4x5x5x64xbf16, #tpu.memory_space<vmem>>, vector<1x1x4x4x64xbf16>
    %21 = vector.shape_cast %20 : vector<1x1x4x4x64xbf16> to vector<4x4x64xbf16>
    %22 = vector.shape_cast %21 : vector<4x4x64xbf16> to vector<16x64xbf16>
    %c0_31 = arith.constant 0 : index
    %c0_32 = arith.constant 0 : index
    %23 = vector.load %arg4[%c0_31, %c0_32] : memref<16x128xf32, #tpu.memory_space<vmem>>, vector<16x128xf32>
    %c2 = arith.constant 2 : index
    %c0_33 = arith.constant 0 : index
    %c0_34 = arith.constant 0 : index
    %24 = vector.load %arg2[%c2, %c0_33, %c0_34] : memref<9x64x128xbf16, #tpu.memory_space<vmem>>, vector<1x64x128xbf16>
    %25 = vector.shape_cast %24 : vector<1x64x128xbf16> to vector<64x128xbf16>
    %cst_35 = arith.constant dense<0.000000e+00> : vector<16x128xf32>
    %26 = tpu.matmul %22, %25, %cst_35 {dimension_numbers = #tpu.dot_dimension_numbers<[1], [0], [0], [1], [0, 0, 1, 1], [], []>} : vector<16x64xbf16>, vector<64x128xbf16>, vector<16x128xf32> -> vector<16x128xf32>
    %27 = arith.addf %23, %26 : vector<16x128xf32>
    %c0_36 = arith.constant 0 : index
    %c0_37 = arith.constant 0 : index
    %28 = vector.load %arg4[%c0_36, %c0_37] : memref<16x128xf32, #tpu.memory_space<vmem>>, vector<16x128xf32>
    tpu.vector_store %arg4[%c0_36, %c0_37], %27 {strides = array<i32>} : memref<16x128xf32, #tpu.memory_space<vmem>>, vector<16x128xf32>,
    %c0_38 = arith.constant 0 : index
    %c2_39 = arith.constant 2 : index
    %c0_40 = arith.constant 0 : index
    %c0_41 = arith.constant 0 : index
    %c0_42 = arith.constant 0 : index
    %29 = vector.load %arg1[%c0_38, %c2_39, %c0_40, %c0_41, %c0_42] : memref<1x4x5x5x64xbf16, #tpu.memory_space<vmem>>, vector<1x1x4x4x64xbf16>
    %30 = vector.shape_cast %29 : vector<1x1x4x4x64xbf16> to vector<4x4x64xbf16>
    %31 = vector.shape_cast %30 : vector<4x4x64xbf16> to vector<16x64xbf16>
    %c0_43 = arith.constant 0 : index
    %c0_44 = arith.constant 0 : index
    %32 = vector.load %arg4[%c0_43, %c0_44] : memref<16x128xf32, #tpu.memory_space<vmem>>, vector<16x128xf32>
    %c3 = arith.constant 3 : index
    %c0_45 = arith.constant 0 : index
    %c0_46 = arith.constant 0 : index
    %33 = vector.load %arg2[%c3, %c0_45, %c0_46] : memref<9x64x128xbf16, #tpu.memory_space<vmem>>, vector<1x64x128xbf16>
    %34 = vector.shape_cast %33 : vector<1x64x128xbf16> to vector<64x128xbf16>
    %cst_47 = arith.constant dense<0.000000e+00> : vector<16x128xf32>
    %35 = tpu.matmul %31, %34, %cst_47 {dimension_numbers = #tpu.dot_dimension_numbers<[1], [0], [0], [1], [0, 0, 1, 1], [], []>} : vector<16x64xbf16>, vector<64x128xbf16>, vector<16x128xf32> -> vector<16x128xf32>
    %36 = arith.addf %32, %35 : vector<16x128xf32>
    %c0_48 = arith.constant 0 : index
    %c0_49 = arith.constant 0 : index
    %37 = vector.load %arg4[%c0_48, %c0_49] : memref<16x128xf32, #tpu.memory_space<vmem>>, vector<16x128xf32>
    tpu.vector_store %arg4[%c0_48, %c0_49], %36 {strides = array<i32>} : memref<16x128xf32, #tpu.memory_space<vmem>>, vector<16x128xf32>,
    %c0_50 = arith.constant 0 : index
    %c3_51 = arith.constant 3 : index
    %c0_52 = arith.constant 0 : index
    %c0_53 = arith.constant 0 : index
    %c0_54 = arith.constant 0 : index
    %38 = vector.load %arg1[%c0_50, %c3_51, %c0_52, %c0_53, %c0_54] : memref<1x4x5x5x64xbf16, #tpu.memory_space<vmem>>, vector<1x1x4x4x64xbf16>
    %39 = vector.shape_cast %38 : vector<1x1x4x4x64xbf16> to vector<4x4x64xbf16>
    %40 = vector.shape_cast %39 : vector<4x4x64xbf16> to vector<16x64xbf16>
    %c0_55 = arith.constant 0 : index
    %c0_56 = arith.constant 0 : index
    %41 = vector.load %arg4[%c0_55, %c0_56] : memref<16x128xf32, #tpu.memory_space<vmem>>, vector<16x128xf32>
    %c4 = arith.constant 4 : index
    %c0_57 = arith.constant 0 : index
    %c0_58 = arith.constant 0 : index
    %42 = vector.load %arg2[%c4, %c0_57, %c0_58] : memref<9x64x128xbf16, #tpu.memory_space<vmem>>, vector<1x64x128xbf16>
    %43 = vector.shape_cast %42 : vector<1x64x128xbf16> to vector<64x128xbf16>
    %cst_59 = arith.constant dense<0.000000e+00> : vector<16x128xf32>
    %44 = tpu.matmul %40, %43, %cst_59 {dimension_numbers = #tpu.dot_dimension_numbers<[1], [0], [0], [1], [0, 0, 1, 1], [], []>} : vector<16x64xbf16>, vector<64x128xbf16>, vector<16x128xf32> -> vector<16x128xf32>
    %45 = arith.addf %41, %44 : vector<16x128xf32>
    %c0_60 = arith.constant 0 : index
    %c0_61 = arith.constant 0 : index
    %46 = vector.load %arg4[%c0_60, %c0_61] : memref<16x128xf32, #tpu.memory_space<vmem>>, vector<16x128xf32>
    tpu.vector_store %arg4[%c0_60, %c0_61], %45 {strides = array<i32>} : memref<16x128xf32, #tpu.memory_space<vmem>>, vector<16x128xf32>,
    %c0_62 = arith.constant 0 : index
    %c2_63 = arith.constant 2 : index
    %c0_64 = arith.constant 0 : index
    %c1_65 = arith.constant 1 : index
    %c0_66 = arith.constant 0 : index
    %47 = vector.load %arg1[%c0_62, %c2_63, %c0_64, %c1_65, %c0_66] : memref<1x4x5x5x64xbf16, #tpu.memory_space<vmem>>, vector<1x1x4x4x64xbf16>
    %48 = vector.shape_cast %47 : vector<1x1x4x4x64xbf16> to vector<4x4x64xbf16>
    %49 = vector.shape_cast %48 : vector<4x4x64xbf16> to vector<16x64xbf16>
    %c0_67 = arith.constant 0 : index
    %c0_68 = arith.constant 0 : index
    %50 = vector.load %arg4[%c0_67, %c0_68] : memref<16x128xf32, #tpu.memory_space<vmem>>, vector<16x128xf32>
    %c5 = arith.constant 5 : index
    %c0_69 = arith.constant 0 : index
    %c0_70 = arith.constant 0 : index
    %51 = vector.load %arg2[%c5, %c0_69, %c0_70] : memref<9x64x128xbf16, #tpu.memory_space<vmem>>, vector<1x64x128xbf16>
    %52 = vector.shape_cast %51 : vector<1x64x128xbf16> to vector<64x128xbf16>
    %cst_71 = arith.constant dense<0.000000e+00> : vector<16x128xf32>
    %53 = tpu.matmul %49, %52, %cst_71 {dimension_numbers = #tpu.dot_dimension_numbers<[1], [0], [0], [1], [0, 0, 1, 1], [], []>} : vector<16x64xbf16>, vector<64x128xbf16>, vector<16x128xf32> -> vector<16x128xf32>
    %54 = arith.addf %50, %53 : vector<16x128xf32>
    %c0_72 = arith.constant 0 : index
    %c0_73 = arith.constant 0 : index
    %55 = vector.load %arg4[%c0_72, %c0_73] : memref<16x128xf32, #tpu.memory_space<vmem>>, vector<16x128xf32>
    tpu.vector_store %arg4[%c0_72, %c0_73], %54 {strides = array<i32>} : memref<16x128xf32, #tpu.memory_space<vmem>>, vector<16x128xf32>,
    %c0_74 = arith.constant 0 : index
    %c0_75 = arith.constant 0 : index
    %c1_76 = arith.constant 1 : index
    %c0_77 = arith.constant 0 : index
    %c0_78 = arith.constant 0 : index
    %56 = vector.load %arg1[%c0_74, %c0_75, %c1_76, %c0_77, %c0_78] : memref<1x4x5x5x64xbf16, #tpu.memory_space<vmem>>, vector<1x1x4x4x64xbf16>
    %57 = vector.shape_cast %56 : vector<1x1x4x4x64xbf16> to vector<4x4x64xbf16>
    %58 = vector.shape_cast %57 : vector<4x4x64xbf16> to vector<16x64xbf16>
    %c0_79 = arith.constant 0 : index
    %c0_80 = arith.constant 0 : index
    %59 = vector.load %arg4[%c0_79, %c0_80] : memref<16x128xf32, #tpu.memory_space<vmem>>, vector<16x128xf32>
    %c6 = arith.constant 6 : index
    %c0_81 = arith.constant 0 : index
    %c0_82 = arith.constant 0 : index
    %60 = vector.load %arg2[%c6, %c0_81, %c0_82] : memref<9x64x128xbf16, #tpu.memory_space<vmem>>, vector<1x64x128xbf16>
    %61 = vector.shape_cast %60 : vector<1x64x128xbf16> to vector<64x128xbf16>
    %cst_83 = arith.constant dense<0.000000e+00> : vector<16x128xf32>
    %62 = tpu.matmul %58, %61, %cst_83 {dimension_numbers = #tpu.dot_dimension_numbers<[1], [0], [0], [1], [0, 0, 1, 1], [], []>} : vector<16x64xbf16>, vector<64x128xbf16>, vector<16x128xf32> -> vector<16x128xf32>
    %63 = arith.addf %59, %62 : vector<16x128xf32>
    %c0_84 = arith.constant 0 : index
    %c0_85 = arith.constant 0 : index
    %64 = vector.load %arg4[%c0_84, %c0_85] : memref<16x128xf32, #tpu.memory_space<vmem>>, vector<16x128xf32>
    tpu.vector_store %arg4[%c0_84, %c0_85], %63 {strides = array<i32>} : memref<16x128xf32, #tpu.memory_space<vmem>>, vector<16x128xf32>,
    %c0_86 = arith.constant 0 : index
    %c1_87 = arith.constant 1 : index
    %c1_88 = arith.constant 1 : index
    %c0_89 = arith.constant 0 : index
    %c0_90 = arith.constant 0 : index
    %65 = vector.load %arg1[%c0_86, %c1_87, %c1_88, %c0_89, %c0_90] : memref<1x4x5x5x64xbf16, #tpu.memory_space<vmem>>, vector<1x1x4x4x64xbf16>
    %66 = vector.shape_cast %65 : vector<1x1x4x4x64xbf16> to vector<4x4x64xbf16>
    %67 = vector.shape_cast %66 : vector<4x4x64xbf16> to vector<16x64xbf16>
    %c0_91 = arith.constant 0 : index
    %c0_92 = arith.constant 0 : index
    %68 = vector.load %arg4[%c0_91, %c0_92] : memref<16x128xf32, #tpu.memory_space<vmem>>, vector<16x128xf32>
    %c7 = arith.constant 7 : index
    %c0_93 = arith.constant 0 : index
    %c0_94 = arith.constant 0 : index
    %69 = vector.load %arg2[%c7, %c0_93, %c0_94] : memref<9x64x128xbf16, #tpu.memory_space<vmem>>, vector<1x64x128xbf16>
    %70 = vector.shape_cast %69 : vector<1x64x128xbf16> to vector<64x128xbf16>
    %cst_95 = arith.constant dense<0.000000e+00> : vector<16x128xf32>
    %71 = tpu.matmul %67, %70, %cst_95 {dimension_numbers = #tpu.dot_dimension_numbers<[1], [0], [0], [1], [0, 0, 1, 1], [], []>} : vector<16x64xbf16>, vector<64x128xbf16>, vector<16x128xf32> -> vector<16x128xf32>
    %72 = arith.addf %68, %71 : vector<16x128xf32>
    %c0_96 = arith.constant 0 : index
    %c0_97 = arith.constant 0 : index
    %73 = vector.load %arg4[%c0_96, %c0_97] : memref<16x128xf32, #tpu.memory_space<vmem>>, vector<16x128xf32>
    tpu.vector_store %arg4[%c0_96, %c0_97], %72 {strides = array<i32>} : memref<16x128xf32, #tpu.memory_space<vmem>>, vector<16x128xf32>,
    %c0_98 = arith.constant 0 : index
    %c0_99 = arith.constant 0 : index
    %c1_100 = arith.constant 1 : index
    %c1_101 = arith.constant 1 : index
    %c0_102 = arith.constant 0 : index
    %74 = vector.load %arg1[%c0_98, %c0_99, %c1_100, %c1_101, %c0_102] : memref<1x4x5x5x64xbf16, #tpu.memory_space<vmem>>, vector<1x1x4x4x64xbf16>
    %75 = vector.shape_cast %74 : vector<1x1x4x4x64xbf16> to vector<4x4x64xbf16>
    %76 = vector.shape_cast %75 : vector<4x4x64xbf16> to vector<16x64xbf16>
    %c0_103 = arith.constant 0 : index
    %c0_104 = arith.constant 0 : index
    %77 = vector.load %arg4[%c0_103, %c0_104] : memref<16x128xf32, #tpu.memory_space<vmem>>, vector<16x128xf32>
    %c8 = arith.constant 8 : index
    %c0_105 = arith.constant 0 : index
    %c0_106 = arith.constant 0 : index
    %78 = vector.load %arg2[%c8, %c0_105, %c0_106] : memref<9x64x128xbf16, #tpu.memory_space<vmem>>, vector<1x64x128xbf16>
    %79 = vector.shape_cast %78 : vector<1x64x128xbf16> to vector<64x128xbf16>
    %cst_107 = arith.constant dense<0.000000e+00> : vector<16x128xf32>
    %80 = tpu.matmul %76, %79, %cst_107 {dimension_numbers = #tpu.dot_dimension_numbers<[1], [0], [0], [1], [0, 0, 1, 1], [], []>} : vector<16x64xbf16>, vector<64x128xbf16>, vector<16x128xf32> -> vector<16x128xf32>
    %81 = arith.addf %77, %80 : vector<16x128xf32>
    %c0_108 = arith.constant 0 : index
    %c0_109 = arith.constant 0 : index
    %82 = vector.load %arg4[%c0_108, %c0_109] : memref<16x128xf32, #tpu.memory_space<vmem>>, vector<16x128xf32>
    tpu.vector_store %arg4[%c0_108, %c0_109], %81 {strides = array<i32>} : memref<16x128xf32, #tpu.memory_space<vmem>>, vector<16x128xf32>,
    %c0_110 = arith.constant 0 : index
    %c0_111 = arith.constant 0 : index
    %83 = vector.load %arg4[%c0_110, %c0_111] : memref<16x128xf32, #tpu.memory_space<vmem>>, vector<16x128xf32>
    %cst_112 = arith.constant 0.000000e+00 : f32
    %84 = vector.broadcast %cst_112 : f32 to vector<16x128xf32>
    %85 = arith.maximumf %83, %84 : vector<16x128xf32>
    %86 = vector.shape_cast %85 : vector<16x128xf32> to vector<4x4x128xf32>
    %87 = arith.truncf %86 : vector<4x4x128xf32> to vector<4x4x128xbf16>
    %c0_113 = arith.constant 0 : index
    %c0_114 = arith.constant 0 : index
    %c0_115 = arith.constant 0 : index
    %c0_116 = arith.constant 0 : index
    %88 = vector.load %arg3[%c0_113, %c0_114, %c0_115, %c0_116] : memref<1x4x4x128xbf16, #tpu.memory_space<vmem>>, vector<1x4x4x128xbf16>
    %89 = vector.shape_cast %88 : vector<1x4x4x128xbf16> to vector<4x4x128xbf16>
    %90 = vector.shape_cast %87 : vector<4x4x128xbf16> to vector<1x4x4x128xbf16>
    tpu.vector_store %arg3[%c0_113, %c0_114, %c0_115, %c0_116], %90 {strides = array<i32>} : memref<1x4x4x128xbf16, #tpu.memory_space<vmem>>, vector<1x4x4x128xbf16>,
    return
  }
  func.func @transform_0(%arg0: i32) -> (i32, i32, i32, i32, i32) {
    %c0_i32 = arith.constant 0 : i32
    %c0_i32_0 = arith.constant 0 : i32
    %c0_i32_1 = arith.constant 0 : i32
    %c0_i32_2 = arith.constant 0 : i32
    %c0_i32_3 = arith.constant 0 : i32
    return %arg0, %c0_i32, %c0_i32_0, %c0_i32_1, %c0_i32_2 : i32, i32, i32, i32, i32
  }
  func.func @transform_1(%arg0: i32) -> (i32, i32, i32) {
    %c0_i32 = arith.constant 0 : i32
    %c0_i32_0 = arith.constant 0 : i32
    %c0_i32_1 = arith.constant 0 : i32
    %c0_i32_2 = arith.constant 0 : i32
    return %c0_i32, %c0_i32_0, %c0_i32_1 : i32, i32, i32
  }
  func.func @transform_2(%arg0: i32) -> (i32, i32, i32, i32) {
    %c0_i32 = arith.constant 0 : i32
    %c0_i32_0 = arith.constant 0 : i32
    %c0_i32_1 = arith.constant 0 : i32
    %c0_i32_2 = arith.constant 0 : i32
    return %arg0, %c0_i32, %c0_i32_0, %c0_i32_1 : i32, i32, i32, i32
  }
}

module attributes {stable_mosaic.version = 11 : i64} {
  func.func @_conv3x3_tap_kernel(%arg0: i32, %arg1: memref<1x4x3x3x128xbf16, #tpu.memory_space<vmem>>, %arg2: memref<9x128x256xbf16, #tpu.memory_space<vmem>>, %arg3: memref<1x2x2x256xbf16, #tpu.memory_space<vmem>>, %arg4: memref<4x256xf32, #tpu.memory_space<vmem>>) attributes {dimension_semantics = [#tpu.dimension_semantics<parallel>], iteration_bounds = array<i64: 2>, scalar_prefetch = 0 : i64, scratch_operands = 1 : i64, tpu.core_type = #tpu.core_type<tc>, window_params = [{transform_indices = @transform_0, window_bounds = array<i64: 1, 4, 3, 3, 128>}, {pipeline_mode = #tpu.pipeline_mode<synchronous>, transform_indices = @transform_1, window_bounds = array<i64: 9, 128, 256>}, {transform_indices = @transform_2, window_bounds = array<i64: 1, 2, 2, 256>}]} {
    %cst = arith.constant 0.000000e+00 : f32
    %0 = vector.broadcast %cst : f32 to vector<4x256xf32>
    %c0 = arith.constant 0 : index
    %c0_0 = arith.constant 0 : index
    %1 = vector.load %arg4[%c0, %c0_0] : memref<4x256xf32, #tpu.memory_space<vmem>>, vector<4x256xf32>
    tpu.vector_store %arg4[%c0, %c0_0], %0 {strides = array<i32>} : memref<4x256xf32, #tpu.memory_space<vmem>>, vector<4x256xf32>,
    %c0_1 = arith.constant 0 : index
    %c0_2 = arith.constant 0 : index
    %c0_3 = arith.constant 0 : index
    %c0_4 = arith.constant 0 : index
    %c0_5 = arith.constant 0 : index
    %2 = vector.load %arg1[%c0_1, %c0_2, %c0_3, %c0_4, %c0_5] : memref<1x4x3x3x128xbf16, #tpu.memory_space<vmem>>, vector<1x1x2x2x128xbf16>
    %3 = vector.shape_cast %2 : vector<1x1x2x2x128xbf16> to vector<2x2x128xbf16>
    %4 = vector.shape_cast %3 : vector<2x2x128xbf16> to vector<4x128xbf16>
    %c0_6 = arith.constant 0 : index
    %c0_7 = arith.constant 0 : index
    %5 = vector.load %arg4[%c0_6, %c0_7] : memref<4x256xf32, #tpu.memory_space<vmem>>, vector<4x256xf32>
    %c0_8 = arith.constant 0 : index
    %c0_9 = arith.constant 0 : index
    %c0_10 = arith.constant 0 : index
    %6 = vector.load %arg2[%c0_8, %c0_9, %c0_10] : memref<9x128x256xbf16, #tpu.memory_space<vmem>>, vector<1x128x256xbf16>
    %7 = vector.shape_cast %6 : vector<1x128x256xbf16> to vector<128x256xbf16>
    %cst_11 = arith.constant dense<0.000000e+00> : vector<4x256xf32>
    %8 = tpu.matmul %4, %7, %cst_11 {dimension_numbers = #tpu.dot_dimension_numbers<[1], [0], [0], [1], [0, 0, 1, 1], [], []>} : vector<4x128xbf16>, vector<128x256xbf16>, vector<4x256xf32> -> vector<4x256xf32>
    %9 = arith.addf %5, %8 : vector<4x256xf32>
    %c0_12 = arith.constant 0 : index
    %c0_13 = arith.constant 0 : index
    %10 = vector.load %arg4[%c0_12, %c0_13] : memref<4x256xf32, #tpu.memory_space<vmem>>, vector<4x256xf32>
    tpu.vector_store %arg4[%c0_12, %c0_13], %9 {strides = array<i32>} : memref<4x256xf32, #tpu.memory_space<vmem>>, vector<4x256xf32>,
    %c0_14 = arith.constant 0 : index
    %c1 = arith.constant 1 : index
    %c0_15 = arith.constant 0 : index
    %c0_16 = arith.constant 0 : index
    %c0_17 = arith.constant 0 : index
    %11 = vector.load %arg1[%c0_14, %c1, %c0_15, %c0_16, %c0_17] : memref<1x4x3x3x128xbf16, #tpu.memory_space<vmem>>, vector<1x1x2x2x128xbf16>
    %12 = vector.shape_cast %11 : vector<1x1x2x2x128xbf16> to vector<2x2x128xbf16>
    %13 = vector.shape_cast %12 : vector<2x2x128xbf16> to vector<4x128xbf16>
    %c0_18 = arith.constant 0 : index
    %c0_19 = arith.constant 0 : index
    %14 = vector.load %arg4[%c0_18, %c0_19] : memref<4x256xf32, #tpu.memory_space<vmem>>, vector<4x256xf32>
    %c1_20 = arith.constant 1 : index
    %c0_21 = arith.constant 0 : index
    %c0_22 = arith.constant 0 : index
    %15 = vector.load %arg2[%c1_20, %c0_21, %c0_22] : memref<9x128x256xbf16, #tpu.memory_space<vmem>>, vector<1x128x256xbf16>
    %16 = vector.shape_cast %15 : vector<1x128x256xbf16> to vector<128x256xbf16>
    %cst_23 = arith.constant dense<0.000000e+00> : vector<4x256xf32>
    %17 = tpu.matmul %13, %16, %cst_23 {dimension_numbers = #tpu.dot_dimension_numbers<[1], [0], [0], [1], [0, 0, 1, 1], [], []>} : vector<4x128xbf16>, vector<128x256xbf16>, vector<4x256xf32> -> vector<4x256xf32>
    %18 = arith.addf %14, %17 : vector<4x256xf32>
    %c0_24 = arith.constant 0 : index
    %c0_25 = arith.constant 0 : index
    %19 = vector.load %arg4[%c0_24, %c0_25] : memref<4x256xf32, #tpu.memory_space<vmem>>, vector<4x256xf32>
    tpu.vector_store %arg4[%c0_24, %c0_25], %18 {strides = array<i32>} : memref<4x256xf32, #tpu.memory_space<vmem>>, vector<4x256xf32>,
    %c0_26 = arith.constant 0 : index
    %c0_27 = arith.constant 0 : index
    %c0_28 = arith.constant 0 : index
    %c1_29 = arith.constant 1 : index
    %c0_30 = arith.constant 0 : index
    %20 = vector.load %arg1[%c0_26, %c0_27, %c0_28, %c1_29, %c0_30] : memref<1x4x3x3x128xbf16, #tpu.memory_space<vmem>>, vector<1x1x2x2x128xbf16>
    %21 = vector.shape_cast %20 : vector<1x1x2x2x128xbf16> to vector<2x2x128xbf16>
    %22 = vector.shape_cast %21 : vector<2x2x128xbf16> to vector<4x128xbf16>
    %c0_31 = arith.constant 0 : index
    %c0_32 = arith.constant 0 : index
    %23 = vector.load %arg4[%c0_31, %c0_32] : memref<4x256xf32, #tpu.memory_space<vmem>>, vector<4x256xf32>
    %c2 = arith.constant 2 : index
    %c0_33 = arith.constant 0 : index
    %c0_34 = arith.constant 0 : index
    %24 = vector.load %arg2[%c2, %c0_33, %c0_34] : memref<9x128x256xbf16, #tpu.memory_space<vmem>>, vector<1x128x256xbf16>
    %25 = vector.shape_cast %24 : vector<1x128x256xbf16> to vector<128x256xbf16>
    %cst_35 = arith.constant dense<0.000000e+00> : vector<4x256xf32>
    %26 = tpu.matmul %22, %25, %cst_35 {dimension_numbers = #tpu.dot_dimension_numbers<[1], [0], [0], [1], [0, 0, 1, 1], [], []>} : vector<4x128xbf16>, vector<128x256xbf16>, vector<4x256xf32> -> vector<4x256xf32>
    %27 = arith.addf %23, %26 : vector<4x256xf32>
    %c0_36 = arith.constant 0 : index
    %c0_37 = arith.constant 0 : index
    %28 = vector.load %arg4[%c0_36, %c0_37] : memref<4x256xf32, #tpu.memory_space<vmem>>, vector<4x256xf32>
    tpu.vector_store %arg4[%c0_36, %c0_37], %27 {strides = array<i32>} : memref<4x256xf32, #tpu.memory_space<vmem>>, vector<4x256xf32>,
    %c0_38 = arith.constant 0 : index
    %c2_39 = arith.constant 2 : index
    %c0_40 = arith.constant 0 : index
    %c0_41 = arith.constant 0 : index
    %c0_42 = arith.constant 0 : index
    %29 = vector.load %arg1[%c0_38, %c2_39, %c0_40, %c0_41, %c0_42] : memref<1x4x3x3x128xbf16, #tpu.memory_space<vmem>>, vector<1x1x2x2x128xbf16>
    %30 = vector.shape_cast %29 : vector<1x1x2x2x128xbf16> to vector<2x2x128xbf16>
    %31 = vector.shape_cast %30 : vector<2x2x128xbf16> to vector<4x128xbf16>
    %c0_43 = arith.constant 0 : index
    %c0_44 = arith.constant 0 : index
    %32 = vector.load %arg4[%c0_43, %c0_44] : memref<4x256xf32, #tpu.memory_space<vmem>>, vector<4x256xf32>
    %c3 = arith.constant 3 : index
    %c0_45 = arith.constant 0 : index
    %c0_46 = arith.constant 0 : index
    %33 = vector.load %arg2[%c3, %c0_45, %c0_46] : memref<9x128x256xbf16, #tpu.memory_space<vmem>>, vector<1x128x256xbf16>
    %34 = vector.shape_cast %33 : vector<1x128x256xbf16> to vector<128x256xbf16>
    %cst_47 = arith.constant dense<0.000000e+00> : vector<4x256xf32>
    %35 = tpu.matmul %31, %34, %cst_47 {dimension_numbers = #tpu.dot_dimension_numbers<[1], [0], [0], [1], [0, 0, 1, 1], [], []>} : vector<4x128xbf16>, vector<128x256xbf16>, vector<4x256xf32> -> vector<4x256xf32>
    %36 = arith.addf %32, %35 : vector<4x256xf32>
    %c0_48 = arith.constant 0 : index
    %c0_49 = arith.constant 0 : index
    %37 = vector.load %arg4[%c0_48, %c0_49] : memref<4x256xf32, #tpu.memory_space<vmem>>, vector<4x256xf32>
    tpu.vector_store %arg4[%c0_48, %c0_49], %36 {strides = array<i32>} : memref<4x256xf32, #tpu.memory_space<vmem>>, vector<4x256xf32>,
    %c0_50 = arith.constant 0 : index
    %c3_51 = arith.constant 3 : index
    %c0_52 = arith.constant 0 : index
    %c0_53 = arith.constant 0 : index
    %c0_54 = arith.constant 0 : index
    %38 = vector.load %arg1[%c0_50, %c3_51, %c0_52, %c0_53, %c0_54] : memref<1x4x3x3x128xbf16, #tpu.memory_space<vmem>>, vector<1x1x2x2x128xbf16>
    %39 = vector.shape_cast %38 : vector<1x1x2x2x128xbf16> to vector<2x2x128xbf16>
    %40 = vector.shape_cast %39 : vector<2x2x128xbf16> to vector<4x128xbf16>
    %c0_55 = arith.constant 0 : index
    %c0_56 = arith.constant 0 : index
    %41 = vector.load %arg4[%c0_55, %c0_56] : memref<4x256xf32, #tpu.memory_space<vmem>>, vector<4x256xf32>
    %c4 = arith.constant 4 : index
    %c0_57 = arith.constant 0 : index
    %c0_58 = arith.constant 0 : index
    %42 = vector.load %arg2[%c4, %c0_57, %c0_58] : memref<9x128x256xbf16, #tpu.memory_space<vmem>>, vector<1x128x256xbf16>
    %43 = vector.shape_cast %42 : vector<1x128x256xbf16> to vector<128x256xbf16>
    %cst_59 = arith.constant dense<0.000000e+00> : vector<4x256xf32>
    %44 = tpu.matmul %40, %43, %cst_59 {dimension_numbers = #tpu.dot_dimension_numbers<[1], [0], [0], [1], [0, 0, 1, 1], [], []>} : vector<4x128xbf16>, vector<128x256xbf16>, vector<4x256xf32> -> vector<4x256xf32>
    %45 = arith.addf %41, %44 : vector<4x256xf32>
    %c0_60 = arith.constant 0 : index
    %c0_61 = arith.constant 0 : index
    %46 = vector.load %arg4[%c0_60, %c0_61] : memref<4x256xf32, #tpu.memory_space<vmem>>, vector<4x256xf32>
    tpu.vector_store %arg4[%c0_60, %c0_61], %45 {strides = array<i32>} : memref<4x256xf32, #tpu.memory_space<vmem>>, vector<4x256xf32>,
    %c0_62 = arith.constant 0 : index
    %c2_63 = arith.constant 2 : index
    %c0_64 = arith.constant 0 : index
    %c1_65 = arith.constant 1 : index
    %c0_66 = arith.constant 0 : index
    %47 = vector.load %arg1[%c0_62, %c2_63, %c0_64, %c1_65, %c0_66] : memref<1x4x3x3x128xbf16, #tpu.memory_space<vmem>>, vector<1x1x2x2x128xbf16>
    %48 = vector.shape_cast %47 : vector<1x1x2x2x128xbf16> to vector<2x2x128xbf16>
    %49 = vector.shape_cast %48 : vector<2x2x128xbf16> to vector<4x128xbf16>
    %c0_67 = arith.constant 0 : index
    %c0_68 = arith.constant 0 : index
    %50 = vector.load %arg4[%c0_67, %c0_68] : memref<4x256xf32, #tpu.memory_space<vmem>>, vector<4x256xf32>
    %c5 = arith.constant 5 : index
    %c0_69 = arith.constant 0 : index
    %c0_70 = arith.constant 0 : index
    %51 = vector.load %arg2[%c5, %c0_69, %c0_70] : memref<9x128x256xbf16, #tpu.memory_space<vmem>>, vector<1x128x256xbf16>
    %52 = vector.shape_cast %51 : vector<1x128x256xbf16> to vector<128x256xbf16>
    %cst_71 = arith.constant dense<0.000000e+00> : vector<4x256xf32>
    %53 = tpu.matmul %49, %52, %cst_71 {dimension_numbers = #tpu.dot_dimension_numbers<[1], [0], [0], [1], [0, 0, 1, 1], [], []>} : vector<4x128xbf16>, vector<128x256xbf16>, vector<4x256xf32> -> vector<4x256xf32>
    %54 = arith.addf %50, %53 : vector<4x256xf32>
    %c0_72 = arith.constant 0 : index
    %c0_73 = arith.constant 0 : index
    %55 = vector.load %arg4[%c0_72, %c0_73] : memref<4x256xf32, #tpu.memory_space<vmem>>, vector<4x256xf32>
    tpu.vector_store %arg4[%c0_72, %c0_73], %54 {strides = array<i32>} : memref<4x256xf32, #tpu.memory_space<vmem>>, vector<4x256xf32>,
    %c0_74 = arith.constant 0 : index
    %c0_75 = arith.constant 0 : index
    %c1_76 = arith.constant 1 : index
    %c0_77 = arith.constant 0 : index
    %c0_78 = arith.constant 0 : index
    %56 = vector.load %arg1[%c0_74, %c0_75, %c1_76, %c0_77, %c0_78] : memref<1x4x3x3x128xbf16, #tpu.memory_space<vmem>>, vector<1x1x2x2x128xbf16>
    %57 = vector.shape_cast %56 : vector<1x1x2x2x128xbf16> to vector<2x2x128xbf16>
    %58 = vector.shape_cast %57 : vector<2x2x128xbf16> to vector<4x128xbf16>
    %c0_79 = arith.constant 0 : index
    %c0_80 = arith.constant 0 : index
    %59 = vector.load %arg4[%c0_79, %c0_80] : memref<4x256xf32, #tpu.memory_space<vmem>>, vector<4x256xf32>
    %c6 = arith.constant 6 : index
    %c0_81 = arith.constant 0 : index
    %c0_82 = arith.constant 0 : index
    %60 = vector.load %arg2[%c6, %c0_81, %c0_82] : memref<9x128x256xbf16, #tpu.memory_space<vmem>>, vector<1x128x256xbf16>
    %61 = vector.shape_cast %60 : vector<1x128x256xbf16> to vector<128x256xbf16>
    %cst_83 = arith.constant dense<0.000000e+00> : vector<4x256xf32>
    %62 = tpu.matmul %58, %61, %cst_83 {dimension_numbers = #tpu.dot_dimension_numbers<[1], [0], [0], [1], [0, 0, 1, 1], [], []>} : vector<4x128xbf16>, vector<128x256xbf16>, vector<4x256xf32> -> vector<4x256xf32>
    %63 = arith.addf %59, %62 : vector<4x256xf32>
    %c0_84 = arith.constant 0 : index
    %c0_85 = arith.constant 0 : index
    %64 = vector.load %arg4[%c0_84, %c0_85] : memref<4x256xf32, #tpu.memory_space<vmem>>, vector<4x256xf32>
    tpu.vector_store %arg4[%c0_84, %c0_85], %63 {strides = array<i32>} : memref<4x256xf32, #tpu.memory_space<vmem>>, vector<4x256xf32>,
    %c0_86 = arith.constant 0 : index
    %c1_87 = arith.constant 1 : index
    %c1_88 = arith.constant 1 : index
    %c0_89 = arith.constant 0 : index
    %c0_90 = arith.constant 0 : index
    %65 = vector.load %arg1[%c0_86, %c1_87, %c1_88, %c0_89, %c0_90] : memref<1x4x3x3x128xbf16, #tpu.memory_space<vmem>>, vector<1x1x2x2x128xbf16>
    %66 = vector.shape_cast %65 : vector<1x1x2x2x128xbf16> to vector<2x2x128xbf16>
    %67 = vector.shape_cast %66 : vector<2x2x128xbf16> to vector<4x128xbf16>
    %c0_91 = arith.constant 0 : index
    %c0_92 = arith.constant 0 : index
    %68 = vector.load %arg4[%c0_91, %c0_92] : memref<4x256xf32, #tpu.memory_space<vmem>>, vector<4x256xf32>
    %c7 = arith.constant 7 : index
    %c0_93 = arith.constant 0 : index
    %c0_94 = arith.constant 0 : index
    %69 = vector.load %arg2[%c7, %c0_93, %c0_94] : memref<9x128x256xbf16, #tpu.memory_space<vmem>>, vector<1x128x256xbf16>
    %70 = vector.shape_cast %69 : vector<1x128x256xbf16> to vector<128x256xbf16>
    %cst_95 = arith.constant dense<0.000000e+00> : vector<4x256xf32>
    %71 = tpu.matmul %67, %70, %cst_95 {dimension_numbers = #tpu.dot_dimension_numbers<[1], [0], [0], [1], [0, 0, 1, 1], [], []>} : vector<4x128xbf16>, vector<128x256xbf16>, vector<4x256xf32> -> vector<4x256xf32>
    %72 = arith.addf %68, %71 : vector<4x256xf32>
    %c0_96 = arith.constant 0 : index
    %c0_97 = arith.constant 0 : index
    %73 = vector.load %arg4[%c0_96, %c0_97] : memref<4x256xf32, #tpu.memory_space<vmem>>, vector<4x256xf32>
    tpu.vector_store %arg4[%c0_96, %c0_97], %72 {strides = array<i32>} : memref<4x256xf32, #tpu.memory_space<vmem>>, vector<4x256xf32>,
    %c0_98 = arith.constant 0 : index
    %c0_99 = arith.constant 0 : index
    %c1_100 = arith.constant 1 : index
    %c1_101 = arith.constant 1 : index
    %c0_102 = arith.constant 0 : index
    %74 = vector.load %arg1[%c0_98, %c0_99, %c1_100, %c1_101, %c0_102] : memref<1x4x3x3x128xbf16, #tpu.memory_space<vmem>>, vector<1x1x2x2x128xbf16>
    %75 = vector.shape_cast %74 : vector<1x1x2x2x128xbf16> to vector<2x2x128xbf16>
    %76 = vector.shape_cast %75 : vector<2x2x128xbf16> to vector<4x128xbf16>
    %c0_103 = arith.constant 0 : index
    %c0_104 = arith.constant 0 : index
    %77 = vector.load %arg4[%c0_103, %c0_104] : memref<4x256xf32, #tpu.memory_space<vmem>>, vector<4x256xf32>
    %c8 = arith.constant 8 : index
    %c0_105 = arith.constant 0 : index
    %c0_106 = arith.constant 0 : index
    %78 = vector.load %arg2[%c8, %c0_105, %c0_106] : memref<9x128x256xbf16, #tpu.memory_space<vmem>>, vector<1x128x256xbf16>
    %79 = vector.shape_cast %78 : vector<1x128x256xbf16> to vector<128x256xbf16>
    %cst_107 = arith.constant dense<0.000000e+00> : vector<4x256xf32>
    %80 = tpu.matmul %76, %79, %cst_107 {dimension_numbers = #tpu.dot_dimension_numbers<[1], [0], [0], [1], [0, 0, 1, 1], [], []>} : vector<4x128xbf16>, vector<128x256xbf16>, vector<4x256xf32> -> vector<4x256xf32>
    %81 = arith.addf %77, %80 : vector<4x256xf32>
    %c0_108 = arith.constant 0 : index
    %c0_109 = arith.constant 0 : index
    %82 = vector.load %arg4[%c0_108, %c0_109] : memref<4x256xf32, #tpu.memory_space<vmem>>, vector<4x256xf32>
    tpu.vector_store %arg4[%c0_108, %c0_109], %81 {strides = array<i32>} : memref<4x256xf32, #tpu.memory_space<vmem>>, vector<4x256xf32>,
    %c0_110 = arith.constant 0 : index
    %c0_111 = arith.constant 0 : index
    %83 = vector.load %arg4[%c0_110, %c0_111] : memref<4x256xf32, #tpu.memory_space<vmem>>, vector<4x256xf32>
    %cst_112 = arith.constant 0.000000e+00 : f32
    %84 = vector.broadcast %cst_112 : f32 to vector<4x256xf32>
    %85 = arith.maximumf %83, %84 : vector<4x256xf32>
    %86 = vector.shape_cast %85 : vector<4x256xf32> to vector<2x2x256xf32>
    %87 = arith.truncf %86 : vector<2x2x256xf32> to vector<2x2x256xbf16>
    %c0_113 = arith.constant 0 : index
    %c0_114 = arith.constant 0 : index
    %c0_115 = arith.constant 0 : index
    %c0_116 = arith.constant 0 : index
    %88 = vector.load %arg3[%c0_113, %c0_114, %c0_115, %c0_116] : memref<1x2x2x256xbf16, #tpu.memory_space<vmem>>, vector<1x2x2x256xbf16>
    %89 = vector.shape_cast %88 : vector<1x2x2x256xbf16> to vector<2x2x256xbf16>
    %90 = vector.shape_cast %87 : vector<2x2x256xbf16> to vector<1x2x2x256xbf16>
    tpu.vector_store %arg3[%c0_113, %c0_114, %c0_115, %c0_116], %90 {strides = array<i32>} : memref<1x2x2x256xbf16, #tpu.memory_space<vmem>>, vector<1x2x2x256xbf16>,
    return
  }
  func.func @transform_0(%arg0: i32) -> (i32, i32, i32, i32, i32) {
    %c0_i32 = arith.constant 0 : i32
    %c0_i32_0 = arith.constant 0 : i32
    %c0_i32_1 = arith.constant 0 : i32
    %c0_i32_2 = arith.constant 0 : i32
    %c0_i32_3 = arith.constant 0 : i32
    return %arg0, %c0_i32, %c0_i32_0, %c0_i32_1, %c0_i32_2 : i32, i32, i32, i32, i32
  }
  func.func @transform_1(%arg0: i32) -> (i32, i32, i32) {
    %c0_i32 = arith.constant 0 : i32
    %c0_i32_0 = arith.constant 0 : i32
    %c0_i32_1 = arith.constant 0 : i32
    %c0_i32_2 = arith.constant 0 : i32
    return %c0_i32, %c0_i32_0, %c0_i32_1 : i32, i32, i32
  }
  func.func @transform_2(%arg0: i32) -> (i32, i32, i32, i32) {
    %c0_i32 = arith.constant 0 : i32
    %c0_i32_0 = arith.constant 0 : i32
    %c0_i32_1 = arith.constant 0 : i32
    %c0_i32_2 = arith.constant 0 : i32
    return %arg0, %c0_i32, %c0_i32_0, %c0_i32_1 : i32, i32, i32, i32
  }
}

module attributes {stable_mosaic.version = 11 : i64} {
  func.func @_conv3x3_tap_kernel(%arg0: i32, %arg1: memref<1x4x2x2x256xbf16, #tpu.memory_space<vmem>>, %arg2: memref<9x256x768xbf16, #tpu.memory_space<vmem>>, %arg3: memref<1x1x1x768xf32, #tpu.memory_space<vmem>>, %arg4: memref<1x768xf32, #tpu.memory_space<vmem>>) attributes {dimension_semantics = [#tpu.dimension_semantics<parallel>], iteration_bounds = array<i64: 2>, scalar_prefetch = 0 : i64, scratch_operands = 1 : i64, tpu.core_type = #tpu.core_type<tc>, window_params = [{transform_indices = @transform_0, window_bounds = array<i64: 1, 4, 2, 2, 256>}, {pipeline_mode = #tpu.pipeline_mode<synchronous>, transform_indices = @transform_1, window_bounds = array<i64: 9, 256, 768>}, {transform_indices = @transform_2, window_bounds = array<i64: 1, 1, 1, 768>}]} {
    %cst = arith.constant 0.000000e+00 : f32
    %0 = vector.broadcast %cst : f32 to vector<1x768xf32>
    %c0 = arith.constant 0 : index
    %c0_0 = arith.constant 0 : index
    %1 = vector.load %arg4[%c0, %c0_0] : memref<1x768xf32, #tpu.memory_space<vmem>>, vector<1x768xf32>
    tpu.vector_store %arg4[%c0, %c0_0], %0 {strides = array<i32>} : memref<1x768xf32, #tpu.memory_space<vmem>>, vector<1x768xf32>,
    %c0_1 = arith.constant 0 : index
    %c0_2 = arith.constant 0 : index
    %c0_3 = arith.constant 0 : index
    %c0_4 = arith.constant 0 : index
    %c0_5 = arith.constant 0 : index
    %2 = vector.load %arg1[%c0_1, %c0_2, %c0_3, %c0_4, %c0_5] : memref<1x4x2x2x256xbf16, #tpu.memory_space<vmem>>, vector<1x1x1x1x256xbf16>
    %3 = vector.shape_cast %2 : vector<1x1x1x1x256xbf16> to vector<1x1x256xbf16>
    %4 = vector.shape_cast %3 : vector<1x1x256xbf16> to vector<1x256xbf16>
    %c0_6 = arith.constant 0 : index
    %c0_7 = arith.constant 0 : index
    %5 = vector.load %arg4[%c0_6, %c0_7] : memref<1x768xf32, #tpu.memory_space<vmem>>, vector<1x768xf32>
    %c0_8 = arith.constant 0 : index
    %c0_9 = arith.constant 0 : index
    %c0_10 = arith.constant 0 : index
    %6 = vector.load %arg2[%c0_8, %c0_9, %c0_10] : memref<9x256x768xbf16, #tpu.memory_space<vmem>>, vector<1x256x768xbf16>
    %7 = vector.shape_cast %6 : vector<1x256x768xbf16> to vector<256x768xbf16>
    %cst_11 = arith.constant dense<0.000000e+00> : vector<1x768xf32>
    %8 = tpu.matmul %4, %7, %cst_11 {dimension_numbers = #tpu.dot_dimension_numbers<[1], [0], [0], [1], [0, 0, 1, 1], [], []>} : vector<1x256xbf16>, vector<256x768xbf16>, vector<1x768xf32> -> vector<1x768xf32>
    %9 = arith.addf %5, %8 : vector<1x768xf32>
    %c0_12 = arith.constant 0 : index
    %c0_13 = arith.constant 0 : index
    %10 = vector.load %arg4[%c0_12, %c0_13] : memref<1x768xf32, #tpu.memory_space<vmem>>, vector<1x768xf32>
    tpu.vector_store %arg4[%c0_12, %c0_13], %9 {strides = array<i32>} : memref<1x768xf32, #tpu.memory_space<vmem>>, vector<1x768xf32>,
    %c0_14 = arith.constant 0 : index
    %c1 = arith.constant 1 : index
    %c0_15 = arith.constant 0 : index
    %c0_16 = arith.constant 0 : index
    %c0_17 = arith.constant 0 : index
    %11 = vector.load %arg1[%c0_14, %c1, %c0_15, %c0_16, %c0_17] : memref<1x4x2x2x256xbf16, #tpu.memory_space<vmem>>, vector<1x1x1x1x256xbf16>
    %12 = vector.shape_cast %11 : vector<1x1x1x1x256xbf16> to vector<1x1x256xbf16>
    %13 = vector.shape_cast %12 : vector<1x1x256xbf16> to vector<1x256xbf16>
    %c0_18 = arith.constant 0 : index
    %c0_19 = arith.constant 0 : index
    %14 = vector.load %arg4[%c0_18, %c0_19] : memref<1x768xf32, #tpu.memory_space<vmem>>, vector<1x768xf32>
    %c1_20 = arith.constant 1 : index
    %c0_21 = arith.constant 0 : index
    %c0_22 = arith.constant 0 : index
    %15 = vector.load %arg2[%c1_20, %c0_21, %c0_22] : memref<9x256x768xbf16, #tpu.memory_space<vmem>>, vector<1x256x768xbf16>
    %16 = vector.shape_cast %15 : vector<1x256x768xbf16> to vector<256x768xbf16>
    %cst_23 = arith.constant dense<0.000000e+00> : vector<1x768xf32>
    %17 = tpu.matmul %13, %16, %cst_23 {dimension_numbers = #tpu.dot_dimension_numbers<[1], [0], [0], [1], [0, 0, 1, 1], [], []>} : vector<1x256xbf16>, vector<256x768xbf16>, vector<1x768xf32> -> vector<1x768xf32>
    %18 = arith.addf %14, %17 : vector<1x768xf32>
    %c0_24 = arith.constant 0 : index
    %c0_25 = arith.constant 0 : index
    %19 = vector.load %arg4[%c0_24, %c0_25] : memref<1x768xf32, #tpu.memory_space<vmem>>, vector<1x768xf32>
    tpu.vector_store %arg4[%c0_24, %c0_25], %18 {strides = array<i32>} : memref<1x768xf32, #tpu.memory_space<vmem>>, vector<1x768xf32>,
    %c0_26 = arith.constant 0 : index
    %c0_27 = arith.constant 0 : index
    %c0_28 = arith.constant 0 : index
    %c1_29 = arith.constant 1 : index
    %c0_30 = arith.constant 0 : index
    %20 = vector.load %arg1[%c0_26, %c0_27, %c0_28, %c1_29, %c0_30] : memref<1x4x2x2x256xbf16, #tpu.memory_space<vmem>>, vector<1x1x1x1x256xbf16>
    %21 = vector.shape_cast %20 : vector<1x1x1x1x256xbf16> to vector<1x1x256xbf16>
    %22 = vector.shape_cast %21 : vector<1x1x256xbf16> to vector<1x256xbf16>
    %c0_31 = arith.constant 0 : index
    %c0_32 = arith.constant 0 : index
    %23 = vector.load %arg4[%c0_31, %c0_32] : memref<1x768xf32, #tpu.memory_space<vmem>>, vector<1x768xf32>
    %c2 = arith.constant 2 : index
    %c0_33 = arith.constant 0 : index
    %c0_34 = arith.constant 0 : index
    %24 = vector.load %arg2[%c2, %c0_33, %c0_34] : memref<9x256x768xbf16, #tpu.memory_space<vmem>>, vector<1x256x768xbf16>
    %25 = vector.shape_cast %24 : vector<1x256x768xbf16> to vector<256x768xbf16>
    %cst_35 = arith.constant dense<0.000000e+00> : vector<1x768xf32>
    %26 = tpu.matmul %22, %25, %cst_35 {dimension_numbers = #tpu.dot_dimension_numbers<[1], [0], [0], [1], [0, 0, 1, 1], [], []>} : vector<1x256xbf16>, vector<256x768xbf16>, vector<1x768xf32> -> vector<1x768xf32>
    %27 = arith.addf %23, %26 : vector<1x768xf32>
    %c0_36 = arith.constant 0 : index
    %c0_37 = arith.constant 0 : index
    %28 = vector.load %arg4[%c0_36, %c0_37] : memref<1x768xf32, #tpu.memory_space<vmem>>, vector<1x768xf32>
    tpu.vector_store %arg4[%c0_36, %c0_37], %27 {strides = array<i32>} : memref<1x768xf32, #tpu.memory_space<vmem>>, vector<1x768xf32>,
    %c0_38 = arith.constant 0 : index
    %c2_39 = arith.constant 2 : index
    %c0_40 = arith.constant 0 : index
    %c0_41 = arith.constant 0 : index
    %c0_42 = arith.constant 0 : index
    %29 = vector.load %arg1[%c0_38, %c2_39, %c0_40, %c0_41, %c0_42] : memref<1x4x2x2x256xbf16, #tpu.memory_space<vmem>>, vector<1x1x1x1x256xbf16>
    %30 = vector.shape_cast %29 : vector<1x1x1x1x256xbf16> to vector<1x1x256xbf16>
    %31 = vector.shape_cast %30 : vector<1x1x256xbf16> to vector<1x256xbf16>
    %c0_43 = arith.constant 0 : index
    %c0_44 = arith.constant 0 : index
    %32 = vector.load %arg4[%c0_43, %c0_44] : memref<1x768xf32, #tpu.memory_space<vmem>>, vector<1x768xf32>
    %c3 = arith.constant 3 : index
    %c0_45 = arith.constant 0 : index
    %c0_46 = arith.constant 0 : index
    %33 = vector.load %arg2[%c3, %c0_45, %c0_46] : memref<9x256x768xbf16, #tpu.memory_space<vmem>>, vector<1x256x768xbf16>
    %34 = vector.shape_cast %33 : vector<1x256x768xbf16> to vector<256x768xbf16>
    %cst_47 = arith.constant dense<0.000000e+00> : vector<1x768xf32>
    %35 = tpu.matmul %31, %34, %cst_47 {dimension_numbers = #tpu.dot_dimension_numbers<[1], [0], [0], [1], [0, 0, 1, 1], [], []>} : vector<1x256xbf16>, vector<256x768xbf16>, vector<1x768xf32> -> vector<1x768xf32>
    %36 = arith.addf %32, %35 : vector<1x768xf32>
    %c0_48 = arith.constant 0 : index
    %c0_49 = arith.constant 0 : index
    %37 = vector.load %arg4[%c0_48, %c0_49] : memref<1x768xf32, #tpu.memory_space<vmem>>, vector<1x768xf32>
    tpu.vector_store %arg4[%c0_48, %c0_49], %36 {strides = array<i32>} : memref<1x768xf32, #tpu.memory_space<vmem>>, vector<1x768xf32>,
    %c0_50 = arith.constant 0 : index
    %c3_51 = arith.constant 3 : index
    %c0_52 = arith.constant 0 : index
    %c0_53 = arith.constant 0 : index
    %c0_54 = arith.constant 0 : index
    %38 = vector.load %arg1[%c0_50, %c3_51, %c0_52, %c0_53, %c0_54] : memref<1x4x2x2x256xbf16, #tpu.memory_space<vmem>>, vector<1x1x1x1x256xbf16>
    %39 = vector.shape_cast %38 : vector<1x1x1x1x256xbf16> to vector<1x1x256xbf16>
    %40 = vector.shape_cast %39 : vector<1x1x256xbf16> to vector<1x256xbf16>
    %c0_55 = arith.constant 0 : index
    %c0_56 = arith.constant 0 : index
    %41 = vector.load %arg4[%c0_55, %c0_56] : memref<1x768xf32, #tpu.memory_space<vmem>>, vector<1x768xf32>
    %c4 = arith.constant 4 : index
    %c0_57 = arith.constant 0 : index
    %c0_58 = arith.constant 0 : index
    %42 = vector.load %arg2[%c4, %c0_57, %c0_58] : memref<9x256x768xbf16, #tpu.memory_space<vmem>>, vector<1x256x768xbf16>
    %43 = vector.shape_cast %42 : vector<1x256x768xbf16> to vector<256x768xbf16>
    %cst_59 = arith.constant dense<0.000000e+00> : vector<1x768xf32>
    %44 = tpu.matmul %40, %43, %cst_59 {dimension_numbers = #tpu.dot_dimension_numbers<[1], [0], [0], [1], [0, 0, 1, 1], [], []>} : vector<1x256xbf16>, vector<256x768xbf16>, vector<1x768xf32> -> vector<1x768xf32>
    %45 = arith.addf %41, %44 : vector<1x768xf32>
    %c0_60 = arith.constant 0 : index
    %c0_61 = arith.constant 0 : index
    %46 = vector.load %arg4[%c0_60, %c0_61] : memref<1x768xf32, #tpu.memory_space<vmem>>, vector<1x768xf32>
    tpu.vector_store %arg4[%c0_60, %c0_61], %45 {strides = array<i32>} : memref<1x768xf32, #tpu.memory_space<vmem>>, vector<1x768xf32>,
    %c0_62 = arith.constant 0 : index
    %c2_63 = arith.constant 2 : index
    %c0_64 = arith.constant 0 : index
    %c1_65 = arith.constant 1 : index
    %c0_66 = arith.constant 0 : index
    %47 = vector.load %arg1[%c0_62, %c2_63, %c0_64, %c1_65, %c0_66] : memref<1x4x2x2x256xbf16, #tpu.memory_space<vmem>>, vector<1x1x1x1x256xbf16>
    %48 = vector.shape_cast %47 : vector<1x1x1x1x256xbf16> to vector<1x1x256xbf16>
    %49 = vector.shape_cast %48 : vector<1x1x256xbf16> to vector<1x256xbf16>
    %c0_67 = arith.constant 0 : index
    %c0_68 = arith.constant 0 : index
    %50 = vector.load %arg4[%c0_67, %c0_68] : memref<1x768xf32, #tpu.memory_space<vmem>>, vector<1x768xf32>
    %c5 = arith.constant 5 : index
    %c0_69 = arith.constant 0 : index
    %c0_70 = arith.constant 0 : index
    %51 = vector.load %arg2[%c5, %c0_69, %c0_70] : memref<9x256x768xbf16, #tpu.memory_space<vmem>>, vector<1x256x768xbf16>
    %52 = vector.shape_cast %51 : vector<1x256x768xbf16> to vector<256x768xbf16>
    %cst_71 = arith.constant dense<0.000000e+00> : vector<1x768xf32>
    %53 = tpu.matmul %49, %52, %cst_71 {dimension_numbers = #tpu.dot_dimension_numbers<[1], [0], [0], [1], [0, 0, 1, 1], [], []>} : vector<1x256xbf16>, vector<256x768xbf16>, vector<1x768xf32> -> vector<1x768xf32>
    %54 = arith.addf %50, %53 : vector<1x768xf32>
    %c0_72 = arith.constant 0 : index
    %c0_73 = arith.constant 0 : index
    %55 = vector.load %arg4[%c0_72, %c0_73] : memref<1x768xf32, #tpu.memory_space<vmem>>, vector<1x768xf32>
    tpu.vector_store %arg4[%c0_72, %c0_73], %54 {strides = array<i32>} : memref<1x768xf32, #tpu.memory_space<vmem>>, vector<1x768xf32>,
    %c0_74 = arith.constant 0 : index
    %c0_75 = arith.constant 0 : index
    %c1_76 = arith.constant 1 : index
    %c0_77 = arith.constant 0 : index
    %c0_78 = arith.constant 0 : index
    %56 = vector.load %arg1[%c0_74, %c0_75, %c1_76, %c0_77, %c0_78] : memref<1x4x2x2x256xbf16, #tpu.memory_space<vmem>>, vector<1x1x1x1x256xbf16>
    %57 = vector.shape_cast %56 : vector<1x1x1x1x256xbf16> to vector<1x1x256xbf16>
    %58 = vector.shape_cast %57 : vector<1x1x256xbf16> to vector<1x256xbf16>
    %c0_79 = arith.constant 0 : index
    %c0_80 = arith.constant 0 : index
    %59 = vector.load %arg4[%c0_79, %c0_80] : memref<1x768xf32, #tpu.memory_space<vmem>>, vector<1x768xf32>
    %c6 = arith.constant 6 : index
    %c0_81 = arith.constant 0 : index
    %c0_82 = arith.constant 0 : index
    %60 = vector.load %arg2[%c6, %c0_81, %c0_82] : memref<9x256x768xbf16, #tpu.memory_space<vmem>>, vector<1x256x768xbf16>
    %61 = vector.shape_cast %60 : vector<1x256x768xbf16> to vector<256x768xbf16>
    %cst_83 = arith.constant dense<0.000000e+00> : vector<1x768xf32>
    %62 = tpu.matmul %58, %61, %cst_83 {dimension_numbers = #tpu.dot_dimension_numbers<[1], [0], [0], [1], [0, 0, 1, 1], [], []>} : vector<1x256xbf16>, vector<256x768xbf16>, vector<1x768xf32> -> vector<1x768xf32>
    %63 = arith.addf %59, %62 : vector<1x768xf32>
    %c0_84 = arith.constant 0 : index
    %c0_85 = arith.constant 0 : index
    %64 = vector.load %arg4[%c0_84, %c0_85] : memref<1x768xf32, #tpu.memory_space<vmem>>, vector<1x768xf32>
    tpu.vector_store %arg4[%c0_84, %c0_85], %63 {strides = array<i32>} : memref<1x768xf32, #tpu.memory_space<vmem>>, vector<1x768xf32>,
    %c0_86 = arith.constant 0 : index
    %c1_87 = arith.constant 1 : index
    %c1_88 = arith.constant 1 : index
    %c0_89 = arith.constant 0 : index
    %c0_90 = arith.constant 0 : index
    %65 = vector.load %arg1[%c0_86, %c1_87, %c1_88, %c0_89, %c0_90] : memref<1x4x2x2x256xbf16, #tpu.memory_space<vmem>>, vector<1x1x1x1x256xbf16>
    %66 = vector.shape_cast %65 : vector<1x1x1x1x256xbf16> to vector<1x1x256xbf16>
    %67 = vector.shape_cast %66 : vector<1x1x256xbf16> to vector<1x256xbf16>
    %c0_91 = arith.constant 0 : index
    %c0_92 = arith.constant 0 : index
    %68 = vector.load %arg4[%c0_91, %c0_92] : memref<1x768xf32, #tpu.memory_space<vmem>>, vector<1x768xf32>
    %c7 = arith.constant 7 : index
    %c0_93 = arith.constant 0 : index
    %c0_94 = arith.constant 0 : index
    %69 = vector.load %arg2[%c7, %c0_93, %c0_94] : memref<9x256x768xbf16, #tpu.memory_space<vmem>>, vector<1x256x768xbf16>
    %70 = vector.shape_cast %69 : vector<1x256x768xbf16> to vector<256x768xbf16>
    %cst_95 = arith.constant dense<0.000000e+00> : vector<1x768xf32>
    %71 = tpu.matmul %67, %70, %cst_95 {dimension_numbers = #tpu.dot_dimension_numbers<[1], [0], [0], [1], [0, 0, 1, 1], [], []>} : vector<1x256xbf16>, vector<256x768xbf16>, vector<1x768xf32> -> vector<1x768xf32>
    %72 = arith.addf %68, %71 : vector<1x768xf32>
    %c0_96 = arith.constant 0 : index
    %c0_97 = arith.constant 0 : index
    %73 = vector.load %arg4[%c0_96, %c0_97] : memref<1x768xf32, #tpu.memory_space<vmem>>, vector<1x768xf32>
    tpu.vector_store %arg4[%c0_96, %c0_97], %72 {strides = array<i32>} : memref<1x768xf32, #tpu.memory_space<vmem>>, vector<1x768xf32>,
    %c0_98 = arith.constant 0 : index
    %c0_99 = arith.constant 0 : index
    %c1_100 = arith.constant 1 : index
    %c1_101 = arith.constant 1 : index
    %c0_102 = arith.constant 0 : index
    %74 = vector.load %arg1[%c0_98, %c0_99, %c1_100, %c1_101, %c0_102] : memref<1x4x2x2x256xbf16, #tpu.memory_space<vmem>>, vector<1x1x1x1x256xbf16>
    %75 = vector.shape_cast %74 : vector<1x1x1x1x256xbf16> to vector<1x1x256xbf16>
    %76 = vector.shape_cast %75 : vector<1x1x256xbf16> to vector<1x256xbf16>
    %c0_103 = arith.constant 0 : index
    %c0_104 = arith.constant 0 : index
    %77 = vector.load %arg4[%c0_103, %c0_104] : memref<1x768xf32, #tpu.memory_space<vmem>>, vector<1x768xf32>
    %c8 = arith.constant 8 : index
    %c0_105 = arith.constant 0 : index
    %c0_106 = arith.constant 0 : index
    %78 = vector.load %arg2[%c8, %c0_105, %c0_106] : memref<9x256x768xbf16, #tpu.memory_space<vmem>>, vector<1x256x768xbf16>
    %79 = vector.shape_cast %78 : vector<1x256x768xbf16> to vector<256x768xbf16>
    %cst_107 = arith.constant dense<0.000000e+00> : vector<1x768xf32>
    %80 = tpu.matmul %76, %79, %cst_107 {dimension_numbers = #tpu.dot_dimension_numbers<[1], [0], [0], [1], [0, 0, 1, 1], [], []>} : vector<1x256xbf16>, vector<256x768xbf16>, vector<1x768xf32> -> vector<1x768xf32>
    %81 = arith.addf %77, %80 : vector<1x768xf32>
    %c0_108 = arith.constant 0 : index
    %c0_109 = arith.constant 0 : index
    %82 = vector.load %arg4[%c0_108, %c0_109] : memref<1x768xf32, #tpu.memory_space<vmem>>, vector<1x768xf32>
    tpu.vector_store %arg4[%c0_108, %c0_109], %81 {strides = array<i32>} : memref<1x768xf32, #tpu.memory_space<vmem>>, vector<1x768xf32>,
    %c0_110 = arith.constant 0 : index
    %c0_111 = arith.constant 0 : index
    %83 = vector.load %arg4[%c0_110, %c0_111] : memref<1x768xf32, #tpu.memory_space<vmem>>, vector<1x768xf32>
    %84 = vector.shape_cast %83 : vector<1x768xf32> to vector<1x1x768xf32>
    %c0_112 = arith.constant 0 : index
    %c0_113 = arith.constant 0 : index
    %c0_114 = arith.constant 0 : index
    %c0_115 = arith.constant 0 : index
    %85 = vector.load %arg3[%c0_112, %c0_113, %c0_114, %c0_115] : memref<1x1x1x768xf32, #tpu.memory_space<vmem>>, vector<1x1x1x768xf32>
    %86 = vector.shape_cast %85 : vector<1x1x1x768xf32> to vector<1x1x768xf32>
    %87 = vector.shape_cast %84 : vector<1x1x768xf32> to vector<1x1x1x768xf32>
    tpu.vector_store %arg3[%c0_112, %c0_113, %c0_114, %c0_115], %87 {strides = array<i32>} : memref<1x1x1x768xf32, #tpu.memory_space<vmem>>, vector<1x1x1x768xf32>,
    return
  }
  func.func @transform_0(%arg0: i32) -> (i32, i32, i32, i32, i32) {
    %c0_i32 = arith.constant 0 : i32
    %c0_i32_0 = arith.constant 0 : i32
    %c0_i32_1 = arith.constant 0 : i32
    %c0_i32_2 = arith.constant 0 : i32
    %c0_i32_3 = arith.constant 0 : i32
    return %arg0, %c0_i32, %c0_i32_0, %c0_i32_1, %c0_i32_2 : i32, i32, i32, i32, i32
  }
  func.func @transform_1(%arg0: i32) -> (i32, i32, i32) {
    %c0_i32 = arith.constant 0 : i32
    %c0_i32_0 = arith.constant 0 : i32
    %c0_i32_1 = arith.constant 0 : i32
    %c0_i32_2 = arith.constant 0 : i32
    return %c0_i32, %c0_i32_0, %c0_i32_1 : i32, i32, i32
  }
  func.func @transform_2(%arg0: i32) -> (i32, i32, i32, i32) {
    %c0_i32 = arith.constant 0 : i32
    %c0_i32_0 = arith.constant 0 : i32
    %c0_i32_1 = arith.constant 0 : i32
    %c0_i32_2 = arith.constant 0 : i32
    return %arg0, %c0_i32, %c0_i32_0, %c0_i32_1 : i32, i32, i32, i32
  }
}

</mosaic_0001>

<bundles_post_ra>
// kernel: _lambda_.4
= control target key start
LH: loop header
LB: loop body
LE: loop exit
PB: predicated region body
PF: predicated region fallthrough
CT: control target
= control target key end

     0   :  { %s799_s1 = inlined_call_operand.vmem [shape: bf16[256,128], index: 1, kind: input, shape index: {}]   ;;  %s800_s0 = inlined_call_operand.vmem [shape: bf16[128,256], index: 0, kind: input, shape index: {}]   ;;  %s801_s2 = inlined_call_operand.vmem [shape: bf16[128,128], index: 2, kind: output, shape index: {}]  }
   0x1   :  { %v624_v0 = vld [vmem:[%s799_s1 + $0x78] sm:$0xff]   ;;  %v626_v2 = vld [vmem:[%s799_s1 + $0x70] sm:$0xff]   ;;  %v628_v4 = vld [vmem:[%s799_s1 + $0x68] sm:$0xff]  }
   0x2   :  { %v625_v1 = vld [vmem:[%s799_s1 + $0x38] sm:$0xff]   ;;  %544 = vmatprep.subr.bf16.mxu0 %v624_v0  ;;  %608 = vmatprep.subr.bf16.mxu1 %v624_v0  ;;  %v627_v3 = vld [vmem:[%s799_s1 + $0x30] sm:$0xff]   ;;  %v629_v5 = vld [vmem:[%s799_s1 + $0x28] sm:$0xff]  }
   0x3   :  { %545 = vmatpush3.bf16.msra.mxu0 %v625_v1  ;;  %616 = vmatpush3.bf16.msra.mxu1 %v625_v1  ;;  %v630_v6 = vld [vmem:[%s799_s1 + $0x60] sm:$0xff]   ;;  %v632_v8 = vld [vmem:[%s799_s1 + $0x58] sm:$0xff]   ;;  %v634_v10 = vld [vmem:[%s799_s1 + $0x50] sm:$0xff]  }
   0x4   :  { %546 = vmatprep.subr.bf16.mxu0 %v626_v2  ;;  %609 = vmatprep.subr.bf16.mxu1 %v626_v2  ;;  %v631_v7 = vld [vmem:[%s799_s1 + $0x20] sm:$0xff]   ;;  %v633_v9 = vld [vmem:[%s799_s1 + $0x18] sm:$0xff]   ;;  %v635_v13 = vld [vmem:[%s799_s1 + $0x10] sm:$0xff]  }
   0x5   :  { %v642_v11 = vld [vmem:[%s800_s0 + $0x4] ss:$8 sps:$4 sm:$0xff]   ;;  %v640_v18 = vld [vmem:[%s800_s0] ss:$8 sps:$4 sm:$0xff]   ;;  %v646_v20 = vld [vmem:[%s800_s0 + $0x14] ss:$8 sps:$4 sm:$0xff]  }
   0x6   :  { %v645_v12 = vld [vmem:[%s800_s0 + $0x44] ss:$8 sps:$4 sm:$0xff]   ;;  %268 = vmatprep.mubr.bf16.mxu0 %v642_v11  ;;  %v643_v19 = vld [vmem:[%s800_s0 + $0x40] ss:$8 sps:$4 sm:$0xff]   ;;  %v648_v21 = vld [vmem:[%s800_s0 + $0x54] ss:$8 sps:$4 sm:$0xff]  }
   0x7   :  { %547 = vmatpush3.bf16.msra.mxu0 %v627_v3  ;;  %617 = vmatpush3.bf16.msra.mxu1 %v627_v3  ;;  %v636_v14 = vld [vmem:[%s799_s1 + $0x48] sm:$0xff]   ;;  %v638_v16 = vld [vmem:[%s799_s1 + $0x40] sm:$0xff]   ;;  %v650_v22 = vld [vmem:[%s800_s0 + $0x10] ss:$8 sps:$4 sm:$0xff]  }
   0x8   :  { %548 = vmatprep.subr.bf16.mxu0 %v628_v4  ;;  %610 = vmatprep.subr.bf16.mxu1 %v628_v4  ;;  %v637_v15 = vld [vmem:[%s799_s1 + $0x8] sm:$0xff]   ;;  %v639_v17 = vld [vmem:[%s799_s1] sm:$0xff]   ;;  %v651_v23 = vld [vmem:[%s800_s0 + $0x50] ss:$8 sps:$4 sm:$0xff]  }
   0x9   :  { %300 = vmatprep.mubr.bf16.mxu1 %v645_v12  ;;  %v652_v24 = vld [vmem:[%s800_s0 + $0x24] ss:$8 sps:$4 sm:$0xff]   ;;  %v656_v26 = vld [vmem:[%s800_s0 + $0x20] ss:$8 sps:$4 sm:$0xff]   ;;  %v658_v28 = vld [vmem:[%s800_s0 + $0x34] ss:$8 sps:$4 sm:$0xff]  }
   0xa   :  { %v654_v25 = vld [vmem:[%s800_s0 + $0x64] ss:$8 sps:$4 sm:$0xff]   ;;  %v657_v27 = vld [vmem:[%s800_s0 + $0x60] ss:$8 sps:$4 sm:$0xff]   ;;  %v660_v29 = vld [vmem:[%s800_s0 + $0x74] ss:$8 sps:$4 sm:$0xff]  }
   0xb   :  { %549 = vmatpush3.bf16.msra.mxu0 %v629_v5  ;;  %618 = vmatpush3.bf16.msra.mxu1 %v629_v5  ;;  %v662_v30 = vld [vmem:[%s800_s0 + $0x30] ss:$8 sps:$4 sm:$0xff]  }
   0xc   :  { %550 = vmatprep.subr.bf16.mxu0 %v630_v6  ;;  %611 = vmatprep.subr.bf16.mxu1 %v630_v6  ;;  %v663_v31 = vld [vmem:[%s800_s0 + $0x70] ss:$8 sps:$4 sm:$0xff]  }
   0xf   :  { %551 = vmatpush3.bf16.msra.mxu0 %v631_v7  ;;  %619 = vmatpush3.bf16.msra.mxu1 %v631_v7 }
  0x10   :  { %552 = vmatprep.subr.bf16.mxu0 %v632_v8  ;;  %612 = vmatprep.subr.bf16.mxu1 %v632_v8 }
  0x13   :  { %553 = vmatpush3.bf16.msra.mxu0 %v633_v9  ;;  %620 = vmatpush3.bf16.msra.mxu1 %v633_v9 }
  0x14   :  { %554 = vmatprep.subr.bf16.mxu0 %v634_v10  ;;  %613 = vmatprep.subr.bf16.mxu1 %v634_v10 }
  0x17   :  { %555 = vmatpush3.bf16.msra.mxu0 %v635_v13  ;;  %621 = vmatpush3.bf16.msra.mxu1 %v635_v13 }
  0x18   :  { %556 = vmatprep.subr.bf16.mxu0 %v636_v14  ;;  %614 = vmatprep.subr.bf16.mxu1 %v636_v14 }
  0x1b   :  { %557 = vmatpush3.bf16.msra.mxu0 %v637_v15  ;;  %622 = vmatpush3.bf16.msra.mxu1 %v637_v15 }
  0x1c   :  { %558 = vmatprep.subr.bf16.mxu0 %v638_v16  ;;  %615 = vmatprep.subr.bf16.mxu1 %v638_v16 }
  0x1f   :  { %559 = vmatpush3.bf16.msra.mxu0 %v639_v17  ;;  %623 = vmatpush3.bf16.msra.mxu1 %v639_v17 }
  0x22   :  { %269 = vmatmul.mubr.bf16.vlgmr.msra.gmra.mxu0 %v640_v18  ;;  %301 = vmatmul.mubr.bf16.vlgmr.msra.gmra.mxu1 %v643_v19 }
  0x23   :  { %276 = vmatprep.mubr.bf16.mxu0 %v646_v20  ;;  %308 = vmatprep.mubr.bf16.mxu1 %v648_v21 }
  0x2a   :  { %277 = vmatmul.mubr.bf16.gmra.mxu0 %v650_v22  ;;  %309 = vmatmul.mubr.bf16.gmra.mxu1 %v651_v23 }
  0x2b   :  { %284 = vmatprep.mubr.bf16.mxu0 %v652_v24  ;;  %316 = vmatprep.mubr.bf16.mxu1 %v654_v25 }
  0x32   :  { %285 = vmatmul.mubr.bf16.gmra.mxu0 %v656_v26  ;;  %317 = vmatmul.mubr.bf16.gmra.mxu1 %v657_v27 }
  0x33   :  { %292 = vmatprep.mubr.bf16.mxu0 %v658_v28  ;;  %324 = vmatprep.mubr.bf16.mxu1 %v660_v29 }
  0x3a   :  { %293 = vmatmul.mubr.bf16.gmra.mxu0 %v662_v30  ;;  %325 = vmatmul.mubr.bf16.gmra.mxu1 %v663_v31 }
  0xe2   :  { %v560_v32 = vpop.f32.mrf.mxu0  ;;  %v584_v33 = vpop.f32.mrf.mxu1 }
  0xe4   :  { %v561_v34 = vpop.f32.mrf.mxu0  ;;  %v585_v35 = vpop.f32.mrf.mxu1 }
  0xe5   :  { %v562_v38 = vadd.f32 %v561_v34, %v560_v32  ;;  %v586_v39 = vadd.f32 %v585_v35, %v584_v33 }
  0xe6   :  { %v563_v36 = vpop.f32.mrf.mxu0  ;;  %v587_v37 = vpop.f32.mrf.mxu1 }
  0xe7   :  { %v333_v46 = vmax.f32 %v562_v38, 0.0  ;;  %v341_v47 = vmax.f32 %v586_v39, 0.0 }
  0xe8   :  { %v564_v40 = vpop.f32.mrf.mxu0  ;;  %v588_v41 = vpop.f32.mrf.mxu1 }
  0xe9   :  { %v565_v42 = vadd.f32 %v564_v40, %v563_v36  ;;  %v589_v43 = vadd.f32 %v588_v41, %v587_v37 }
  0xea   :  { %v566_v44 = vpop.f32.mrf.mxu0  ;;  %v590_v45 = vpop.f32.mrf.mxu1 }
  0xeb   :  { %v334_v48 = vmax.f32 %v565_v42, 0.0  ;;  %v342_v49 = vmax.f32 %v589_v43, 0.0 }
  0xec   :  { %v567_v50 = vpop.f32.mrf.mxu0  ;;  %v591_v51 = vpop.f32.mrf.mxu1 }
  0xed   :  { %v500_v52 = vpack.c.bf16 %v334_v48, %v333_v46  ;;  %v520_v53 = vpack.c.bf16 %v342_v49, %v341_v47  ;;  %v568_v56 = vadd.f32 %v567_v50, %v566_v44  ;;  %v592_v57 = vadd.f32 %v591_v51, %v590_v45 }
  0xee   :  { %v569_v54 = vpop.f32.mrf.mxu0  ;;  %v593_v55 = vpop.f32.mrf.mxu1 }
  0xef   :  { %501 = vst [vmem:[%s801_s2] sm:$0xff] %v500_v52   ;;  %540 = vst [vmem:[%s801_s2 + $0x20] sm:$0xff] %v520_v53   ;;  %v335_v0 = vmax.f32 %v568_v56, 0.0  ;;  %v343_v1 = vmax.f32 %v592_v57, 0.0 }
  0xf0   :  { %v570_v58 = vpop.f32.mrf.mxu0  ;;  %v594_v59 = vpop.f32.mrf.mxu1 }
  0xf1   :  { %v571_v60 = vadd.f32 %v570_v58, %v569_v54  ;;  %v595_v61 = vadd.f32 %v594_v59, %v593_v55 }
  0xf2   :  { %v572_v62 = vpop.f32.mrf.mxu0  ;;  %v596_v63 = vpop.f32.mrf.mxu1 }
  0xf3   :  { %v336_v2 = vmax.f32 %v571_v60, 0.0  ;;  %v344_v3 = vmax.f32 %v595_v61, 0.0 }
  0xf4   :  { %v573_v4 = vpop.f32.mrf.mxu0  ;;  %v597_v5 = vpop.f32.mrf.mxu1 }
  0xf5   :  { %v505_v6 = vpack.c.bf16 %v336_v2, %v335_v0  ;;  %v525_v7 = vpack.c.bf16 %v344_v3, %v343_v1  ;;  %v574_v10 = vadd.f32 %v573_v4, %v572_v62  ;;  %v598_v11 = vadd.f32 %v597_v5, %v596_v63 }
  0xf6   :  { %v575_v8 = vpop.f32.mrf.mxu0  ;;  %v599_v9 = vpop.f32.mrf.mxu1 }
  0xf7   :  { %537 = vst [vmem:[%s801_s2 + $0x8] sm:$0xff] %v505_v6   ;;  %541 = vst [vmem:[%s801_s2 + $0x28] sm:$0xff] %v525_v7   ;;  %v337_v18 = vmax.f32 %v574_v10, 0.0  ;;  %v345_v19 = vmax.f32 %v598_v11, 0.0 }
  0xf8   :  { %v576_v12 = vpop.f32.mrf.mxu0  ;;  %v600_v13 = vpop.f32.mrf.mxu1 }
  0xf9   :  { %v577_v14 = vadd.f32 %v576_v12, %v575_v8  ;;  %v601_v15 = vadd.f32 %v600_v13, %v599_v9 }
  0xfa   :  { %v578_v16 = vpop.f32.mrf.mxu0  ;;  %v602_v17 = vpop.f32.mrf.mxu1 }
  0xfb   :  { %v338_v20 = vmax.f32 %v577_v14, 0.0  ;;  %v346_v21 = vmax.f32 %v601_v15, 0.0 }
  0xfc   :  { %v579_v22 = vpop.f32.mrf.mxu0  ;;  %v603_v23 = vpop.f32.mrf.mxu1 }
  0xfd   :  { %v510_v24 = vpack.c.bf16 %v338_v20, %v337_v18  ;;  %v530_v25 = vpack.c.bf16 %v346_v21, %v345_v19  ;;  %v580_v28 = vadd.f32 %v579_v22, %v578_v16  ;;  %v604_v29 = vadd.f32 %v603_v23, %v602_v17 }
  0xfe   :  { %v581_v26 = vpop.f32.mrf.mxu0  ;;  %v605_v27 = vpop.f32.mrf.mxu1 }
  0xff   :  { %538 = vst [vmem:[%s801_s2 + $0x10] sm:$0xff] %v510_v24   ;;  %542 = vst [vmem:[%s801_s2 + $0x30] sm:$0xff] %v530_v25   ;;  %v339_v34 = vmax.f32 %v580_v28, 0.0  ;;  %v347_v35 = vmax.f32 %v604_v29, 0.0 }
 0x100   :  { %v582_v30 = vpop.f32.mrf.mxu0  ;;  %v606_v31 = vpop.f32.mrf.mxu1 }
 0x101   :  { %v583_v32 = vadd.f32 %v582_v30, %v581_v26  ;;  %v607_v33 = vadd.f32 %v606_v31, %v605_v27 }
 0x103   :  { %v340_v36 = vmax.f32 %v583_v32, 0.0  ;;  %v348_v37 = vmax.f32 %v607_v33, 0.0 }
 0x105   :  { %v515_v38 = vpack.c.bf16 %v340_v36, %v339_v34  ;;  %v535_v39 = vpack.c.bf16 %v348_v37, %v347_v35 }
 0x107   :  { %539 = vst [vmem:[%s801_s2 + $0x18] sm:$0xff] %v515_v38   ;;  %543 = vst [vmem:[%s801_s2 + $0x38] sm:$0xff] %v535_v39  }

// kernel: _lambda_.5
= control target key start
LH: loop header
LB: loop body
LE: loop exit
PB: predicated region body
PF: predicated region fallthrough
CT: control target
= control target key end

     0   :  { %s1879_s9 = smov 0   ;;  %s2149_s0 = inlined_call_operand.vmem [shape: bf16[2,4,5,5,64], index: 0, kind: input, shape index: {}]   ;;  %s2150_s1 = inlined_call_operand.vmem [shape: bf16[9,64,128], index: 1, kind: input, shape index: {}]   ;;  %s2151_s2 = inlined_call_operand.vmem [shape: bf16[2,4,4,128], index: 2, kind: output, shape index: {}]  }
   0x1 LB: > { %s1468_s10 = sadd.s32 4294967295, %s1859_s9   ;;  %p1472_p0 = scmp.ge.s32.totalorder %s1859_s9, 1  ;;  %s1859_s9 = sphi %s1879_s9, %s12_s9  }
   0x2   : > { %p112_p1 = scmp.lt.s32.totalorder %s1859_s9, 3 }
   0x4   : > { %p113_p2 = pnand %p1472_p0, %p112_p1 }
   0x5   : > { %p134_p3 = scmp.lt.s32.totalorder (!%p113_p2), %s1468_s10, 1 }
   0x6   : > { %116 = sbr.rel (%p113_p2) target bundleno = 298 (0x12a), region = 28 }
   0xb   : > { %v1793_v0 = vld [vmem:[%s2150_s1 + $0x18] sm:$0xff]   ;;  %v1861_v1 = vmov 0.0   ;;  %v1795_v3 = vld [vmem:[%s2150_s1 + $0x10] sm:$0xff]   ;;  %vm1862_vm0 = vmmov 0   ;;  %v170_v5 = vlaneseq  ;;  %s2159_s10 = smov (!%p134_p3, %s1468_s10), 1  ;;  %v1797_v6 = vld [vmem:[%s2150_s1 + $0x8] sm:$0xff]  }
   0xc   : > { %1673 = vmatprep.subr.bf16.mxu0 %v1861_v1  ;;  %1685 = vmatprep.subr.bf16.mxu1 %v1861_v1  ;;  %v1794_v2 = vld [vmem:[%s2150_s1 + $0x38] sm:$0xff]   ;;  %v1796_v4 = vld [vmem:[%s2150_s1 + $0x30] sm:$0xff]   ;;  %s1781_s21 = smul.u32 80, %s2159_s10  ;;  %v1798_v7 = vld [vmem:[%s2150_s1 + $0x28] sm:$0xff]   ;;  %v1863_v11 = vmov 1983009808  }
   0xd   : > { %1674 = vmatpush3.bf16.msra.mxu0 %v1793_v0  ;;  %1681 = vmatprep.mubr.msk.bf16.mxu0 %vm1862_vm0, %v1861_v1  ;;  %v171_v8 = vshrl.u32 %v170_v5, 7  ;;  %v1799_v9 = vld [vmem:[%s2150_s1] sm:$0xff]   ;;  %v168_v12 = vunpack.c.l.s4 %v1863_v11  ;;  %v1805_v19 = vld [vmem:[%s2150_s1 + $0x58] sm:$0xff]   ;;  %vm206_vm1 = vcmask 523264   ;;  %v1807_v23 = vld [vmem:[%s2150_s1 + $0x50] sm:$0xff]   ;;  %s1627_s8 = sshll.u32 %s2159_s10, 3 }
   0xe   : > { %1686 = vmatpush3.bf16.msra.mxu1 %v1794_v2  ;;  %1675 = vmatprep.subr.bf16.mxu0 %v1861_v1  ;;  %s1924_s28 = scalar_lea.vmem %s2149_s0, %s1781_s21  ;;  %v1800_v10 = vld [vmem:[%s2150_s1 + $0x20] sm:$0xff]   ;;  %v1806_v20 = vld [vmem:[%s2150_s1 + $0x78] sm:$0xff]   ;;  %v1808_v24 = vld [vmem:[%s2150_s1 + $0x70] sm:$0xff]   ;;  %vm404_vm2 = vsmask.f32 1280  ;;  %s143_s13 = scalar_lea.vmem %s2151_s2, %s1627_s8 }
   0xf   : > { %1687 = vmatprep.subr.bf16.mxu1 %v1861_v1  ;;  %1693 = vmatprep.mubr.msk.bf16.mxu1 %vm1862_vm0, %v1861_v1  ;;  %v1841_v13 = vld.sshfl [vmem:[%s1924_s28] sm:$0xf pattern:$0x76325410]  ;;  %v169_v15 = vunpack.c.0.s8 %v168_v12  ;;  %v1809_v28 = vld [vmem:[%s2150_s1 + $0x48] sm:$0xff]  }
  0x10   : > { %v1842_v14 = vld.sshfl [vmem:[%s1924_s28 + $0x8] sm:$0xf pattern:$0x76325410]  ;;  %vm405_vm3 = vsmask.f32 3336 }
  0x11   : > { %1676 = vmatpush3.bf16.msra.mxu0 %v1795_v3  ;;  %v1843_v16 = vld.sshfl [vmem:[%s1924_s28 + $0x14] sm:$0xf pattern:$0x76325410]  ;;  %v1935_v18 = vsub.s32 %v169_v15, %v171_v8  ;;  %v181_v21 = vcombine.low %v1841_v13, %v1842_v14  ;;  %v1810_v29 = vld [vmem:[%s2150_s1 + $0x68] sm:$0xff]   ;;  %vm1969_vm4 = vmor %vm404_vm2, %vm405_vm3 }
  0x12   : > { %1688 = vmatpush3.bf16.msra.mxu1 %v1796_v4  ;;  %1677 = vmatprep.subr.bf16.mxu0 %v1861_v1  ;;  %v1844_v17 = vld.sshfl [vmem:[%s1924_s28 + $0x1c] sm:$0xf pattern:$0x76325410]  ;;  %vm407_vm5 = vsmask.f32 5392 }
  0x13   : > { %1689 = vmatprep.subr.bf16.mxu1 %v1861_v1  ;;  %v291_v22 = vcombine.low %v1843_v16, %v1844_v17  ;;  %v1498_v25 = vld.sshfl [vmem:[%s1924_s28] sm:$0x13 pattern:$0x76325410]  ;;  %vm409_vm6 = vsmask.f32 7448  ;;  %vm1980_vm7 = vmor %vm1969_vm4, %vm407_vm5 }
  0x14   : > { %v1499_v26 = vld.sshfl [vmem:[%s1924_s28 + $0x4] sm:$0x13 pattern:$0x76325410]  ;;  %v379_v27 = vcombine.high %v1498_v25, %v1498_v25  ;;  %v412_v36 = vshrl.u32 %v1498_v25, 16  ;;  %v415_v37 = vshll.u32 %v1498_v25, 16  ;;  %vm1992_vm8 = vmor %vm1980_vm7, %vm409_vm6 }
  0x15   : > { %1678 = vmatpush3.bf16.msra.mxu0 %v1797_v6  ;;  %v1500_v30 = vld.sshfl [vmem:[%s1924_s28 + $0x8] sm:$0x13 pattern:$0x76325410]  ;;  %v387_v31 = vcombine.high %v1499_v26, %v1499_v26  ;;  %v426_v39 = vshrl.u32 %v1499_v26, 16  ;;  %v429_v40 = vshll.u32 %v1499_v26, 16 }
  0x16   : > { %1690 = vmatpush3.bf16.msra.mxu1 %v1798_v7  ;;  %1679 = vmatprep.subr.bf16.mxu0 %v1861_v1  ;;  %v1501_v32 = vld.sshfl [vmem:[%s1924_s28 + $0xc] sm:$0x13 pattern:$0x76325410]  ;;  %v395_v33 = vcombine.high %v1500_v30, %v1500_v30  ;;  %v421_v38 = vshll.u32 %v379_v27, 16  ;;  %v1811_v42 = vld [vmem:[%s2150_s1 + $0x40] sm:$0xff]  }
  0x17   : > { %1691 = vmatprep.subr.bf16.mxu1 %v1861_v1  ;;  %v403_v35 = vcombine.high %v1501_v32, %v1501_v32  ;;  %v435_v41 = vshll.u32 %v387_v31, 16  ;;  %v414_v44 = vrot.slane %v412_v36, 6  ;;  %v417_v45 = vrot.slane %v415_v37, 7  ;;  %v1812_v52 = vld [vmem:[%s2150_s1 + $0x60] sm:$0xff]   ;;  %v1817_v31 = vld [vmem:[%s2150_s1 + $0x90] sm:$0xff]  }
  0x18   : > { %v440_v46 = vshrl.u32 %v1500_v30, 16  ;;  %v443_v47 = vshll.u32 %v1500_v30, 16  ;;  %v423_v48 = vrot.slane %v421_v38, 7  ;;  %v428_v49 = vrot.slane %v426_v39, 6 }
  0x19   : > { %1680 = vmatpush3.bf16.msra.mxu0 %v1799_v9  ;;  %v431_v50 = vrot.slane %v429_v40, 7  ;;  %v437_v51 = vrot.slane %v435_v41, 7  ;;  %v418_v53 = vor.u32 %v417_v45, %v414_v44  ;;  %v449_v56 = vshll.u32 %v395_v33, 16  ;;  %v1822_v40 = vld [vmem:[%s2150_s1 + $0xa0] sm:$0xff]  }
  0x1a   : > { %1692 = vmatpush3.bf16.msra.mxu1 %v1800_v10  ;;  %1697 = vmatprep.subr.bf16.mxu0 %v1861_v1  ;;  %v442_v54 = vrot.slane %v440_v46, 6  ;;  %v445_v55 = vrot.slane %v443_v47, 7  ;;  %v454_v59 = vshrl.u32 %v1501_v32, 16  ;;  %v457_v60 = vshll.u32 %v1501_v32, 16  ;;  %v1816_v10 = vld [vmem:[%s2150_s1 + $0xb8] sm:$0xff]  }
  0x1b   : > { %1709 = vmatprep.subr.bf16.mxu1 %v1861_v1  ;;  %v432_v58 = vor.u32 %v431_v50, %v428_v49  ;;  %v463_v61 = vshll.u32 %v403_v35, 16  ;;  %v419_v62 = vrot.slane %v418_v53, 2  ;;  %v451_v0 = vrot.slane %v449_v56, 7 }
  0x1c   : > { %1682 = vmatmul.mubr.msk.bf16.vlgmr.msra.gmra.mxu0 %vm206_vm1, %v181_v21  ;;  %v446_v63 = vor.u32 %v445_v55, %v442_v54  ;;  %v1845_v2 = vld.sshfl [vmem:[%s1924_s28 + $0x28] sm:$0xf pattern:$0x76325410]  ;;  %v456_v5 = vrot.slane %v454_v59, 6  ;;  %v459_v6 = vrot.slane %v457_v60, 7 }
  0x1d   : > { %1694 = vmatmul.mubr.msk.bf16.vlgmr.msra.gmra.mxu1 %vm206_vm1, %v291_v22  ;;  %1698 = vmatpush3.bf16.msra.mxu0 %v1805_v19  ;;  %v1846_v3 = vld.sshfl [vmem:[%s1924_s28 + $0x30] sm:$0xf pattern:$0x76325410]  ;;  %v433_v4 = vrot.slane %v432_v58, 2  ;;  %v465_v7 = vrot.slane %v463_v61, 7  ;;  %v424_v8 = vsel %vm1992_vm8, %v419_v62, %v423_v48 }
  0x1e   : > { %1710 = vmatpush3.bf16.msra.mxu1 %v1806_v20  ;;  %1699 = vmatprep.subr.bf16.mxu0 %v1861_v1  ;;  %v447_v9 = vrot.slane %v446_v63, 2  ;;  %v460_v12 = vor.u32 %v459_v6, %v456_v5  ;;  %v603_v14 = vcombine.low %v1845_v2, %v1846_v3  ;;  %v1818_v19 = vld [vmem:[%s2150_s1 + $0xb0] sm:$0xff]   ;;  %v1813_v22 = vld [vmem:[%s2150_s1 + $0x98] sm:$0xff]   ;;  %v1819_v60 = vld [vmem:[%s2150_s1 + $0x88] sm:$0xff]  }
  0x1f   : > { %1711 = vmatprep.subr.bf16.mxu1 %v1861_v1  ;;  %1705 = vmatprep.mubr.msk.bf16.mxu0 %vm1862_vm0, %v1861_v1  ;;  %v2005_v11 = vsel %vm1992_vm8, %v433_v4, %v437_v51  ;;  %v1553_v25 = vld.sshfl [vmem:[%s1924_s28 + $0x28] sm:$0x13 pattern:$0x76325410] }
  0x20   : > { %1717 = vmatprep.mubr.msk.bf16.mxu1 %vm1862_vm0, %v1861_v1  ;;  %v478_v13 = vcombine.low %v424_v8, %v2005_v11  ;;  %v2012_v15 = vsel %vm1992_vm8, %v447_v9, %v451_v0  ;;  %v461_v16 = vrot.slane %v460_v12, 2  ;;  %v1554_v27 = vld.sshfl [vmem:[%s1924_s28 + $0x2c] sm:$0x13 pattern:$0x76325410]  ;;  %v829_v30 = vshll.u32 %v1553_v25, 16 }
  0x21   : > { %1700 = vmatpush3.bf16.msra.mxu0 %v1807_v23  ;;  %v1555_v32 = vld.sshfl [vmem:[%s1924_s28 + $0x30] sm:$0x13 pattern:$0x76325410]  ;;  %v808_v33 = vcombine.high %v1554_v27, %v1554_v27  ;;  %v840_v34 = vshrl.u32 %v1554_v27, 16  ;;  %v843_v35 = vshll.u32 %v1554_v27, 16 }
  0x22   : > { %1712 = vmatpush3.bf16.msra.mxu1 %v1808_v24  ;;  %1701 = vmatprep.subr.bf16.mxu0 %v1861_v1  ;;  %v2017_v17 = vsel %vm1992_vm8, %v461_v16, %v465_v7  ;;  %v486_v21 = vrot.slane %v478_v13, %v1935_v18  ;;  %v1820_v24 = vld [vmem:[%s2150_s1 + $0xa8] sm:$0xff]   ;;  %v1556_v36 = vld.sshfl [vmem:[%s1924_s28 + $0x34] sm:$0x13 pattern:$0x76325410]  ;;  %v816_v37 = vcombine.high %v1555_v32, %v1555_v32  ;;  %v831_v39 = vrot.slane %v829_v30, 7 }
  0x23   : > { %1713 = vmatprep.subr.bf16.mxu1 %v1861_v1  ;;  %v479_v20 = vcombine.low %v2012_v15, %v2017_v17  ;;  %v824_v41 = vcombine.high %v1556_v36, %v1556_v36  ;;  %v842_v43 = vrot.slane %v840_v34, 6  ;;  %v845_v44 = vrot.slane %v843_v35, 7  ;;  %v1847_v45 = vld.sshfl [vmem:[%s1924_s28 + $0x3c] sm:$0xf pattern:$0x76325410] }
  0x24   : > { %v1848_v46 = vld.sshfl [vmem:[%s1924_s28 + $0x44] sm:$0xf pattern:$0x76325410]  ;;  %v849_v48 = vshll.u32 %v808_v33, 16  ;;  %v854_v49 = vshrl.u32 %v1555_v32, 16 }
  0x25   : > { %1702 = vmatpush3.bf16.msra.mxu0 %v1809_v28  ;;  %v493_v23 = vrot.slane %v479_v20, %v1935_v18  ;;  %v800_v28 = vcombine.high %v1553_v25, %v1553_v25  ;;  %v857_v50 = vshll.u32 %v1555_v32, 16  ;;  %v863_v53 = vshll.u32 %v816_v37, 16  ;;  %v1821_v8 = vld [vmem:[%s2150_s1 + $0x80] sm:$0xff]   ;;  %v1828_v33 = vld [vmem:[%s2150_s1 + $0xf0] sm:$0xff]   ;;  %v1829_v34 = vld [vmem:[%s2150_s1 + $0xc8] sm:$0xff]  }
  0x26   : > { %1714 = vmatpush3.bf16.msra.mxu1 %v1810_v29  ;;  %1703 = vmatprep.subr.bf16.mxu0 %v1861_v1  ;;  %v826_v29 = vshrl.u32 %v1553_v25, 16  ;;  %v868_v54 = vshrl.u32 %v1556_v36, 16  ;;  %v851_v56 = vrot.slane %v849_v48, 7  ;;  %v856_v58 = vrot.slane %v854_v49, 6  ;;  %v1827_v25 = vld [vmem:[%s2150_s1 + $0xd0] sm:$0xff]   ;;  %v1832_v48 = vld [vmem:[%s2150_s1 + $0xe0] sm:$0xff]  }
  0x27   : > { %1715 = vmatprep.subr.bf16.mxu1 %v1861_v1  ;;  %v494_v26 = vcombine.low %v486_v21, %v493_v23  ;;  %v859_v59 = vrot.slane %v857_v50, 7  ;;  %v871_v63 = vshll.u32 %v1556_v36, 16  ;;  %v877_v2 = vshll.u32 %v824_v41, 16  ;;  %v1835_v49 = vld [vmem:[%s2150_s1 + $0x118] sm:$0xff]  }
  0x28   : > { %v828_v38 = vrot.slane %v826_v29, 6  ;;  %v870_v62 = vrot.slane %v868_v54, 6  ;;  %v865_v5 = vrot.slane %v863_v53, 7  ;;  %v712_v16 = vcombine.low %v1847_v45, %v1848_v46 }
  0x29   : > { %1704 = vmatpush3.bf16.msra.mxu0 %v1811_v42  ;;  %v835_v42 = vshll.u32 %v800_v28, 16  ;;  %v860_v0 = vor.u32 %v859_v59, %v856_v58  ;;  %v873_v6 = vrot.slane %v871_v63, 7  ;;  %v1611_v27 = vld.sshfl [vmem:[%s1924_s28 + $0x10] sm:$0x13 pattern:$0x76325410] }
  0x2a   : > { %1716 = vmatpush3.bf16.msra.mxu1 %v1812_v52  ;;  %1721 = vmatprep.subr.bf16.mxu0 %v1861_v1  ;;  %v832_v47 = vor.u32 %v831_v39, %v828_v38  ;;  %v846_v52 = vor.u32 %v845_v44, %v842_v43  ;;  %v1238_v28 = vcombine.high %v1611_v27, %v1611_v27  ;;  %v1282_v29 = vshrl.u32 %v1611_v27, 16  ;;  %v1850_v32 = vld.sshfl [vmem:[%s1924_s28 + $0xc] sm:$0xf pattern:$0x76325410]  ;;  %v1831_v44 = vld [vmem:[%s2150_s1 + $0xc0] sm:$0xff]  }
  0x2b   : > { %1733 = vmatprep.subr.bf16.mxu1 %v1861_v1  ;;  %v837_v51 = vrot.slane %v835_v42, 7  ;;  %v861_v7 = vrot.slane %v860_v0, 2  ;;  %v874_v9 = vor.u32 %v873_v6, %v870_v62  ;;  %v1285_v30 = vshll.u32 %v1611_v27, 16  ;;  %v1830_v43 = vld [vmem:[%s2150_s1 + $0xe8] sm:$0xff]  }
  0x2c   : > { %1706 = vmatmul.mubr.msk.bf16.vlgmr.msra.gmra.mxu0 %vm206_vm1, %v494_v26  ;;  %v833_v55 = vrot.slane %v832_v47, 2  ;;  %v847_v61 = vrot.slane %v846_v52, 2  ;;  %v1284_v35 = vrot.slane %v1282_v29, 6  ;;  %v1291_v37 = vshll.u32 %v1238_v28, 16  ;;  %v1840_v52 = vld [vmem:[%s2150_s1 + $0x100] sm:$0xff]  }
  0x2d   : > { %1718 = vmatmul.mubr.msk.bf16.vlgmr.msra.gmra.mxu1 %vm206_vm1, %v603_v14  ;;  %1722 = vmatpush3.bf16.msra.mxu0 %v1813_v22  ;;  %v866_v13 = vsel %vm1992_vm8, %v861_v7, %v865_v5  ;;  %v875_v14 = vrot.slane %v874_v9, 2  ;;  %v1287_v36 = vrot.slane %v1285_v30, 7  ;;  %v1851_v41 = vld.sshfl [vmem:[%s1924_s28 + $0x18] sm:$0xf pattern:$0x76325410] }
  0x2e   : > { %1734 = vmatpush3.bf16.msra.mxu1 %v1816_v10  ;;  %1741 = vmatprep.mubr.msk.bf16.mxu1 %vm1862_vm0, %v1861_v1  ;;  %v838_v3 = vsel %vm1992_vm8, %v833_v55, %v837_v51  ;;  %v852_v4 = vsel %vm1992_vm8, %v847_v61, %v851_v56  ;;  %v879_v10 = vrot.slane %v877_v2, 7  ;;  %v1293_v39 = vrot.slane %v1291_v37, 7  ;;  %v1852_v42 = vld.sshfl [vmem:[%s1924_s28 + $0x20] sm:$0xf pattern:$0x76325410] }
  0x2f   : > { %1735 = vmatprep.subr.bf16.mxu1 %v1861_v1  ;;  %1723 = vmatprep.subr.bf16.mxu0 %v1861_v1  ;;  %v892_v12 = vcombine.low %v838_v3, %v852_v4  ;;  %v1288_v38 = vor.u32 %v1287_v36, %v1284_v35  ;;  %v1126_v50 = vcombine.low %v1851_v41, %v1852_v42  ;;  %v1838_v51 = vld [vmem:[%s2150_s1 + $0x110] sm:$0xff]  }
  0x30   : > { %1729 = vmatprep.mubr.msk.bf16.mxu0 %vm1862_vm0, %v1861_v1  ;;  %v880_v20 = vsel %vm1992_vm8, %v875_v14, %v879_v10 }
  0x31   : > { %1724 = vmatpush3.bf16.msra.mxu0 %v1817_v31  ;;  %v893_v21 = vcombine.low %v866_v13, %v880_v20  ;;  %v900_v22 = vrot.slane %v892_v12, %v1935_v18  ;;  %v1849_v31 = vld.sshfl [vmem:[%s1924_s28 + $0x4] sm:$0xf pattern:$0x76325410]  ;;  %v1289_v45 = vrot.slane %v1288_v38, 2 }
  0x32   : > { %1736 = vmatpush3.bf16.msra.mxu1 %v1818_v19  ;;  %1725 = vmatprep.subr.bf16.mxu0 %v1861_v1  ;;  %v1825_v19 = vld [vmem:[%s2150_s1 + $0xd8] sm:$0xff]   ;;  %v1017_v46 = vcombine.low %v1849_v31, %v1850_v32 }
  0x33   : > { %1737 = vmatprep.subr.bf16.mxu1 %v1861_v1  ;;  %v907_v23 = vrot.slane %v893_v21, %v1935_v18 }
  0x35   : > { %1726 = vmatpush3.bf16.msra.mxu0 %v1819_v60  ;;  %v908_v26 = vcombine.low %v900_v22, %v907_v23 }
  0x36   : > { %1738 = vmatpush3.bf16.msra.mxu1 %v1820_v24  ;;  %1727 = vmatprep.subr.bf16.mxu0 %v1861_v1  ;;  %v1826_v24 = vld [vmem:[%s2150_s1 + $0xf8] sm:$0xff]  }
  0x37   : > { %1739 = vmatprep.subr.bf16.mxu1 %v1861_v1 }
  0x39   : > { %1728 = vmatpush3.bf16.msra.mxu0 %v1821_v8 }
  0x3a   : > { %1740 = vmatpush3.bf16.msra.mxu1 %v1822_v40  ;;  %1745 = vmatprep.subr.bf16.mxu0 %v1861_v1  ;;  %v1306_v40 = vcombine.low %v2005_v11, %v2012_v15  ;;  %v1294_v11 = vsel %vm1992_vm8, %v1289_v45, %v1293_v39 }
  0x3b   : > { %1757 = vmatprep.subr.bf16.mxu1 %v1861_v1  ;;  %v1307_v47 = vcombine.low %v2017_v17, %v1294_v11 }
  0x3c   : > { %1730 = vmatmul.mubr.msk.bf16.vlgmr.msra.gmra.mxu0 %vm206_vm1, %v712_v16  ;;  %v1314_v15 = vrot.slane %v1306_v40, %v1935_v18 }
  0x3d   : > { %1746 = vmatpush3.bf16.msra.mxu0 %v1825_v19  ;;  %1753 = vmatprep.mubr.msk.bf16.mxu0 %vm1862_vm0, %v1861_v1  ;;  %v1321_v57 = vrot.slane %v1307_v47, %v1935_v18  ;;  %v1839_v18 = vld [vmem:[%s2150_s1 + $0x108] sm:$0xff]  }
  0x3e   : > { %1747 = vmatprep.subr.bf16.mxu0 %v1861_v1  ;;  %1742 = vmatmul.mubr.msk.bf16.vlgmr.msra.gmra.mxu1 %vm206_vm1, %v908_v26 }
  0x3f   : > { %1758 = vmatpush3.bf16.msra.mxu1 %v1826_v24  ;;  %1765 = vmatprep.mubr.msk.bf16.mxu1 %vm1862_vm0, %v1861_v1  ;;  %v1322_v17 = vcombine.low %v1314_v15, %v1321_v57 }
  0x40   : > { %1759 = vmatprep.subr.bf16.mxu1 %v1861_v1 }
  0x41   : > { %1748 = vmatpush3.bf16.msra.mxu0 %v1827_v25 }
  0x42   : > { %1749 = vmatprep.subr.bf16.mxu0 %v1861_v1 }
  0x43   : > { %1760 = vmatpush3.bf16.msra.mxu1 %v1828_v33 }
  0x44   : > { %1761 = vmatprep.subr.bf16.mxu1 %v1861_v1 }
  0x45   : > { %1750 = vmatpush3.bf16.msra.mxu0 %v1829_v34 }
  0x46   : > { %1751 = vmatprep.subr.bf16.mxu0 %v1861_v1 }
  0x47   : > { %1762 = vmatpush3.bf16.msra.mxu1 %v1830_v43 }
  0x48   : > { %1763 = vmatprep.subr.bf16.mxu1 %v1861_v1 }
  0x49   : > { %1752 = vmatpush3.bf16.msra.mxu0 %v1831_v44 }
  0x4a   : > { %1769 = vmatprep.subr.bf16.mxu0 %v1861_v1 }
  0x4b   : > { %1764 = vmatpush3.bf16.msra.mxu1 %v1832_v48 }
  0x4c   : > { %1754 = vmatmul.mubr.msk.bf16.vlgmr.msra.gmra.mxu0 %vm206_vm1, %v1017_v46 }
  0x4d   : > { %1770 = vmatpush3.bf16.msra.mxu0 %v1835_v49  ;;  %1777 = vmatprep.mubr.msk.bf16.mxu0 %vm1862_vm0, %v1861_v1 }
  0x4e   : > { %1771 = vmatprep.subr.bf16.mxu0 %v1861_v1  ;;  %1766 = vmatmul.mubr.msk.bf16.vlgmr.msra.gmra.mxu1 %vm206_vm1, %v1126_v50 }
  0x51   : > { %1772 = vmatpush3.bf16.msra.mxu0 %v1838_v51 }
  0x52   : > { %1773 = vmatprep.subr.bf16.mxu0 %v1861_v1 }
  0x55   : > { %1774 = vmatpush3.bf16.msra.mxu0 %v1839_v18 }
  0x56   : > { %1775 = vmatprep.subr.bf16.mxu0 %v1861_v1 }
  0x59   : > { %1776 = vmatpush3.bf16.msra.mxu0 %v1840_v52 }
  0x5c   : > { %1778 = vmatmul.mubr.msk.bf16.vlgmr.msra.gmra.mxu0 %vm206_vm1, %v1322_v17 }
  0xdc   : > { %v244_v53 = vpop.f32.mrf.mxu0 }
  0xdd   : > { %v353_v54 = vpop.f32.mrf.mxu1 }
  0xde   : > { %v1683_v55 = vpop.f32.mrf.mxu0  ;;  %v360_v16 = vadd.f32 %v353_v54, %v244_v53 }
  0xdf   : > { %v1695_v56 = vpop.f32.mrf.mxu1 }
  0xe0   : > { %v247_v58 = vpop.f32.mrf.mxu0 }
  0xe1   : > { %v356_v59 = vpop.f32.mrf.mxu1 }
  0xe2   : > { %v1684_v60 = vpop.f32.mrf.mxu0  ;;  %v361_v21 = vadd.f32 %v356_v59, %v247_v58 }
  0xe3   : > { %v1696_v61 = vpop.f32.mrf.mxu1 }
  0xec   : > { %v556_v3 = vpop.f32.mrf.mxu0 }
  0xed   : > { %v665_v62 = vpop.f32.mrf.mxu1  ;;  %v563_v19 = vadd.f32 %v556_v3, %v360_v16 }
  0xee   : > { %v1707_v4 = vpop.f32.mrf.mxu0 }
  0xef   : > { %v1719_v63 = vpop.f32.mrf.mxu1  ;;  %v672_v23 = vadd.f32 %v665_v62, %v563_v19 }
  0xf0   : > { %v559_v5 = vpop.f32.mrf.mxu0 }
  0xf1   : > { %v668_v0 = vpop.f32.mrf.mxu1  ;;  %v564_v24 = vadd.f32 %v559_v5, %v361_v21 }
  0xf2   : > { %v1708_v6 = vpop.f32.mrf.mxu0 }
  0xf3   : > { %v1720_v2 = vpop.f32.mrf.mxu1  ;;  %v673_v30 = vadd.f32 %v668_v0, %v564_v24 }
  0xfc   : > { %v774_v1 = vpop.f32.mrf.mxu0 }
  0xfd   : > { %v781_v27 = vadd.f32 %v774_v1, %v672_v23 }
  0xfe   : > { %v1731_v7 = vpop.f32.mrf.mxu0  ;;  %v970_v8 = vpop.f32.mrf.mxu1 }
  0xff   : > { %v977_v32 = vadd.f32 %v970_v8, %v781_v27 }
 0x100   : > { %v777_v9 = vpop.f32.mrf.mxu0  ;;  %v1743_v10 = vpop.f32.mrf.mxu1 }
 0x101   : > { %v782_v33 = vadd.f32 %v777_v9, %v673_v30 }
 0x102   : > { %v1732_v12 = vpop.f32.mrf.mxu0  ;;  %v973_v13 = vpop.f32.mrf.mxu1 }
 0x103   : > { %v978_v36 = vadd.f32 %v973_v13, %v782_v33 }
 0x104   : > { %v1744_v14 = vpop.f32.mrf.mxu1 }
 0x10c   : > { %v1079_v20 = vpop.f32.mrf.mxu0 }
 0x10d   : > { %v1086_v35 = vadd.f32 %v1079_v20, %v977_v32 }
 0x10e   : > { %v1755_v22 = vpop.f32.mrf.mxu0  ;;  %v1188_v25 = vpop.f32.mrf.mxu1 }
 0x10f   : > { %v1195_v37 = vadd.f32 %v1188_v25, %v1086_v35 }
 0x110   : > { %v1082_v26 = vpop.f32.mrf.mxu0  ;;  %v1767_v28 = vpop.f32.mrf.mxu1 }
 0x111   : > { %v1087_v38 = vadd.f32 %v1082_v26, %v978_v36 }
 0x112   : > { %v1756_v29 = vpop.f32.mrf.mxu0  ;;  %v1191_v31 = vpop.f32.mrf.mxu1 }
 0x113   : > { %v1196_v42 = vadd.f32 %v1191_v31, %v1087_v38 }
 0x114   : > { %v1768_v34 = vpop.f32.mrf.mxu1 }
 0x11c   : > { %v1384_v39 = vpop.f32.mrf.mxu0 }
 0x11d   : > { %v1391_v40 = vadd.f32 %v1384_v39, %v1195_v37 }
 0x11e   : > { %v1779_v41 = vpop.f32.mrf.mxu0 }
 0x11f   : > { %v1397_v43 = vmax.f32 %v1391_v40, 0.0 }
 0x120   : > { %v1387_v44 = vpop.f32.mrf.mxu0 }
 0x121   : > { %v1401_v45 = vcombine.high %v1397_v43, %v1397_v43  ;;  %v1405_v11 = vpack.c.bf16 %v1397_v43, %v1397_v43  ;;  %v1392_v15 = vadd.f32 %v1387_v44, %v1196_v42 }
 0x122   : > { %v1780_v46 = vpop.f32.mrf.mxu0 }
 0x123   : > { %v1406_v47 = vpack.c.bf16 %v1401_v45, %v1401_v45  ;;  %1409 = vst [vmem:[%s143_s13] sm:$0x3] %v1405_v11  ;;  %v1398_v48 = vmax.f32 %v1392_v15, 0.0 }
 0x125   : > { %1410 = vst [vmem:[%s143_s13 + $0x2] sm:$0x3] %v1406_v47  ;;  %v1402_v49 = vcombine.high %v1398_v48, %v1398_v48  ;;  %v1407_v57 = vpack.c.bf16 %v1398_v48, %v1398_v48 }
 0x127   : > { %v1408_v50 = vpack.c.bf16 %v1402_v49, %v1402_v49  ;;  %1411 = vst [vmem:[%s143_s13 + $0x4] sm:$0x3] %v1407_v57 }
 0x129   : > { %1412 = vst [vmem:[%s143_s13 + $0x6] sm:$0x3] %v1408_v50 }
 0x12a PF: > { %s12_s9 = sadd.s32 1, %s1859_s9  }
 0x12b   : > { %p9_p4 = scmp.ge.s32.totalorder %s12_s9, 4  }
 0x12d   :  { %11 = sbr.rel (!%p9_p4) target bundleno = 1 (0x1), region = 71 }

// kernel: _lambda_.6
= control target key start
LH: loop header
LB: loop body
LE: loop exit
PB: predicated region body
PF: predicated region fallthrough
CT: control target
= control target key end

     0   :  { %s2441_s9 = smov 0   ;;  %s2983_s0 = inlined_call_operand.vmem [shape: bf16[2,4,3,3,128], index: 0, kind: input, shape index: {}]   ;;  %s2984_s1 = inlined_call_operand.vmem [shape: bf16[9,128,256], index: 1, kind: input, shape index: {}]   ;;  %s2985_s2 = inlined_call_operand.vmem [shape: bf16[2,2,2,256], index: 2, kind: output, shape index: {}]  }
   0x1 LB: > { %s1876_s10 = sadd.s32 4294967295, %s2421_s9   ;;  %p1880_p0 = scmp.ge.s32.totalorder %s2421_s9, 1  ;;  %s2421_s9 = sphi %s2441_s9, %s12_s9  }
   0x2   : > { %p112_p1 = scmp.lt.s32.totalorder %s2421_s9, 3 }
   0x4   : > { %p113_p2 = pnand %p1880_p0, %p112_p1 }
   0x5   : > { %p133_p3 = scmp.lt.s32.totalorder (!%p113_p2), %s1876_s10, 1 }
   0x6   : > { %116 = sbr.rel (%p113_p2) target bundleno = 387 (0x183), region = 28 }
   0xb   : > { %v2199_v0 = vld [vmem:[%s2984_s1 + $0x74] ss:$8 sps:$4 sm:$0xff]   ;;  %v2423_v2 = vmov 0   ;;  %v2203_v3 = vld [vmem:[%s2984_s1 + $0x70] ss:$8 sps:$4 sm:$0xff]   ;;  %s2989_s10 = smov (!%p133_p3, %s1876_s10), 1  ;;  %v169_v23 = vlaneseq }
   0xc   : > { %v2201_v1 = vld [vmem:[%s2984_s1 + $0xf4] ss:$8 sps:$4 sm:$0xff]   ;;  %293 = vmatprep.mubr.bf16.mxu0 %v2423_v2  ;;  %459 = vmatprep.mubr.bf16.mxu1 %v2423_v2  ;;  %v2204_v4 = vld [vmem:[%s2984_s1 + $0xf0] ss:$8 sps:$4 sm:$0xff]   ;;  %v2205_v5 = vld [vmem:[%s2984_s1 + $0x64] ss:$8 sps:$4 sm:$0xff]  }
   0xd   : > { %261 = vmatprep.subr.bf16.mxu0 %v2199_v0  ;;  %427 = vmatprep.subr.bf16.mxu1 %v2201_v1  ;;  %v2207_v6 = vld [vmem:[%s2984_s1 + $0xe4] ss:$8 sps:$4 sm:$0xff]   ;;  %v2209_v7 = vld [vmem:[%s2984_s1 + $0x60] ss:$8 sps:$4 sm:$0xff]   ;;  %v2211_v9 = vld [vmem:[%s2984_s1 + $0x54] ss:$8 sps:$4 sm:$0xff]  }
   0xe   : > { %262 = vmatpush1.bf16.msra.mxu0 %v2203_v3  ;;  %428 = vmatpush1.bf16.msra.mxu1 %v2204_v4  ;;  %v2210_v8 = vld [vmem:[%s2984_s1 + $0xe0] ss:$8 sps:$4 sm:$0xff]   ;;  %v2213_v10 = vld [vmem:[%s2984_s1 + $0xd4] ss:$8 sps:$4 sm:$0xff]   ;;  %v2215_v11 = vld [vmem:[%s2984_s1 + $0x50] ss:$8 sps:$4 sm:$0xff]  }
   0xf   : > { %263 = vmatprep.subr.bf16.mxu0 %v2205_v5  ;;  %429 = vmatprep.subr.bf16.mxu1 %v2207_v6  ;;  %v2216_v12 = vld [vmem:[%s2984_s1 + $0xd0] ss:$8 sps:$4 sm:$0xff]   ;;  %v2217_v13 = vld [vmem:[%s2984_s1 + $0x44] ss:$8 sps:$4 sm:$0xff]   ;;  %v2221_v15 = vld [vmem:[%s2984_s1 + $0x40] ss:$8 sps:$4 sm:$0xff]  }
  0x10   : > { %v2219_v14 = vld [vmem:[%s2984_s1 + $0xc4] ss:$8 sps:$4 sm:$0xff]   ;;  %v2222_v16 = vld [vmem:[%s2984_s1 + $0xc0] ss:$8 sps:$4 sm:$0xff]   ;;  %v2223_v17 = vld [vmem:[%s2984_s1 + $0x34] ss:$8 sps:$4 sm:$0xff]  }
  0x11   : > { %v2225_v18 = vld [vmem:[%s2984_s1 + $0xb4] ss:$8 sps:$4 sm:$0xff]   ;;  %s2187_s21 = smul.u32 24, %s2989_s10  ;;  %v2227_v19 = vld [vmem:[%s2984_s1 + $0x30] ss:$8 sps:$4 sm:$0xff]   ;;  %v2532_v28 = vshrl.u32 %v169_v23, 7 }
  0x12   : > { %264 = vmatpush1.bf16.msra.mxu0 %v2209_v7  ;;  %430 = vmatpush1.bf16.msra.mxu1 %v2210_v8  ;;  %v2228_v20 = vld [vmem:[%s2984_s1 + $0xb0] ss:$8 sps:$4 sm:$0xff]   ;;  %v2424_v21 = vmov 1966171168   ;;  %v2229_v24 = vld [vmem:[%s2984_s1 + $0x24] ss:$8 sps:$4 sm:$0xff]  }
  0x13   : > { %265 = vmatprep.subr.bf16.mxu0 %v2211_v9  ;;  %431 = vmatprep.subr.bf16.mxu1 %v2213_v10  ;;  %v167_v22 = vunpack.c.l.s4 %v2424_v21  ;;  %v2231_v25 = vld [vmem:[%s2984_s1 + $0xa4] ss:$8 sps:$4 sm:$0xff]   ;;  %s2527_s4 = scalar_lea.vmem %s2983_s0, %s2187_s21  ;;  %v2233_v26 = vld [vmem:[%s2984_s1 + $0x20] ss:$8 sps:$4 sm:$0xff]   ;;  %v2235_v30 = vld [vmem:[%s2984_s1 + $0x14] ss:$8 sps:$4 sm:$0xff]  }
  0x14   : > { %v2234_v29 = vld [vmem:[%s2984_s1 + $0xa0] ss:$8 sps:$4 sm:$0xff]   ;;  %v2237_v31 = vld [vmem:[%s2984_s1 + $0x94] ss:$8 sps:$4 sm:$0xff]   ;;  %v1899_v34 = vld [vmem:[%s2527_s4 + $0x6] sm:$0x1] }
  0x15   : > { %v168_v27 = vunpack.c.0.s8 %v167_v22  ;;  %v144_v32 = vld [vmem:[%s2527_s4] sm:$0x1]  ;;  %v145_v33 = vld [vmem:[%s2527_s4 + $0x2] sm:$0x1]  ;;  %v1900_v35 = vld [vmem:[%s2527_s4 + $0x8] sm:$0x1] }
  0x16   : > { %266 = vmatpush1.bf16.msra.mxu0 %v2215_v11  ;;  %432 = vmatpush1.bf16.msra.mxu1 %v2216_v12  ;;  %v2239_v36 = vld [vmem:[%s2984_s1 + $0x10] ss:$8 sps:$4 sm:$0xff]   ;;  %v165_v38 = vcombine.low %v144_v32, %v145_v33  ;;  %v331_v40 = vcombine.low %v1899_v34, %v1900_v35  ;;  %v2241_v41 = vld [vmem:[%s2984_s1 + $0x4] ss:$8 sps:$4 sm:$0xff]   ;;  %v2245_v43 = vld [vmem:[%s2984_s1] ss:$8 sps:$4 sm:$0xff]  }
  0x17   : > { %267 = vmatprep.subr.bf16.mxu0 %v2217_v13  ;;  %433 = vmatprep.subr.bf16.mxu1 %v2219_v14  ;;  %v2240_v37 = vld [vmem:[%s2984_s1 + $0x90] ss:$8 sps:$4 sm:$0xff]   ;;  %v2554_v39 = vsub.s32 %v168_v27, %v2532_v28  ;;  %v2243_v42 = vld [vmem:[%s2984_s1 + $0x84] ss:$8 sps:$4 sm:$0xff]   ;;  %v2246_v44 = vld [vmem:[%s2984_s1 + $0x80] ss:$8 sps:$4 sm:$0xff]  }
  0x18   : > { %v2249_v47 = vld [vmem:[%s2984_s1 + $0x174] ss:$8 sps:$4 sm:$0xff]   ;;  %v2247_v51 = vld [vmem:[%s2984_s1 + $0x170] ss:$8 sps:$4 sm:$0xff]   ;;  %v2255_v53 = vld [vmem:[%s2984_s1 + $0x164] ss:$8 sps:$4 sm:$0xff]  }
  0x19   : > { %v172_v45 = vrot.slane %v165_v38, %v2554_v39  ;;  %v338_v46 = vrot.slane %v331_v40, %v2554_v39  ;;  %v2252_v48 = vld [vmem:[%s2984_s1 + $0x1f4] ss:$8 sps:$4 sm:$0xff]   ;;  %v2250_v52 = vld [vmem:[%s2984_s1 + $0x1f0] ss:$8 sps:$4 sm:$0xff]   ;;  %v2258_v54 = vld [vmem:[%s2984_s1 + $0x1e4] ss:$8 sps:$4 sm:$0xff]  }
  0x1a   : > { %268 = vmatpush1.bf16.msra.mxu0 %v2221_v15  ;;  %434 = vmatpush1.bf16.msra.mxu1 %v2222_v16  ;;  %v2253_v55 = vld [vmem:[%s2984_s1 + $0x160] ss:$8 sps:$4 sm:$0xff]   ;;  %v2261_v57 = vld [vmem:[%s2984_s1 + $0x154] ss:$8 sps:$4 sm:$0xff]   ;;  %vm494_vm0 = vsmask.f32 256 }
  0x1b   : > { %269 = vmatprep.subr.bf16.mxu0 %v2223_v17  ;;  %435 = vmatprep.subr.bf16.mxu1 %v2225_v18  ;;  %v179_v49 = vrot.slane %v172_v45, %v2554_v39  ;;  %v345_v50 = vrot.slane %v338_v46, %v2554_v39  ;;  %v2256_v56 = vld [vmem:[%s2984_s1 + $0x1e0] ss:$8 sps:$4 sm:$0xff]   ;;  %v2264_v58 = vld [vmem:[%s2984_s1 + $0x1d4] ss:$8 sps:$4 sm:$0xff]   ;;  %vm495_vm1 = vsmask.f32 1284 }
  0x1c   : > { %vm497_vm2 = vsmask.f32 2312  ;;  %vm499_vm3 = vsmask.f32 3340  ;;  %v2259_v59 = vld [vmem:[%s2984_s1 + $0x150] ss:$8 sps:$4 sm:$0xff]   ;;  %vm496_vm6 = vmor %vm494_vm0, %vm495_vm1 }
  0x1d   : > { %v2262_v60 = vld [vmem:[%s2984_s1 + $0x1d0] ss:$8 sps:$4 sm:$0xff]   ;;  %v2267_v61 = vld [vmem:[%s2984_s1 + $0x144] ss:$8 sps:$4 sm:$0xff]   ;;  %vm501_vm4 = vsmask.f32 4368  ;;  %vm498_vm7 = vmor %vm496_vm6, %vm497_vm2 }
  0x1e   : > { %270 = vmatpush1.bf16.msra.mxu0 %v2227_v19  ;;  %436 = vmatpush1.bf16.msra.mxu1 %v2228_v20  ;;  %v2270_v62 = vld [vmem:[%s2984_s1 + $0x1c4] ss:$8 sps:$4 sm:$0xff]   ;;  %vm503_vm5 = vsmask.f32 5396  ;;  %v2265_v63 = vld [vmem:[%s2984_s1 + $0x140] ss:$8 sps:$4 sm:$0xff]   ;;  %vm500_vm8 = vmor %vm498_vm7, %vm499_vm3 }
  0x1f   : > { %271 = vmatprep.subr.bf16.mxu0 %v2229_v24  ;;  %437 = vmatprep.subr.bf16.mxu1 %v2231_v25  ;;  %v2268_v0 = vld [vmem:[%s2984_s1 + $0x1c0] ss:$8 sps:$4 sm:$0xff]   ;;  %v2273_v1 = vld [vmem:[%s2984_s1 + $0x134] ss:$8 sps:$4 sm:$0xff]   ;;  %vm505_vm9 = vsmask.f32 6424  ;;  %vm502_vm10 = vmor %vm500_vm8, %vm501_vm4 }
  0x20   : > { %v2276_v3 = vld [vmem:[%s2984_s1 + $0x1b4] ss:$8 sps:$4 sm:$0xff]   ;;  %v1933_v4 = vld.sshfl [vmem:[%s2527_s4] sm:$0x11 pattern:$0x75316420]  ;;  %vm504_vm12 = vmor %vm502_vm10, %vm503_vm5 }
  0x21   : > { %v1934_v5 = vld.sshfl [vmem:[%s2527_s4 + $0x2] sm:$0x11 pattern:$0x75316420]  ;;  %v485_v6 = vcombine.high %v1933_v4, %v1933_v4  ;;  %v2271_v8 = vld [vmem:[%s2984_s1 + $0x130] ss:$8 sps:$4 sm:$0xff]   ;;  %vm506_vm13 = vmor %vm504_vm12, %vm505_vm9 }
  0x22   : > { %272 = vmatpush1.bf16.msra.mxu0 %v2233_v26  ;;  %438 = vmatpush1.bf16.msra.mxu1 %v2234_v29  ;;  %v493_v7 = vcombine.high %v1934_v5, %v1934_v5  ;;  %v2274_v9 = vld [vmem:[%s2984_s1 + $0x1b0] ss:$8 sps:$4 sm:$0xff]   ;;  %vm507_vm11 = vsmask.f32 7452  ;;  %v510_v10 = vshrl.u32 %v1933_v4, 16  ;;  %v519_v12 = vshrl.u32 %v1934_v5, 16 }
  0x23   : > { %273 = vmatprep.subr.bf16.mxu0 %v2235_v30  ;;  %439 = vmatprep.subr.bf16.mxu1 %v2237_v31  ;;  %v515_v11 = vshll.u32 %v485_v6, 16  ;;  %v2279_v14 = vld [vmem:[%s2984_s1 + $0x124] ss:$8 sps:$4 sm:$0xff]   ;;  %v2277_v16 = vld [vmem:[%s2984_s1 + $0x120] ss:$8 sps:$4 sm:$0xff]   ;;  %vm2652_vm14 = vmor %vm506_vm13, %vm507_vm11  ;;  %s1882_s24 = sshll.u32 %s2989_s10, 2 }
  0x24   : > { %v524_v13 = vshll.u32 %v493_v7, 16  ;;  %v2282_v15 = vld [vmem:[%s2984_s1 + $0x1a4] ss:$8 sps:$4 sm:$0xff]   ;;  %v2280_v18 = vld [vmem:[%s2984_s1 + $0x1a0] ss:$8 sps:$4 sm:$0xff]   ;;  %s141_s27 = scalar_lea.vmem %s2985_s2, %s1882_s24 }
  0x25   : > { %v2285_v19 = vld [vmem:[%s2984_s1 + $0x114] ss:$8 sps:$4 sm:$0xff]   ;;  %v517_v20 = vsel %vm2652_vm14, %v510_v10, %v515_v11  ;;  %v1969_v22 = vld [vmem:[%s2527_s4 + $0xc] sm:$0x1]  ;;  %v1970_v23 = vld [vmem:[%s2527_s4 + $0xe] sm:$0x1] }
  0x26   : > { %274 = vmatpush1.bf16.msra.mxu0 %v2239_v36  ;;  %440 = vmatpush1.bf16.msra.mxu1 %v2240_v37  ;;  %v2666_v21 = vsel %vm2652_vm14, %v519_v12, %v524_v13  ;;  %v2288_v24 = vld [vmem:[%s2984_s1 + $0x194] ss:$8 sps:$4 sm:$0xff]   ;;  %v2283_v25 = vld [vmem:[%s2984_s1 + $0x110] ss:$8 sps:$4 sm:$0xff]   ;;  %v711_v27 = vcombine.low %v1969_v22, %v1970_v23  ;;  %v2291_v30 = vld [vmem:[%s2984_s1 + $0x104] ss:$8 sps:$4 sm:$0xff]  }
  0x27   : > { %275 = vmatprep.subr.bf16.mxu0 %v2241_v41  ;;  %441 = vmatprep.subr.bf16.mxu1 %v2243_v42  ;;  %v545_v26 = vcombine.low %v517_v20, %v2666_v21  ;;  %v2286_v29 = vld [vmem:[%s2984_s1 + $0x190] ss:$8 sps:$4 sm:$0xff]   ;;  %v2294_v31 = vld [vmem:[%s2984_s1 + $0x184] ss:$8 sps:$4 sm:$0xff]   ;;  %v2289_v32 = vld [vmem:[%s2984_s1 + $0x100] ss:$8 sps:$4 sm:$0xff]  }
  0x28   : > { %v718_v34 = vrot.slane %v711_v27, %v2554_v39  ;;  %v2292_v35 = vld [vmem:[%s2984_s1 + $0x180] ss:$8 sps:$4 sm:$0xff]   ;;  %v2297_v36 = vld [vmem:[%s2984_s1 + $0x274] ss:$8 sps:$4 sm:$0xff]   ;;  %v2295_v40 = vld [vmem:[%s2984_s1 + $0x270] ss:$8 sps:$4 sm:$0xff]  }
  0x29   : > { %v552_v33 = vrot.slane %v545_v26, %v2554_v39  ;;  %v2300_v37 = vld [vmem:[%s2984_s1 + $0x2f4] ss:$8 sps:$4 sm:$0xff]   ;;  %v2298_v42 = vld [vmem:[%s2984_s1 + $0x2f0] ss:$8 sps:$4 sm:$0xff]   ;;  %v2301_v45 = vld [vmem:[%s2984_s1 + $0x260] ss:$8 sps:$4 sm:$0xff]  }
  0x2a   : > { %276 = vmatpush1.bf16.msra.mxu0 %v2245_v43  ;;  %442 = vmatpush1.bf16.msra.mxu1 %v2246_v44  ;;  %v725_v41 = vrot.slane %v718_v34, %v2554_v39  ;;  %v2303_v43 = vld [vmem:[%s2984_s1 + $0x264] ss:$8 sps:$4 sm:$0xff]   ;;  %v2304_v46 = vld [vmem:[%s2984_s1 + $0x2e0] ss:$8 sps:$4 sm:$0xff]   ;;  %v2004_v10 = vld [vmem:[%s2527_s4 + $0x14] sm:$0x1] }
  0x2b   : > { %641 = vmatprep.subr.bf16.mxu0 %v2249_v47  ;;  %807 = vmatprep.subr.bf16.mxu1 %v2252_v48  ;;  %v559_v38 = vrot.slane %v552_v33, %v2554_v39  ;;  %v2306_v44 = vld [vmem:[%s2984_s1 + $0x2e4] ss:$8 sps:$4 sm:$0xff]   ;;  %v2309_v47 = vld [vmem:[%s2984_s1 + $0x254] ss:$8 sps:$4 sm:$0xff]   ;;  %v2325_v6 = vld [vmem:[%s2984_s1 + $0x220] ss:$8 sps:$4 sm:$0xff]  }
  0x2c   : > { %v2312_v48 = vld [vmem:[%s2984_s1 + $0x2d4] ss:$8 sps:$4 sm:$0xff]   ;;  %v2330_v5 = vld [vmem:[%s2984_s1 + $0x2a4] ss:$8 sps:$4 sm:$0xff]   ;;  %v2328_v7 = vld [vmem:[%s2984_s1 + $0x2a0] ss:$8 sps:$4 sm:$0xff]  }
  0x2d   : > { %294 = vmatmul.mubr.bf16.vlgmr.msra.gmra.mxu0 %v179_v49  ;;  %460 = vmatmul.mubr.bf16.vlgmr.msra.gmra.mxu1 %v345_v50  ;;  %v2307_v49 = vld [vmem:[%s2984_s1 + $0x250] ss:$8 sps:$4 sm:$0xff]   ;;  %v2336_v13 = vld [vmem:[%s2984_s1 + $0x294] ss:$8 sps:$4 sm:$0xff]   ;;  %v2342_v20 = vld [vmem:[%s2984_s1 + $0x284] ss:$8 sps:$4 sm:$0xff]  }
  0x2e   : > { %642 = vmatpush1.bf16.msra.mxu0 %v2247_v51  ;;  %808 = vmatpush1.bf16.msra.mxu1 %v2250_v52  ;;  %v2310_v50 = vld [vmem:[%s2984_s1 + $0x2d0] ss:$8 sps:$4 sm:$0xff]   ;;  %v2315_v51 = vld [vmem:[%s2984_s1 + $0x244] ss:$8 sps:$4 sm:$0xff]   ;;  %v2345_v26 = vld [vmem:[%s2984_s1 + $0x374] ss:$8 sps:$4 sm:$0xff]  }
  0x2f   : > { %643 = vmatprep.subr.bf16.mxu0 %v2255_v53  ;;  %809 = vmatprep.subr.bf16.mxu1 %v2258_v54  ;;  %v2318_v52 = vld [vmem:[%s2984_s1 + $0x2c4] ss:$8 sps:$4 sm:$0xff]   ;;  %v2348_v27 = vld [vmem:[%s2984_s1 + $0x3f4] ss:$8 sps:$4 sm:$0xff]  }
  0x30   : > { %673 = vmatprep.mubr.bf16.mxu0 %v2423_v2  ;;  %839 = vmatprep.mubr.bf16.mxu1 %v2423_v2  ;;  %v2039_v53 = vld.sshfl [vmem:[%s2527_s4 + $0xc] sm:$0x11 pattern:$0x75316420] }
  0x31   : > { %v2040_v54 = vld.sshfl [vmem:[%s2527_s4 + $0xe] sm:$0x11 pattern:$0x75316420] }
  0x32   : > { %644 = vmatpush1.bf16.msra.mxu0 %v2253_v55  ;;  %810 = vmatpush1.bf16.msra.mxu1 %v2256_v56  ;;  %v2313_v55 = vld [vmem:[%s2984_s1 + $0x240] ss:$8 sps:$4 sm:$0xff]   ;;  %v2351_v33 = vld [vmem:[%s2984_s1 + $0x364] ss:$8 sps:$4 sm:$0xff]  }
  0x33   : > { %645 = vmatprep.subr.bf16.mxu0 %v2261_v57  ;;  %811 = vmatprep.subr.bf16.mxu1 %v2264_v58  ;;  %v2316_v56 = vld [vmem:[%s2984_s1 + $0x2c0] ss:$8 sps:$4 sm:$0xff]   ;;  %v2321_v57 = vld [vmem:[%s2984_s1 + $0x234] ss:$8 sps:$4 sm:$0xff]   ;;  %v1031_v58 = vcombine.high %v2039_v53, %v2039_v53  ;;  %v2354_v34 = vld [vmem:[%s2984_s1 + $0x3e4] ss:$8 sps:$4 sm:$0xff]  }
  0x34   : > { %v2375_v17 = vld [vmem:[%s2984_s1 + $0x324] ss:$8 sps:$4 sm:$0xff]  }
  0x36   : > { %646 = vmatpush1.bf16.msra.mxu0 %v2259_v59  ;;  %812 = vmatpush1.bf16.msra.mxu1 %v2262_v60  ;;  %v1039_v59 = vcombine.high %v2040_v54, %v2040_v54  ;;  %v2324_v60 = vld [vmem:[%s2984_s1 + $0x2b4] ss:$8 sps:$4 sm:$0xff]  }
  0x37   : > { %647 = vmatprep.subr.bf16.mxu0 %v2267_v61  ;;  %813 = vmatprep.subr.bf16.mxu1 %v2270_v62  ;;  %v2319_v61 = vld [vmem:[%s2984_s1 + $0x230] ss:$8 sps:$4 sm:$0xff]  }
  0x38   : > { %v2322_v62 = vld [vmem:[%s2984_s1 + $0x2b0] ss:$8 sps:$4 sm:$0xff]   ;;  %v1055_v4 = vshll.u32 %v1039_v59, 16  ;;  %v2075_v59 = vld [vmem:[%s2527_s4 + $0x2] sm:$0x1] }
  0x3a   : > { %648 = vmatpush1.bf16.msra.mxu0 %v2265_v63  ;;  %814 = vmatpush1.bf16.msra.mxu1 %v2268_v0  ;;  %v2327_v63 = vld [vmem:[%s2984_s1 + $0x224] ss:$8 sps:$4 sm:$0xff]   ;;  %v1041_v0 = vshrl.u32 %v2039_v53, 16 }
  0x3b   : > { %649 = vmatprep.subr.bf16.mxu0 %v2273_v1  ;;  %815 = vmatprep.subr.bf16.mxu1 %v2276_v3  ;;  %v1046_v1 = vshll.u32 %v1031_v58, 16  ;;  %v1050_v3 = vshrl.u32 %v2040_v54, 16  ;;  %v2367_v54 = vld [vmem:[%s2984_s1 + $0x330] ss:$8 sps:$4 sm:$0xff]   ;;  %v2376_v58 = vld [vmem:[%s2984_s1 + $0x3a0] ss:$8 sps:$4 sm:$0xff]  }
  0x3d   : > { %v1048_v11 = vsel %vm2652_vm14, %v1041_v0, %v1046_v1  ;;  %v1057_v12 = vsel %vm2652_vm14, %v1050_v3, %v1055_v4  ;;  %v2384_v0 = vld [vmem:[%s2984_s1 + $0x394] ss:$8 sps:$4 sm:$0xff]   ;;  %v2379_v4 = vld [vmem:[%s2984_s1 + $0x310] ss:$8 sps:$4 sm:$0xff]  }
  0x3e   : > { %650 = vmatpush1.bf16.msra.mxu0 %v2271_v8  ;;  %816 = vmatpush1.bf16.msra.mxu1 %v2274_v9  ;;  %v2333_v8 = vld [vmem:[%s2984_s1 + $0x214] ss:$8 sps:$4 sm:$0xff]   ;;  %v2003_v9 = vld [vmem:[%s2527_s4 + $0x12] sm:$0x1] }
  0x3f   : > { %651 = vmatprep.subr.bf16.mxu0 %v2279_v14  ;;  %817 = vmatprep.subr.bf16.mxu1 %v2282_v15  ;;  %v2331_v14 = vld [vmem:[%s2984_s1 + $0x210] ss:$8 sps:$4 sm:$0xff]  }
  0x40   : > { %v2334_v15 = vld [vmem:[%s2984_s1 + $0x290] ss:$8 sps:$4 sm:$0xff]  }
  0x42   : > { %652 = vmatpush1.bf16.msra.mxu0 %v2277_v16  ;;  %818 = vmatpush1.bf16.msra.mxu1 %v2280_v18  ;;  %v877_v16 = vcombine.low %v2003_v9, %v2004_v10  ;;  %v1076_v18 = vcombine.low %v1048_v11, %v1057_v12  ;;  %v2385_v10 = vld [vmem:[%s2984_s1 + $0x300] ss:$8 sps:$4 sm:$0xff]   ;;  %v2393_v12 = vld [vmem:[%s2984_s1 + $0x474] ss:$8 sps:$4 sm:$0xff]  }
  0x43   : > { %653 = vmatprep.subr.bf16.mxu0 %v2285_v19  ;;  %819 = vmatprep.subr.bf16.mxu1 %v2288_v24  ;;  %v2339_v19 = vld [vmem:[%s2984_s1 + $0x204] ss:$8 sps:$4 sm:$0xff]   ;;  %v2337_v24 = vld [vmem:[%s2984_s1 + $0x200] ss:$8 sps:$4 sm:$0xff]  }
  0x44   : > { %v884_v22 = vrot.slane %v877_v16, %v2554_v39  ;;  %v1083_v23 = vrot.slane %v1076_v18, %v2554_v39  ;;  %v2388_v11 = vld [vmem:[%s2984_s1 + $0x380] ss:$8 sps:$4 sm:$0xff]   ;;  %v2396_v16 = vld [vmem:[%s2984_s1 + $0x464] ss:$8 sps:$4 sm:$0xff]  }
  0x45   : > { %v2394_v18 = vld [vmem:[%s2984_s1 + $0x460] ss:$8 sps:$4 sm:$0xff]  }
  0x46   : > { %654 = vmatpush1.bf16.msra.mxu0 %v2283_v25  ;;  %820 = vmatpush1.bf16.msra.mxu1 %v2286_v29  ;;  %v2340_v25 = vld [vmem:[%s2984_s1 + $0x280] ss:$8 sps:$4 sm:$0xff]   ;;  %v891_v29 = vrot.slane %v884_v22, %v2554_v39  ;;  %v2402_v22 = vld [vmem:[%s2984_s1 + $0x444] ss:$8 sps:$4 sm:$0xff]  }
  0x47   : > { %655 = vmatprep.subr.bf16.mxu0 %v2291_v30  ;;  %821 = vmatprep.subr.bf16.mxu1 %v2294_v31  ;;  %v2343_v30 = vld [vmem:[%s2984_s1 + $0x370] ss:$8 sps:$4 sm:$0xff]   ;;  %v1090_v31 = vrot.slane %v1083_v23, %v2554_v39  ;;  %v2405_v23 = vld [vmem:[%s2984_s1 + $0x434] ss:$8 sps:$4 sm:$0xff]  }
  0x4a   : > { %656 = vmatpush1.bf16.msra.mxu0 %v2289_v32  ;;  %822 = vmatpush1.bf16.msra.mxu1 %v2292_v35  ;;  %v2346_v32 = vld [vmem:[%s2984_s1 + $0x3f0] ss:$8 sps:$4 sm:$0xff]   ;;  %v2349_v35 = vld [vmem:[%s2984_s1 + $0x360] ss:$8 sps:$4 sm:$0xff]  }
  0x4b   : > { %973 = vmatprep.subr.bf16.mxu0 %v2297_v36  ;;  %1172 = vmatprep.subr.bf16.mxu1 %v2300_v37  ;;  %v2352_v36 = vld [vmem:[%s2984_s1 + $0x3e0] ss:$8 sps:$4 sm:$0xff]   ;;  %v2357_v37 = vld [vmem:[%s2984_s1 + $0x354] ss:$8 sps:$4 sm:$0xff]  }
  0x4d   : > { %674 = vmatmul.mubr.bf16.vlgmr.msra.gmra.mxu0 %v559_v38  ;;  %840 = vmatmul.mubr.bf16.vlgmr.msra.gmra.mxu1 %v725_v41  ;;  %v2360_v38 = vld [vmem:[%s2984_s1 + $0x3d4] ss:$8 sps:$4 sm:$0xff]   ;;  %v2358_v41 = vld [vmem:[%s2984_s1 + $0x3d0] ss:$8 sps:$4 sm:$0xff]  }
  0x4e   : > { %974 = vmatpush1.bf16.msra.mxu0 %v2295_v40  ;;  %1173 = vmatpush1.bf16.msra.mxu1 %v2298_v42  ;;  %v2355_v40 = vld [vmem:[%s2984_s1 + $0x350] ss:$8 sps:$4 sm:$0xff]   ;;  %v2146_v42 = vld.sshfl [vmem:[%s2527_s4 + $0x4] sm:$0x11 pattern:$0x75316420] }
  0x4f   : > { %975 = vmatprep.subr.bf16.mxu0 %v2303_v43  ;;  %1174 = vmatprep.subr.bf16.mxu1 %v2306_v44  ;;  %v2363_v43 = vld [vmem:[%s2984_s1 + $0x344] ss:$8 sps:$4 sm:$0xff]  }
  0x50   : > { %1005 = vmatprep.mubr.bf16.mxu0 %v2423_v2  ;;  %1204 = vmatprep.mubr.bf16.mxu1 %v2423_v2  ;;  %v2366_v44 = vld [vmem:[%s2984_s1 + $0x3c4] ss:$8 sps:$4 sm:$0xff]  }
  0x52   : > { %976 = vmatpush1.bf16.msra.mxu0 %v2301_v45  ;;  %1175 = vmatpush1.bf16.msra.mxu1 %v2304_v46  ;;  %v1570_v45 = vcombine.high %v2146_v42, %v2146_v42  ;;  %v1581_v46 = vshrl.u32 %v2146_v42, 16 }
  0x53   : > { %977 = vmatprep.subr.bf16.mxu0 %v2309_v47  ;;  %1176 = vmatprep.subr.bf16.mxu1 %v2312_v48  ;;  %v2361_v48 = vld [vmem:[%s2984_s1 + $0x340] ss:$8 sps:$4 sm:$0xff]  }
  0x54   : > { %v1586_v47 = vshll.u32 %v1570_v45, 16 }
  0x56   : > { %978 = vmatpush1.bf16.msra.mxu0 %v2307_v49  ;;  %1177 = vmatpush1.bf16.msra.mxu1 %v2310_v50  ;;  %v2364_v49 = vld [vmem:[%s2984_s1 + $0x3c0] ss:$8 sps:$4 sm:$0xff]   ;;  %v2369_v50 = vld [vmem:[%s2984_s1 + $0x334] ss:$8 sps:$4 sm:$0xff]  }
  0x57   : > { %979 = vmatprep.subr.bf16.mxu0 %v2315_v51  ;;  %1178 = vmatprep.subr.bf16.mxu1 %v2318_v52  ;;  %v2372_v51 = vld [vmem:[%s2984_s1 + $0x3b4] ss:$8 sps:$4 sm:$0xff]   ;;  %v2865_v52 = vsel %vm2652_vm14, %v1581_v46, %v1586_v47 }
  0x58   : > { %v1607_v53 = vcombine.low %v2666_v21, %v2865_v52 }
  0x5a   : > { %980 = vmatpush1.bf16.msra.mxu0 %v2313_v55  ;;  %1179 = vmatpush1.bf16.msra.mxu1 %v2316_v56  ;;  %v2370_v55 = vld [vmem:[%s2984_s1 + $0x3b0] ss:$8 sps:$4 sm:$0xff]   ;;  %v2378_v56 = vld [vmem:[%s2984_s1 + $0x3a4] ss:$8 sps:$4 sm:$0xff]  }
  0x5b   : > { %981 = vmatprep.subr.bf16.mxu0 %v2321_v57  ;;  %1180 = vmatprep.subr.bf16.mxu1 %v2324_v60  ;;  %v2373_v57 = vld [vmem:[%s2984_s1 + $0x320] ss:$8 sps:$4 sm:$0xff]   ;;  %v2076_v60 = vld [vmem:[%s2527_s4 + $0x4] sm:$0x1] }
  0x5c   : > { %v1242_v1 = vcombine.low %v2075_v59, %v2076_v60 }
  0x5e   : > { %982 = vmatpush1.bf16.msra.mxu0 %v2319_v61  ;;  %1181 = vmatpush1.bf16.msra.mxu1 %v2322_v62  ;;  %v2109_v61 = vld [vmem:[%s2527_s4 + $0x8] sm:$0x1]  ;;  %v2110_v62 = vld [vmem:[%s2527_s4 + $0xa] sm:$0x1] }
  0x5f   : > { %983 = vmatprep.subr.bf16.mxu0 %v2327_v63  ;;  %1182 = vmatprep.subr.bf16.mxu1 %v2330_v5  ;;  %v2381_v63 = vld [vmem:[%s2984_s1 + $0x314] ss:$8 sps:$4 sm:$0xff]   ;;  %v1408_v3 = vcombine.low %v2109_v61, %v2110_v62  ;;  %v2382_v5 = vld [vmem:[%s2984_s1 + $0x390] ss:$8 sps:$4 sm:$0xff]  }
  0x61   : > { %v1415_v9 = vrot.slane %v1408_v3, %v2554_v39 }
  0x62   : > { %984 = vmatpush1.bf16.msra.mxu0 %v2325_v6  ;;  %1183 = vmatpush1.bf16.msra.mxu1 %v2328_v7  ;;  %v2387_v6 = vld [vmem:[%s2984_s1 + $0x304] ss:$8 sps:$4 sm:$0xff]  }
  0x63   : > { %985 = vmatprep.subr.bf16.mxu0 %v2333_v8  ;;  %1184 = vmatprep.subr.bf16.mxu1 %v2336_v13  ;;  %v2390_v7 = vld [vmem:[%s2984_s1 + $0x384] ss:$8 sps:$4 sm:$0xff]   ;;  %v1249_v8 = vrot.slane %v1242_v1, %v2554_v39 }
  0x65   : > { %v1256_v13 = vrot.slane %v1249_v8, %v2554_v39 }
  0x66   : > { %986 = vmatpush1.bf16.msra.mxu0 %v2331_v14  ;;  %1185 = vmatpush1.bf16.msra.mxu1 %v2334_v15  ;;  %v1422_v14 = vrot.slane %v1415_v9, %v2554_v39  ;;  %v2391_v15 = vld [vmem:[%s2984_s1 + $0x470] ss:$8 sps:$4 sm:$0xff]  }
  0x67   : > { %987 = vmatprep.subr.bf16.mxu0 %v2339_v19  ;;  %1186 = vmatprep.subr.bf16.mxu1 %v2342_v20  ;;  %v2399_v19 = vld [vmem:[%s2984_s1 + $0x454] ss:$8 sps:$4 sm:$0xff]   ;;  %v2397_v20 = vld [vmem:[%s2984_s1 + $0x450] ss:$8 sps:$4 sm:$0xff]  }
  0x6a   : > { %988 = vmatpush1.bf16.msra.mxu0 %v2337_v24  ;;  %1187 = vmatpush1.bf16.msra.mxu1 %v2340_v25  ;;  %v2403_v24 = vld [vmem:[%s2984_s1 + $0x430] ss:$8 sps:$4 sm:$0xff]   ;;  %v2408_v25 = vld [vmem:[%s2984_s1 + $0x424] ss:$8 sps:$4 sm:$0xff]  }
  0x6b   : > { %1338 = vmatprep.subr.bf16.mxu0 %v2345_v26  ;;  %1504 = vmatprep.subr.bf16.mxu1 %v2348_v27  ;;  %v2406_v26 = vld [vmem:[%s2984_s1 + $0x420] ss:$8 sps:$4 sm:$0xff]   ;;  %v2411_v27 = vld [vmem:[%s2984_s1 + $0x414] ss:$8 sps:$4 sm:$0xff]  }
  0x6d   : > { %1006 = vmatmul.mubr.bf16.vlgmr.msra.gmra.mxu0 %v891_v29  ;;  %1205 = vmatmul.mubr.bf16.vlgmr.msra.gmra.mxu1 %v1090_v31  ;;  %v2409_v29 = vld [vmem:[%s2984_s1 + $0x410] ss:$8 sps:$4 sm:$0xff]   ;;  %v1614_v31 = vrot.slane %v1607_v53, %v2554_v39 }
  0x6e   : > { %1339 = vmatpush1.bf16.msra.mxu0 %v2343_v30  ;;  %1505 = vmatpush1.bf16.msra.mxu1 %v2346_v32  ;;  %v2414_v30 = vld [vmem:[%s2984_s1 + $0x404] ss:$8 sps:$4 sm:$0xff]   ;;  %v2412_v32 = vld [vmem:[%s2984_s1 + $0x400] ss:$8 sps:$4 sm:$0xff]  }
  0x6f   : > { %1340 = vmatprep.subr.bf16.mxu0 %v2351_v33  ;;  %1506 = vmatprep.subr.bf16.mxu1 %v2354_v34  ;;  %v1621_v33 = vrot.slane %v1614_v31, %v2554_v39 }
  0x70   : > { %1370 = vmatprep.mubr.bf16.mxu0 %v2423_v2  ;;  %1536 = vmatprep.mubr.bf16.mxu1 %v2423_v2 }
  0x72   : > { %1341 = vmatpush1.bf16.msra.mxu0 %v2349_v35  ;;  %1507 = vmatpush1.bf16.msra.mxu1 %v2352_v36 }
  0x73   : > { %1342 = vmatprep.subr.bf16.mxu0 %v2357_v37  ;;  %1508 = vmatprep.subr.bf16.mxu1 %v2360_v38 }
  0x76   : > { %1343 = vmatpush1.bf16.msra.mxu0 %v2355_v40  ;;  %1509 = vmatpush1.bf16.msra.mxu1 %v2358_v41 }
  0x77   : > { %1344 = vmatprep.subr.bf16.mxu0 %v2363_v43  ;;  %1510 = vmatprep.subr.bf16.mxu1 %v2366_v44 }
  0x7a   : > { %1345 = vmatpush1.bf16.msra.mxu0 %v2361_v48  ;;  %1511 = vmatpush1.bf16.msra.mxu1 %v2364_v49 }
  0x7b   : > { %1346 = vmatprep.subr.bf16.mxu0 %v2369_v50  ;;  %1512 = vmatprep.subr.bf16.mxu1 %v2372_v51 }
  0x7e   : > { %1347 = vmatpush1.bf16.msra.mxu0 %v2367_v54  ;;  %1513 = vmatpush1.bf16.msra.mxu1 %v2370_v55 }
  0x7f   : > { %1348 = vmatprep.subr.bf16.mxu0 %v2375_v17  ;;  %1514 = vmatprep.subr.bf16.mxu1 %v2378_v56 }
  0x82   : > { %1349 = vmatpush1.bf16.msra.mxu0 %v2373_v57  ;;  %1515 = vmatpush1.bf16.msra.mxu1 %v2376_v58 }
  0x83   : > { %1350 = vmatprep.subr.bf16.mxu0 %v2381_v63  ;;  %1516 = vmatprep.subr.bf16.mxu1 %v2384_v0 }
  0x86   : > { %1351 = vmatpush1.bf16.msra.mxu0 %v2379_v4  ;;  %1517 = vmatpush1.bf16.msra.mxu1 %v2382_v5 }
  0x87   : > { %1352 = vmatprep.subr.bf16.mxu0 %v2387_v6  ;;  %1518 = vmatprep.subr.bf16.mxu1 %v2390_v7 }
  0x8a   : > { %1353 = vmatpush1.bf16.msra.mxu0 %v2385_v10  ;;  %1519 = vmatpush1.bf16.msra.mxu1 %v2388_v11 }
  0x8b   : > { %1703 = vmatprep.subr.bf16.mxu0 %v2393_v12 }
  0x8d   : > { %1371 = vmatmul.mubr.bf16.vlgmr.msra.gmra.mxu0 %v1256_v13  ;;  %1537 = vmatmul.mubr.bf16.vlgmr.msra.gmra.mxu1 %v1422_v14  ;;  %v2425_v14 = vmov 1983009808  }
  0x8e   : > { %1704 = vmatpush1.bf16.msra.mxu0 %v2391_v15  ;;  %1735 = vmatprep.mubr.bf16.mxu0 %v2423_v2  ;;  %v2400_v2 = vld [vmem:[%s2984_s1 + $0x440] ss:$8 sps:$4 sm:$0xff]   ;;  %v1754_v15 = vunpack.c.l.s4 %v2425_v14 }
  0x8f   : > { %1705 = vmatprep.subr.bf16.mxu0 %v2396_v16 }
  0x92   : > { %1706 = vmatpush1.bf16.msra.mxu0 %v2394_v18 }
  0x93   : > { %1707 = vmatprep.subr.bf16.mxu0 %v2399_v19 }
  0x96   : > { %1708 = vmatpush1.bf16.msra.mxu0 %v2397_v20  ;;  %v1755_v20 = vunpack.c.0.s8 %v1754_v15 }
  0x97   : > { %1709 = vmatprep.subr.bf16.mxu0 %v2402_v22 }
  0x9a   : > { %1710 = vmatpush1.bf16.msra.mxu0 %v2400_v2 }
  0x9b   : > { %1711 = vmatprep.subr.bf16.mxu0 %v2405_v23 }
  0x9e   : > { %1712 = vmatpush1.bf16.msra.mxu0 %v2403_v24 }
  0x9f   : > { %1713 = vmatprep.subr.bf16.mxu0 %v2408_v25 }
  0xa2   : > { %1714 = vmatpush1.bf16.msra.mxu0 %v2406_v26  ;;  %v1758_v26 = vsub.s32 %v1755_v20, %v2532_v28 }
  0xa3   : > { %1715 = vmatprep.subr.bf16.mxu0 %v2411_v27 }
  0xa6   : > { %1716 = vmatpush1.bf16.msra.mxu0 %v2409_v29 }
  0xa7   : > { %1717 = vmatprep.subr.bf16.mxu0 %v2414_v30 }
  0xaa   : > { %1718 = vmatpush1.bf16.msra.mxu0 %v2412_v32 }
  0xad   : > { %1736 = vmatmul.mubr.bf16.vlgmr.msra.gmra.mxu0 %v1621_v33 }
  0xed   : > { %v295_v34 = vpop.f32.mrf.mxu0  ;;  %v461_v35 = vpop.f32.mrf.mxu1 }
  0xef   : > { %v297_v36 = vpop.f32.mrf.mxu0  ;;  %v463_v37 = vpop.f32.mrf.mxu1 }
  0xf0   : > { %v304_v38 = vcombine.low %v295_v34, %v297_v36  ;;  %v470_v40 = vcombine.low %v461_v35, %v463_v37 }
  0xf1   : > { %v299_v41 = vpop.f32.mrf.mxu0  ;;  %v465_v42 = vpop.f32.mrf.mxu1 }
  0xf2   : > { %v472_v21 = vadd.f32 %v470_v40, %v304_v38 }
  0xf3   : > { %v300_v43 = vpop.f32.mrf.mxu0  ;;  %v466_v44 = vpop.f32.mrf.mxu1 }
 0x10d   : > { %v675_v45 = vpop.f32.mrf.mxu0  ;;  %v841_v46 = vpop.f32.mrf.mxu1 }
 0x10f   : > { %v677_v47 = vpop.f32.mrf.mxu0  ;;  %v843_v48 = vpop.f32.mrf.mxu1 }
 0x110   : > { %v684_v49 = vcombine.low %v675_v45, %v677_v47  ;;  %v850_v50 = vcombine.low %v841_v46, %v843_v48 }
 0x111   : > { %v679_v51 = vpop.f32.mrf.mxu0  ;;  %v845_v52 = vpop.f32.mrf.mxu1 }
 0x112   : > { %v686_v53 = vadd.f32 %v684_v49, %v472_v21 }
 0x113   : > { %v680_v54 = vpop.f32.mrf.mxu0  ;;  %v846_v55 = vpop.f32.mrf.mxu1 }
 0x114   : > { %v852_v17 = vadd.f32 %v850_v50, %v686_v53 }
 0x12d   : > { %v1007_v56 = vpop.f32.mrf.mxu0  ;;  %v1206_v57 = vpop.f32.mrf.mxu1 }
 0x12f   : > { %v1009_v58 = vpop.f32.mrf.mxu0  ;;  %v1208_v59 = vpop.f32.mrf.mxu1 }
 0x130   : > { %v1016_v9 = vcombine.low %v1007_v56, %v1009_v58  ;;  %v1215_v11 = vcombine.low %v1206_v57, %v1208_v59 }
 0x131   : > { %v1011_v60 = vpop.f32.mrf.mxu0  ;;  %v1210_v61 = vpop.f32.mrf.mxu1 }
 0x132   : > { %v1018_v10 = vadd.f32 %v1016_v9, %v852_v17 }
 0x133   : > { %v1012_v62 = vpop.f32.mrf.mxu0  ;;  %v1211_v63 = vpop.f32.mrf.mxu1 }
 0x134   : > { %v1217_v13 = vadd.f32 %v1215_v11, %v1018_v10 }
 0x14d   : > { %v1372_v0 = vpop.f32.mrf.mxu0  ;;  %v1538_v1 = vpop.f32.mrf.mxu1 }
 0x14f   : > { %v1374_v3 = vpop.f32.mrf.mxu0  ;;  %v1540_v4 = vpop.f32.mrf.mxu1 }
 0x150   : > { %v1381_v12 = vcombine.low %v1372_v0, %v1374_v3  ;;  %v1547_v18 = vcombine.low %v1538_v1, %v1540_v4 }
 0x151   : > { %v1376_v5 = vpop.f32.mrf.mxu0  ;;  %v1542_v6 = vpop.f32.mrf.mxu1 }
 0x152   : > { %v1383_v16 = vadd.f32 %v1381_v12, %v1217_v13 }
 0x153   : > { %v1377_v7 = vpop.f32.mrf.mxu0  ;;  %v1543_v8 = vpop.f32.mrf.mxu1 }
 0x154   : > { %v1549_v2 = vadd.f32 %v1547_v18, %v1383_v16 }
 0x16d   : > { %v1737_v19 = vpop.f32.mrf.mxu0 }
 0x16f   : > { %v1739_v22 = vpop.f32.mrf.mxu0 }
 0x170   : > { %v1746_v23 = vcombine.low %v1737_v19, %v1739_v22 }
 0x171   : > { %v1741_v24 = vpop.f32.mrf.mxu0 }
 0x172   : > { %v1748_v25 = vadd.f32 %v1746_v23, %v1549_v2 }
 0x173   : > { %v1742_v27 = vpop.f32.mrf.mxu0 }
 0x174   : > { %v1751_v29 = vmax.f32 %v1748_v25, 0.0 }
 0x176   : > { %v1759_v30 = vrot.slane %v1751_v29, %v1758_v26 }
 0x178   : > { %v1760_v31 = vcombine.high %v1759_v30, %v1759_v30  ;;  %v1767_v32 = vrot.slane %v1759_v30, %v1758_v26 }
 0x17a   : > { %v1768_v33 = vcombine.high %v1767_v32, %v1767_v32  ;;  %v1775_v34 = vrot.slane %v1760_v31, %v1758_v26 }
 0x17c   : > { %v1776_v35 = vcombine.high %v1775_v34, %v1775_v34  ;;  %v2181_v36 = vpack.c.bf16 %v1768_v33, %v1767_v32 }
 0x17e   : > { %v1796_v37 = vrot.slane %v2181_v36, %v2554_v39  ;;  %v2182_v38 = vpack.c.bf16 %v1776_v35, %v1775_v34 }
 0x180   : > { %v1811_v40 = vrot.slane %v2182_v38, %v2554_v39  ;;  %2183 = vst.sshfl [vmem:[%s141_s27] sm:$0x5 pattern:$0x73625140] %v1796_v37 }
 0x182   : > { %2184 = vst.sshfl [vmem:[%s141_s27 + $0x2] sm:$0x5 pattern:$0x73625140] %v1811_v40 }
 0x183 PF: > { %s12_s9 = sadd.s32 1, %s2421_s9  }
 0x184   : > { %p9_p4 = scmp.ge.s32.totalorder %s12_s9, 4  }
 0x186   :  { %11 = sbr.rel (!%p9_p4) target bundleno = 1 (0x1), region = 71 }

// kernel: _lambda_.7
= control target key start
LH: loop header
LB: loop body
LE: loop exit
PB: predicated region body
PF: predicated region fallthrough
CT: control target
= control target key end

     0   :  { %7 = vsyncpa [#allocation4], 0  ;;  %s13278_s0 = inlined_call_operand.vmem [shape: bf16[2,4,2,2,256], index: 0, kind: input, shape index: {}]   ;;  %s13279_s1 = inlined_call_operand.vmem [shape: bf16[9,256,768], index: 1, kind: input, shape index: {}]   ;;  %s13280_s2 = inlined_call_operand.hbm [shape: f32[2,1,1,768], index: 2, kind: output, shape index: {}]  }
   0x1   :  { %9 = vsyncpa [#allocation4 + $0x1], 0  ;;  %s10301_s9 = smov 0   ;;  %s10303_s10 = smov 0  }
   0x2   :  { %s10305_s11 = smov 0   ;;  %s10307_s12 = smov 0  }
   0x3 LB: > { %s10322_s13 = sadd.s32 4294967295, %s10281_s12   ;;  %s7226_s14 = sadd.s32 4294967294, %s10281_s12   ;;  %s10281_s12 = sphi %s10307_s12, %s13288_s12   ;;  %s10277_s11 = sphi %s10305_s11, %s13287_s11   ;;  %s10273_s10 = sphi %s10303_s10, %s13286_s10   ;;  %s10269_s9 = sphi %s10301_s9, %s13285_s9  }
   0x4   : > { %s10326_s15 = sadd.s32 1, %s10281_s12   ;;  %s69_s16 = sadd.s32 1, %s10277_s11 }
   0x5   : > { %s66_s17 = ssub.s32 %s10281_s12, %s10326_s15  ;;  %p79_p0 = scmp.ne.s32.totalorder %s10277_s11, %s10273_s10 }
   0x6   : > { %p67_p1 = scmp.eq.s32.totalorder %s66_s17, 0  ;;  %p80_p2 = scmp.eq.s32.totalorder %s10322_s13, 1 }
   0x7   : > { %p85_p3 = scmp.ne.s32.totalorder %s10273_s10, %s10269_s9  ;;  %p86_p4 = scmp.eq.s32.totalorder %s7226_s14, 1 }
   0x8   : > { %s10337_s18 = scalar_select %p67_p1, %s10277_s11, %s69_s16  }
   0x9   : > { %p10339_p5 = por %p80_p2, %p79_p0  ;;  %p10343_p6 = por %p86_p4, %p85_p3 }
   0xa   : > { %p7229_p7 = scmp.ge.s32.totalorder %s10281_s12, 1  ;;  %p114_p8 = scmp.lt.s32.totalorder %s10281_s12, 3 }
   0xc   : > { %p115_p9 = pnand %p7229_p7, %p114_p8 }
   0xd   : > { %p135_p10 = scmp.lt.s32.totalorder (!%p115_p9), %s10322_s13, 1  ;;  %s132_s28 = sand.u32 (!%p115_p9), 1, %s10273_s10  }
   0xe   : > { %118 = sbr.rel (%p115_p9) target bundleno = 1142 (0x476), region = 28  ;;  %s7153_s8 = scalar_lea.sflag (!%p115_p9), [#allocation4], %s132_s28 }
   0xf   : > { %s8882_s29 = smul.u32 (!%p115_p9), 6, %s132_s28  ;;  %s10285_s16 = smov (!%p115_p9), [#allocation3]  }
  0x11   : > { %s134_s3 = scalar_lea.vmem (!%p115_p9), [#allocation3], %s8882_s29 }
  0x12   : > { %s7167_s4 = sshll.u32 (!%p115_p9), %s134_s3, 4  ;;  %s7168_s4 = int_to_ptr.vmem [resolvable:$true] %s7167_s4 }
  0x13   : > { %v8925_v0 = vld [vmem:[%s13279_s1 + $0x154] ss:$24 sps:$4 sm:$0xff]   ;;  %v8929_v2 = vld [vmem:[%s13279_s1 + $0x150] ss:$24 sps:$4 sm:$0xff]   ;;  %v8931_v4 = vld [vmem:[%s13279_s1 + $0x124] ss:$24 sps:$4 sm:$0xff]   ;;  %v139_v38 = vlaneseq }
  0x14   : > { %v8927_v1 = vld [vmem:[%s13279_s1 + $0x15c] ss:$24 sps:$4 sm:$0xff]   ;;  %747 = vmatprep.subr.bf16.mxu0 %v8925_v0  ;;  %v8930_v3 = vld [vmem:[%s13279_s1 + $0x158] ss:$24 sps:$4 sm:$0xff]   ;;  %v8933_v5 = vld [vmem:[%s13279_s1 + $0x12c] ss:$24 sps:$4 sm:$0xff]  }
  0x15   : > { %788 = vmatprep.subr.bf16.mxu1 %v8927_v1  ;;  %748 = vmatpush1.bf16.msra.mxu0 %v8929_v2  ;;  %v8935_v6 = vld [vmem:[%s13279_s1 + $0x120] ss:$24 sps:$4 sm:$0xff]   ;;  %v8937_v8 = vld [vmem:[%s13279_s1 + $0xf4] ss:$24 sps:$4 sm:$0xff]   ;;  %v8941_v10 = vld [vmem:[%s13279_s1 + $0xf0] ss:$24 sps:$4 sm:$0xff]  }
  0x16   : > { %789 = vmatpush1.bf16.msra.mxu1 %v8930_v3  ;;  %749 = vmatprep.subr.bf16.mxu0 %v8931_v4  ;;  %v8936_v7 = vld [vmem:[%s13279_s1 + $0x128] ss:$24 sps:$4 sm:$0xff]   ;;  %v8939_v9 = vld [vmem:[%s13279_s1 + $0xfc] ss:$24 sps:$4 sm:$0xff]   ;;  %v8942_v11 = vld [vmem:[%s13279_s1 + $0xf8] ss:$24 sps:$4 sm:$0xff]  }
  0x17   : > { %790 = vmatprep.subr.bf16.mxu1 %v8933_v5  ;;  %v8943_v12 = vld [vmem:[%s13279_s1 + $0xc4] ss:$24 sps:$4 sm:$0xff]   ;;  %v8947_v14 = vld [vmem:[%s13279_s1 + $0xc0] ss:$24 sps:$4 sm:$0xff]   ;;  %v8949_v16 = vld [vmem:[%s13279_s1 + $0x94] ss:$24 sps:$4 sm:$0xff]  }
  0x18   : > { %v8945_v13 = vld [vmem:[%s13279_s1 + $0xcc] ss:$24 sps:$4 sm:$0xff]   ;;  %v8948_v15 = vld [vmem:[%s13279_s1 + $0xc8] ss:$24 sps:$4 sm:$0xff]   ;;  %v8951_v17 = vld [vmem:[%s13279_s1 + $0x9c] ss:$24 sps:$4 sm:$0xff]  }
  0x19   : > { %750 = vmatpush1.bf16.msra.mxu0 %v8935_v6  ;;  %v8953_v18 = vld [vmem:[%s13279_s1 + $0x90] ss:$24 sps:$4 sm:$0xff]   ;;  %v8955_v20 = vld [vmem:[%s13279_s1 + $0x64] ss:$24 sps:$4 sm:$0xff]   ;;  %v8959_v22 = vld [vmem:[%s13279_s1 + $0x60] ss:$24 sps:$4 sm:$0xff]  }
  0x1a   : > { %791 = vmatpush1.bf16.msra.mxu1 %v8936_v7  ;;  %751 = vmatprep.subr.bf16.mxu0 %v8937_v8  ;;  %v8954_v19 = vld [vmem:[%s13279_s1 + $0x98] ss:$24 sps:$4 sm:$0xff]   ;;  %v8957_v21 = vld [vmem:[%s13279_s1 + $0x6c] ss:$24 sps:$4 sm:$0xff]   ;;  %v8960_v23 = vld [vmem:[%s13279_s1 + $0x68] ss:$24 sps:$4 sm:$0xff]  }
  0x1b   : > { %792 = vmatprep.subr.bf16.mxu1 %v8939_v9  ;;  %v8961_v24 = vld [vmem:[%s13279_s1 + $0x34] ss:$24 sps:$4 sm:$0xff]   ;;  %v8965_v26 = vld [vmem:[%s13279_s1 + $0x30] ss:$24 sps:$4 sm:$0xff]   ;;  %v8967_v28 = vld [vmem:[%s13279_s1 + $0x4] ss:$24 sps:$4 sm:$0xff]  }
  0x1c   : > { %v8963_v25 = vld [vmem:[%s13279_s1 + $0x3c] ss:$24 sps:$4 sm:$0xff]   ;;  %v8966_v27 = vld [vmem:[%s13279_s1 + $0x38] ss:$24 sps:$4 sm:$0xff]   ;;  %v8969_v29 = vld [vmem:[%s13279_s1 + $0xc] ss:$24 sps:$4 sm:$0xff]  }
  0x1d   : > { %752 = vmatpush1.bf16.msra.mxu0 %v8941_v10  ;;  %v8971_v30 = vld [vmem:[%s13279_s1] ss:$24 sps:$4 sm:$0xff]   ;;  %v8973_v32 = vld [vmem:[%s13279_s1 + $0x2d4] ss:$24 sps:$4 sm:$0xff]   ;;  %v8977_v34 = vld [vmem:[%s13279_s1 + $0x2d0] ss:$24 sps:$4 sm:$0xff]  }
  0x1e   : > { %793 = vmatpush1.bf16.msra.mxu1 %v8942_v11  ;;  %753 = vmatprep.subr.bf16.mxu0 %v8943_v12  ;;  %v8972_v31 = vld [vmem:[%s13279_s1 + $0x8] ss:$24 sps:$4 sm:$0xff]   ;;  %v8975_v33 = vld [vmem:[%s13279_s1 + $0x2dc] ss:$24 sps:$4 sm:$0xff]   ;;  %v8978_v35 = vld [vmem:[%s13279_s1 + $0x2d8] ss:$24 sps:$4 sm:$0xff]  }
  0x1f   : > { %794 = vmatprep.subr.bf16.mxu1 %v8945_v13  ;;  %v8979_v36 = vld [vmem:[%s13279_s1 + $0x2a4] ss:$24 sps:$4 sm:$0xff]   ;;  %s136_s21 = scalar_select %p135_p10, %s10322_s13, 1  ;;  %v10283_v39 = vmov 1966171168   ;;  %v255_v46 = vshrl.u32 %v139_v38, 7 }
  0x20   : > { %v8981_v37 = vld [vmem:[%s13279_s1 + $0x2ac] ss:$24 sps:$4 sm:$0xff]   ;;  %v252_v40 = vunpack.c.l.s4 %v10283_v39  ;;  %v8983_v41 = vld [vmem:[%s13279_s1 + $0x2a0] ss:$24 sps:$4 sm:$0xff]   ;;  %v8987_v44 = vld [vmem:[%s13279_s1 + $0x27c] ss:$24 sps:$4 sm:$0xff]  }
  0x21   : > { %754 = vmatpush1.bf16.msra.mxu0 %v8947_v14  ;;  %v8984_v42 = vld [vmem:[%s13279_s1 + $0x2a8] ss:$24 sps:$4 sm:$0xff]   ;;  %v8985_v43 = vld [vmem:[%s13279_s1 + $0x274] ss:$24 sps:$4 sm:$0xff]   ;;  %s7230_s30 = sshll.u32 %s136_s21, 4  ;;  %vm10997_vm0 = vcmp.lt.s32.totalorder %v139_v38, 768 }
  0x22   : > { %795 = vmatpush1.bf16.msra.mxu1 %v8948_v15  ;;  %755 = vmatprep.subr.bf16.mxu0 %v8949_v16  ;;  %v253_v45 = vunpack.c.0.s8 %v252_v40  ;;  %v8989_v47 = vld [vmem:[%s13279_s1 + $0x270] ss:$24 sps:$4 sm:$0xff]   ;;  %v8991_v49 = vld [vmem:[%s13279_s1 + $0x244] ss:$24 sps:$4 sm:$0xff]   ;;  %s10490_s17 = scalar_lea.vmem %s13278_s0, %s7230_s30  ;;  %v8995_v53 = vld [vmem:[%s13279_s1 + $0x240] ss:$24 sps:$4 sm:$0xff]  }
  0x23   : > { %796 = vmatprep.subr.bf16.mxu1 %v8951_v17  ;;  %v8990_v48 = vld [vmem:[%s13279_s1 + $0x278] ss:$24 sps:$4 sm:$0xff]   ;;  %v8993_v50 = vld [vmem:[%s13279_s1 + $0x24c] ss:$24 sps:$4 sm:$0xff]   ;;  %v8996_v54 = vld [vmem:[%s13279_s1 + $0x248] ss:$24 sps:$4 sm:$0xff]  }
  0x24   : > { %v10495_v51 = vsub.s32 %v253_v45, %v255_v46  ;;  %v7231_v52 = vld.sshfl [vmem:[%s10490_s17] sm:$0x11 pattern:$0x75316420]  ;;  %v8997_v56 = vld [vmem:[%s13279_s1 + $0x214] ss:$24 sps:$4 sm:$0xff]  }
  0x25   : > { %756 = vmatpush1.bf16.msra.mxu0 %v8953_v18  ;;  %v250_v55 = vcombine.high %v7231_v52, %v7231_v52  ;;  %v8999_v57 = vld [vmem:[%s13279_s1 + $0x21c] ss:$24 sps:$4 sm:$0xff]   ;;  %v9001_v59 = vld [vmem:[%s13279_s1 + $0x210] ss:$24 sps:$4 sm:$0xff]   ;;  %v9005_v62 = vld [vmem:[%s13279_s1 + $0x1ec] ss:$24 sps:$4 sm:$0xff]  }
  0x26   : > { %797 = vmatpush1.bf16.msra.mxu1 %v8954_v19  ;;  %757 = vmatprep.subr.bf16.mxu0 %v8955_v20  ;;  %v9002_v60 = vld [vmem:[%s13279_s1 + $0x218] ss:$24 sps:$4 sm:$0xff]   ;;  %v9003_v61 = vld [vmem:[%s13279_s1 + $0x1e4] ss:$24 sps:$4 sm:$0xff]   ;;  %v9008_v0 = vld [vmem:[%s13279_s1 + $0x1e8] ss:$24 sps:$4 sm:$0xff]   ;;  %v10560_v11 = vrot.slane %v7231_v52, %v10495_v51 }
  0x27   : > { %798 = vmatprep.subr.bf16.mxu1 %v8957_v21  ;;  %v264_v58 = vrot.slane %v250_v55, %v10495_v51  ;;  %v9007_v63 = vld [vmem:[%s13279_s1 + $0x1e0] ss:$24 sps:$4 sm:$0xff]   ;;  %v9009_v1 = vld [vmem:[%s13279_s1 + $0x1b4] ss:$24 sps:$4 sm:$0xff]   ;;  %v9013_v3 = vld [vmem:[%s13279_s1 + $0x1b0] ss:$24 sps:$4 sm:$0xff]  }
  0x28   : > { %v9011_v2 = vld [vmem:[%s13279_s1 + $0x1bc] ss:$24 sps:$4 sm:$0xff]   ;;  %v9014_v4 = vld [vmem:[%s13279_s1 + $0x1b8] ss:$24 sps:$4 sm:$0xff]   ;;  %v9017_v6 = vld [vmem:[%s13279_s1 + $0x18c] ss:$24 sps:$4 sm:$0xff]  }
  0x29   : > { %758 = vmatpush1.bf16.msra.mxu0 %v8959_v22  ;;  %779 = vmatprep.mubr.bf16.mxu0 %v264_v58  ;;  %v9015_v5 = vld [vmem:[%s13279_s1 + $0x184] ss:$24 sps:$4 sm:$0xff]   ;;  %v9019_v7 = vld [vmem:[%s13279_s1 + $0x180] ss:$24 sps:$4 sm:$0xff]   ;;  %v9026_v10 = vld [vmem:[%s13279_s1 + $0x454] ss:$24 sps:$4 sm:$0xff]  }
  0x2a   : > { %799 = vmatpush1.bf16.msra.mxu1 %v8960_v23  ;;  %759 = vmatprep.subr.bf16.mxu0 %v8961_v24  ;;  %v9020_v8 = vld [vmem:[%s13279_s1 + $0x188] ss:$24 sps:$4 sm:$0xff]   ;;  %v9023_v9 = vld [vmem:[%s13279_s1 + $0x164] ss:$24 sps:$4 sm:$0xff]   ;;  %v9029_v14 = vld [vmem:[%s13279_s1 + $0x134] ss:$24 sps:$4 sm:$0xff]  }
  0x2b   : > { %800 = vmatprep.subr.bf16.mxu1 %v8963_v25  ;;  %820 = vmatprep.mubr.bf16.mxu1 %v264_v58  ;;  %v9021_v12 = vld [vmem:[%s13279_s1 + $0x160] ss:$24 sps:$4 sm:$0xff]   ;;  %v9024_v13 = vld [vmem:[%s13279_s1 + $0x450] ss:$24 sps:$4 sm:$0xff]   ;;  %v9032_v15 = vld [vmem:[%s13279_s1 + $0x424] ss:$24 sps:$4 sm:$0xff]  }
  0x2c   : > { %v9027_v16 = vld [vmem:[%s13279_s1 + $0x130] ss:$24 sps:$4 sm:$0xff]   ;;  %v9030_v17 = vld [vmem:[%s13279_s1 + $0x420] ss:$24 sps:$4 sm:$0xff]   ;;  %v9035_v18 = vld [vmem:[%s13279_s1 + $0x104] ss:$24 sps:$4 sm:$0xff]  }
  0x2d   : > { %760 = vmatpush1.bf16.msra.mxu0 %v8965_v26  ;;  %v9038_v19 = vld [vmem:[%s13279_s1 + $0x3f4] ss:$24 sps:$4 sm:$0xff]   ;;  %v9033_v20 = vld [vmem:[%s13279_s1 + $0x100] ss:$24 sps:$4 sm:$0xff]   ;;  %v9036_v21 = vld [vmem:[%s13279_s1 + $0x3f0] ss:$24 sps:$4 sm:$0xff]  }
  0x2e   : > { %801 = vmatpush1.bf16.msra.mxu1 %v8966_v27  ;;  %761 = vmatprep.subr.bf16.mxu0 %v8967_v28  ;;  %v9041_v22 = vld [vmem:[%s13279_s1 + $0xd4] ss:$24 sps:$4 sm:$0xff]   ;;  %v9044_v23 = vld [vmem:[%s13279_s1 + $0x3c4] ss:$24 sps:$4 sm:$0xff]   ;;  %v9039_v24 = vld [vmem:[%s13279_s1 + $0xd0] ss:$24 sps:$4 sm:$0xff]  }
  0x2f   : > { %802 = vmatprep.subr.bf16.mxu1 %v8969_v29  ;;  %v9042_v25 = vld [vmem:[%s13279_s1 + $0x3c0] ss:$24 sps:$4 sm:$0xff]   ;;  %v9047_v26 = vld [vmem:[%s13279_s1 + $0xa4] ss:$24 sps:$4 sm:$0xff]   ;;  %v9050_v27 = vld [vmem:[%s13279_s1 + $0x394] ss:$24 sps:$4 sm:$0xff]  }
  0x30   : > { %v9045_v28 = vld [vmem:[%s13279_s1 + $0xa0] ss:$24 sps:$4 sm:$0xff]   ;;  %v9048_v29 = vld [vmem:[%s13279_s1 + $0x390] ss:$24 sps:$4 sm:$0xff]   ;;  %v9071_v46 = vld [vmem:[%s13279_s1 + $0x2e4] ss:$24 sps:$4 sm:$0xff]  }
  0x31   : > { %762 = vmatpush1.bf16.msra.mxu0 %v8971_v30  ;;  %v9053_v30 = vld [vmem:[%s13279_s1 + $0x74] ss:$24 sps:$4 sm:$0xff]   ;;  %v9057_v39 = vld [vmem:[%s13279_s1 + $0x40] ss:$24 sps:$4 sm:$0xff]   ;;  %v9060_v40 = vld [vmem:[%s13279_s1 + $0x330] ss:$24 sps:$4 sm:$0xff]  }
  0x32   : > { %803 = vmatpush1.bf16.msra.mxu1 %v8972_v31  ;;  %763 = vmatprep.subr.bf16.mxu0 %v8973_v32  ;;  %v9056_v31 = vld [vmem:[%s13279_s1 + $0x364] ss:$24 sps:$4 sm:$0xff]   ;;  %v9051_v32 = vld [vmem:[%s13279_s1 + $0x70] ss:$24 sps:$4 sm:$0xff]   ;;  %v9066_v45 = vld [vmem:[%s13279_s1 + $0x300] ss:$24 sps:$4 sm:$0xff]  }
  0x33   : > { %804 = vmatprep.subr.bf16.mxu1 %v8975_v33  ;;  %v9054_v33 = vld [vmem:[%s13279_s1 + $0x360] ss:$24 sps:$4 sm:$0xff]   ;;  %v9080_v52 = vld [vmem:[%s13279_s1 + $0x5a4] ss:$24 sps:$4 sm:$0xff]   ;;  %v9225_v38 = vld [vmem:[%s13279_s1 + $0x6f0] ss:$24 sps:$4 sm:$0xff]  }
  0x34   : > { %v9083_v55 = vld [vmem:[%s13279_s1 + $0x284] ss:$24 sps:$4 sm:$0xff]   ;;  %s8883_s30 = smul.u32 96, %s10322_s13  ;;  %s10221_s14 = scalar_lea.vmem %s7168_s4, 96 }
  0x35   : > { %764 = vmatpush2.bf16.msra.mxu0 %v8977_v34  ;;  %v9059_v34 = vld [vmem:[%s13279_s1 + $0x44] ss:$24 sps:$4 sm:$0xff]   ;;  %p10222_p11 = scmp.ne.s32.totalorder %s7168_s4, %s10221_s14  ;;  %s10225_s13 = sshll.u32 %s10285_s16, 4  ;;  %s10226_s13 = int_to_ptr.vmem [resolvable:$false] %s10225_s13 }
  0x36   : > { %805 = vmatpush2.bf16.msra.mxu1 %v8978_v35  ;;  %765 = vmatprep.subr.bf16.mxu0 %v8979_v36  ;;  %v9062_v35 = vld [vmem:[%s13279_s1 + $0x334] ss:$24 sps:$4 sm:$0xff]   ;;  %v10637_v36 = vld.sshfl [vmem:[%s10490_s17 + $0x4] sm:$0x11 pattern:$0x75316420]  ;;  %s13241_s7 = scalar_lea.hbm %s13280_s2, %s8883_s30  ;;  %p10228_p0 = scmp.lt.s32.totalorder %s7168_s4, %s10226_s13 }
  0x37   : > { %806 = vmatprep.subr.bf16.mxu1 %v8981_v37  ;;  %v1027_v37 = vcombine.high %v10637_v36, %v10637_v36  ;;  %p10223_p12 = pnand %p10222_p11, %p10339_p5  ;;  %s10227_s21 = scalar_lea.vmem %s10226_s13, 192 }
  0x38   : > { %p10229_p1 = scmp.lt.s32.totalorder %s10227_s21, %s10221_s14 }
  0x39   : > { %766 = vmatpush2.bf16.msra.mxu0 %v8983_v41  ;;  %v9065_v41 = vld [vmem:[%s13279_s1 + $0x14] ss:$24 sps:$4 sm:$0xff]   ;;  %p10224_p13 = pneg %p10223_p12 }
  0x3a   : > { %807 = vmatpush2.bf16.msra.mxu1 %v8984_v42  ;;  %767 = vmatprep.subr.bf16.mxu0 %v8985_v43  ;;  %v9068_v42 = vld [vmem:[%s13279_s1 + $0x304] ss:$24 sps:$4 sm:$0xff]   ;;  %v10654_v43 = vrot.slane %v1027_v37, %v10495_v51  ;;  %v9152_v37 = vld [vmem:[%s13279_s1 + $0x374] ss:$24 sps:$4 sm:$0xff]   ;;  %p10230_p2 = por %p10229_p1, %p10228_p0 }
  0x3b   : > { %808 = vmatprep.subr.bf16.mxu1 %v8987_v44  ;;  %v9063_v44 = vld [vmem:[%s13279_s1 + $0x10] ss:$24 sps:$4 sm:$0xff]  }
  0x3c   : > { %p10231_p3 = pnand %p10230_p2, %p10224_p13 }
  0x3d   : > { %768 = vmatpush2.bf16.msra.mxu0 %v8989_v47  ;;  %v9074_v47 = vld [vmem:[%s13279_s1 + $0x5d4] ss:$24 sps:$4 sm:$0xff]  }
  0x3e   : > { %809 = vmatpush2.bf16.msra.mxu1 %v8990_v48  ;;  %769 = vmatprep.subr.bf16.mxu0 %v8991_v49  ;;  %v9069_v48 = vld [vmem:[%s13279_s1 + $0x2e0] ss:$24 sps:$4 sm:$0xff]   ;;  %v9072_v49 = vld [vmem:[%s13279_s1 + $0x5d0] ss:$24 sps:$4 sm:$0xff]  }
  0x3f   : > { %810 = vmatprep.subr.bf16.mxu1 %v8993_v50  ;;  %v9077_v50 = vld [vmem:[%s13279_s1 + $0x2b4] ss:$24 sps:$4 sm:$0xff]  }
  0x41   : > { %770 = vmatpush2.bf16.msra.mxu0 %v8995_v53  ;;  %v9075_v53 = vld [vmem:[%s13279_s1 + $0x2b0] ss:$24 sps:$4 sm:$0xff]  }
  0x42   : > { %811 = vmatpush2.bf16.msra.mxu1 %v8996_v54  ;;  %771 = vmatprep.subr.bf16.mxu0 %v8997_v56  ;;  %v9078_v54 = vld [vmem:[%s13279_s1 + $0x5a0] ss:$24 sps:$4 sm:$0xff]   ;;  %v9086_v56 = vld [vmem:[%s13279_s1 + $0x574] ss:$24 sps:$4 sm:$0xff]  }
  0x43   : > { %812 = vmatprep.subr.bf16.mxu1 %v8999_v57  ;;  %v9081_v57 = vld [vmem:[%s13279_s1 + $0x280] ss:$24 sps:$4 sm:$0xff]  }
  0x45   : > { %772 = vmatpush2.bf16.msra.mxu0 %v9001_v59  ;;  %v9089_v59 = vld [vmem:[%s13279_s1 + $0x254] ss:$24 sps:$4 sm:$0xff]  }
  0x46   : > { %813 = vmatpush2.bf16.msra.mxu1 %v9002_v60  ;;  %773 = vmatprep.subr.bf16.mxu0 %v9003_v61  ;;  %v9092_v60 = vld [vmem:[%s13279_s1 + $0x544] ss:$24 sps:$4 sm:$0xff]   ;;  %v9087_v61 = vld [vmem:[%s13279_s1 + $0x250] ss:$24 sps:$4 sm:$0xff]  }
  0x47   : > { %814 = vmatprep.subr.bf16.mxu1 %v9005_v62  ;;  %v9090_v62 = vld [vmem:[%s13279_s1 + $0x540] ss:$24 sps:$4 sm:$0xff]  }
  0x49   : > { %774 = vmatpush2.bf16.msra.mxu0 %v9007_v63  ;;  %v9095_v63 = vld [vmem:[%s13279_s1 + $0x224] ss:$24 sps:$4 sm:$0xff]  }
  0x4a   : > { %815 = vmatpush2.bf16.msra.mxu1 %v9008_v0  ;;  %775 = vmatprep.subr.bf16.mxu0 %v9009_v1  ;;  %v9098_v0 = vld [vmem:[%s13279_s1 + $0x514] ss:$24 sps:$4 sm:$0xff]   ;;  %v9093_v1 = vld [vmem:[%s13279_s1 + $0x220] ss:$24 sps:$4 sm:$0xff]  }
  0x4b   : > { %816 = vmatprep.subr.bf16.mxu1 %v9011_v2  ;;  %v9096_v2 = vld [vmem:[%s13279_s1 + $0x510] ss:$24 sps:$4 sm:$0xff]  }
  0x4d   : > { %776 = vmatpush2.bf16.msra.mxu0 %v9013_v3  ;;  %v9101_v3 = vld [vmem:[%s13279_s1 + $0x1f4] ss:$24 sps:$4 sm:$0xff]  }
  0x4e   : > { %817 = vmatpush2.bf16.msra.mxu1 %v9014_v4  ;;  %777 = vmatprep.subr.bf16.mxu0 %v9015_v5  ;;  %v9104_v4 = vld [vmem:[%s13279_s1 + $0x4e4] ss:$24 sps:$4 sm:$0xff]   ;;  %v9099_v5 = vld [vmem:[%s13279_s1 + $0x1f0] ss:$24 sps:$4 sm:$0xff]  }
  0x4f   : > { %818 = vmatprep.subr.bf16.mxu1 %v9017_v6  ;;  %v9102_v6 = vld [vmem:[%s13279_s1 + $0x4e0] ss:$24 sps:$4 sm:$0xff]  }
  0x51   : > { %778 = vmatpush2.bf16.msra.mxu0 %v9019_v7  ;;  %v9107_v7 = vld [vmem:[%s13279_s1 + $0x1c4] ss:$24 sps:$4 sm:$0xff]  }
  0x52   : > { %819 = vmatpush2.bf16.msra.mxu1 %v9020_v8  ;;  %829 = vmatprep.subr.bf16.mxu0 %v9023_v9  ;;  %v9110_v8 = vld [vmem:[%s13279_s1 + $0x4b4] ss:$24 sps:$4 sm:$0xff]   ;;  %v9105_v9 = vld [vmem:[%s13279_s1 + $0x1c0] ss:$24 sps:$4 sm:$0xff]  }
  0x53   : > { %1524 = vmatprep.subr.bf16.mxu1 %v9026_v10  ;;  %v9108_v10 = vld [vmem:[%s13279_s1 + $0x4b0] ss:$24 sps:$4 sm:$0xff]  }
  0x54   : > { %780 = vmatmul.mubr.bf16.vlgmr.msra.gmra.mxu0 %v10560_v11 }
  0x55   : > { %821 = vmatmul.mubr.bf16.vlgmr.msra.gmra.mxu1 %v10560_v11  ;;  %830 = vmatpush1.bf16.msra.mxu0 %v9021_v12  ;;  %v9113_v12 = vld [vmem:[%s13279_s1 + $0x194] ss:$24 sps:$4 sm:$0xff]  }
  0x56   : > { %1525 = vmatpush1.bf16.msra.mxu1 %v9024_v13  ;;  %831 = vmatprep.subr.bf16.mxu0 %v9029_v14  ;;  %v9116_v13 = vld [vmem:[%s13279_s1 + $0x484] ss:$24 sps:$4 sm:$0xff]   ;;  %v9111_v14 = vld [vmem:[%s13279_s1 + $0x190] ss:$24 sps:$4 sm:$0xff]  }
  0x57   : > { %1526 = vmatprep.subr.bf16.mxu1 %v9032_v15  ;;  %861 = vmatprep.mubr.bf16.mxu0 %v264_v58  ;;  %v9084_v58 = vld [vmem:[%s13279_s1 + $0x570] ss:$24 sps:$4 sm:$0xff]   ;;  %v9114_v15 = vld [vmem:[%s13279_s1 + $0x480] ss:$24 sps:$4 sm:$0xff]  }
  0x58   : > { %1556 = vmatprep.mubr.bf16.mxu1 %v10654_v43 }
  0x59   : > { %832 = vmatpush1.bf16.msra.mxu0 %v9027_v16  ;;  %v9119_v16 = vld [vmem:[%s13279_s1 + $0x45c] ss:$24 sps:$4 sm:$0xff]  }
  0x5a   : > { %1527 = vmatpush1.bf16.msra.mxu1 %v9030_v17  ;;  %833 = vmatprep.subr.bf16.mxu0 %v9035_v18  ;;  %v9122_v17 = vld [vmem:[%s13279_s1 + $0x464] ss:$24 sps:$4 sm:$0xff]   ;;  %v10767_v18 = vrot.slane %v10637_v36, %v10495_v51 }
  0x5b   : > { %1528 = vmatprep.subr.bf16.mxu1 %v9038_v19  ;;  %v9117_v19 = vld [vmem:[%s13279_s1 + $0x458] ss:$24 sps:$4 sm:$0xff]   ;;  %v9149_v36 = vld [vmem:[%s13279_s1 + $0x36c] ss:$24 sps:$4 sm:$0xff]  }
  0x5d   : > { %834 = vmatpush1.bf16.msra.mxu0 %v9033_v20  ;;  %v9120_v20 = vld [vmem:[%s13279_s1 + $0x460] ss:$24 sps:$4 sm:$0xff]  }
  0x5e   : > { %1529 = vmatpush1.bf16.msra.mxu1 %v9036_v21  ;;  %835 = vmatprep.subr.bf16.mxu0 %v9041_v22  ;;  %v9125_v21 = vld [vmem:[%s13279_s1 + $0x42c] ss:$24 sps:$4 sm:$0xff]  }
  0x5f   : > { %1530 = vmatprep.subr.bf16.mxu1 %v9044_v23  ;;  %v9128_v22 = vld [vmem:[%s13279_s1 + $0x434] ss:$24 sps:$4 sm:$0xff]   ;;  %v9123_v23 = vld [vmem:[%s13279_s1 + $0x428] ss:$24 sps:$4 sm:$0xff]  }
  0x61   : > { %836 = vmatpush1.bf16.msra.mxu0 %v9039_v24  ;;  %v9126_v24 = vld [vmem:[%s13279_s1 + $0x430] ss:$24 sps:$4 sm:$0xff]  }
  0x62   : > { %1531 = vmatpush1.bf16.msra.mxu1 %v9042_v25  ;;  %837 = vmatprep.subr.bf16.mxu0 %v9047_v26  ;;  %v9131_v25 = vld [vmem:[%s13279_s1 + $0x3fc] ss:$24 sps:$4 sm:$0xff]   ;;  %v9129_v26 = vld [vmem:[%s13279_s1 + $0x3f8] ss:$24 sps:$4 sm:$0xff]  }
  0x63   : > { %1532 = vmatprep.subr.bf16.mxu1 %v9050_v27  ;;  %v9132_v27 = vld [vmem:[%s13279_s1 + $0x400] ss:$24 sps:$4 sm:$0xff]  }
  0x65   : > { %838 = vmatpush1.bf16.msra.mxu0 %v9045_v28  ;;  %v9137_v28 = vld [vmem:[%s13279_s1 + $0x3cc] ss:$24 sps:$4 sm:$0xff]  }
  0x66   : > { %1533 = vmatpush1.bf16.msra.mxu1 %v9048_v29  ;;  %839 = vmatprep.subr.bf16.mxu0 %v9053_v30  ;;  %v9140_v29 = vld [vmem:[%s13279_s1 + $0x3d4] ss:$24 sps:$4 sm:$0xff]   ;;  %v9135_v30 = vld [vmem:[%s13279_s1 + $0x3c8] ss:$24 sps:$4 sm:$0xff]  }
  0x67   : > { %1534 = vmatprep.subr.bf16.mxu1 %v9056_v31  ;;  %v9138_v31 = vld [vmem:[%s13279_s1 + $0x3d0] ss:$24 sps:$4 sm:$0xff]  }
  0x69   : > { %840 = vmatpush1.bf16.msra.mxu0 %v9051_v32  ;;  %v9143_v32 = vld [vmem:[%s13279_s1 + $0x39c] ss:$24 sps:$4 sm:$0xff]  }
  0x6a   : > { %1535 = vmatpush1.bf16.msra.mxu1 %v9054_v33  ;;  %841 = vmatprep.subr.bf16.mxu0 %v9059_v34  ;;  %v9146_v33 = vld [vmem:[%s13279_s1 + $0x3a4] ss:$24 sps:$4 sm:$0xff]   ;;  %v9141_v34 = vld [vmem:[%s13279_s1 + $0x398] ss:$24 sps:$4 sm:$0xff]  }
  0x6b   : > { %1536 = vmatprep.subr.bf16.mxu1 %v9062_v35  ;;  %v9144_v35 = vld [vmem:[%s13279_s1 + $0x3a0] ss:$24 sps:$4 sm:$0xff]  }
  0x6d   : > { %842 = vmatpush1.bf16.msra.mxu0 %v9057_v39  ;;  %v9147_v39 = vld [vmem:[%s13279_s1 + $0x368] ss:$24 sps:$4 sm:$0xff]  }
  0x6e   : > { %1537 = vmatpush1.bf16.msra.mxu1 %v9060_v40  ;;  %843 = vmatprep.subr.bf16.mxu0 %v9065_v41  ;;  %v9150_v40 = vld [vmem:[%s13279_s1 + $0x370] ss:$24 sps:$4 sm:$0xff]   ;;  %v9155_v41 = vld [vmem:[%s13279_s1 + $0x33c] ss:$24 sps:$4 sm:$0xff]  }
  0x6f   : > { %1538 = vmatprep.subr.bf16.mxu1 %v9068_v42  ;;  %v9158_v42 = vld [vmem:[%s13279_s1 + $0x344] ss:$24 sps:$4 sm:$0xff]  }
  0x71   : > { %844 = vmatpush1.bf16.msra.mxu0 %v9063_v44  ;;  %v9156_v44 = vld [vmem:[%s13279_s1 + $0x340] ss:$24 sps:$4 sm:$0xff]  }
  0x72   : > { %1539 = vmatpush1.bf16.msra.mxu1 %v9066_v45  ;;  %845 = vmatprep.subr.bf16.mxu0 %v9071_v46  ;;  %v9161_v45 = vld [vmem:[%s13279_s1 + $0x30c] ss:$24 sps:$4 sm:$0xff]  }
  0x73   : > { %1540 = vmatprep.subr.bf16.mxu1 %v9074_v47  ;;  %v9164_v46 = vld [vmem:[%s13279_s1 + $0x314] ss:$24 sps:$4 sm:$0xff]   ;;  %v9159_v47 = vld [vmem:[%s13279_s1 + $0x308] ss:$24 sps:$4 sm:$0xff]  }
  0x75   : > { %846 = vmatpush2.bf16.msra.mxu0 %v9069_v48  ;;  %v9162_v48 = vld [vmem:[%s13279_s1 + $0x310] ss:$24 sps:$4 sm:$0xff]  }
  0x76   : > { %1541 = vmatpush2.bf16.msra.mxu1 %v9072_v49  ;;  %847 = vmatprep.subr.bf16.mxu0 %v9077_v50  ;;  %v9167_v49 = vld [vmem:[%s13279_s1 + $0x5dc] ss:$24 sps:$4 sm:$0xff]  }
  0x77   : > { %1542 = vmatprep.subr.bf16.mxu1 %v9080_v52  ;;  %v9170_v50 = vld [vmem:[%s13279_s1 + $0x5e4] ss:$24 sps:$4 sm:$0xff]   ;;  %v9165_v52 = vld [vmem:[%s13279_s1 + $0x5d8] ss:$24 sps:$4 sm:$0xff]  }
  0x79   : > { %848 = vmatpush2.bf16.msra.mxu0 %v9075_v53  ;;  %v9168_v53 = vld [vmem:[%s13279_s1 + $0x5e0] ss:$24 sps:$4 sm:$0xff]  }
  0x7a   : > { %1543 = vmatpush2.bf16.msra.mxu1 %v9078_v54  ;;  %849 = vmatprep.subr.bf16.mxu0 %v9083_v55  ;;  %v9173_v54 = vld [vmem:[%s13279_s1 + $0x5ac] ss:$24 sps:$4 sm:$0xff]  }
  0x7b   : > { %1544 = vmatprep.subr.bf16.mxu1 %v9086_v56  ;;  %v9176_v55 = vld [vmem:[%s13279_s1 + $0x5b4] ss:$24 sps:$4 sm:$0xff]   ;;  %v9171_v56 = vld [vmem:[%s13279_s1 + $0x5a8] ss:$24 sps:$4 sm:$0xff]  }
  0x7d   : > { %850 = vmatpush2.bf16.msra.mxu0 %v9081_v57  ;;  %v9174_v57 = vld [vmem:[%s13279_s1 + $0x5b0] ss:$24 sps:$4 sm:$0xff]  }
  0x7e   : > { %1545 = vmatpush2.bf16.msra.mxu1 %v9084_v58  ;;  %851 = vmatprep.subr.bf16.mxu0 %v9089_v59  ;;  %v9179_v58 = vld [vmem:[%s13279_s1 + $0x57c] ss:$24 sps:$4 sm:$0xff]  }
  0x7f   : > { %1546 = vmatprep.subr.bf16.mxu1 %v9092_v60  ;;  %v9182_v59 = vld [vmem:[%s13279_s1 + $0x584] ss:$24 sps:$4 sm:$0xff]   ;;  %v9177_v60 = vld [vmem:[%s13279_s1 + $0x578] ss:$24 sps:$4 sm:$0xff]  }
  0x81   : > { %852 = vmatpush2.bf16.msra.mxu0 %v9087_v61  ;;  %v9180_v61 = vld [vmem:[%s13279_s1 + $0x580] ss:$24 sps:$4 sm:$0xff]  }
  0x82   : > { %1547 = vmatpush2.bf16.msra.mxu1 %v9090_v62  ;;  %853 = vmatprep.subr.bf16.mxu0 %v9095_v63  ;;  %v9185_v62 = vld [vmem:[%s13279_s1 + $0x54c] ss:$24 sps:$4 sm:$0xff]  }
  0x83   : > { %1548 = vmatprep.subr.bf16.mxu1 %v9098_v0  ;;  %v9188_v63 = vld [vmem:[%s13279_s1 + $0x554] ss:$24 sps:$4 sm:$0xff]   ;;  %v9183_v0 = vld [vmem:[%s13279_s1 + $0x548] ss:$24 sps:$4 sm:$0xff]  }
  0x85   : > { %854 = vmatpush2.bf16.msra.mxu0 %v9093_v1  ;;  %v9186_v1 = vld [vmem:[%s13279_s1 + $0x550] ss:$24 sps:$4 sm:$0xff]  }
  0x86   : > { %1549 = vmatpush2.bf16.msra.mxu1 %v9096_v2  ;;  %855 = vmatprep.subr.bf16.mxu0 %v9101_v3  ;;  %v9191_v2 = vld [vmem:[%s13279_s1 + $0x51c] ss:$24 sps:$4 sm:$0xff]  }
  0x87   : > { %1550 = vmatprep.subr.bf16.mxu1 %v9104_v4  ;;  %v9194_v3 = vld [vmem:[%s13279_s1 + $0x524] ss:$24 sps:$4 sm:$0xff]   ;;  %v9189_v4 = vld [vmem:[%s13279_s1 + $0x518] ss:$24 sps:$4 sm:$0xff]  }
  0x89   : > { %856 = vmatpush2.bf16.msra.mxu0 %v9099_v5  ;;  %v9192_v5 = vld [vmem:[%s13279_s1 + $0x520] ss:$24 sps:$4 sm:$0xff]  }
  0x8a   : > { %1551 = vmatpush2.bf16.msra.mxu1 %v9102_v6  ;;  %857 = vmatprep.subr.bf16.mxu0 %v9107_v7  ;;  %v9197_v6 = vld [vmem:[%s13279_s1 + $0x4ec] ss:$24 sps:$4 sm:$0xff]  }
  0x8b   : > { %1552 = vmatprep.subr.bf16.mxu1 %v9110_v8  ;;  %v9200_v7 = vld [vmem:[%s13279_s1 + $0x4f4] ss:$24 sps:$4 sm:$0xff]   ;;  %v9195_v8 = vld [vmem:[%s13279_s1 + $0x4e8] ss:$24 sps:$4 sm:$0xff]  }
  0x8d   : > { %858 = vmatpush2.bf16.msra.mxu0 %v9105_v9  ;;  %v9198_v9 = vld [vmem:[%s13279_s1 + $0x4f0] ss:$24 sps:$4 sm:$0xff]  }
  0x8e   : > { %1553 = vmatpush2.bf16.msra.mxu1 %v9108_v10  ;;  %859 = vmatprep.subr.bf16.mxu0 %v9113_v12  ;;  %v9203_v10 = vld [vmem:[%s13279_s1 + $0x4bc] ss:$24 sps:$4 sm:$0xff]  }
  0x8f   : > { %1554 = vmatprep.subr.bf16.mxu1 %v9116_v13  ;;  %v9206_v12 = vld [vmem:[%s13279_s1 + $0x4c4] ss:$24 sps:$4 sm:$0xff]   ;;  %v9201_v13 = vld [vmem:[%s13279_s1 + $0x4b8] ss:$24 sps:$4 sm:$0xff]  }
  0x91   : > { %860 = vmatpush2.bf16.msra.mxu0 %v9111_v14  ;;  %v9204_v14 = vld [vmem:[%s13279_s1 + $0x4c0] ss:$24 sps:$4 sm:$0xff]  }
  0x92   : > { %1555 = vmatpush2.bf16.msra.mxu1 %v9114_v15  ;;  %1565 = vmatprep.subr.bf16.mxu0 %v9119_v16  ;;  %v10948_v15 = vld.sshfl [vmem:[%s10490_s17] sm:$0x11 pattern:$0x75316420]  ;;  %v9209_v16 = vld [vmem:[%s13279_s1 + $0x48c] ss:$24 sps:$4 sm:$0xff]  }
  0x93   : > { %1606 = vmatprep.subr.bf16.mxu1 %v9122_v17  ;;  %v9212_v17 = vld [vmem:[%s13279_s1 + $0x494] ss:$24 sps:$4 sm:$0xff]  }
  0x94   : > { %862 = vmatmul.mubr.bf16.vlgmr.msra.gmra.mxu0 %v10560_v11  ;;  %v9134_v11 = vld [vmem:[%s13279_s1 + $0x404] ss:$24 sps:$4 sm:$0xff]  }
  0x95   : > { %1557 = vmatmul.mubr.bf16.vlgmr.msra.gmra.mxu1 %v10767_v18  ;;  %1566 = vmatpush1.bf16.msra.mxu0 %v9117_v19  ;;  %v1803_v19 = vcombine.high %v10948_v15, %v10948_v15 }
  0x96   : > { %1607 = vmatpush1.bf16.msra.mxu1 %v9120_v20  ;;  %1567 = vmatprep.subr.bf16.mxu0 %v9125_v21  ;;  %v9207_v20 = vld [vmem:[%s13279_s1 + $0x488] ss:$24 sps:$4 sm:$0xff]  }
  0x97   : > { %1608 = vmatprep.subr.bf16.mxu1 %v9128_v22  ;;  %1597 = vmatprep.mubr.bf16.mxu0 %v10654_v43  ;;  %v9210_v21 = vld [vmem:[%s13279_s1 + $0x490] ss:$24 sps:$4 sm:$0xff]   ;;  %v9215_v22 = vld [vmem:[%s13279_s1 + $0x754] ss:$24 sps:$4 sm:$0xff]  }
  0x98   : > { %1638 = vmatprep.mubr.bf16.mxu1 %v10654_v43  ;;  %v9153_v43 = vld [vmem:[%s13279_s1 + $0x338] ss:$24 sps:$4 sm:$0xff]  }
  0x99   : > { %1568 = vmatpush1.bf16.msra.mxu0 %v9123_v23  ;;  %v9218_v23 = vld [vmem:[%s13279_s1 + $0x75c] ss:$24 sps:$4 sm:$0xff]  }
  0x9a   : > { %1609 = vmatpush1.bf16.msra.mxu1 %v9126_v24  ;;  %1569 = vmatprep.subr.bf16.mxu0 %v9131_v25  ;;  %v1817_v24 = vrot.slane %v1803_v19, %v10495_v51  ;;  %v9213_v25 = vld [vmem:[%s13279_s1 + $0x750] ss:$24 sps:$4 sm:$0xff]  }
  0x9b   : > { %1610 = vmatprep.subr.bf16.mxu1 %v9134_v11  ;;  %v9216_v11 = vld [vmem:[%s13279_s1 + $0x758] ss:$24 sps:$4 sm:$0xff]   ;;  %v9294_v19 = vld [vmem:[%s13279_s1 + $0x7e8] ss:$24 sps:$4 sm:$0xff]  }
  0x9d   : > { %1570 = vmatpush1.bf16.msra.mxu0 %v9129_v26  ;;  %v9221_v26 = vld [vmem:[%s13279_s1 + $0x724] ss:$24 sps:$4 sm:$0xff]  }
  0x9e   : > { %1611 = vmatpush1.bf16.msra.mxu1 %v9132_v27  ;;  %1571 = vmatprep.subr.bf16.mxu0 %v9137_v28  ;;  %v9224_v27 = vld [vmem:[%s13279_s1 + $0x72c] ss:$24 sps:$4 sm:$0xff]   ;;  %v10983_v28 = vshrl.u32 %v1817_v24, 16 }
  0x9f   : > { %1612 = vmatprep.subr.bf16.mxu1 %v9140_v29  ;;  %v9219_v29 = vld [vmem:[%s13279_s1 + $0x720] ss:$24 sps:$4 sm:$0xff]   ;;  %v9305_v24 = vld [vmem:[%s13279_s1 + $0x784] ss:$24 sps:$4 sm:$0xff]  }
  0xa1   : > { %1572 = vmatpush1.bf16.msra.mxu0 %v9135_v30  ;;  %v9222_v30 = vld [vmem:[%s13279_s1 + $0x728] ss:$24 sps:$4 sm:$0xff]  }
  0xa2   : > { %1613 = vmatpush1.bf16.msra.mxu1 %v9138_v31  ;;  %1573 = vmatprep.subr.bf16.mxu0 %v9143_v32  ;;  %v9227_v31 = vld [vmem:[%s13279_s1 + $0x6f4] ss:$24 sps:$4 sm:$0xff]  }
  0xa3   : > { %1614 = vmatprep.subr.bf16.mxu1 %v9146_v33  ;;  %v10284_v33 = vmov 0.0  }
  0xa4   : > { %143 = vst.msk [vmem:[#allocation2] sm:$0x3f] %vm10997_vm0, %v10284_v33  ;;  %v9309_v33 = vld [vmem:[%s13279_s1 + $0x760] ss:$24 sps:$4 sm:$0xff]  }
  0xa5   : > { %1574 = vmatpush1.bf16.msra.mxu0 %v9141_v34  ;;  %v9228_v34 = vld [vmem:[%s13279_s1 + $0x6f8] ss:$24 sps:$4 sm:$0xff]  }
  0xa6   : > { %1615 = vmatpush1.bf16.msra.mxu1 %v9144_v35  ;;  %1575 = vmatprep.subr.bf16.mxu0 %v9149_v36  ;;  %v9233_v35 = vld [vmem:[%s13279_s1 + $0x6c4] ss:$24 sps:$4 sm:$0xff]  }
  0xa7   : > { %1616 = vmatprep.subr.bf16.mxu1 %v9152_v37  ;;  %v9236_v36 = vld [vmem:[%s13279_s1 + $0x6cc] ss:$24 sps:$4 sm:$0xff]   ;;  %v9231_v37 = vld [vmem:[%s13279_s1 + $0x6c0] ss:$24 sps:$4 sm:$0xff]  }
  0xa9   : > { %1576 = vmatpush1.bf16.msra.mxu0 %v9147_v39  ;;  %v9234_v39 = vld [vmem:[%s13279_s1 + $0x6c8] ss:$24 sps:$4 sm:$0xff]  }
  0xaa   : > { %1617 = vmatpush1.bf16.msra.mxu1 %v9150_v40  ;;  %1577 = vmatprep.subr.bf16.mxu0 %v9155_v41  ;;  %v9239_v40 = vld [vmem:[%s13279_s1 + $0x694] ss:$24 sps:$4 sm:$0xff]  }
  0xab   : > { %1618 = vmatprep.subr.bf16.mxu1 %v9158_v42  ;;  %v9242_v41 = vld [vmem:[%s13279_s1 + $0x69c] ss:$24 sps:$4 sm:$0xff]   ;;  %v9237_v42 = vld [vmem:[%s13279_s1 + $0x690] ss:$24 sps:$4 sm:$0xff]  }
  0xad   : > { %1578 = vmatpush1.bf16.msra.mxu0 %v9153_v43  ;;  %v9240_v43 = vld [vmem:[%s13279_s1 + $0x698] ss:$24 sps:$4 sm:$0xff]  }
  0xae   : > { %1619 = vmatpush1.bf16.msra.mxu1 %v9156_v44  ;;  %1579 = vmatprep.subr.bf16.mxu0 %v9161_v45  ;;  %v9245_v44 = vld [vmem:[%s13279_s1 + $0x664] ss:$24 sps:$4 sm:$0xff]  }
  0xaf   : > { %1620 = vmatprep.subr.bf16.mxu1 %v9164_v46  ;;  %v9248_v45 = vld [vmem:[%s13279_s1 + $0x66c] ss:$24 sps:$4 sm:$0xff]   ;;  %v9243_v46 = vld [vmem:[%s13279_s1 + $0x660] ss:$24 sps:$4 sm:$0xff]  }
  0xb1   : > { %1580 = vmatpush1.bf16.msra.mxu0 %v9159_v47  ;;  %v9246_v47 = vld [vmem:[%s13279_s1 + $0x668] ss:$24 sps:$4 sm:$0xff]  }
  0xb2   : > { %1621 = vmatpush1.bf16.msra.mxu1 %v9162_v48  ;;  %1581 = vmatprep.subr.bf16.mxu0 %v9167_v49  ;;  %v9251_v48 = vld [vmem:[%s13279_s1 + $0x634] ss:$24 sps:$4 sm:$0xff]  }
  0xb3   : > { %1622 = vmatprep.subr.bf16.mxu1 %v9170_v50  ;;  %v9254_v49 = vld [vmem:[%s13279_s1 + $0x63c] ss:$24 sps:$4 sm:$0xff]   ;;  %v9249_v50 = vld [vmem:[%s13279_s1 + $0x630] ss:$24 sps:$4 sm:$0xff]  }
  0xb5   : > { %1582 = vmatpush2.bf16.msra.mxu0 %v9165_v52  ;;  %v9252_v52 = vld [vmem:[%s13279_s1 + $0x638] ss:$24 sps:$4 sm:$0xff]  }
  0xb6   : > { %1623 = vmatpush2.bf16.msra.mxu1 %v9168_v53  ;;  %1583 = vmatprep.subr.bf16.mxu0 %v9173_v54  ;;  %v9257_v53 = vld [vmem:[%s13279_s1 + $0x604] ss:$24 sps:$4 sm:$0xff]  }
  0xb7   : > { %1624 = vmatprep.subr.bf16.mxu1 %v9176_v55  ;;  %v9260_v54 = vld [vmem:[%s13279_s1 + $0x60c] ss:$24 sps:$4 sm:$0xff]   ;;  %v9255_v55 = vld [vmem:[%s13279_s1 + $0x600] ss:$24 sps:$4 sm:$0xff]  }
  0xb9   : > { %1584 = vmatpush2.bf16.msra.mxu0 %v9171_v56  ;;  %v9258_v56 = vld [vmem:[%s13279_s1 + $0x608] ss:$24 sps:$4 sm:$0xff]  }
  0xba   : > { %1625 = vmatpush2.bf16.msra.mxu1 %v9174_v57  ;;  %1585 = vmatprep.subr.bf16.mxu0 %v9179_v58  ;;  %v9263_v57 = vld [vmem:[%s13279_s1 + $0x8d4] ss:$24 sps:$4 sm:$0xff]  }
  0xbb   : > { %1626 = vmatprep.subr.bf16.mxu1 %v9182_v59  ;;  %v9266_v58 = vld [vmem:[%s13279_s1 + $0x8dc] ss:$24 sps:$4 sm:$0xff]   ;;  %v9261_v59 = vld [vmem:[%s13279_s1 + $0x8d0] ss:$24 sps:$4 sm:$0xff]  }
  0xbd   : > { %1586 = vmatpush2.bf16.msra.mxu0 %v9177_v60  ;;  %v9264_v60 = vld [vmem:[%s13279_s1 + $0x8d8] ss:$24 sps:$4 sm:$0xff]  }
  0xbe   : > { %1627 = vmatpush2.bf16.msra.mxu1 %v9180_v61  ;;  %1587 = vmatprep.subr.bf16.mxu0 %v9185_v62  ;;  %v9269_v61 = vld [vmem:[%s13279_s1 + $0x8a4] ss:$24 sps:$4 sm:$0xff]  }
  0xbf   : > { %1628 = vmatprep.subr.bf16.mxu1 %v9188_v63  ;;  %v9272_v62 = vld [vmem:[%s13279_s1 + $0x8ac] ss:$24 sps:$4 sm:$0xff]   ;;  %v9267_v63 = vld [vmem:[%s13279_s1 + $0x8a0] ss:$24 sps:$4 sm:$0xff]  }
  0xc1   : > { %1588 = vmatpush2.bf16.msra.mxu0 %v9183_v0  ;;  %v9270_v0 = vld [vmem:[%s13279_s1 + $0x8a8] ss:$24 sps:$4 sm:$0xff]  }
  0xc2   : > { %1629 = vmatpush2.bf16.msra.mxu1 %v9186_v1  ;;  %1589 = vmatprep.subr.bf16.mxu0 %v9191_v2  ;;  %v9275_v1 = vld [vmem:[%s13279_s1 + $0x874] ss:$24 sps:$4 sm:$0xff]  }
  0xc3   : > { %1630 = vmatprep.subr.bf16.mxu1 %v9194_v3  ;;  %v9278_v2 = vld [vmem:[%s13279_s1 + $0x87c] ss:$24 sps:$4 sm:$0xff]   ;;  %v9273_v3 = vld [vmem:[%s13279_s1 + $0x870] ss:$24 sps:$4 sm:$0xff]  }
  0xc5   : > { %1590 = vmatpush2.bf16.msra.mxu0 %v9189_v4  ;;  %v9276_v4 = vld [vmem:[%s13279_s1 + $0x878] ss:$24 sps:$4 sm:$0xff]  }
  0xc6   : > { %1631 = vmatpush2.bf16.msra.mxu1 %v9192_v5  ;;  %1591 = vmatprep.subr.bf16.mxu0 %v9197_v6  ;;  %v9281_v5 = vld [vmem:[%s13279_s1 + $0x844] ss:$24 sps:$4 sm:$0xff]  }
  0xc7   : > { %1632 = vmatprep.subr.bf16.mxu1 %v9200_v7  ;;  %v9284_v6 = vld [vmem:[%s13279_s1 + $0x84c] ss:$24 sps:$4 sm:$0xff]   ;;  %v9279_v7 = vld [vmem:[%s13279_s1 + $0x840] ss:$24 sps:$4 sm:$0xff]  }
  0xc9   : > { %1592 = vmatpush2.bf16.msra.mxu0 %v9195_v8  ;;  %v9282_v8 = vld [vmem:[%s13279_s1 + $0x848] ss:$24 sps:$4 sm:$0xff]  }
  0xca   : > { %1633 = vmatpush2.bf16.msra.mxu1 %v9198_v9  ;;  %1593 = vmatprep.subr.bf16.mxu0 %v9203_v10  ;;  %v9287_v9 = vld [vmem:[%s13279_s1 + $0x814] ss:$24 sps:$4 sm:$0xff]  }
  0xcb   : > { %1634 = vmatprep.subr.bf16.mxu1 %v9206_v12  ;;  %v9290_v10 = vld [vmem:[%s13279_s1 + $0x81c] ss:$24 sps:$4 sm:$0xff]   ;;  %v9285_v12 = vld [vmem:[%s13279_s1 + $0x810] ss:$24 sps:$4 sm:$0xff]  }
  0xcd   : > { %1594 = vmatpush2.bf16.msra.mxu0 %v9201_v13  ;;  %v9288_v13 = vld [vmem:[%s13279_s1 + $0x818] ss:$24 sps:$4 sm:$0xff]  }
  0xce   : > { %1635 = vmatpush2.bf16.msra.mxu1 %v9204_v14  ;;  %1595 = vmatprep.subr.bf16.mxu0 %v9209_v16  ;;  %v9293_v14 = vld [vmem:[%s13279_s1 + $0x7e4] ss:$24 sps:$4 sm:$0xff]  }
  0xcf   : > { %1636 = vmatprep.subr.bf16.mxu1 %v9212_v17  ;;  %v9296_v16 = vld [vmem:[%s13279_s1 + $0x7ec] ss:$24 sps:$4 sm:$0xff]   ;;  %v9291_v17 = vld [vmem:[%s13279_s1 + $0x7e0] ss:$24 sps:$4 sm:$0xff]  }
  0xd1   : > { %1596 = vmatpush2.bf16.msra.mxu0 %v9207_v20  ;;  %v9299_v20 = vld [vmem:[%s13279_s1 + $0x7b4] ss:$24 sps:$4 sm:$0xff]  }
  0xd2   : > { %1637 = vmatpush2.bf16.msra.mxu1 %v9210_v21  ;;  %2306 = vmatprep.subr.bf16.mxu0 %v9215_v22  ;;  %v9302_v21 = vld [vmem:[%s13279_s1 + $0x7bc] ss:$24 sps:$4 sm:$0xff]   ;;  %v9297_v22 = vld [vmem:[%s13279_s1 + $0x7b0] ss:$24 sps:$4 sm:$0xff]  }
  0xd3   : > { %2347 = vmatprep.subr.bf16.mxu1 %v9218_v23  ;;  %v9300_v23 = vld [vmem:[%s13279_s1 + $0x7b8] ss:$24 sps:$4 sm:$0xff]  }
  0xd4   : > { %1598 = vmatmul.mubr.bf16.vlgmr.msra.gmra.mxu0 %v10767_v18 }
  0xd5   : > { %1639 = vmatmul.mubr.bf16.vlgmr.msra.gmra.mxu1 %v10767_v18  ;;  %2307 = vmatpush1.bf16.msra.mxu0 %v9213_v25  ;;  %v9230_v18 = vld [vmem:[%s13279_s1 + $0x6fc] ss:$24 sps:$4 sm:$0xff]   ;;  %v9308_v25 = vld [vmem:[%s13279_s1 + $0x78c] ss:$24 sps:$4 sm:$0xff]  }
  0xd6   : > { %2348 = vmatpush1.bf16.msra.mxu1 %v9216_v11  ;;  %2308 = vmatprep.subr.bf16.mxu0 %v9221_v26  ;;  %v1810_v11 = vrot.slane %v10948_v15, %v10495_v51  ;;  %v11167_v26 = vld.sshfl [vmem:[%s10490_s17 + $0x8] sm:$0x11 pattern:$0x75316420]  ;;  %v9314_v15 = vld [vmem:[%s13279_s1 + $0xa54] ss:$24 sps:$4 sm:$0xff]  }
  0xd7   : > { %2349 = vmatprep.subr.bf16.mxu1 %v9224_v27  ;;  %2338 = vmatprep.mubr.bf16.mxu0 %v10983_v28  ;;  %v9303_v27 = vld [vmem:[%s13279_s1 + $0x780] ss:$24 sps:$4 sm:$0xff]  }
  0xd8   : > { %2379 = vmatprep.mubr.bf16.mxu1 %v10983_v28 }
  0xd9   : > { %2309 = vmatpush1.bf16.msra.mxu0 %v9219_v29  ;;  %v9306_v29 = vld [vmem:[%s13279_s1 + $0x788] ss:$24 sps:$4 sm:$0xff]  }
  0xda   : > { %2350 = vmatpush1.bf16.msra.mxu1 %v9222_v30  ;;  %2310 = vmatprep.subr.bf16.mxu0 %v9227_v31  ;;  %v9311_v30 = vld [vmem:[%s13279_s1 + $0x764] ss:$24 sps:$4 sm:$0xff]   ;;  %v2586_v31 = vcombine.high %v11167_v26, %v11167_v26 }
  0xdb   : > { %2351 = vmatprep.subr.bf16.mxu1 %v9230_v18  ;;  %v11183_v18 = vshrl.u32 %v1810_v11, 16  ;;  %v9369_v11 = vld [vmem:[%s13279_s1 + $0x880] ss:$24 sps:$4 sm:$0xff]  }
  0xdd   : > { %2311 = vmatpush1.bf16.msra.mxu0 %v9225_v38  ;;  %v9312_v38 = vld [vmem:[%s13279_s1 + $0xa50] ss:$24 sps:$4 sm:$0xff]  }
  0xde   : > { %2352 = vmatpush1.bf16.msra.mxu1 %v9228_v34  ;;  %2312 = vmatprep.subr.bf16.mxu0 %v9233_v35  ;;  %v9317_v34 = vld [vmem:[%s13279_s1 + $0x734] ss:$24 sps:$4 sm:$0xff]   ;;  %v9320_v35 = vld [vmem:[%s13279_s1 + $0xa24] ss:$24 sps:$4 sm:$0xff]  }
  0xdf   : > { %2353 = vmatprep.subr.bf16.mxu1 %v9236_v36  ;;  %v11198_v36 = vrot.slane %v2586_v31, %v10495_v51  ;;  %v9378_v31 = vld [vmem:[%s13279_s1 + $0xb40] ss:$24 sps:$4 sm:$0xff]  }
  0xe1   : > { %2313 = vmatpush1.bf16.msra.mxu0 %v9231_v37 }
  0xe2   : > { %2354 = vmatpush1.bf16.msra.mxu1 %v9234_v39  ;;  %2314 = vmatprep.subr.bf16.mxu0 %v9239_v40  ;;  %v9315_v40 = vld [vmem:[%s13279_s1 + $0x730] ss:$24 sps:$4 sm:$0xff]  }
  0xe3   : > { %2355 = vmatprep.subr.bf16.mxu1 %v9242_v41  ;;  %v9318_v41 = vld [vmem:[%s13279_s1 + $0xa20] ss:$24 sps:$4 sm:$0xff]  }
  0xe5   : > { %2315 = vmatpush1.bf16.msra.mxu0 %v9237_v42  ;;  %v9323_v42 = vld [vmem:[%s13279_s1 + $0x704] ss:$24 sps:$4 sm:$0xff]  }
  0xe6   : > { %2356 = vmatpush1.bf16.msra.mxu1 %v9240_v43  ;;  %2316 = vmatprep.subr.bf16.mxu0 %v9245_v44 }
  0xe7   : > { %2357 = vmatprep.subr.bf16.mxu1 %v9248_v45  ;;  %v9326_v45 = vld [vmem:[%s13279_s1 + $0x9f4] ss:$24 sps:$4 sm:$0xff]  }
  0xe9   : > { %2317 = vmatpush1.bf16.msra.mxu0 %v9243_v46 }
  0xea   : > { %2358 = vmatpush1.bf16.msra.mxu1 %v9246_v47  ;;  %2318 = vmatprep.subr.bf16.mxu0 %v9251_v48  ;;  %v9321_v48 = vld [vmem:[%s13279_s1 + $0x700] ss:$24 sps:$4 sm:$0xff]  }
  0xeb   : > { %2359 = vmatprep.subr.bf16.mxu1 %v9254_v49 }
  0xed   : > { %2319 = vmatpush1.bf16.msra.mxu0 %v9249_v50  ;;  %v9324_v50 = vld [vmem:[%s13279_s1 + $0x9f0] ss:$24 sps:$4 sm:$0xff]  }
  0xee   : > { %2360 = vmatpush1.bf16.msra.mxu1 %v9252_v52  ;;  %2320 = vmatprep.subr.bf16.mxu0 %v9257_v53 }
  0xef   : > { %2361 = vmatprep.subr.bf16.mxu1 %v9260_v54 }
  0xf1   : > { %2321 = vmatpush1.bf16.msra.mxu0 %v9255_v55 }
  0xf2   : > { %2362 = vmatpush1.bf16.msra.mxu1 %v9258_v56  ;;  %2322 = vmatprep.subr.bf16.mxu0 %v9263_v57  ;;  %v9332_v56 = vld [vmem:[%s13279_s1 + $0x9c4] ss:$24 sps:$4 sm:$0xff]  }
  0xf3   : > { %2363 = vmatprep.subr.bf16.mxu1 %v9266_v58 }
  0xf5   : > { %2323 = vmatpush2.bf16.msra.mxu0 %v9261_v59  ;;  %v9327_v59 = vld [vmem:[%s13279_s1 + $0x6d0] ss:$24 sps:$4 sm:$0xff]  }
  0xf6   : > { %2364 = vmatpush2.bf16.msra.mxu1 %v9264_v60  ;;  %2324 = vmatprep.subr.bf16.mxu0 %v9269_v61  ;;  %v9330_v60 = vld [vmem:[%s13279_s1 + $0x9c0] ss:$24 sps:$4 sm:$0xff]   ;;  %v9335_v61 = vld [vmem:[%s13279_s1 + $0x6a4] ss:$24 sps:$4 sm:$0xff]  }
  0xf7   : > { %2365 = vmatprep.subr.bf16.mxu1 %v9272_v62  ;;  %v9338_v62 = vld [vmem:[%s13279_s1 + $0x994] ss:$24 sps:$4 sm:$0xff]  }
  0xf9   : > { %2325 = vmatpush2.bf16.msra.mxu0 %v9267_v63  ;;  %v9333_v63 = vld [vmem:[%s13279_s1 + $0x6a0] ss:$24 sps:$4 sm:$0xff]  }
  0xfa   : > { %2366 = vmatpush2.bf16.msra.mxu1 %v9270_v0  ;;  %2326 = vmatprep.subr.bf16.mxu0 %v9275_v1  ;;  %v9336_v0 = vld [vmem:[%s13279_s1 + $0x990] ss:$24 sps:$4 sm:$0xff]   ;;  %v9341_v1 = vld [vmem:[%s13279_s1 + $0x674] ss:$24 sps:$4 sm:$0xff]  }
  0xfb   : > { %2367 = vmatprep.subr.bf16.mxu1 %v9278_v2  ;;  %v9344_v2 = vld [vmem:[%s13279_s1 + $0x964] ss:$24 sps:$4 sm:$0xff]  }
  0xfd   : > { %2327 = vmatpush2.bf16.msra.mxu0 %v9273_v3  ;;  %v9339_v3 = vld [vmem:[%s13279_s1 + $0x670] ss:$24 sps:$4 sm:$0xff]  }
  0xfe   : > { %2368 = vmatpush2.bf16.msra.mxu1 %v9276_v4  ;;  %2328 = vmatprep.subr.bf16.mxu0 %v9281_v5  ;;  %v9342_v4 = vld [vmem:[%s13279_s1 + $0x960] ss:$24 sps:$4 sm:$0xff]   ;;  %v9347_v5 = vld [vmem:[%s13279_s1 + $0x644] ss:$24 sps:$4 sm:$0xff]  }
  0xff   : > { %2369 = vmatprep.subr.bf16.mxu1 %v9284_v6  ;;  %v9350_v6 = vld [vmem:[%s13279_s1 + $0x934] ss:$24 sps:$4 sm:$0xff]  }
 0x101   : > { %2329 = vmatpush2.bf16.msra.mxu0 %v9279_v7  ;;  %v9345_v7 = vld [vmem:[%s13279_s1 + $0x640] ss:$24 sps:$4 sm:$0xff]  }
 0x102   : > { %2370 = vmatpush2.bf16.msra.mxu1 %v9282_v8  ;;  %2330 = vmatprep.subr.bf16.mxu0 %v9287_v9  ;;  %v9348_v8 = vld [vmem:[%s13279_s1 + $0x930] ss:$24 sps:$4 sm:$0xff]   ;;  %v9353_v9 = vld [vmem:[%s13279_s1 + $0x614] ss:$24 sps:$4 sm:$0xff]  }
 0x103   : > { %2371 = vmatprep.subr.bf16.mxu1 %v9290_v10  ;;  %v9356_v10 = vld [vmem:[%s13279_s1 + $0x904] ss:$24 sps:$4 sm:$0xff]  }
 0x105   : > { %2331 = vmatpush2.bf16.msra.mxu0 %v9285_v12  ;;  %v9351_v12 = vld [vmem:[%s13279_s1 + $0x610] ss:$24 sps:$4 sm:$0xff]  }
 0x106   : > { %2372 = vmatpush2.bf16.msra.mxu1 %v9288_v13  ;;  %2332 = vmatprep.subr.bf16.mxu0 %v9293_v14  ;;  %v9354_v13 = vld [vmem:[%s13279_s1 + $0x900] ss:$24 sps:$4 sm:$0xff]   ;;  %v9359_v14 = vld [vmem:[%s13279_s1 + $0x8e4] ss:$24 sps:$4 sm:$0xff]  }
 0x107   : > { %2373 = vmatprep.subr.bf16.mxu1 %v9296_v16  ;;  %v9362_v16 = vld [vmem:[%s13279_s1 + $0xbd4] ss:$24 sps:$4 sm:$0xff]  }
 0x109   : > { %2333 = vmatpush2.bf16.msra.mxu0 %v9291_v17  ;;  %v9357_v17 = vld [vmem:[%s13279_s1 + $0x8e0] ss:$24 sps:$4 sm:$0xff]  }
 0x10a   : > { %2374 = vmatpush2.bf16.msra.mxu1 %v9294_v19  ;;  %2334 = vmatprep.subr.bf16.mxu0 %v9299_v20  ;;  %v9360_v19 = vld [vmem:[%s13279_s1 + $0xbd0] ss:$24 sps:$4 sm:$0xff]   ;;  %v9365_v20 = vld [vmem:[%s13279_s1 + $0x8b4] ss:$24 sps:$4 sm:$0xff]  }
 0x10b   : > { %2375 = vmatprep.subr.bf16.mxu1 %v9302_v21  ;;  %v9368_v21 = vld [vmem:[%s13279_s1 + $0xba4] ss:$24 sps:$4 sm:$0xff]  }
 0x10d   : > { %2335 = vmatpush2.bf16.msra.mxu0 %v9297_v22  ;;  %v9363_v22 = vld [vmem:[%s13279_s1 + $0x8b0] ss:$24 sps:$4 sm:$0xff]  }
 0x10e   : > { %2376 = vmatpush2.bf16.msra.mxu1 %v9300_v23  ;;  %2336 = vmatprep.subr.bf16.mxu0 %v9305_v24  ;;  %v9366_v23 = vld [vmem:[%s13279_s1 + $0xba0] ss:$24 sps:$4 sm:$0xff]   ;;  %v9371_v24 = vld [vmem:[%s13279_s1 + $0x884] ss:$24 sps:$4 sm:$0xff]  }
 0x10f   : > { %2377 = vmatprep.subr.bf16.mxu1 %v9308_v25  ;;  %v9374_v25 = vld [vmem:[%s13279_s1 + $0xb74] ss:$24 sps:$4 sm:$0xff]  }
 0x111   : > { %2337 = vmatpush2.bf16.msra.mxu0 %v9303_v27  ;;  %v9372_v27 = vld [vmem:[%s13279_s1 + $0xb70] ss:$24 sps:$4 sm:$0xff]  }
 0x112   : > { %2378 = vmatpush2.bf16.msra.mxu1 %v9306_v29  ;;  %2388 = vmatprep.subr.bf16.mxu0 %v9311_v30  ;;  %v9377_v29 = vld [vmem:[%s13279_s1 + $0x854] ss:$24 sps:$4 sm:$0xff]   ;;  %v9380_v30 = vld [vmem:[%s13279_s1 + $0xb44] ss:$24 sps:$4 sm:$0xff]  }
 0x113   : > { %3083 = vmatprep.subr.bf16.mxu1 %v9314_v15  ;;  %v9375_v15 = vld [vmem:[%s13279_s1 + $0x850] ss:$24 sps:$4 sm:$0xff]  }
 0x114   : > { %v781_v37 = vpop.f32.mrf.mxu0  ;;  %2339 = vmatmul.mubr.bf16.vlgmr.msra.gmra.mxu0 %v11183_v18 }
 0x115   : > { %v822_v39 = vpop.f32.mrf.mxu1  ;;  %2380 = vmatmul.mubr.bf16.vlgmr.msra.gmra.mxu1 %v11183_v18  ;;  %2389 = vmatpush1.bf16.msra.mxu0 %v9309_v33  ;;  %v9383_v33 = vld [vmem:[%s13279_s1 + $0x824] ss:$24 sps:$4 sm:$0xff]  }
 0x116   : > { %3084 = vmatpush1.bf16.msra.mxu1 %v9312_v38  ;;  %v783_v43 = vpop.f32.mrf.mxu0  ;;  %2390 = vmatprep.subr.bf16.mxu0 %v9317_v34  ;;  %v9386_v38 = vld [vmem:[%s13279_s1 + $0xb14] ss:$24 sps:$4 sm:$0xff]   ;;  %v9381_v34 = vld [vmem:[%s13279_s1 + $0x820] ss:$24 sps:$4 sm:$0xff]  }
 0x117   : > { %v824_v44 = vpop.f32.mrf.mxu1  ;;  %3085 = vmatprep.subr.bf16.mxu1 %v9320_v35  ;;  %v876_v46 = vcombine.low %v781_v37, %v783_v43  ;;  %2420 = vmatprep.mubr.bf16.mxu0 %v10983_v28  ;;  %v9329_v28 = vld [vmem:[%s13279_s1 + $0x6d4] ss:$24 sps:$4 sm:$0xff]   ;;  %v9384_v35 = vld [vmem:[%s13279_s1 + $0xb10] ss:$24 sps:$4 sm:$0xff]  }
 0x118   : > { %v877_v47 = vcombine.low %v822_v39, %v824_v44  ;;  %3115 = vmatprep.mubr.bf16.mxu1 %v11198_v36  ;;  %v785_v49 = vpop.f32.mrf.mxu0  ;;  %v9389_v37 = vld [vmem:[%s13279_s1 + $0x7f4] ss:$24 sps:$4 sm:$0xff]   ;;  %v9392_v39 = vld [vmem:[%s13279_s1 + $0xae4] ss:$24 sps:$4 sm:$0xff]   ;;  %v9393_v44 = vld [vmem:[%s13279_s1 + $0x7c0] ss:$24 sps:$4 sm:$0xff]  }
 0x119   : > { %v826_v52 = vpop.f32.mrf.mxu1  ;;  %v11223_v53 = vrot.slane %v876_v46, %v10495_v51  ;;  %2391 = vmatpush1.bf16.msra.mxu0 %v9315_v40  ;;  %v9387_v40 = vld [vmem:[%s13279_s1 + $0x7f0] ss:$24 sps:$4 sm:$0xff]   ;;  %v9398_v43 = vld [vmem:[%s13279_s1 + $0xab4] ss:$24 sps:$4 sm:$0xff]   ;;  %v9402_v49 = vld [vmem:[%s13279_s1 + $0xa80] ss:$24 sps:$4 sm:$0xff]  }
 0x11a   : > { %v11226_v54 = vrot.slane %v877_v47, %v10495_v51  ;;  %3086 = vmatpush1.bf16.msra.mxu1 %v9318_v41  ;;  %v786_v55 = vpop.f32.mrf.mxu0  ;;  %2392 = vmatprep.subr.bf16.mxu0 %v9323_v42  ;;  %v9390_v41 = vld [vmem:[%s13279_s1 + $0xae0] ss:$24 sps:$4 sm:$0xff]   ;;  %v9395_v42 = vld [vmem:[%s13279_s1 + $0x7c4] ss:$24 sps:$4 sm:$0xff]   ;;  %v9401_v46 = vld [vmem:[%s13279_s1 + $0x794] ss:$24 sps:$4 sm:$0xff]  }
 0x11b   : > { %3087 = vmatprep.subr.bf16.mxu1 %v9326_v45  ;;  %v827_v57 = vpop.f32.mrf.mxu1  ;;  %v9396_v45 = vld [vmem:[%s13279_s1 + $0xab0] ss:$24 sps:$4 sm:$0xff]   ;;  %v9404_v47 = vld [vmem:[%s13279_s1 + $0xa84] ss:$24 sps:$4 sm:$0xff]  }
 0x11c   : > { %v900_v58 = vcombine.low %v11223_v53, %v11226_v54  ;;  %v9410_v52 = vld [vmem:[%s13279_s1 + $0xa64] ss:$24 sps:$4 sm:$0xff]   ;;  %v9405_v55 = vld [vmem:[%s13279_s1 + $0xa58] ss:$24 sps:$4 sm:$0xff]  }
 0x11d   : > { %2393 = vmatpush1.bf16.msra.mxu0 %v9321_v48  ;;  %v9399_v48 = vld [vmem:[%s13279_s1 + $0x790] ss:$24 sps:$4 sm:$0xff]   ;;  %v9413_v57 = vld [vmem:[%s13279_s1 + $0xa2c] ss:$24 sps:$4 sm:$0xff]   ;;  %v9431_v53 = vld [vmem:[%s13279_s1 + $0x99c] ss:$24 sps:$4 sm:$0xff]  }
 0x11e   : > { %3088 = vmatpush1.bf16.msra.mxu1 %v9324_v50  ;;  %2394 = vmatprep.subr.bf16.mxu0 %v9329_v28  ;;  %v9407_v50 = vld [vmem:[%s13279_s1 + $0xa5c] ss:$24 sps:$4 sm:$0xff]   ;;  %v9408_v28 = vld [vmem:[%s13279_s1 + $0xa60] ss:$24 sps:$4 sm:$0xff]  }
 0x11f   : > { %3089 = vmatprep.subr.bf16.mxu1 %v9332_v56  ;;  %v11400_v56 = vrot.slane %v11167_v26, %v10495_v51  ;;  %v9414_v26 = vld [vmem:[%s13279_s1 + $0xa30] ss:$24 sps:$4 sm:$0xff]   ;;  %v9434_v54 = vld [vmem:[%s13279_s1 + $0x9a4] ss:$24 sps:$4 sm:$0xff]  }
 0x121   : > { %2395 = vmatpush1.bf16.msra.mxu0 %v9327_v59  ;;  %v9416_v59 = vld [vmem:[%s13279_s1 + $0xa34] ss:$24 sps:$4 sm:$0xff]  }
 0x122   : > { %3090 = vmatpush1.bf16.msra.mxu1 %v9330_v60  ;;  %2396 = vmatprep.subr.bf16.mxu0 %v9335_v61  ;;  %v9411_v60 = vld [vmem:[%s13279_s1 + $0xa28] ss:$24 sps:$4 sm:$0xff]  }
 0x123   : > { %3091 = vmatprep.subr.bf16.mxu1 %v9338_v62 }
 0x125   : > { %2397 = vmatpush1.bf16.msra.mxu0 %v9333_v63 }
 0x126   : > { %3092 = vmatpush1.bf16.msra.mxu1 %v9336_v0  ;;  %2398 = vmatprep.subr.bf16.mxu0 %v9341_v1  ;;  %v9419_v0 = vld [vmem:[%s13279_s1 + $0x9fc] ss:$24 sps:$4 sm:$0xff]  }
 0x127   : > { %3093 = vmatprep.subr.bf16.mxu1 %v9344_v2  ;;  %v9422_v1 = vld [vmem:[%s13279_s1 + $0xa04] ss:$24 sps:$4 sm:$0xff]  }
 0x129   : > { %2399 = vmatpush1.bf16.msra.mxu0 %v9339_v3  ;;  %v9417_v3 = vld [vmem:[%s13279_s1 + $0x9f8] ss:$24 sps:$4 sm:$0xff]  }
 0x12a   : > { %3094 = vmatpush1.bf16.msra.mxu1 %v9342_v4  ;;  %2400 = vmatprep.subr.bf16.mxu0 %v9347_v5  ;;  %v9420_v4 = vld [vmem:[%s13279_s1 + $0xa00] ss:$24 sps:$4 sm:$0xff]  }
 0x12b   : > { %3095 = vmatprep.subr.bf16.mxu1 %v9350_v6 }
 0x12d   : > { %2401 = vmatpush1.bf16.msra.mxu0 %v9345_v7 }
 0x12e   : > { %3096 = vmatpush1.bf16.msra.mxu1 %v9348_v8  ;;  %2402 = vmatprep.subr.bf16.mxu0 %v9353_v9 }
 0x12f   : > { %3097 = vmatprep.subr.bf16.mxu1 %v9356_v10  ;;  %v9425_v10 = vld [vmem:[%s13279_s1 + $0x9cc] ss:$24 sps:$4 sm:$0xff]  }
 0x131   : > { %2403 = vmatpush1.bf16.msra.mxu0 %v9351_v12  ;;  %v9428_v12 = vld [vmem:[%s13279_s1 + $0x9d4] ss:$24 sps:$4 sm:$0xff]  }
 0x132   : > { %3098 = vmatpush1.bf16.msra.mxu1 %v9354_v13  ;;  %2404 = vmatprep.subr.bf16.mxu0 %v9359_v14  ;;  %v145_v14 = vld [vmem:[#allocation2] sm:$0x3f] }
 0x133   : > { %3099 = vmatprep.subr.bf16.mxu1 %v9362_v16 }
 0x135   : > { %2405 = vmatpush2.bf16.msra.mxu0 %v9357_v17 }
 0x136   : > { %3100 = vmatpush2.bf16.msra.mxu1 %v9360_v19  ;;  %2406 = vmatprep.subr.bf16.mxu0 %v9365_v20  ;;  %v9423_v19 = vld [vmem:[%s13279_s1 + $0x9c8] ss:$24 sps:$4 sm:$0xff]  }
 0x137   : > { %3101 = vmatprep.subr.bf16.mxu1 %v9368_v21  ;;  %v9426_v20 = vld [vmem:[%s13279_s1 + $0x9d0] ss:$24 sps:$4 sm:$0xff]  }
 0x138   : > { %v9429_v21 = vld [vmem:[%s13279_s1 + $0x998] ss:$24 sps:$4 sm:$0xff]  }
 0x139   : > { %2407 = vmatpush2.bf16.msra.mxu0 %v9363_v22  ;;  %v9432_v22 = vld [vmem:[%s13279_s1 + $0x9a0] ss:$24 sps:$4 sm:$0xff]  }
 0x13a   : > { %3102 = vmatpush2.bf16.msra.mxu1 %v9366_v23  ;;  %2408 = vmatprep.subr.bf16.mxu0 %v9371_v24  ;;  %v9437_v23 = vld [vmem:[%s13279_s1 + $0x96c] ss:$24 sps:$4 sm:$0xff]  }
 0x13b   : > { %3103 = vmatprep.subr.bf16.mxu1 %v9374_v25  ;;  %v9440_v24 = vld [vmem:[%s13279_s1 + $0x974] ss:$24 sps:$4 sm:$0xff]   ;;  %v9435_v25 = vld [vmem:[%s13279_s1 + $0x968] ss:$24 sps:$4 sm:$0xff]  }
 0x13d   : > { %2409 = vmatpush2.bf16.msra.mxu0 %v9369_v11  ;;  %v9438_v11 = vld [vmem:[%s13279_s1 + $0x970] ss:$24 sps:$4 sm:$0xff]  }
 0x13e   : > { %3104 = vmatpush2.bf16.msra.mxu1 %v9372_v27  ;;  %2410 = vmatprep.subr.bf16.mxu0 %v9377_v29  ;;  %v9443_v27 = vld [vmem:[%s13279_s1 + $0x93c] ss:$24 sps:$4 sm:$0xff]  }
 0x13f   : > { %3105 = vmatprep.subr.bf16.mxu1 %v9380_v30  ;;  %v9446_v29 = vld [vmem:[%s13279_s1 + $0x944] ss:$24 sps:$4 sm:$0xff]   ;;  %v9441_v30 = vld [vmem:[%s13279_s1 + $0x938] ss:$24 sps:$4 sm:$0xff]  }
 0x141   : > { %2411 = vmatpush2.bf16.msra.mxu0 %v9375_v15  ;;  %v9444_v15 = vld [vmem:[%s13279_s1 + $0x940] ss:$24 sps:$4 sm:$0xff]  }
 0x142   : > { %3106 = vmatpush2.bf16.msra.mxu1 %v9378_v31  ;;  %2412 = vmatprep.subr.bf16.mxu0 %v9383_v33  ;;  %v9449_v31 = vld [vmem:[%s13279_s1 + $0x90c] ss:$24 sps:$4 sm:$0xff]  }
 0x143   : > { %3107 = vmatprep.subr.bf16.mxu1 %v9386_v38  ;;  %v9452_v33 = vld [vmem:[%s13279_s1 + $0x914] ss:$24 sps:$4 sm:$0xff]   ;;  %v9447_v38 = vld [vmem:[%s13279_s1 + $0x908] ss:$24 sps:$4 sm:$0xff]  }
 0x145   : > { %2413 = vmatpush2.bf16.msra.mxu0 %v9381_v34  ;;  %v9450_v34 = vld [vmem:[%s13279_s1 + $0x910] ss:$24 sps:$4 sm:$0xff]  }
 0x146   : > { %3108 = vmatpush2.bf16.msra.mxu1 %v9384_v35  ;;  %2414 = vmatprep.subr.bf16.mxu0 %v9389_v37  ;;  %v9455_v35 = vld [vmem:[%s13279_s1 + $0xbdc] ss:$24 sps:$4 sm:$0xff]  }
 0x147   : > { %3109 = vmatprep.subr.bf16.mxu1 %v9392_v39  ;;  %v9458_v37 = vld [vmem:[%s13279_s1 + $0xbe4] ss:$24 sps:$4 sm:$0xff]   ;;  %v9453_v39 = vld [vmem:[%s13279_s1 + $0xbd8] ss:$24 sps:$4 sm:$0xff]  }
 0x149   : > { %2415 = vmatpush2.bf16.msra.mxu0 %v9387_v40  ;;  %v9456_v40 = vld [vmem:[%s13279_s1 + $0xbe0] ss:$24 sps:$4 sm:$0xff]  }
 0x14a   : > { %3110 = vmatpush2.bf16.msra.mxu1 %v9390_v41  ;;  %2416 = vmatprep.subr.bf16.mxu0 %v9395_v42  ;;  %v9461_v41 = vld [vmem:[%s13279_s1 + $0xbac] ss:$24 sps:$4 sm:$0xff]  }
 0x14b   : > { %3111 = vmatprep.subr.bf16.mxu1 %v9398_v43  ;;  %v9464_v42 = vld [vmem:[%s13279_s1 + $0xbb4] ss:$24 sps:$4 sm:$0xff]   ;;  %v9459_v43 = vld [vmem:[%s13279_s1 + $0xba8] ss:$24 sps:$4 sm:$0xff]  }
 0x14d   : > { %2417 = vmatpush2.bf16.msra.mxu0 %v9393_v44  ;;  %v9462_v44 = vld [vmem:[%s13279_s1 + $0xbb0] ss:$24 sps:$4 sm:$0xff]  }
 0x14e   : > { %3112 = vmatpush2.bf16.msra.mxu1 %v9396_v45  ;;  %2418 = vmatprep.subr.bf16.mxu0 %v9401_v46  ;;  %v9467_v45 = vld [vmem:[%s13279_s1 + $0xb7c] ss:$24 sps:$4 sm:$0xff]  }
 0x14f   : > { %3113 = vmatprep.subr.bf16.mxu1 %v9404_v47  ;;  %v9470_v46 = vld [vmem:[%s13279_s1 + $0xb84] ss:$24 sps:$4 sm:$0xff]   ;;  %v9465_v47 = vld [vmem:[%s13279_s1 + $0xb78] ss:$24 sps:$4 sm:$0xff]  }
 0x151   : > { %2419 = vmatpush2.bf16.msra.mxu0 %v9399_v48  ;;  %v9468_v48 = vld [vmem:[%s13279_s1 + $0xb80] ss:$24 sps:$4 sm:$0xff]  }
 0x152   : > { %3114 = vmatpush2.bf16.msra.mxu1 %v9402_v49  ;;  %3124 = vmatprep.subr.bf16.mxu0 %v9407_v50  ;;  %v9473_v49 = vld [vmem:[%s13279_s1 + $0xb4c] ss:$24 sps:$4 sm:$0xff]  }
 0x153   : > { %3165 = vmatprep.subr.bf16.mxu1 %v9410_v52  ;;  %v9476_v50 = vld [vmem:[%s13279_s1 + $0xb54] ss:$24 sps:$4 sm:$0xff]   ;;  %v9471_v52 = vld [vmem:[%s13279_s1 + $0xb48] ss:$24 sps:$4 sm:$0xff]  }
 0x154   : > { %v863_v61 = vpop.f32.mrf.mxu0  ;;  %2421 = vmatmul.mubr.bf16.vlgmr.msra.gmra.mxu0 %v11183_v18 }
 0x155   : > { %3116 = vmatmul.mubr.bf16.vlgmr.msra.gmra.mxu1 %v11400_v56  ;;  %v11416_v62 = vpop.f32.mrf.mxu1  ;;  %3125 = vmatpush1.bf16.msra.mxu0 %v9405_v55  ;;  %v9474_v55 = vld [vmem:[%s13279_s1 + $0xb50] ss:$24 sps:$4 sm:$0xff]  }
 0x156   : > { %3166 = vmatpush1.bf16.msra.mxu1 %v9408_v28  ;;  %v865_v63 = vpop.f32.mrf.mxu0  ;;  %3126 = vmatprep.subr.bf16.mxu0 %v9413_v57  ;;  %v9479_v28 = vld [vmem:[%s13279_s1 + $0xb1c] ss:$24 sps:$4 sm:$0xff]  }
 0x157   : > { %3167 = vmatprep.subr.bf16.mxu1 %v9416_v59  ;;  %v11424_v2 = vpop.f32.mrf.mxu1  ;;  %v878_v18 = vcombine.low %v863_v61, %v865_v63  ;;  %3156 = vmatprep.mubr.bf16.mxu0 %v11198_v36  ;;  %v9482_v57 = vld [vmem:[%s13279_s1 + $0xb24] ss:$24 sps:$4 sm:$0xff]   ;;  %v9477_v59 = vld [vmem:[%s13279_s1 + $0xb18] ss:$24 sps:$4 sm:$0xff]   ;;  %v9488_v61 = vld [vmem:[%s13279_s1 + $0xaf4] ss:$24 sps:$4 sm:$0xff]  }
 0x158   : > { %v1653_v5 = vcombine.low %v11416_v62, %v11424_v2  ;;  %3197 = vmatprep.mubr.bf16.mxu1 %v11198_v36  ;;  %v867_v6 = vpop.f32.mrf.mxu0  ;;  %v907_v36 = vrot.slane %v900_v58, %v10495_v51  ;;  %v9483_v63 = vld [vmem:[%s13279_s1 + $0xae8] ss:$24 sps:$4 sm:$0xff]  }
 0x159   : > { %v1562_v7 = vpop.f32.mrf.mxu1  ;;  %v899_v8 = vrot.slane %v878_v18, %v10495_v51  ;;  %3127 = vmatpush1.bf16.msra.mxu0 %v9411_v60  ;;  %v9480_v60 = vld [vmem:[%s13279_s1 + $0xb20] ss:$24 sps:$4 sm:$0xff]   ;;  %v9494_v18 = vld [vmem:[%s13279_s1 + $0xac4] ss:$24 sps:$4 sm:$0xff]  }
 0x15a   : > { %3168 = vmatpush1.bf16.msra.mxu1 %v9414_v26  ;;  %v868_v9 = vpop.f32.mrf.mxu0  ;;  %3128 = vmatprep.subr.bf16.mxu0 %v9419_v0  ;;  %v9485_v26 = vld [vmem:[%s13279_s1 + $0xaec] ss:$24 sps:$4 sm:$0xff]   ;;  %v9486_v0 = vld [vmem:[%s13279_s1 + $0xaf0] ss:$24 sps:$4 sm:$0xff]  }
 0x15b   : > { %3169 = vmatprep.subr.bf16.mxu1 %v9422_v1  ;;  %v1563_v13 = vpop.f32.mrf.mxu1  ;;  %v914_v16 = vrot.slane %v899_v8, %v10495_v51  ;;  %v9491_v1 = vld [vmem:[%s13279_s1 + $0xabc] ss:$24 sps:$4 sm:$0xff]   ;;  %v9497_v6 = vld [vmem:[%s13279_s1 + $0xa8c] ss:$24 sps:$4 sm:$0xff]   ;;  %v9495_v9 = vld [vmem:[%s13279_s1 + $0xa88] ss:$24 sps:$4 sm:$0xff]  }
 0x15c   : > { %v9500_v7 = vld [vmem:[%s13279_s1 + $0xa94] ss:$24 sps:$4 sm:$0xff]  }
 0x15d   : > { %v915_v17 = vcombine.low %v907_v36, %v914_v16  ;;  %3129 = vmatpush1.bf16.msra.mxu0 %v9417_v3  ;;  %v9489_v3 = vld [vmem:[%s13279_s1 + $0xab8] ss:$24 sps:$4 sm:$0xff]   ;;  %v11595_v8 = vld.sshfl [vmem:[%s10490_s17 + $0xc] sm:$0x11 pattern:$0x75316420] }
 0x15e   : > { %3170 = vmatpush1.bf16.msra.mxu1 %v9420_v4  ;;  %3130 = vmatprep.subr.bf16.mxu0 %v9425_v10  ;;  %v9492_v4 = vld [vmem:[%s13279_s1 + $0xac0] ss:$24 sps:$4 sm:$0xff]   ;;  %v9498_v10 = vld [vmem:[%s13279_s1 + $0xa90] ss:$24 sps:$4 sm:$0xff]   ;;  %v9506_v13 = vld [vmem:[%s13279_s1 + $0xd5c] ss:$24 sps:$4 sm:$0xff]   ;;  %v3363_v16 = vcombine.high %v11595_v8, %v11595_v8 }
 0x15f   : > { %3171 = vmatprep.subr.bf16.mxu1 %v9428_v12  ;;  %v917_v58 = vadd.f32 %v915_v17, %v145_v14  ;;  %v9503_v12 = vld [vmem:[%s13279_s1 + $0xd54] ss:$24 sps:$4 sm:$0xff]   ;;  %v9501_v36 = vld [vmem:[%s13279_s1 + $0xd50] ss:$24 sps:$4 sm:$0xff]   ;;  %v9509_v17 = vld [vmem:[%s13279_s1 + $0xd24] ss:$24 sps:$4 sm:$0xff]  }
 0x160   : > { %v9504_v14 = vld [vmem:[%s13279_s1 + $0xd58] ss:$24 sps:$4 sm:$0xff]  }
 0x161   : > { %918 = vst.msk [vmem:[#allocation2] sm:$0x3f] %vm10997_vm0, %v917_v58  ;;  %3131 = vmatpush1.bf16.msra.mxu0 %v9423_v19  ;;  %v9512_v19 = vld [vmem:[%s13279_s1 + $0xd2c] ss:$24 sps:$4 sm:$0xff]  }
 0x162   : > { %3172 = vmatpush1.bf16.msra.mxu1 %v9426_v20  ;;  %3132 = vmatprep.subr.bf16.mxu0 %v9431_v53  ;;  %v9507_v20 = vld [vmem:[%s13279_s1 + $0xd20] ss:$24 sps:$4 sm:$0xff]  }
 0x163   : > { %3173 = vmatprep.subr.bf16.mxu1 %v9434_v54  ;;  %v9510_v53 = vld [vmem:[%s13279_s1 + $0xd28] ss:$24 sps:$4 sm:$0xff]   ;;  %v11630_v54 = vrot.slane %v3363_v16, %v10495_v51  ;;  %v9569_v16 = vld [vmem:[%s13279_s1 + $0xe44] ss:$24 sps:$4 sm:$0xff]  }
 0x165   : > { %3133 = vmatpush1.bf16.msra.mxu0 %v9429_v21 }
 0x166   : > { %3174 = vmatpush1.bf16.msra.mxu1 %v9432_v22  ;;  %3134 = vmatprep.subr.bf16.mxu0 %v9437_v23 }
 0x167   : > { %3175 = vmatprep.subr.bf16.mxu1 %v9440_v24  ;;  %v9515_v24 = vld [vmem:[%s13279_s1 + $0xcf4] ss:$24 sps:$4 sm:$0xff]  }
 0x169   : > { %3135 = vmatpush1.bf16.msra.mxu0 %v9435_v25  ;;  %v9518_v25 = vld [vmem:[%s13279_s1 + $0xcfc] ss:$24 sps:$4 sm:$0xff]  }
 0x16a   : > { %3176 = vmatpush1.bf16.msra.mxu1 %v9438_v11  ;;  %3136 = vmatprep.subr.bf16.mxu0 %v9443_v27 }
 0x16b   : > { %3177 = vmatprep.subr.bf16.mxu1 %v9446_v29  ;;  %v9516_v29 = vld [vmem:[%s13279_s1 + $0xcf8] ss:$24 sps:$4 sm:$0xff]  }
 0x16d   : > { %3137 = vmatpush1.bf16.msra.mxu0 %v9441_v30 }
 0x16e   : > { %3178 = vmatpush1.bf16.msra.mxu1 %v9444_v15  ;;  %3138 = vmatprep.subr.bf16.mxu0 %v9449_v31  ;;  %v1662_v31 = vrot.slane %v1653_v5, %v10495_v51  ;;  %v9519_v5 = vld [vmem:[%s13279_s1 + $0xcc0] ss:$24 sps:$4 sm:$0xff]  }
 0x16f   : > { %3179 = vmatprep.subr.bf16.mxu1 %v9452_v33 }
 0x171   : > { %3139 = vmatpush1.bf16.msra.mxu0 %v9447_v38 }
 0x172   : > { %3180 = vmatpush1.bf16.msra.mxu1 %v9450_v34  ;;  %3140 = vmatprep.subr.bf16.mxu0 %v9455_v35  ;;  %v9521_v35 = vld [vmem:[%s13279_s1 + $0xcc4] ss:$24 sps:$4 sm:$0xff]  }
 0x173   : > { %3181 = vmatprep.subr.bf16.mxu1 %v9458_v37  ;;  %v9524_v37 = vld [vmem:[%s13279_s1 + $0xccc] ss:$24 sps:$4 sm:$0xff]  }
 0x175   : > { %3141 = vmatpush2.bf16.msra.mxu0 %v9453_v39 }
 0x176   : > { %3182 = vmatpush2.bf16.msra.mxu1 %v9456_v40  ;;  %3142 = vmatprep.subr.bf16.mxu0 %v9461_v41  ;;  %v9522_v40 = vld [vmem:[%s13279_s1 + $0xcc8] ss:$24 sps:$4 sm:$0xff]  }
 0x177   : > { %3183 = vmatprep.subr.bf16.mxu1 %v9464_v42  ;;  %v9527_v42 = vld [vmem:[%s13279_s1 + $0xc94] ss:$24 sps:$4 sm:$0xff]  }
 0x179   : > { %3143 = vmatpush2.bf16.msra.mxu0 %v9459_v43  ;;  %v9530_v43 = vld [vmem:[%s13279_s1 + $0xc9c] ss:$24 sps:$4 sm:$0xff]  }
 0x17a   : > { %3184 = vmatpush2.bf16.msra.mxu1 %v9462_v44  ;;  %3144 = vmatprep.subr.bf16.mxu0 %v9467_v45  ;;  %v921_v44 = vld [vmem:[#allocation2] sm:$0x3f] }
 0x17b   : > { %3185 = vmatprep.subr.bf16.mxu1 %v9470_v46 }
 0x17d   : > { %3145 = vmatpush2.bf16.msra.mxu0 %v9465_v47  ;;  %v9525_v47 = vld [vmem:[%s13279_s1 + $0xc90] ss:$24 sps:$4 sm:$0xff]  }
 0x17e   : > { %3186 = vmatpush2.bf16.msra.mxu1 %v9468_v48  ;;  %3146 = vmatprep.subr.bf16.mxu0 %v9473_v49  ;;  %v9528_v48 = vld [vmem:[%s13279_s1 + $0xc98] ss:$24 sps:$4 sm:$0xff]   ;;  %v9533_v49 = vld [vmem:[%s13279_s1 + $0xc64] ss:$24 sps:$4 sm:$0xff]  }
 0x17f   : > { %3187 = vmatprep.subr.bf16.mxu1 %v9476_v50  ;;  %v9536_v50 = vld [vmem:[%s13279_s1 + $0xc6c] ss:$24 sps:$4 sm:$0xff]  }
 0x181   : > { %3147 = vmatpush2.bf16.msra.mxu0 %v9471_v52  ;;  %v9531_v52 = vld [vmem:[%s13279_s1 + $0xc60] ss:$24 sps:$4 sm:$0xff]  }
 0x182   : > { %3188 = vmatpush2.bf16.msra.mxu1 %v9474_v55  ;;  %3148 = vmatprep.subr.bf16.mxu0 %v9479_v28  ;;  %v9534_v55 = vld [vmem:[%s13279_s1 + $0xc68] ss:$24 sps:$4 sm:$0xff]   ;;  %v9539_v28 = vld [vmem:[%s13279_s1 + $0xc34] ss:$24 sps:$4 sm:$0xff]  }
 0x183   : > { %3189 = vmatprep.subr.bf16.mxu1 %v9482_v57  ;;  %v9542_v57 = vld [vmem:[%s13279_s1 + $0xc3c] ss:$24 sps:$4 sm:$0xff]  }
 0x185   : > { %3149 = vmatpush2.bf16.msra.mxu0 %v9477_v59  ;;  %v9537_v59 = vld [vmem:[%s13279_s1 + $0xc30] ss:$24 sps:$4 sm:$0xff]  }
 0x186   : > { %3190 = vmatpush2.bf16.msra.mxu1 %v9480_v60  ;;  %3150 = vmatprep.subr.bf16.mxu0 %v9485_v26  ;;  %v9540_v60 = vld [vmem:[%s13279_s1 + $0xc38] ss:$24 sps:$4 sm:$0xff]   ;;  %v9545_v26 = vld [vmem:[%s13279_s1 + $0xc04] ss:$24 sps:$4 sm:$0xff]  }
 0x187   : > { %3191 = vmatprep.subr.bf16.mxu1 %v9488_v61  ;;  %v9548_v61 = vld [vmem:[%s13279_s1 + $0xc0c] ss:$24 sps:$4 sm:$0xff]  }
 0x189   : > { %3151 = vmatpush2.bf16.msra.mxu0 %v9483_v63  ;;  %v9543_v63 = vld [vmem:[%s13279_s1 + $0xc00] ss:$24 sps:$4 sm:$0xff]  }
 0x18a   : > { %3192 = vmatpush2.bf16.msra.mxu1 %v9486_v0  ;;  %3152 = vmatprep.subr.bf16.mxu0 %v9491_v1  ;;  %v9546_v0 = vld [vmem:[%s13279_s1 + $0xc08] ss:$24 sps:$4 sm:$0xff]   ;;  %v9551_v1 = vld [vmem:[%s13279_s1 + $0xed4] ss:$24 sps:$4 sm:$0xff]  }
 0x18b   : > { %3193 = vmatprep.subr.bf16.mxu1 %v9494_v18  ;;  %v9554_v18 = vld [vmem:[%s13279_s1 + $0xedc] ss:$24 sps:$4 sm:$0xff]  }
 0x18d   : > { %3153 = vmatpush2.bf16.msra.mxu0 %v9489_v3  ;;  %v9549_v3 = vld [vmem:[%s13279_s1 + $0xed0] ss:$24 sps:$4 sm:$0xff]  }
 0x18e   : > { %3194 = vmatpush2.bf16.msra.mxu1 %v9492_v4  ;;  %3154 = vmatprep.subr.bf16.mxu0 %v9497_v6  ;;  %v9552_v4 = vld [vmem:[%s13279_s1 + $0xed8] ss:$24 sps:$4 sm:$0xff]   ;;  %v9557_v6 = vld [vmem:[%s13279_s1 + $0xea4] ss:$24 sps:$4 sm:$0xff]  }
 0x18f   : > { %3195 = vmatprep.subr.bf16.mxu1 %v9500_v7  ;;  %v9560_v7 = vld [vmem:[%s13279_s1 + $0xeac] ss:$24 sps:$4 sm:$0xff]  }
 0x191   : > { %3155 = vmatpush2.bf16.msra.mxu0 %v9495_v9  ;;  %v9555_v9 = vld [vmem:[%s13279_s1 + $0xea0] ss:$24 sps:$4 sm:$0xff]  }
 0x192   : > { %3196 = vmatpush2.bf16.msra.mxu1 %v9498_v10  ;;  %3860 = vmatprep.subr.bf16.mxu0 %v9503_v12  ;;  %v9558_v10 = vld [vmem:[%s13279_s1 + $0xea8] ss:$24 sps:$4 sm:$0xff]   ;;  %v9563_v12 = vld [vmem:[%s13279_s1 + $0xe74] ss:$24 sps:$4 sm:$0xff]  }
 0x193   : > { %3901 = vmatprep.subr.bf16.mxu1 %v9506_v13  ;;  %v9566_v13 = vld [vmem:[%s13279_s1 + $0xe7c] ss:$24 sps:$4 sm:$0xff]  }
 0x194   : > { %v1599_v58 = vpop.f32.mrf.mxu0  ;;  %3157 = vmatmul.mubr.bf16.vlgmr.msra.gmra.mxu0 %v11400_v56 }
 0x195   : > { %3198 = vmatmul.mubr.bf16.vlgmr.msra.gmra.mxu1 %v11400_v56  ;;  %v1640_v21 = vpop.f32.mrf.mxu1  ;;  %3861 = vmatpush1.bf16.msra.mxu0 %v9501_v36  ;;  %v9513_v56 = vld [vmem:[%s13279_s1 + $0xcf0] ss:$24 sps:$4 sm:$0xff]  }
 0x196   : > { %3902 = vmatpush1.bf16.msra.mxu1 %v9504_v14  ;;  %v1601_v22 = vpop.f32.mrf.mxu0  ;;  %3862 = vmatprep.subr.bf16.mxu0 %v9509_v17  ;;  %v9561_v36 = vld [vmem:[%s13279_s1 + $0xe70] ss:$24 sps:$4 sm:$0xff]   ;;  %v9572_v17 = vld [vmem:[%s13279_s1 + $0xe4c] ss:$24 sps:$4 sm:$0xff]  }
 0x197   : > { %v1642_v23 = vpop.f32.mrf.mxu1  ;;  %3903 = vmatprep.subr.bf16.mxu1 %v9512_v19  ;;  %v1654_v11 = vcombine.low %v1599_v58, %v1601_v22  ;;  %3892 = vmatprep.mubr.bf16.mxu0 %v11630_v54  ;;  %v9564_v14 = vld [vmem:[%s13279_s1 + $0xe78] ss:$24 sps:$4 sm:$0xff]   ;;  %v9578_v58 = vld [vmem:[%s13279_s1 + $0xe1c] ss:$24 sps:$4 sm:$0xff]  }
 0x198   : > { %v1655_v27 = vcombine.low %v1640_v21, %v1642_v23  ;;  %3933 = vmatprep.mubr.bf16.mxu1 %v11630_v54  ;;  %v1603_v30 = vpop.f32.mrf.mxu0  ;;  %v9567_v19 = vld [vmem:[%s13279_s1 + $0xe40] ss:$24 sps:$4 sm:$0xff]   ;;  %v9573_v21 = vld [vmem:[%s13279_s1 + $0xe10] ss:$24 sps:$4 sm:$0xff]   ;;  %v9581_v23 = vld [vmem:[%s13279_s1 + $0xde4] ss:$24 sps:$4 sm:$0xff]  }
 0x199   : > { %v1644_v15 = vpop.f32.mrf.mxu1  ;;  %v1669_v33 = vrot.slane %v1654_v11, %v10495_v51  ;;  %3863 = vmatpush1.bf16.msra.mxu0 %v9507_v20  ;;  %v9570_v20 = vld [vmem:[%s13279_s1 + $0xe48] ss:$24 sps:$4 sm:$0xff]   ;;  %v9576_v22 = vld [vmem:[%s13279_s1 + $0xe18] ss:$24 sps:$4 sm:$0xff]  }
 0x19a   : > { %v1676_v38 = vrot.slane %v1655_v27, %v10495_v51  ;;  %3904 = vmatpush1.bf16.msra.mxu1 %v9510_v53  ;;  %v1604_v34 = vpop.f32.mrf.mxu0  ;;  %3864 = vmatprep.subr.bf16.mxu0 %v9515_v24  ;;  %v9575_v53 = vld [vmem:[%s13279_s1 + $0xe14] ss:$24 sps:$4 sm:$0xff]   ;;  %v9582_v11 = vld [vmem:[%s13279_s1 + $0xde8] ss:$24 sps:$4 sm:$0xff]   ;;  %v9588_v15 = vld [vmem:[%s13279_s1 + $0xdb8] ss:$24 sps:$4 sm:$0xff]  }
 0x19b   : > { %3905 = vmatprep.subr.bf16.mxu1 %v9518_v25  ;;  %v1645_v39 = vpop.f32.mrf.mxu1  ;;  %v1677_v62 = vcombine.low %v1662_v31, %v1669_v33  ;;  %v9584_v24 = vld [vmem:[%s13279_s1 + $0xdec] ss:$24 sps:$4 sm:$0xff]   ;;  %v9579_v25 = vld [vmem:[%s13279_s1 + $0xde0] ss:$24 sps:$4 sm:$0xff]   ;;  %v9585_v30 = vld [vmem:[%s13279_s1 + $0xdb0] ss:$24 sps:$4 sm:$0xff]  }
 0x19c   : > { %v1691_v2 = vrot.slane %v1676_v38, %v10495_v51  ;;  %v9587_v27 = vld [vmem:[%s13279_s1 + $0xdb4] ss:$24 sps:$4 sm:$0xff]   ;;  %v9593_v31 = vld [vmem:[%s13279_s1 + $0xd84] ss:$24 sps:$4 sm:$0xff]   ;;  %v9591_v34 = vld [vmem:[%s13279_s1 + $0xd80] ss:$24 sps:$4 sm:$0xff]  }
 0x19d   : > { %v1684_v41 = vrot.slane %v1677_v62, %v10495_v51  ;;  %3865 = vmatpush1.bf16.msra.mxu0 %v9513_v56  ;;  %v9590_v56 = vld [vmem:[%s13279_s1 + $0xdbc] ss:$24 sps:$4 sm:$0xff]   ;;  %v9596_v33 = vld [vmem:[%s13279_s1 + $0xd8c] ss:$24 sps:$4 sm:$0xff]   ;;  %v9597_v62 = vld [vmem:[%s13279_s1 + $0xd60] ss:$24 sps:$4 sm:$0xff]  }
 0x19e   : > { %3906 = vmatpush1.bf16.msra.mxu1 %v9516_v29  ;;  %3866 = vmatprep.subr.bf16.mxu0 %v9521_v35  ;;  %v11797_v29 = vld.sshfl [vmem:[%s10490_s17 + $0x8] sm:$0x11 pattern:$0x75316420]  ;;  %v9602_v39 = vld [vmem:[%s13279_s1 + $0x1054] ss:$24 sps:$4 sm:$0xff]  }
 0x19f   : > { %3907 = vmatprep.subr.bf16.mxu1 %v9524_v37  ;;  %v1692_v45 = vcombine.low %v1684_v41, %v1691_v2  ;;  %v4139_v38 = vcombine.high %v11797_v29, %v11797_v29  ;;  %v9594_v35 = vld [vmem:[%s13279_s1 + $0xd88] ss:$24 sps:$4 sm:$0xff]   ;;  %v9599_v37 = vld [vmem:[%s13279_s1 + $0xd64] ss:$24 sps:$4 sm:$0xff]   ;;  %v9605_v41 = vld [vmem:[%s13279_s1 + $0xd34] ss:$24 sps:$4 sm:$0xff]  }
 0x1a0   : > { %v9600_v2 = vld [vmem:[%s13279_s1 + $0x1050] ss:$24 sps:$4 sm:$0xff]  }
 0x1a1   : > { %v1694_v46 = vadd.f32 %v1692_v45, %v921_v44  ;;  %3867 = vmatpush1.bf16.msra.mxu0 %v9519_v5  ;;  %v4153_v5 = vrot.slane %v4139_v38, %v10495_v51  ;;  %v9657_v38 = vld [vmem:[%s13279_s1 + $0xe80] ss:$24 sps:$4 sm:$0xff]  }
 0x1a2   : > { %3908 = vmatpush1.bf16.msra.mxu1 %v9522_v40  ;;  %3868 = vmatprep.subr.bf16.mxu0 %v9527_v42  ;;  %v11834_v40 = vrot.slane %v11595_v8, %v10495_v51  ;;  %v9608_v42 = vld [vmem:[%s13279_s1 + $0x1024] ss:$24 sps:$4 sm:$0xff]   ;;  %v9606_v8 = vld [vmem:[%s13279_s1 + $0x1020] ss:$24 sps:$4 sm:$0xff]  }
 0x1a3   : > { %3909 = vmatprep.subr.bf16.mxu1 %v9530_v43  ;;  %1695 = vst.msk [vmem:[#allocation2] sm:$0x3f] %vm10997_vm0, %v1694_v46  ;;  %v9603_v43 = vld [vmem:[%s13279_s1 + $0xd30] ss:$24 sps:$4 sm:$0xff]   ;;  %v11848_v44 = vshrl.u32 %v4153_v5, 16 }
 0x1a4   : > { %v9674_v5 = vld [vmem:[%s13279_s1 + $0x1114] ss:$24 sps:$4 sm:$0xff]  }
 0x1a5   : > { %3869 = vmatpush1.bf16.msra.mxu0 %v9525_v47 }
 0x1a6   : > { %3910 = vmatpush1.bf16.msra.mxu1 %v9528_v48  ;;  %3870 = vmatprep.subr.bf16.mxu0 %v9533_v49  ;;  %v9611_v49 = vld [vmem:[%s13279_s1 + $0xd04] ss:$24 sps:$4 sm:$0xff]  }
 0x1a7   : > { %3911 = vmatprep.subr.bf16.mxu1 %v9536_v50  ;;  %v9614_v50 = vld [vmem:[%s13279_s1 + $0xff4] ss:$24 sps:$4 sm:$0xff]  }
 0x1a9   : > { %3871 = vmatpush1.bf16.msra.mxu0 %v9531_v52 }
 0x1aa   : > { %3912 = vmatpush1.bf16.msra.mxu1 %v9534_v55  ;;  %3872 = vmatprep.subr.bf16.mxu0 %v9539_v28  ;;  %v9609_v28 = vld [vmem:[%s13279_s1 + $0xd00] ss:$24 sps:$4 sm:$0xff]  }
 0x1ab   : > { %3913 = vmatprep.subr.bf16.mxu1 %v9542_v57  ;;  %v9612_v57 = vld [vmem:[%s13279_s1 + $0xff0] ss:$24 sps:$4 sm:$0xff]  }
 0x1ad   : > { %3873 = vmatpush1.bf16.msra.mxu0 %v9537_v59 }
 0x1ae   : > { %3914 = vmatpush1.bf16.msra.mxu1 %v9540_v60  ;;  %3874 = vmatprep.subr.bf16.mxu0 %v9545_v26 }
 0x1af   : > { %3915 = vmatprep.subr.bf16.mxu1 %v9548_v61 }
 0x1b1   : > { %3875 = vmatpush1.bf16.msra.mxu0 %v9543_v63 }
 0x1b2   : > { %3916 = vmatpush1.bf16.msra.mxu1 %v9546_v0  ;;  %3876 = vmatprep.subr.bf16.mxu0 %v9551_v1  ;;  %v9617_v0 = vld [vmem:[%s13279_s1 + $0xcd4] ss:$24 sps:$4 sm:$0xff]  }
 0x1b3   : > { %3917 = vmatprep.subr.bf16.mxu1 %v9554_v18 }
 0x1b5   : > { %3877 = vmatpush2.bf16.msra.mxu0 %v9549_v3  ;;  %v9615_v3 = vld [vmem:[%s13279_s1 + $0xcd0] ss:$24 sps:$4 sm:$0xff]  }
 0x1b6   : > { %3918 = vmatpush2.bf16.msra.mxu1 %v9552_v4  ;;  %3878 = vmatprep.subr.bf16.mxu0 %v9557_v6  ;;  %v9618_v4 = vld [vmem:[%s13279_s1 + $0xfc0] ss:$24 sps:$4 sm:$0xff]   ;;  %v9623_v6 = vld [vmem:[%s13279_s1 + $0xca4] ss:$24 sps:$4 sm:$0xff]  }
 0x1b7   : > { %3919 = vmatprep.subr.bf16.mxu1 %v9560_v7  ;;  %v9626_v7 = vld [vmem:[%s13279_s1 + $0xf94] ss:$24 sps:$4 sm:$0xff]  }
 0x1b9   : > { %3879 = vmatpush2.bf16.msra.mxu0 %v9555_v9  ;;  %v9621_v9 = vld [vmem:[%s13279_s1 + $0xca0] ss:$24 sps:$4 sm:$0xff]  }
 0x1ba   : > { %3920 = vmatpush2.bf16.msra.mxu1 %v9558_v10  ;;  %3880 = vmatprep.subr.bf16.mxu0 %v9563_v12  ;;  %v9624_v10 = vld [vmem:[%s13279_s1 + $0xf90] ss:$24 sps:$4 sm:$0xff]   ;;  %v9629_v12 = vld [vmem:[%s13279_s1 + $0xc74] ss:$24 sps:$4 sm:$0xff]  }
 0x1bb   : > { %3921 = vmatprep.subr.bf16.mxu1 %v9566_v13  ;;  %v9632_v13 = vld [vmem:[%s13279_s1 + $0xf64] ss:$24 sps:$4 sm:$0xff]  }
 0x1bd   : > { %3881 = vmatpush2.bf16.msra.mxu0 %v9561_v36  ;;  %v9627_v36 = vld [vmem:[%s13279_s1 + $0xc70] ss:$24 sps:$4 sm:$0xff]  }
 0x1be   : > { %3922 = vmatpush2.bf16.msra.mxu1 %v9564_v14  ;;  %3882 = vmatprep.subr.bf16.mxu0 %v9569_v16  ;;  %v9630_v14 = vld [vmem:[%s13279_s1 + $0xf60] ss:$24 sps:$4 sm:$0xff]   ;;  %v9635_v16 = vld [vmem:[%s13279_s1 + $0xc44] ss:$24 sps:$4 sm:$0xff]  }
 0x1bf   : > { %3923 = vmatprep.subr.bf16.mxu1 %v9572_v17  ;;  %v9638_v17 = vld [vmem:[%s13279_s1 + $0xf34] ss:$24 sps:$4 sm:$0xff]  }
 0x1c1   : > { %3883 = vmatpush2.bf16.msra.mxu0 %v9567_v19  ;;  %v9633_v19 = vld [vmem:[%s13279_s1 + $0xc40] ss:$24 sps:$4 sm:$0xff]  }
 0x1c2   : > { %3924 = vmatpush2.bf16.msra.mxu1 %v9570_v20  ;;  %3884 = vmatprep.subr.bf16.mxu0 %v9575_v53  ;;  %v9636_v20 = vld [vmem:[%s13279_s1 + $0xf30] ss:$24 sps:$4 sm:$0xff]   ;;  %v9641_v53 = vld [vmem:[%s13279_s1 + $0xc14] ss:$24 sps:$4 sm:$0xff]  }
 0x1c3   : > { %3925 = vmatprep.subr.bf16.mxu1 %v9578_v58  ;;  %v9644_v58 = vld [vmem:[%s13279_s1 + $0xf04] ss:$24 sps:$4 sm:$0xff]  }
 0x1c5   : > { %3885 = vmatpush2.bf16.msra.mxu0 %v9573_v21  ;;  %v9639_v21 = vld [vmem:[%s13279_s1 + $0xc10] ss:$24 sps:$4 sm:$0xff]  }
 0x1c6   : > { %3926 = vmatpush2.bf16.msra.mxu1 %v9576_v22  ;;  %3886 = vmatprep.subr.bf16.mxu0 %v9581_v23  ;;  %v9642_v22 = vld [vmem:[%s13279_s1 + $0xf00] ss:$24 sps:$4 sm:$0xff]   ;;  %v9647_v23 = vld [vmem:[%s13279_s1 + $0xee4] ss:$24 sps:$4 sm:$0xff]  }
 0x1c7   : > { %3927 = vmatprep.subr.bf16.mxu1 %v9584_v24  ;;  %v9650_v24 = vld [vmem:[%s13279_s1 + $0x11d4] ss:$24 sps:$4 sm:$0xff]  }
 0x1c9   : > { %3887 = vmatpush2.bf16.msra.mxu0 %v9579_v25  ;;  %v9645_v25 = vld [vmem:[%s13279_s1 + $0xee0] ss:$24 sps:$4 sm:$0xff]  }
 0x1ca   : > { %3928 = vmatpush2.bf16.msra.mxu1 %v9582_v11  ;;  %3888 = vmatprep.subr.bf16.mxu0 %v9587_v27  ;;  %v9648_v11 = vld [vmem:[%s13279_s1 + $0x11d0] ss:$24 sps:$4 sm:$0xff]   ;;  %v9653_v27 = vld [vmem:[%s13279_s1 + $0xeb4] ss:$24 sps:$4 sm:$0xff]  }
 0x1cb   : > { %3929 = vmatprep.subr.bf16.mxu1 %v9590_v56  ;;  %v9656_v56 = vld [vmem:[%s13279_s1 + $0x11a4] ss:$24 sps:$4 sm:$0xff]  }
 0x1cd   : > { %3889 = vmatpush2.bf16.msra.mxu0 %v9585_v30  ;;  %v9651_v30 = vld [vmem:[%s13279_s1 + $0xeb0] ss:$24 sps:$4 sm:$0xff]  }
 0x1ce   : > { %3930 = vmatpush2.bf16.msra.mxu1 %v9588_v15  ;;  %3890 = vmatprep.subr.bf16.mxu0 %v9593_v31  ;;  %v9654_v15 = vld [vmem:[%s13279_s1 + $0x11a0] ss:$24 sps:$4 sm:$0xff]   ;;  %v9659_v31 = vld [vmem:[%s13279_s1 + $0xe84] ss:$24 sps:$4 sm:$0xff]  }
 0x1cf   : > { %3931 = vmatprep.subr.bf16.mxu1 %v9596_v33  ;;  %v9662_v33 = vld [vmem:[%s13279_s1 + $0x1174] ss:$24 sps:$4 sm:$0xff]  }
 0x1d1   : > { %3891 = vmatpush2.bf16.msra.mxu0 %v9591_v34  ;;  %v9660_v34 = vld [vmem:[%s13279_s1 + $0x1170] ss:$24 sps:$4 sm:$0xff]  }
 0x1d2   : > { %3932 = vmatpush2.bf16.msra.mxu1 %v9594_v35  ;;  %3942 = vmatprep.subr.bf16.mxu0 %v9599_v37  ;;  %v9665_v35 = vld [vmem:[%s13279_s1 + $0xe54] ss:$24 sps:$4 sm:$0xff]   ;;  %v9668_v37 = vld [vmem:[%s13279_s1 + $0x1144] ss:$24 sps:$4 sm:$0xff]  }
 0x1d3   : > { %4642 = vmatprep.subr.bf16.mxu1 %v9602_v39  ;;  %v9663_v39 = vld [vmem:[%s13279_s1 + $0xe50] ss:$24 sps:$4 sm:$0xff]  }
 0x1d4   : > { %v2340_v45 = vpop.f32.mrf.mxu0  ;;  %3893 = vmatmul.mubr.bf16.vlgmr.msra.gmra.mxu0 %v11834_v40 }
 0x1d5   : > { %v2381_v46 = vpop.f32.mrf.mxu1  ;;  %3934 = vmatmul.mubr.bf16.vlgmr.msra.gmra.mxu1 %v11834_v40  ;;  %3943 = vmatpush1.bf16.msra.mxu0 %v9597_v62  ;;  %v9666_v62 = vld [vmem:[%s13279_s1 + $0x1140] ss:$24 sps:$4 sm:$0xff]  }
 0x1d6   : > { %4643 = vmatpush1.bf16.msra.mxu1 %v9600_v2  ;;  %v2342_v47 = vpop.f32.mrf.mxu0  ;;  %3944 = vmatprep.subr.bf16.mxu0 %v9605_v41  ;;  %v9671_v2 = vld [vmem:[%s13279_s1 + $0xe24] ss:$24 sps:$4 sm:$0xff]   ;;  %v9669_v41 = vld [vmem:[%s13279_s1 + $0xe20] ss:$24 sps:$4 sm:$0xff]  }
 0x1d7   : > { %v2383_v48 = vpop.f32.mrf.mxu1  ;;  %4644 = vmatprep.subr.bf16.mxu1 %v9608_v42  ;;  %v2435_v52 = vcombine.low %v2340_v45, %v2342_v47  ;;  %3974 = vmatprep.mubr.bf16.mxu0 %v11630_v54  ;;  %v9620_v54 = vld [vmem:[%s13279_s1 + $0xfc4] ss:$24 sps:$4 sm:$0xff]   ;;  %v9672_v42 = vld [vmem:[%s13279_s1 + $0x1110] ss:$24 sps:$4 sm:$0xff]  }
 0x1d8   : > { %v2436_v55 = vcombine.low %v2381_v46, %v2383_v48  ;;  %4674 = vmatprep.mubr.bf16.mxu1 %v11848_v44  ;;  %v2344_v59 = vpop.f32.mrf.mxu0  ;;  %v9675_v45 = vld [vmem:[%s13279_s1 + $0xdf0] ss:$24 sps:$4 sm:$0xff]   ;;  %v9678_v46 = vld [vmem:[%s13279_s1 + $0x10e0] ss:$24 sps:$4 sm:$0xff]   ;;  %v9683_v47 = vld [vmem:[%s13279_s1 + $0xdc4] ss:$24 sps:$4 sm:$0xff]  }
 0x1d9   : > { %v2385_v60 = vpop.f32.mrf.mxu1  ;;  %v11867_v26 = vrot.slane %v2435_v52, %v10495_v51  ;;  %3945 = vmatpush1.bf16.msra.mxu0 %v9603_v43  ;;  %v9677_v43 = vld [vmem:[%s13279_s1 + $0xdf4] ss:$24 sps:$4 sm:$0xff]   ;;  %v9690_v59 = vld [vmem:[%s13279_s1 + $0x1080] ss:$24 sps:$4 sm:$0xff]  }
 0x1da   : > { %v11870_v61 = vrot.slane %v2436_v55, %v10495_v51  ;;  %4645 = vmatpush1.bf16.msra.mxu1 %v9606_v8  ;;  %v2345_v63 = vpop.f32.mrf.mxu0  ;;  %3946 = vmatprep.subr.bf16.mxu0 %v9611_v49  ;;  %v9680_v8 = vld [vmem:[%s13279_s1 + $0x10e4] ss:$24 sps:$4 sm:$0xff]   ;;  %v9686_v48 = vld [vmem:[%s13279_s1 + $0x10b4] ss:$24 sps:$4 sm:$0xff]   ;;  %v9681_v49 = vld [vmem:[%s13279_s1 + $0xdc0] ss:$24 sps:$4 sm:$0xff]  }
 0x1db   : > { %4646 = vmatprep.subr.bf16.mxu1 %v9614_v50  ;;  %v2386_v1 = vpop.f32.mrf.mxu1  ;;  %v9684_v50 = vld [vmem:[%s13279_s1 + $0x10b0] ss:$24 sps:$4 sm:$0xff]   ;;  %v9689_v52 = vld [vmem:[%s13279_s1 + $0xd94] ss:$24 sps:$4 sm:$0xff]   ;;  %v9692_v55 = vld [vmem:[%s13279_s1 + $0x1084] ss:$24 sps:$4 sm:$0xff]  }
 0x1dc   : > { %v2459_v18 = vcombine.low %v11867_v26, %v11870_v61  ;;  %v9695_v60 = vld [vmem:[%s13279_s1 + $0x105c] ss:$24 sps:$4 sm:$0xff]   ;;  %v9701_v1 = vld [vmem:[%s13279_s1 + $0x102c] ss:$24 sps:$4 sm:$0xff]  }
 0x1dd   : > { %3947 = vmatpush1.bf16.msra.mxu0 %v9609_v28  ;;  %v4146_v28 = vrot.slane %v11797_v29, %v10495_v51  ;;  %v9698_v29 = vld [vmem:[%s13279_s1 + $0x1064] ss:$24 sps:$4 sm:$0xff]  }
 0x1de   : > { %4647 = vmatpush1.bf16.msra.mxu1 %v9612_v57  ;;  %3948 = vmatprep.subr.bf16.mxu0 %v9617_v0  ;;  %v9687_v57 = vld [vmem:[%s13279_s1 + $0xd90] ss:$24 sps:$4 sm:$0xff]   ;;  %v9719_v26 = vld [vmem:[%s13279_s1 + $0xf9c] ss:$24 sps:$4 sm:$0xff]  }
 0x1df   : > { %4648 = vmatprep.subr.bf16.mxu1 %v9620_v54  ;;  %v12038_v63 = vshrl.u32 %v4146_v28, 16  ;;  %v9693_v0 = vld [vmem:[%s13279_s1 + $0x1058] ss:$24 sps:$4 sm:$0xff]   ;;  %v9722_v61 = vld [vmem:[%s13279_s1 + $0xfa4] ss:$24 sps:$4 sm:$0xff]  }
 0x1e0   : > { %v9696_v54 = vld [vmem:[%s13279_s1 + $0x1060] ss:$24 sps:$4 sm:$0xff]  }
 0x1e1   : > { %3949 = vmatpush1.bf16.msra.mxu0 %v9615_v3  ;;  %v9704_v3 = vld [vmem:[%s13279_s1 + $0x1034] ss:$24 sps:$4 sm:$0xff]   ;;  %v9753_v28 = vld [vmem:[%s13279_s1 + $0x1178] ss:$24 sps:$4 sm:$0xff]  }
 0x1e2   : > { %4649 = vmatpush1.bf16.msra.mxu1 %v9618_v4  ;;  %3950 = vmatprep.subr.bf16.mxu0 %v9623_v6 }
 0x1e3   : > { %4650 = vmatprep.subr.bf16.mxu1 %v9626_v7  ;;  %v9699_v7 = vld [vmem:[%s13279_s1 + $0x1028] ss:$24 sps:$4 sm:$0xff]  }
 0x1e5   : > { %3951 = vmatpush1.bf16.msra.mxu0 %v9621_v9  ;;  %v9702_v9 = vld [vmem:[%s13279_s1 + $0x1030] ss:$24 sps:$4 sm:$0xff]  }
 0x1e6   : > { %4651 = vmatpush1.bf16.msra.mxu1 %v9624_v10  ;;  %3952 = vmatprep.subr.bf16.mxu0 %v9629_v12  ;;  %v9710_v12 = vld [vmem:[%s13279_s1 + $0x1004] ss:$24 sps:$4 sm:$0xff]  }
 0x1e7   : > { %4652 = vmatprep.subr.bf16.mxu1 %v9632_v13 }
 0x1e9   : > { %3953 = vmatpush1.bf16.msra.mxu0 %v9627_v36 }
 0x1ea   : > { %4653 = vmatpush1.bf16.msra.mxu1 %v9630_v14  ;;  %3954 = vmatprep.subr.bf16.mxu0 %v9635_v16 }
 0x1eb   : > { %4654 = vmatprep.subr.bf16.mxu1 %v9638_v17 }
 0x1ed   : > { %3955 = vmatpush1.bf16.msra.mxu0 %v9633_v19 }
 0x1ee   : > { %4655 = vmatpush1.bf16.msra.mxu1 %v9636_v20  ;;  %3956 = vmatprep.subr.bf16.mxu0 %v9641_v53  ;;  %v9705_v20 = vld [vmem:[%s13279_s1 + $0xff8] ss:$24 sps:$4 sm:$0xff]  }
 0x1ef   : > { %4656 = vmatprep.subr.bf16.mxu1 %v9644_v58  ;;  %v9708_v53 = vld [vmem:[%s13279_s1 + $0x1000] ss:$24 sps:$4 sm:$0xff]  }
 0x1f1   : > { %3957 = vmatpush1.bf16.msra.mxu0 %v9639_v21  ;;  %v9716_v21 = vld [vmem:[%s13279_s1 + $0xfd4] ss:$24 sps:$4 sm:$0xff]  }
 0x1f2   : > { %4657 = vmatpush1.bf16.msra.mxu1 %v9642_v22  ;;  %3958 = vmatprep.subr.bf16.mxu0 %v9647_v23  ;;  %v2466_v23 = vrot.slane %v2459_v18, %v10495_v51 }
 0x1f3   : > { %4658 = vmatprep.subr.bf16.mxu1 %v9650_v24 }
 0x1f5   : > { %3959 = vmatpush2.bf16.msra.mxu0 %v9645_v25 }
 0x1f6   : > { %4659 = vmatpush2.bf16.msra.mxu1 %v9648_v11  ;;  %3960 = vmatprep.subr.bf16.mxu0 %v9653_v27  ;;  %v9711_v11 = vld [vmem:[%s13279_s1 + $0xfc8] ss:$24 sps:$4 sm:$0xff]  }
 0x1f7   : > { %4660 = vmatprep.subr.bf16.mxu1 %v9656_v56  ;;  %v9714_v27 = vld [vmem:[%s13279_s1 + $0xfd0] ss:$24 sps:$4 sm:$0xff]   ;;  %v1697_v56 = vld [vmem:[#allocation2] sm:$0x3f] }
 0x1f9   : > { %3961 = vmatpush2.bf16.msra.mxu0 %v9651_v30  ;;  %v9717_v30 = vld [vmem:[%s13279_s1 + $0xf98] ss:$24 sps:$4 sm:$0xff]  }
 0x1fa   : > { %4661 = vmatpush2.bf16.msra.mxu1 %v9654_v15  ;;  %3962 = vmatprep.subr.bf16.mxu0 %v9659_v31  ;;  %v9720_v15 = vld [vmem:[%s13279_s1 + $0xfa0] ss:$24 sps:$4 sm:$0xff]   ;;  %v9725_v31 = vld [vmem:[%s13279_s1 + $0xf6c] ss:$24 sps:$4 sm:$0xff]  }
 0x1fb   : > { %4662 = vmatprep.subr.bf16.mxu1 %v9662_v33  ;;  %v9728_v33 = vld [vmem:[%s13279_s1 + $0xf74] ss:$24 sps:$4 sm:$0xff]  }
 0x1fd   : > { %3963 = vmatpush2.bf16.msra.mxu0 %v9657_v38  ;;  %v9723_v38 = vld [vmem:[%s13279_s1 + $0xf68] ss:$24 sps:$4 sm:$0xff]  }
 0x1fe   : > { %4663 = vmatpush2.bf16.msra.mxu1 %v9660_v34  ;;  %3964 = vmatprep.subr.bf16.mxu0 %v9665_v35  ;;  %v9726_v34 = vld [vmem:[%s13279_s1 + $0xf70] ss:$24 sps:$4 sm:$0xff]   ;;  %v9731_v35 = vld [vmem:[%s13279_s1 + $0xf3c] ss:$24 sps:$4 sm:$0xff]  }
 0x1ff   : > { %4664 = vmatprep.subr.bf16.mxu1 %v9668_v37  ;;  %v9734_v37 = vld [vmem:[%s13279_s1 + $0xf44] ss:$24 sps:$4 sm:$0xff]  }
 0x201   : > { %3965 = vmatpush2.bf16.msra.mxu0 %v9663_v39  ;;  %v9729_v39 = vld [vmem:[%s13279_s1 + $0xf38] ss:$24 sps:$4 sm:$0xff]  }
 0x202   : > { %4665 = vmatpush2.bf16.msra.mxu1 %v9666_v62  ;;  %3966 = vmatprep.subr.bf16.mxu0 %v9671_v2  ;;  %v9732_v62 = vld [vmem:[%s13279_s1 + $0xf40] ss:$24 sps:$4 sm:$0xff]   ;;  %v9737_v2 = vld [vmem:[%s13279_s1 + $0xf0c] ss:$24 sps:$4 sm:$0xff]  }
 0x203   : > { %4666 = vmatprep.subr.bf16.mxu1 %v9674_v5  ;;  %v9740_v5 = vld [vmem:[%s13279_s1 + $0xf14] ss:$24 sps:$4 sm:$0xff]  }
 0x205   : > { %3967 = vmatpush2.bf16.msra.mxu0 %v9669_v41  ;;  %v9735_v41 = vld [vmem:[%s13279_s1 + $0xf08] ss:$24 sps:$4 sm:$0xff]  }
 0x206   : > { %4667 = vmatpush2.bf16.msra.mxu1 %v9672_v42  ;;  %3968 = vmatprep.subr.bf16.mxu0 %v9677_v43  ;;  %v9738_v42 = vld [vmem:[%s13279_s1 + $0xf10] ss:$24 sps:$4 sm:$0xff]   ;;  %v9743_v43 = vld [vmem:[%s13279_s1 + $0x11dc] ss:$24 sps:$4 sm:$0xff]  }
 0x207   : > { %4668 = vmatprep.subr.bf16.mxu1 %v9680_v8  ;;  %v9746_v8 = vld [vmem:[%s13279_s1 + $0x11e4] ss:$24 sps:$4 sm:$0xff]  }
 0x209   : > { %3969 = vmatpush2.bf16.msra.mxu0 %v9675_v45  ;;  %v9741_v45 = vld [vmem:[%s13279_s1 + $0x11d8] ss:$24 sps:$4 sm:$0xff]  }
 0x20a   : > { %4669 = vmatpush2.bf16.msra.mxu1 %v9678_v46  ;;  %3970 = vmatprep.subr.bf16.mxu0 %v9683_v47  ;;  %v9744_v46 = vld [vmem:[%s13279_s1 + $0x11e0] ss:$24 sps:$4 sm:$0xff]   ;;  %v9749_v47 = vld [vmem:[%s13279_s1 + $0x11ac] ss:$24 sps:$4 sm:$0xff]  }
 0x20b   : > { %4670 = vmatprep.subr.bf16.mxu1 %v9686_v48  ;;  %v9752_v48 = vld [vmem:[%s13279_s1 + $0x11b4] ss:$24 sps:$4 sm:$0xff]  }
 0x20d   : > { %3971 = vmatpush2.bf16.msra.mxu0 %v9681_v49  ;;  %v9747_v49 = vld [vmem:[%s13279_s1 + $0x11a8] ss:$24 sps:$4 sm:$0xff]  }
 0x20e   : > { %4671 = vmatpush2.bf16.msra.mxu1 %v9684_v50  ;;  %3972 = vmatprep.subr.bf16.mxu0 %v9689_v52  ;;  %v9750_v50 = vld [vmem:[%s13279_s1 + $0x11b0] ss:$24 sps:$4 sm:$0xff]   ;;  %v9755_v52 = vld [vmem:[%s13279_s1 + $0x117c] ss:$24 sps:$4 sm:$0xff]  }
 0x20f   : > { %4672 = vmatprep.subr.bf16.mxu1 %v9692_v55  ;;  %v9758_v55 = vld [vmem:[%s13279_s1 + $0x1184] ss:$24 sps:$4 sm:$0xff]  }
 0x211   : > { %3973 = vmatpush2.bf16.msra.mxu0 %v9687_v57  ;;  %v9756_v57 = vld [vmem:[%s13279_s1 + $0x1180] ss:$24 sps:$4 sm:$0xff]  }
 0x212   : > { %4673 = vmatpush2.bf16.msra.mxu1 %v9690_v59  ;;  %4683 = vmatprep.subr.bf16.mxu0 %v9695_v60  ;;  %v9761_v59 = vld [vmem:[%s13279_s1 + $0x114c] ss:$24 sps:$4 sm:$0xff]  }
 0x213   : > { %4724 = vmatprep.subr.bf16.mxu1 %v9698_v29  ;;  %v9764_v60 = vld [vmem:[%s13279_s1 + $0x1154] ss:$24 sps:$4 sm:$0xff]   ;;  %v9759_v29 = vld [vmem:[%s13279_s1 + $0x1148] ss:$24 sps:$4 sm:$0xff]  }
 0x214   : > { %v2422_v4 = vpop.f32.mrf.mxu0  ;;  %3975 = vmatmul.mubr.bf16.vlgmr.msra.gmra.mxu0 %v11834_v40  ;;  %v9707_v40 = vld [vmem:[%s13279_s1 + $0xffc] ss:$24 sps:$4 sm:$0xff]  }
 0x215   : > { %4675 = vmatmul.mubr.bf16.vlgmr.msra.gmra.mxu1 %v12038_v63  ;;  %v12054_v6 = vpop.f32.mrf.mxu1  ;;  %4684 = vmatpush1.bf16.msra.mxu0 %v9693_v0  ;;  %v9762_v0 = vld [vmem:[%s13279_s1 + $0x1150] ss:$24 sps:$4 sm:$0xff]  }
 0x216   : > { %4725 = vmatpush1.bf16.msra.mxu1 %v9696_v54  ;;  %v2424_v10 = vpop.f32.mrf.mxu0  ;;  %4685 = vmatprep.subr.bf16.mxu0 %v9701_v1  ;;  %v9767_v54 = vld [vmem:[%s13279_s1 + $0x111c] ss:$24 sps:$4 sm:$0xff]  }
 0x217   : > { %4726 = vmatprep.subr.bf16.mxu1 %v9704_v3  ;;  %v12068_v13 = vpop.f32.mrf.mxu1  ;;  %v2437_v36 = vcombine.low %v2422_v4, %v2424_v10  ;;  %4715 = vmatprep.mubr.bf16.mxu0 %v11848_v44  ;;  %v9770_v1 = vld [vmem:[%s13279_s1 + $0x1124] ss:$24 sps:$4 sm:$0xff]   ;;  %v9765_v3 = vld [vmem:[%s13279_s1 + $0x1118] ss:$24 sps:$4 sm:$0xff]   ;;  %v9771_v10 = vld [vmem:[%s13279_s1 + $0x10e8] ss:$24 sps:$4 sm:$0xff]  }
 0x218   : > { %v3212_v14 = vcombine.low %v12054_v6, %v12068_v13  ;;  %4756 = vmatprep.mubr.bf16.mxu1 %v11848_v44  ;;  %v2426_v16 = vpop.f32.mrf.mxu0  ;;  %v9713_v44 = vld [vmem:[%s13279_s1 + $0xfcc] ss:$24 sps:$4 sm:$0xff]   ;;  %v9768_v4 = vld [vmem:[%s13279_s1 + $0x1120] ss:$24 sps:$4 sm:$0xff]  }
 0x219   : > { %v3121_v17 = vpop.f32.mrf.mxu1  ;;  %v2458_v19 = vrot.slane %v2437_v36, %v10495_v51  ;;  %4686 = vmatpush1.bf16.msra.mxu0 %v9699_v7  ;;  %v9773_v7 = vld [vmem:[%s13279_s1 + $0x10ec] ss:$24 sps:$4 sm:$0xff]   ;;  %v9777_v16 = vld [vmem:[%s13279_s1 + $0x10b8] ss:$24 sps:$4 sm:$0xff]  }
 0x21a   : > { %4727 = vmatpush1.bf16.msra.mxu1 %v9702_v9  ;;  %v2427_v58 = vpop.f32.mrf.mxu0  ;;  %4687 = vmatprep.subr.bf16.mxu0 %v9707_v40  ;;  %v9776_v9 = vld [vmem:[%s13279_s1 + $0x10f4] ss:$24 sps:$4 sm:$0xff]   ;;  %v9774_v40 = vld [vmem:[%s13279_s1 + $0x10f0] ss:$24 sps:$4 sm:$0xff]   ;;  %v9782_v36 = vld [vmem:[%s13279_s1 + $0x10c4] ss:$24 sps:$4 sm:$0xff]  }
 0x21b   : > { %4728 = vmatprep.subr.bf16.mxu1 %v9710_v12  ;;  %v3122_v22 = vpop.f32.mrf.mxu1  ;;  %v2473_v24 = vrot.slane %v2458_v19, %v10495_v51  ;;  %v9779_v12 = vld [vmem:[%s13279_s1 + $0x10bc] ss:$24 sps:$4 sm:$0xff]   ;;  %v9780_v17 = vld [vmem:[%s13279_s1 + $0x10c0] ss:$24 sps:$4 sm:$0xff]   ;;  %v9785_v19 = vld [vmem:[%s13279_s1 + $0x108c] ss:$24 sps:$4 sm:$0xff]  }
 0x21c   : > { %v9783_v58 = vld [vmem:[%s13279_s1 + $0x1088] ss:$24 sps:$4 sm:$0xff]   ;;  %v9794_v22 = vld [vmem:[%s13279_s1 + $0x135c] ss:$24 sps:$4 sm:$0xff]   ;;  %v9812_v13 = vld [vmem:[%s13279_s1 + $0x12cc] ss:$24 sps:$4 sm:$0xff]  }
 0x21d   : > { %v2474_v25 = vcombine.low %v2466_v23, %v2473_v24  ;;  %4688 = vmatpush1.bf16.msra.mxu0 %v9705_v20  ;;  %v9788_v20 = vld [vmem:[%s13279_s1 + $0x1094] ss:$24 sps:$4 sm:$0xff]   ;;  %v9789_v24 = vld [vmem:[%s13279_s1 + $0x1350] ss:$24 sps:$4 sm:$0xff]   ;;  %v9809_v6 = vld [vmem:[%s13279_s1 + $0x12c4] ss:$24 sps:$4 sm:$0xff]  }
 0x21e   : > { %4729 = vmatpush1.bf16.msra.mxu1 %v9708_v53  ;;  %4689 = vmatprep.subr.bf16.mxu0 %v9713_v44  ;;  %v12239_v53 = vld.sshfl [vmem:[%s10490_s17 + $0x2] sm:$0x11 pattern:$0x75316420]  ;;  %v9786_v44 = vld [vmem:[%s13279_s1 + $0x1090] ss:$24 sps:$4 sm:$0xff]  }
 0x21f   : > { %4730 = vmatprep.subr.bf16.mxu1 %v9716_v21  ;;  %v2476_v18 = vadd.f32 %v2474_v25, %v1697_v56  ;;  %v9791_v21 = vld [vmem:[%s13279_s1 + $0x1354] ss:$24 sps:$4 sm:$0xff]   ;;  %v4922_v23 = vcombine.high %v12239_v53, %v12239_v53  ;;  %v9792_v25 = vld [vmem:[%s13279_s1 + $0x1358] ss:$24 sps:$4 sm:$0xff]  }
 0x221   : > { %2477 = vst.msk [vmem:[#allocation2] sm:$0x3f] %vm10997_vm0, %v2476_v18  ;;  %4690 = vmatpush1.bf16.msra.mxu0 %v9711_v11  ;;  %v9797_v11 = vld [vmem:[%s13279_s1 + $0x1324] ss:$24 sps:$4 sm:$0xff]   ;;  %v12268_v56 = vrot.slane %v4922_v23, %v10495_v51  ;;  %v9795_v18 = vld [vmem:[%s13279_s1 + $0x1320] ss:$24 sps:$4 sm:$0xff]  }
 0x222   : > { %4731 = vmatpush1.bf16.msra.mxu1 %v9714_v27  ;;  %4691 = vmatprep.subr.bf16.mxu0 %v9719_v26  ;;  %v9800_v27 = vld [vmem:[%s13279_s1 + $0x132c] ss:$24 sps:$4 sm:$0xff]   ;;  %v9849_v23 = vld [vmem:[%s13279_s1 + $0x1470] ss:$24 sps:$4 sm:$0xff]  }
 0x223   : > { %4732 = vmatprep.subr.bf16.mxu1 %v9722_v61 }
 0x225   : > { %4692 = vmatpush1.bf16.msra.mxu0 %v9717_v30  ;;  %v9798_v30 = vld [vmem:[%s13279_s1 + $0x1328] ss:$24 sps:$4 sm:$0xff]  }
 0x226   : > { %4733 = vmatpush1.bf16.msra.mxu1 %v9720_v15  ;;  %4693 = vmatprep.subr.bf16.mxu0 %v9725_v31 }
 0x227   : > { %4734 = vmatprep.subr.bf16.mxu1 %v9728_v33  ;;  %v9803_v33 = vld [vmem:[%s13279_s1 + $0x12f4] ss:$24 sps:$4 sm:$0xff]  }
 0x229   : > { %4694 = vmatpush1.bf16.msra.mxu0 %v9723_v38 }
 0x22a   : > { %4735 = vmatpush1.bf16.msra.mxu1 %v9726_v34  ;;  %4695 = vmatprep.subr.bf16.mxu0 %v9731_v35 }
 0x22b   : > { %4736 = vmatprep.subr.bf16.mxu1 %v9734_v37 }
 0x22d   : > { %4696 = vmatpush1.bf16.msra.mxu0 %v9729_v39  ;;  %v3221_v39 = vrot.slane %v3212_v14, %v10495_v51 }
 0x22e   : > { %4737 = vmatpush1.bf16.msra.mxu1 %v9732_v62  ;;  %4697 = vmatprep.subr.bf16.mxu0 %v9737_v2 }
 0x22f   : > { %4738 = vmatprep.subr.bf16.mxu1 %v9740_v5  ;;  %v9801_v5 = vld [vmem:[%s13279_s1 + $0x12f0] ss:$24 sps:$4 sm:$0xff]  }
 0x231   : > { %4698 = vmatpush1.bf16.msra.mxu0 %v9735_v41  ;;  %v9804_v41 = vld [vmem:[%s13279_s1 + $0x12f8] ss:$24 sps:$4 sm:$0xff]  }
 0x232   : > { %4739 = vmatpush1.bf16.msra.mxu1 %v9738_v42  ;;  %4699 = vmatprep.subr.bf16.mxu0 %v9743_v43 }
 0x233   : > { %4740 = vmatprep.subr.bf16.mxu1 %v9746_v8 }
 0x235   : > { %4700 = vmatpush2.bf16.msra.mxu0 %v9741_v45 }
 0x236   : > { %4741 = vmatpush2.bf16.msra.mxu1 %v9744_v46  ;;  %4701 = vmatprep.subr.bf16.mxu0 %v9749_v47  ;;  %v9807_v46 = vld [vmem:[%s13279_s1 + $0x12c0] ss:$24 sps:$4 sm:$0xff]  }
 0x237   : > { %4742 = vmatprep.subr.bf16.mxu1 %v9752_v48  ;;  %v9810_v47 = vld [vmem:[%s13279_s1 + $0x12c8] ss:$24 sps:$4 sm:$0xff]   ;;  %v9815_v48 = vld [vmem:[%s13279_s1 + $0x1294] ss:$24 sps:$4 sm:$0xff]  }
 0x239   : > { %4702 = vmatpush2.bf16.msra.mxu0 %v9747_v49  ;;  %v9818_v49 = vld [vmem:[%s13279_s1 + $0x129c] ss:$24 sps:$4 sm:$0xff]  }
 0x23a   : > { %4743 = vmatpush2.bf16.msra.mxu1 %v9750_v50  ;;  %4703 = vmatprep.subr.bf16.mxu0 %v9755_v52  ;;  %v2480_v52 = vld [vmem:[#allocation2] sm:$0x3f] }
 0x23b   : > { %4744 = vmatprep.subr.bf16.mxu1 %v9758_v55 }
 0x23d   : > { %4704 = vmatpush2.bf16.msra.mxu0 %v9753_v28  ;;  %v9813_v28 = vld [vmem:[%s13279_s1 + $0x1290] ss:$24 sps:$4 sm:$0xff]  }
 0x23e   : > { %4745 = vmatpush2.bf16.msra.mxu1 %v9756_v57  ;;  %4705 = vmatprep.subr.bf16.mxu0 %v9761_v59  ;;  %v9816_v57 = vld [vmem:[%s13279_s1 + $0x1298] ss:$24 sps:$4 sm:$0xff]   ;;  %v9821_v59 = vld [vmem:[%s13279_s1 + $0x1264] ss:$24 sps:$4 sm:$0xff]  }
 0x23f   : > { %4746 = vmatprep.subr.bf16.mxu1 %v9764_v60  ;;  %v9824_v60 = vld [vmem:[%s13279_s1 + $0x126c] ss:$24 sps:$4 sm:$0xff]  }
 0x241   : > { %4706 = vmatpush2.bf16.msra.mxu0 %v9759_v29  ;;  %v9819_v29 = vld [vmem:[%s13279_s1 + $0x1260] ss:$24 sps:$4 sm:$0xff]  }
 0x242   : > { %4747 = vmatpush2.bf16.msra.mxu1 %v9762_v0  ;;  %4707 = vmatprep.subr.bf16.mxu0 %v9767_v54  ;;  %v9822_v0 = vld [vmem:[%s13279_s1 + $0x1268] ss:$24 sps:$4 sm:$0xff]   ;;  %v9827_v54 = vld [vmem:[%s13279_s1 + $0x1234] ss:$24 sps:$4 sm:$0xff]  }
 0x243   : > { %4748 = vmatprep.subr.bf16.mxu1 %v9770_v1  ;;  %v9830_v1 = vld [vmem:[%s13279_s1 + $0x123c] ss:$24 sps:$4 sm:$0xff]  }
 0x245   : > { %4708 = vmatpush2.bf16.msra.mxu0 %v9765_v3  ;;  %v9825_v3 = vld [vmem:[%s13279_s1 + $0x1230] ss:$24 sps:$4 sm:$0xff]  }
 0x246   : > { %4749 = vmatpush2.bf16.msra.mxu1 %v9768_v4  ;;  %4709 = vmatprep.subr.bf16.mxu0 %v9773_v7  ;;  %v9828_v4 = vld [vmem:[%s13279_s1 + $0x1238] ss:$24 sps:$4 sm:$0xff]   ;;  %v9833_v7 = vld [vmem:[%s13279_s1 + $0x1204] ss:$24 sps:$4 sm:$0xff]  }
 0x247   : > { %4750 = vmatprep.subr.bf16.mxu1 %v9776_v9  ;;  %v9836_v9 = vld [vmem:[%s13279_s1 + $0x120c] ss:$24 sps:$4 sm:$0xff]  }
 0x249   : > { %4710 = vmatpush2.bf16.msra.mxu0 %v9771_v10  ;;  %v9831_v10 = vld [vmem:[%s13279_s1 + $0x1200] ss:$24 sps:$4 sm:$0xff]  }
 0x24a   : > { %4751 = vmatpush2.bf16.msra.mxu1 %v9774_v40  ;;  %4711 = vmatprep.subr.bf16.mxu0 %v9779_v12  ;;  %v9834_v40 = vld [vmem:[%s13279_s1 + $0x1208] ss:$24 sps:$4 sm:$0xff]   ;;  %v9839_v12 = vld [vmem:[%s13279_s1 + $0x14d4] ss:$24 sps:$4 sm:$0xff]  }
 0x24b   : > { %4752 = vmatprep.subr.bf16.mxu1 %v9782_v36  ;;  %v9842_v36 = vld [vmem:[%s13279_s1 + $0x14dc] ss:$24 sps:$4 sm:$0xff]  }
 0x24d   : > { %4712 = vmatpush2.bf16.msra.mxu0 %v9777_v16  ;;  %v9837_v16 = vld [vmem:[%s13279_s1 + $0x14d0] ss:$24 sps:$4 sm:$0xff]  }
 0x24e   : > { %4753 = vmatpush2.bf16.msra.mxu1 %v9780_v17  ;;  %4713 = vmatprep.subr.bf16.mxu0 %v9785_v19  ;;  %v9840_v17 = vld [vmem:[%s13279_s1 + $0x14d8] ss:$24 sps:$4 sm:$0xff]   ;;  %v9845_v19 = vld [vmem:[%s13279_s1 + $0x14a4] ss:$24 sps:$4 sm:$0xff]  }
 0x24f   : > { %4754 = vmatprep.subr.bf16.mxu1 %v9788_v20  ;;  %v9848_v20 = vld [vmem:[%s13279_s1 + $0x14ac] ss:$24 sps:$4 sm:$0xff]  }
 0x251   : > { %4714 = vmatpush2.bf16.msra.mxu0 %v9783_v58  ;;  %v9843_v58 = vld [vmem:[%s13279_s1 + $0x14a0] ss:$24 sps:$4 sm:$0xff]  }
 0x252   : > { %4755 = vmatpush2.bf16.msra.mxu1 %v9786_v44  ;;  %5419 = vmatprep.subr.bf16.mxu0 %v9791_v21  ;;  %v9846_v44 = vld [vmem:[%s13279_s1 + $0x14a8] ss:$24 sps:$4 sm:$0xff]   ;;  %v9851_v21 = vld [vmem:[%s13279_s1 + $0x1474] ss:$24 sps:$4 sm:$0xff]  }
 0x253   : > { %5460 = vmatprep.subr.bf16.mxu1 %v9794_v22  ;;  %v9854_v22 = vld [vmem:[%s13279_s1 + $0x147c] ss:$24 sps:$4 sm:$0xff]  }
 0x254   : > { %v3158_v26 = vpop.f32.mrf.mxu0  ;;  %4716 = vmatmul.mubr.bf16.vlgmr.msra.gmra.mxu0 %v12038_v63 }
 0x255   : > { %4757 = vmatmul.mubr.bf16.vlgmr.msra.gmra.mxu1 %v12038_v63  ;;  %v3199_v61 = vpop.f32.mrf.mxu1  ;;  %5420 = vmatpush1.bf16.msra.mxu0 %v9789_v24  ;;  %v9806_v63 = vld [vmem:[%s13279_s1 + $0x12fc] ss:$24 sps:$4 sm:$0xff]   ;;  %v9852_v24 = vld [vmem:[%s13279_s1 + $0x1478] ss:$24 sps:$4 sm:$0xff]  }
 0x256   : > { %5461 = vmatpush1.bf16.msra.mxu1 %v9792_v25  ;;  %v3160_v15 = vpop.f32.mrf.mxu0  ;;  %5421 = vmatprep.subr.bf16.mxu0 %v9797_v11  ;;  %v9857_v25 = vld [vmem:[%s13279_s1 + $0x1444] ss:$24 sps:$4 sm:$0xff]  }
 0x257   : > { %v3201_v31 = vpop.f32.mrf.mxu1  ;;  %5462 = vmatprep.subr.bf16.mxu1 %v9800_v27  ;;  %v3213_v38 = vcombine.low %v3158_v26, %v3160_v15  ;;  %5451 = vmatprep.mubr.bf16.mxu0 %v12268_v56  ;;  %v9860_v11 = vld [vmem:[%s13279_s1 + $0x144c] ss:$24 sps:$4 sm:$0xff]   ;;  %v9855_v27 = vld [vmem:[%s13279_s1 + $0x1440] ss:$24 sps:$4 sm:$0xff]  }
 0x258   : > { %v3214_v34 = vcombine.low %v3199_v61, %v3201_v31  ;;  %5492 = vmatprep.mubr.bf16.mxu1 %v12268_v56  ;;  %v3162_v35 = vpop.f32.mrf.mxu0  ;;  %v9858_v26 = vld [vmem:[%s13279_s1 + $0x1448] ss:$24 sps:$4 sm:$0xff]   ;;  %v9863_v61 = vld [vmem:[%s13279_s1 + $0x1414] ss:$24 sps:$4 sm:$0xff]   ;;  %v9864_v15 = vld [vmem:[%s13279_s1 + $0x1418] ss:$24 sps:$4 sm:$0xff]  }
 0x259   : > { %v3203_v37 = vpop.f32.mrf.mxu1  ;;  %v3228_v62 = vrot.slane %v3213_v38, %v10495_v51  ;;  %5422 = vmatpush1.bf16.msra.mxu0 %v9795_v18  ;;  %v9866_v18 = vld [vmem:[%s13279_s1 + $0x141c] ss:$24 sps:$4 sm:$0xff]   ;;  %v9870_v38 = vld [vmem:[%s13279_s1 + $0x13e8] ss:$24 sps:$4 sm:$0xff]  }
 0x25a   : > { %v3235_v2 = vrot.slane %v3214_v34, %v10495_v51  ;;  %5463 = vmatpush1.bf16.msra.mxu1 %v9798_v30  ;;  %v3163_v42 = vpop.f32.mrf.mxu0  ;;  %5423 = vmatprep.subr.bf16.mxu0 %v9803_v33  ;;  %v9861_v30 = vld [vmem:[%s13279_s1 + $0x1410] ss:$24 sps:$4 sm:$0xff]   ;;  %v9869_v31 = vld [vmem:[%s13279_s1 + $0x13e4] ss:$24 sps:$4 sm:$0xff]   ;;  %v9875_v34 = vld [vmem:[%s13279_s1 + $0x13b4] ss:$24 sps:$4 sm:$0xff]  }
 0x25b   : > { %5464 = vmatprep.subr.bf16.mxu1 %v9806_v63  ;;  %v3204_v14 = vpop.f32.mrf.mxu1  ;;  %v3236_v43 = vcombine.low %v3221_v39, %v3228_v62  ;;  %v9872_v33 = vld [vmem:[%s13279_s1 + $0x13ec] ss:$24 sps:$4 sm:$0xff]   ;;  %v9867_v63 = vld [vmem:[%s13279_s1 + $0x13e0] ss:$24 sps:$4 sm:$0xff]   ;;  %v9878_v35 = vld [vmem:[%s13279_s1 + $0x13bc] ss:$24 sps:$4 sm:$0xff]  }
 0x25c   : > { %v3250_v8 = vrot.slane %v3235_v2, %v10495_v51  ;;  %v9873_v37 = vld [vmem:[%s13279_s1 + $0x13b0] ss:$24 sps:$4 sm:$0xff]   ;;  %v9881_v62 = vld [vmem:[%s13279_s1 + $0x1384] ss:$24 sps:$4 sm:$0xff]  }
 0x25d   : > { %v3243_v45 = vrot.slane %v3236_v43, %v10495_v51  ;;  %5424 = vmatpush1.bf16.msra.mxu0 %v9801_v5  ;;  %v9876_v39 = vld [vmem:[%s13279_s1 + $0x13b8] ss:$24 sps:$4 sm:$0xff]   ;;  %v9884_v2 = vld [vmem:[%s13279_s1 + $0x138c] ss:$24 sps:$4 sm:$0xff]   ;;  %v9882_v42 = vld [vmem:[%s13279_s1 + $0x1388] ss:$24 sps:$4 sm:$0xff]   ;;  %v12471_v43 = vrot.slane %v12239_v53, %v10495_v51 }
 0x25e   : > { %5465 = vmatpush1.bf16.msra.mxu1 %v9804_v41  ;;  %5425 = vmatprep.subr.bf16.mxu0 %v9809_v6  ;;  %v12453_v5 = vld.sshfl [vmem:[%s10490_s17 + $0x6] sm:$0x11 pattern:$0x75316420]  ;;  %v9879_v41 = vld [vmem:[%s13279_s1 + $0x1380] ss:$24 sps:$4 sm:$0xff]  }
 0x25f   : > { %5466 = vmatprep.subr.bf16.mxu1 %v9812_v13  ;;  %v3251_v50 = vcombine.low %v3243_v45, %v3250_v8  ;;  %v9887_v6 = vld [vmem:[%s13279_s1 + $0x1364] ss:$24 sps:$4 sm:$0xff]   ;;  %v9890_v13 = vld [vmem:[%s13279_s1 + $0x1654] ss:$24 sps:$4 sm:$0xff]   ;;  %v5699_v14 = vcombine.high %v12453_v5, %v12453_v5  ;;  %v9885_v8 = vld [vmem:[%s13279_s1 + $0x1360] ss:$24 sps:$4 sm:$0xff]  }
 0x260   : > { %v9888_v45 = vld [vmem:[%s13279_s1 + $0x1650] ss:$24 sps:$4 sm:$0xff]   ;;  %v9896_v53 = vld [vmem:[%s13279_s1 + $0x1624] ss:$24 sps:$4 sm:$0xff]  }
 0x261   : > { %v3253_v55 = vadd.f32 %v3251_v50, %v2480_v52  ;;  %5426 = vmatpush1.bf16.msra.mxu0 %v9807_v46  ;;  %v9893_v46 = vld [vmem:[%s13279_s1 + $0x1334] ss:$24 sps:$4 sm:$0xff]   ;;  %v9891_v50 = vld [vmem:[%s13279_s1 + $0x1330] ss:$24 sps:$4 sm:$0xff]   ;;  %v9894_v52 = vld [vmem:[%s13279_s1 + $0x1620] ss:$24 sps:$4 sm:$0xff]  }
 0x262   : > { %5467 = vmatpush1.bf16.msra.mxu1 %v9810_v47  ;;  %5427 = vmatprep.subr.bf16.mxu0 %v9815_v48  ;;  %v12486_v47 = vrot.slane %v5699_v14, %v10495_v51  ;;  %v9954_v14 = vld [vmem:[%s13279_s1 + $0x1740] ss:$24 sps:$4 sm:$0xff]  }
 0x263   : > { %5468 = vmatprep.subr.bf16.mxu1 %v9818_v49  ;;  %3254 = vst.msk [vmem:[#allocation2] sm:$0x3f] %vm10997_vm0, %v3253_v55 }
 0x265   : > { %5428 = vmatpush1.bf16.msra.mxu0 %v9813_v28 }
 0x266   : > { %5469 = vmatpush1.bf16.msra.mxu1 %v9816_v57  ;;  %5429 = vmatprep.subr.bf16.mxu0 %v9821_v59  ;;  %v9899_v57 = vld [vmem:[%s13279_s1 + $0x1304] ss:$24 sps:$4 sm:$0xff]   ;;  %v9902_v59 = vld [vmem:[%s13279_s1 + $0x15f4] ss:$24 sps:$4 sm:$0xff]  }
 0x267   : > { %5470 = vmatprep.subr.bf16.mxu1 %v9824_v60 }
 0x269   : > { %5430 = vmatpush1.bf16.msra.mxu0 %v9819_v29 }
 0x26a   : > { %5471 = vmatpush1.bf16.msra.mxu1 %v9822_v0  ;;  %5431 = vmatprep.subr.bf16.mxu0 %v9827_v54 }
 0x26b   : > { %5472 = vmatprep.subr.bf16.mxu1 %v9830_v1 }
 0x26d   : > { %5432 = vmatpush1.bf16.msra.mxu0 %v9825_v3 }
 0x26e   : > { %5473 = vmatpush1.bf16.msra.mxu1 %v9828_v4  ;;  %5433 = vmatprep.subr.bf16.mxu0 %v9833_v7  ;;  %v9897_v4 = vld [vmem:[%s13279_s1 + $0x1300] ss:$24 sps:$4 sm:$0xff]  }
 0x26f   : > { %5474 = vmatprep.subr.bf16.mxu1 %v9836_v9  ;;  %v9905_v9 = vld [vmem:[%s13279_s1 + $0x12d4] ss:$24 sps:$4 sm:$0xff]  }
 0x271   : > { %5434 = vmatpush1.bf16.msra.mxu0 %v9831_v10  ;;  %v9908_v10 = vld [vmem:[%s13279_s1 + $0x15c4] ss:$24 sps:$4 sm:$0xff]  }
 0x272   : > { %5475 = vmatpush1.bf16.msra.mxu1 %v9834_v40  ;;  %5435 = vmatprep.subr.bf16.mxu0 %v9839_v12 }
 0x273   : > { %5476 = vmatprep.subr.bf16.mxu1 %v9842_v36  ;;  %v9903_v36 = vld [vmem:[%s13279_s1 + $0x12d0] ss:$24 sps:$4 sm:$0xff]  }
 0x275   : > { %5436 = vmatpush2.bf16.msra.mxu0 %v9837_v16  ;;  %v9906_v16 = vld [vmem:[%s13279_s1 + $0x15c0] ss:$24 sps:$4 sm:$0xff]  }
 0x276   : > { %5477 = vmatpush2.bf16.msra.mxu1 %v9840_v17  ;;  %5437 = vmatprep.subr.bf16.mxu0 %v9845_v19  ;;  %v9911_v17 = vld [vmem:[%s13279_s1 + $0x12a4] ss:$24 sps:$4 sm:$0xff]   ;;  %v9914_v19 = vld [vmem:[%s13279_s1 + $0x1594] ss:$24 sps:$4 sm:$0xff]  }
 0x277   : > { %5478 = vmatprep.subr.bf16.mxu1 %v9848_v20  ;;  %v9909_v20 = vld [vmem:[%s13279_s1 + $0x12a0] ss:$24 sps:$4 sm:$0xff]  }
 0x279   : > { %5438 = vmatpush2.bf16.msra.mxu0 %v9843_v58  ;;  %v9912_v58 = vld [vmem:[%s13279_s1 + $0x1590] ss:$24 sps:$4 sm:$0xff]  }
 0x27a   : > { %5479 = vmatpush2.bf16.msra.mxu1 %v9846_v44  ;;  %5439 = vmatprep.subr.bf16.mxu0 %v9851_v21  ;;  %v9917_v44 = vld [vmem:[%s13279_s1 + $0x1274] ss:$24 sps:$4 sm:$0xff]   ;;  %v9920_v21 = vld [vmem:[%s13279_s1 + $0x1564] ss:$24 sps:$4 sm:$0xff]  }
 0x27b   : > { %5480 = vmatprep.subr.bf16.mxu1 %v9854_v22  ;;  %v9915_v22 = vld [vmem:[%s13279_s1 + $0x1270] ss:$24 sps:$4 sm:$0xff]  }
 0x27d   : > { %5440 = vmatpush2.bf16.msra.mxu0 %v9849_v23  ;;  %v9918_v23 = vld [vmem:[%s13279_s1 + $0x1560] ss:$24 sps:$4 sm:$0xff]  }
 0x27e   : > { %5481 = vmatpush2.bf16.msra.mxu1 %v9852_v24  ;;  %5441 = vmatprep.subr.bf16.mxu0 %v9857_v25  ;;  %v9923_v24 = vld [vmem:[%s13279_s1 + $0x1244] ss:$24 sps:$4 sm:$0xff]   ;;  %v9926_v25 = vld [vmem:[%s13279_s1 + $0x1534] ss:$24 sps:$4 sm:$0xff]  }
 0x27f   : > { %5482 = vmatprep.subr.bf16.mxu1 %v9860_v11  ;;  %v9921_v11 = vld [vmem:[%s13279_s1 + $0x1240] ss:$24 sps:$4 sm:$0xff]  }
 0x281   : > { %5442 = vmatpush2.bf16.msra.mxu0 %v9855_v27  ;;  %v9924_v27 = vld [vmem:[%s13279_s1 + $0x1530] ss:$24 sps:$4 sm:$0xff]  }
 0x282   : > { %5483 = vmatpush2.bf16.msra.mxu1 %v9858_v26  ;;  %5443 = vmatprep.subr.bf16.mxu0 %v9863_v61  ;;  %v9929_v26 = vld [vmem:[%s13279_s1 + $0x1214] ss:$24 sps:$4 sm:$0xff]   ;;  %v9932_v61 = vld [vmem:[%s13279_s1 + $0x1504] ss:$24 sps:$4 sm:$0xff]  }
 0x283   : > { %5484 = vmatprep.subr.bf16.mxu1 %v9866_v18  ;;  %v9927_v18 = vld [vmem:[%s13279_s1 + $0x1210] ss:$24 sps:$4 sm:$0xff]  }
 0x285   : > { %5444 = vmatpush2.bf16.msra.mxu0 %v9861_v30  ;;  %v9930_v30 = vld [vmem:[%s13279_s1 + $0x1500] ss:$24 sps:$4 sm:$0xff]  }
 0x286   : > { %5485 = vmatpush2.bf16.msra.mxu1 %v9864_v15  ;;  %5445 = vmatprep.subr.bf16.mxu0 %v9869_v31  ;;  %v9935_v15 = vld [vmem:[%s13279_s1 + $0x14e4] ss:$24 sps:$4 sm:$0xff]   ;;  %v9938_v31 = vld [vmem:[%s13279_s1 + $0x17d4] ss:$24 sps:$4 sm:$0xff]  }
 0x287   : > { %5486 = vmatprep.subr.bf16.mxu1 %v9872_v33  ;;  %v9933_v33 = vld [vmem:[%s13279_s1 + $0x14e0] ss:$24 sps:$4 sm:$0xff]  }
 0x289   : > { %5446 = vmatpush2.bf16.msra.mxu0 %v9867_v63  ;;  %v9936_v63 = vld [vmem:[%s13279_s1 + $0x17d0] ss:$24 sps:$4 sm:$0xff]  }
 0x28a   : > { %5487 = vmatpush2.bf16.msra.mxu1 %v9870_v38  ;;  %5447 = vmatprep.subr.bf16.mxu0 %v9875_v34  ;;  %v9941_v38 = vld [vmem:[%s13279_s1 + $0x14b4] ss:$24 sps:$4 sm:$0xff]   ;;  %v9944_v34 = vld [vmem:[%s13279_s1 + $0x17a4] ss:$24 sps:$4 sm:$0xff]  }
 0x28b   : > { %5488 = vmatprep.subr.bf16.mxu1 %v9878_v35  ;;  %v9939_v35 = vld [vmem:[%s13279_s1 + $0x14b0] ss:$24 sps:$4 sm:$0xff]  }
 0x28d   : > { %5448 = vmatpush2.bf16.msra.mxu0 %v9873_v37  ;;  %v9942_v37 = vld [vmem:[%s13279_s1 + $0x17a0] ss:$24 sps:$4 sm:$0xff]  }
 0x28e   : > { %5489 = vmatpush2.bf16.msra.mxu1 %v9876_v39  ;;  %5449 = vmatprep.subr.bf16.mxu0 %v9881_v62  ;;  %v9947_v39 = vld [vmem:[%s13279_s1 + $0x1484] ss:$24 sps:$4 sm:$0xff]   ;;  %v9950_v62 = vld [vmem:[%s13279_s1 + $0x1774] ss:$24 sps:$4 sm:$0xff]  }
 0x28f   : > { %5490 = vmatprep.subr.bf16.mxu1 %v9884_v2  ;;  %v9945_v2 = vld [vmem:[%s13279_s1 + $0x1480] ss:$24 sps:$4 sm:$0xff]  }
 0x291   : > { %5450 = vmatpush2.bf16.msra.mxu0 %v9879_v41  ;;  %v9948_v41 = vld [vmem:[%s13279_s1 + $0x1770] ss:$24 sps:$4 sm:$0xff]  }
 0x292   : > { %5491 = vmatpush2.bf16.msra.mxu1 %v9882_v42  ;;  %5501 = vmatprep.subr.bf16.mxu0 %v9887_v6  ;;  %v9953_v42 = vld [vmem:[%s13279_s1 + $0x1454] ss:$24 sps:$4 sm:$0xff]   ;;  %v9956_v6 = vld [vmem:[%s13279_s1 + $0x1744] ss:$24 sps:$4 sm:$0xff]  }
 0x293   : > { %6196 = vmatprep.subr.bf16.mxu1 %v9890_v13  ;;  %v9951_v13 = vld [vmem:[%s13279_s1 + $0x1450] ss:$24 sps:$4 sm:$0xff]  }
 0x294   : > { %v3894_v48 = vpop.f32.mrf.mxu0  ;;  %5452 = vmatmul.mubr.bf16.vlgmr.msra.gmra.mxu0 %v12471_v43 }
 0x295   : > { %v3935_v49 = vpop.f32.mrf.mxu1  ;;  %5493 = vmatmul.mubr.bf16.vlgmr.msra.gmra.mxu1 %v12471_v43  ;;  %5502 = vmatpush1.bf16.msra.mxu0 %v9885_v8  ;;  %v9959_v8 = vld [vmem:[%s13279_s1 + $0x1424] ss:$24 sps:$4 sm:$0xff]  }
 0x296   : > { %6197 = vmatpush1.bf16.msra.mxu1 %v9888_v45  ;;  %v3896_v55 = vpop.f32.mrf.mxu0  ;;  %5503 = vmatprep.subr.bf16.mxu0 %v9893_v46  ;;  %v9962_v45 = vld [vmem:[%s13279_s1 + $0x1714] ss:$24 sps:$4 sm:$0xff]   ;;  %v9957_v46 = vld [vmem:[%s13279_s1 + $0x1420] ss:$24 sps:$4 sm:$0xff]  }
 0x297   : > { %v3937_v28 = vpop.f32.mrf.mxu1  ;;  %6198 = vmatprep.subr.bf16.mxu1 %v9896_v53  ;;  %v3989_v60 = vcombine.low %v3894_v48, %v3896_v55  ;;  %5533 = vmatprep.mubr.bf16.mxu0 %v12268_v56  ;;  %v9900_v56 = vld [vmem:[%s13279_s1 + $0x15f0] ss:$24 sps:$4 sm:$0xff]   ;;  %v9965_v48 = vld [vmem:[%s13279_s1 + $0x13f4] ss:$24 sps:$4 sm:$0xff]   ;;  %v9971_v55 = vld [vmem:[%s13279_s1 + $0x13c4] ss:$24 sps:$4 sm:$0xff]  }
 0x298   : > { %v3990_v29 = vcombine.low %v3935_v49, %v3937_v28  ;;  %6228 = vmatprep.mubr.bf16.mxu1 %v12486_v47  ;;  %v3898_v0 = vpop.f32.mrf.mxu0  ;;  %v9960_v53 = vld [vmem:[%s13279_s1 + $0x1710] ss:$24 sps:$4 sm:$0xff]   ;;  %v9968_v49 = vld [vmem:[%s13279_s1 + $0x16e4] ss:$24 sps:$4 sm:$0xff]   ;;  %v9974_v28 = vld [vmem:[%s13279_s1 + $0x16b4] ss:$24 sps:$4 sm:$0xff]  }
 0x299   : > { %v3939_v54 = vpop.f32.mrf.mxu1  ;;  %v12505_v1 = vrot.slane %v3989_v60, %v10495_v51  ;;  %5504 = vmatpush1.bf16.msra.mxu0 %v9891_v50  ;;  %v9963_v50 = vld [vmem:[%s13279_s1 + $0x13f0] ss:$24 sps:$4 sm:$0xff]   ;;  %v9977_v60 = vld [vmem:[%s13279_s1 + $0x1394] ss:$24 sps:$4 sm:$0xff]  }
 0x29a   : > { %v12508_v3 = vrot.slane %v3990_v29, %v10495_v51  ;;  %6199 = vmatpush1.bf16.msra.mxu1 %v9894_v52  ;;  %v3899_v7 = vpop.f32.mrf.mxu0  ;;  %5505 = vmatprep.subr.bf16.mxu0 %v9899_v57  ;;  %v9966_v52 = vld [vmem:[%s13279_s1 + $0x16e0] ss:$24 sps:$4 sm:$0xff]   ;;  %v9980_v29 = vld [vmem:[%s13279_s1 + $0x1684] ss:$24 sps:$4 sm:$0xff]   ;;  %v9975_v0 = vld [vmem:[%s13279_s1 + $0x1390] ss:$24 sps:$4 sm:$0xff]  }
 0x29b   : > { %6200 = vmatprep.subr.bf16.mxu1 %v9902_v59  ;;  %v3940_v40 = vpop.f32.mrf.mxu1  ;;  %v9969_v57 = vld [vmem:[%s13279_s1 + $0x13c0] ss:$24 sps:$4 sm:$0xff]   ;;  %v9972_v59 = vld [vmem:[%s13279_s1 + $0x16b0] ss:$24 sps:$4 sm:$0xff]   ;;  %v12682_v7 = vrot.slane %v12453_v5, %v10495_v51  ;;  %v9992_v5 = vld [vmem:[%s13279_s1 + $0x1634] ss:$24 sps:$4 sm:$0xff]  }
 0x29c   : > { %v4013_v12 = vcombine.low %v12505_v1, %v12508_v3  ;;  %v9978_v54 = vld [vmem:[%s13279_s1 + $0x1680] ss:$24 sps:$4 sm:$0xff]   ;;  %v9989_v40 = vld [vmem:[%s13279_s1 + $0x162c] ss:$24 sps:$4 sm:$0xff]   ;;  %v10007_v1 = vld [vmem:[%s13279_s1 + $0x159c] ss:$24 sps:$4 sm:$0xff]  }
 0x29d   : > { %5506 = vmatpush1.bf16.msra.mxu0 %v9897_v4  ;;  %v9983_v4 = vld [vmem:[%s13279_s1 + $0x165c] ss:$24 sps:$4 sm:$0xff]  }
 0x29e   : > { %6201 = vmatpush1.bf16.msra.mxu1 %v9900_v56  ;;  %5507 = vmatprep.subr.bf16.mxu0 %v9905_v9  ;;  %v9986_v56 = vld [vmem:[%s13279_s1 + $0x1664] ss:$24 sps:$4 sm:$0xff]   ;;  %v9981_v9 = vld [vmem:[%s13279_s1 + $0x1658] ss:$24 sps:$4 sm:$0xff]  }
 0x29f   : > { %6202 = vmatprep.subr.bf16.mxu1 %v9908_v10  ;;  %v9984_v10 = vld [vmem:[%s13279_s1 + $0x1660] ss:$24 sps:$4 sm:$0xff]   ;;  %v10010_v3 = vld [vmem:[%s13279_s1 + $0x15a4] ss:$24 sps:$4 sm:$0xff]  }
 0x2a1   : > { %5508 = vmatpush1.bf16.msra.mxu0 %v9903_v36 }
 0x2a2   : > { %6203 = vmatpush1.bf16.msra.mxu1 %v9906_v16  ;;  %5509 = vmatprep.subr.bf16.mxu0 %v9911_v17  ;;  %v9987_v17 = vld [vmem:[%s13279_s1 + $0x1628] ss:$24 sps:$4 sm:$0xff]  }
 0x2a3   : > { %6204 = vmatprep.subr.bf16.mxu1 %v9914_v19  ;;  %v9990_v19 = vld [vmem:[%s13279_s1 + $0x1630] ss:$24 sps:$4 sm:$0xff]  }
 0x2a5   : > { %5510 = vmatpush1.bf16.msra.mxu0 %v9909_v20 }
 0x2a6   : > { %6205 = vmatpush1.bf16.msra.mxu1 %v9912_v58  ;;  %5511 = vmatprep.subr.bf16.mxu0 %v9917_v44  ;;  %v9998_v58 = vld [vmem:[%s13279_s1 + $0x1604] ss:$24 sps:$4 sm:$0xff]  }
 0x2a7   : > { %6206 = vmatprep.subr.bf16.mxu1 %v9920_v21 }
 0x2a9   : > { %5512 = vmatpush1.bf16.msra.mxu0 %v9915_v22 }
 0x2aa   : > { %6207 = vmatpush1.bf16.msra.mxu1 %v9918_v23  ;;  %5513 = vmatprep.subr.bf16.mxu0 %v9923_v24 }
 0x2ab   : > { %6208 = vmatprep.subr.bf16.mxu1 %v9926_v25 }
 0x2ad   : > { %5514 = vmatpush1.bf16.msra.mxu0 %v9921_v11  ;;  %v9993_v11 = vld [vmem:[%s13279_s1 + $0x15f8] ss:$24 sps:$4 sm:$0xff]  }
 0x2ae   : > { %6209 = vmatpush1.bf16.msra.mxu1 %v9924_v27  ;;  %5515 = vmatprep.subr.bf16.mxu0 %v9929_v26  ;;  %v9996_v27 = vld [vmem:[%s13279_s1 + $0x1600] ss:$24 sps:$4 sm:$0xff]  }
 0x2af   : > { %6210 = vmatprep.subr.bf16.mxu1 %v9932_v61  ;;  %v10004_v61 = vld [vmem:[%s13279_s1 + $0x15d4] ss:$24 sps:$4 sm:$0xff]  }
 0x2b1   : > { %5516 = vmatpush1.bf16.msra.mxu0 %v9927_v18 }
 0x2b2   : > { %6211 = vmatpush1.bf16.msra.mxu1 %v9930_v30  ;;  %5517 = vmatprep.subr.bf16.mxu0 %v9935_v15  ;;  %v4020_v30 = vrot.slane %v4013_v12, %v10495_v51 }
 0x2b3   : > { %6212 = vmatprep.subr.bf16.mxu1 %v9938_v31 }
 0x2b5   : > { %5518 = vmatpush2.bf16.msra.mxu0 %v9933_v33  ;;  %v9999_v33 = vld [vmem:[%s13279_s1 + $0x15c8] ss:$24 sps:$4 sm:$0xff]  }
 0x2b6   : > { %6213 = vmatpush2.bf16.msra.mxu1 %v9936_v63  ;;  %5519 = vmatprep.subr.bf16.mxu0 %v9941_v38  ;;  %v10002_v63 = vld [vmem:[%s13279_s1 + $0x15d0] ss:$24 sps:$4 sm:$0xff]   ;;  %v3257_v38 = vld [vmem:[#allocation2] sm:$0x3f] }
 0x2b7   : > { %6214 = vmatprep.subr.bf16.mxu1 %v9944_v34  ;;  %v10005_v34 = vld [vmem:[%s13279_s1 + $0x1598] ss:$24 sps:$4 sm:$0xff]  }
 0x2b9   : > { %5520 = vmatpush2.bf16.msra.mxu0 %v9939_v35  ;;  %v10008_v35 = vld [vmem:[%s13279_s1 + $0x15a0] ss:$24 sps:$4 sm:$0xff]  }
 0x2ba   : > { %6215 = vmatpush2.bf16.msra.mxu1 %v9942_v37  ;;  %5521 = vmatprep.subr.bf16.mxu0 %v9947_v39  ;;  %v10013_v37 = vld [vmem:[%s13279_s1 + $0x156c] ss:$24 sps:$4 sm:$0xff]  }
 0x2bb   : > { %6216 = vmatprep.subr.bf16.mxu1 %v9950_v62  ;;  %v10016_v39 = vld [vmem:[%s13279_s1 + $0x1574] ss:$24 sps:$4 sm:$0xff]   ;;  %v10011_v62 = vld [vmem:[%s13279_s1 + $0x1568] ss:$24 sps:$4 sm:$0xff]  }
 0x2bd   : > { %5522 = vmatpush2.bf16.msra.mxu0 %v9945_v2  ;;  %v10014_v2 = vld [vmem:[%s13279_s1 + $0x1570] ss:$24 sps:$4 sm:$0xff]  }
 0x2be   : > { %6217 = vmatpush2.bf16.msra.mxu1 %v9948_v41  ;;  %5523 = vmatprep.subr.bf16.mxu0 %v9953_v42  ;;  %v10019_v41 = vld [vmem:[%s13279_s1 + $0x153c] ss:$24 sps:$4 sm:$0xff]  }
 0x2bf   : > { %6218 = vmatprep.subr.bf16.mxu1 %v9956_v6  ;;  %v10022_v42 = vld [vmem:[%s13279_s1 + $0x1544] ss:$24 sps:$4 sm:$0xff]   ;;  %v10017_v6 = vld [vmem:[%s13279_s1 + $0x1538] ss:$24 sps:$4 sm:$0xff]  }
 0x2c1   : > { %5524 = vmatpush2.bf16.msra.mxu0 %v9951_v13  ;;  %v10020_v13 = vld [vmem:[%s13279_s1 + $0x1540] ss:$24 sps:$4 sm:$0xff]  }
 0x2c2   : > { %6219 = vmatpush2.bf16.msra.mxu1 %v9954_v14  ;;  %5525 = vmatprep.subr.bf16.mxu0 %v9959_v8  ;;  %v10025_v14 = vld [vmem:[%s13279_s1 + $0x150c] ss:$24 sps:$4 sm:$0xff]  }
 0x2c3   : > { %6220 = vmatprep.subr.bf16.mxu1 %v9962_v45  ;;  %v10028_v8 = vld [vmem:[%s13279_s1 + $0x1514] ss:$24 sps:$4 sm:$0xff]   ;;  %v10023_v45 = vld [vmem:[%s13279_s1 + $0x1508] ss:$24 sps:$4 sm:$0xff]  }
 0x2c5   : > { %5526 = vmatpush2.bf16.msra.mxu0 %v9957_v46  ;;  %v10026_v46 = vld [vmem:[%s13279_s1 + $0x1510] ss:$24 sps:$4 sm:$0xff]  }
 0x2c6   : > { %6221 = vmatpush2.bf16.msra.mxu1 %v9960_v53  ;;  %5527 = vmatprep.subr.bf16.mxu0 %v9965_v48  ;;  %v10031_v53 = vld [vmem:[%s13279_s1 + $0x17dc] ss:$24 sps:$4 sm:$0xff]  }
 0x2c7   : > { %6222 = vmatprep.subr.bf16.mxu1 %v9968_v49  ;;  %v10034_v48 = vld [vmem:[%s13279_s1 + $0x17e4] ss:$24 sps:$4 sm:$0xff]   ;;  %v10029_v49 = vld [vmem:[%s13279_s1 + $0x17d8] ss:$24 sps:$4 sm:$0xff]  }
 0x2c9   : > { %5528 = vmatpush2.bf16.msra.mxu0 %v9963_v50  ;;  %v10032_v50 = vld [vmem:[%s13279_s1 + $0x17e0] ss:$24 sps:$4 sm:$0xff]  }
 0x2ca   : > { %6223 = vmatpush2.bf16.msra.mxu1 %v9966_v52  ;;  %5529 = vmatprep.subr.bf16.mxu0 %v9971_v55  ;;  %v10037_v52 = vld [vmem:[%s13279_s1 + $0x17ac] ss:$24 sps:$4 sm:$0xff]  }
 0x2cb   : > { %6224 = vmatprep.subr.bf16.mxu1 %v9974_v28  ;;  %v10040_v55 = vld [vmem:[%s13279_s1 + $0x17b4] ss:$24 sps:$4 sm:$0xff]   ;;  %v10035_v28 = vld [vmem:[%s13279_s1 + $0x17a8] ss:$24 sps:$4 sm:$0xff]  }
 0x2cd   : > { %5530 = vmatpush2.bf16.msra.mxu0 %v9969_v57  ;;  %v10038_v57 = vld [vmem:[%s13279_s1 + $0x17b0] ss:$24 sps:$4 sm:$0xff]  }
 0x2ce   : > { %6225 = vmatpush2.bf16.msra.mxu1 %v9972_v59  ;;  %5531 = vmatprep.subr.bf16.mxu0 %v9977_v60  ;;  %v10043_v59 = vld [vmem:[%s13279_s1 + $0x177c] ss:$24 sps:$4 sm:$0xff]  }
 0x2cf   : > { %6226 = vmatprep.subr.bf16.mxu1 %v9980_v29  ;;  %v10046_v60 = vld [vmem:[%s13279_s1 + $0x1784] ss:$24 sps:$4 sm:$0xff]   ;;  %v10041_v29 = vld [vmem:[%s13279_s1 + $0x1778] ss:$24 sps:$4 sm:$0xff]  }
 0x2d1   : > { %5532 = vmatpush2.bf16.msra.mxu0 %v9975_v0  ;;  %v10044_v0 = vld [vmem:[%s13279_s1 + $0x1780] ss:$24 sps:$4 sm:$0xff]  }
 0x2d2   : > { %6227 = vmatpush2.bf16.msra.mxu1 %v9978_v54  ;;  %6237 = vmatprep.subr.bf16.mxu0 %v9983_v4  ;;  %v10049_v54 = vld [vmem:[%s13279_s1 + $0x174c] ss:$24 sps:$4 sm:$0xff]  }
 0x2d3   : > { %6278 = vmatprep.subr.bf16.mxu1 %v9986_v56  ;;  %v10052_v4 = vld [vmem:[%s13279_s1 + $0x1754] ss:$24 sps:$4 sm:$0xff]   ;;  %v10047_v56 = vld [vmem:[%s13279_s1 + $0x1748] ss:$24 sps:$4 sm:$0xff]  }
 0x2d4   : > { %v3976_v36 = vpop.f32.mrf.mxu0  ;;  %5534 = vmatmul.mubr.bf16.vlgmr.msra.gmra.mxu0 %v12471_v43  ;;  %v9995_v43 = vld [vmem:[%s13279_s1 + $0x15fc] ss:$24 sps:$4 sm:$0xff]  }
 0x2d5   : > { %6229 = vmatmul.mubr.bf16.vlgmr.msra.gmra.mxu1 %v12682_v7  ;;  %v12698_v16 = vpop.f32.mrf.mxu1  ;;  %6238 = vmatpush1.bf16.msra.mxu0 %v9981_v9  ;;  %v10050_v9 = vld [vmem:[%s13279_s1 + $0x1750] ss:$24 sps:$4 sm:$0xff]  }
 0x2d6   : > { %6279 = vmatpush1.bf16.msra.mxu1 %v9984_v10  ;;  %v3978_v20 = vpop.f32.mrf.mxu0  ;;  %6239 = vmatprep.subr.bf16.mxu0 %v9989_v40  ;;  %v10055_v10 = vld [vmem:[%s13279_s1 + $0x171c] ss:$24 sps:$4 sm:$0xff]  }
 0x2d7   : > { %6280 = vmatprep.subr.bf16.mxu1 %v9992_v5  ;;  %v12712_v44 = vpop.f32.mrf.mxu1  ;;  %v3991_v21 = vcombine.low %v3976_v36, %v3978_v20  ;;  %6269 = vmatprep.mubr.bf16.mxu0 %v12486_v47  ;;  %v10058_v40 = vld [vmem:[%s13279_s1 + $0x1724] ss:$24 sps:$4 sm:$0xff]   ;;  %v10053_v5 = vld [vmem:[%s13279_s1 + $0x1718] ss:$24 sps:$4 sm:$0xff]   ;;  %v10059_v20 = vld [vmem:[%s13279_s1 + $0x16e8] ss:$24 sps:$4 sm:$0xff]  }
 0x2d8   : > { %v4771_v22 = vcombine.low %v12698_v16, %v12712_v44  ;;  %6310 = vmatprep.mubr.bf16.mxu1 %v12486_v47  ;;  %v3980_v23 = vpop.f32.mrf.mxu0  ;;  %v10001_v47 = vld [vmem:[%s13279_s1 + $0x15cc] ss:$24 sps:$4 sm:$0xff]   ;;  %v10056_v36 = vld [vmem:[%s13279_s1 + $0x1720] ss:$24 sps:$4 sm:$0xff]  }
 0x2d9   : > { %v4680_v24 = vpop.f32.mrf.mxu1  ;;  %v4012_v25 = vrot.slane %v3991_v21, %v10495_v51  ;;  %6240 = vmatpush1.bf16.msra.mxu0 %v9987_v17  ;;  %v10061_v17 = vld [vmem:[%s13279_s1 + $0x16ec] ss:$24 sps:$4 sm:$0xff]   ;;  %v12871_v23 = vld.sshfl [vmem:[%s10490_s17 + $0x2] sm:$0x11 pattern:$0x75316420] }
 0x2da   : > { %6281 = vmatpush1.bf16.msra.mxu1 %v9990_v19  ;;  %v3981_v26 = vpop.f32.mrf.mxu0  ;;  %6241 = vmatprep.subr.bf16.mxu0 %v9995_v43  ;;  %v10064_v19 = vld [vmem:[%s13279_s1 + $0x16f4] ss:$24 sps:$4 sm:$0xff]   ;;  %v10062_v43 = vld [vmem:[%s13279_s1 + $0x16f0] ss:$24 sps:$4 sm:$0xff]   ;;  %v10070_v21 = vld [vmem:[%s13279_s1 + $0x16c4] ss:$24 sps:$4 sm:$0xff]  }
 0x2db   : > { %6282 = vmatprep.subr.bf16.mxu1 %v9998_v58  ;;  %v4681_v18 = vpop.f32.mrf.mxu1  ;;  %v4027_v15 = vrot.slane %v4012_v25, %v10495_v51  ;;  %v10067_v58 = vld [vmem:[%s13279_s1 + $0x16bc] ss:$24 sps:$4 sm:$0xff]   ;;  %v10065_v24 = vld [vmem:[%s13279_s1 + $0x16b8] ss:$24 sps:$4 sm:$0xff]   ;;  %v6475_v26 = vcombine.high %v12871_v23, %v12871_v23  ;;  %v10100_v44 = vld [vmem:[%s13279_s1 + $0x18cc] ss:$24 sps:$4 sm:$0xff]  }
 0x2dc   : > { %v10068_v25 = vld [vmem:[%s13279_s1 + $0x16c0] ss:$24 sps:$4 sm:$0xff]   ;;  %v10079_v18 = vld [vmem:[%s13279_s1 + $0x1954] ss:$24 sps:$4 sm:$0xff]   ;;  %v10097_v16 = vld [vmem:[%s13279_s1 + $0x18c4] ss:$24 sps:$4 sm:$0xff]  }
 0x2dd   : > { %v4028_v31 = vcombine.low %v4020_v30, %v4027_v15  ;;  %6242 = vmatpush1.bf16.msra.mxu0 %v9993_v11  ;;  %v10073_v11 = vld [vmem:[%s13279_s1 + $0x168c] ss:$24 sps:$4 sm:$0xff]   ;;  %v10082_v30 = vld [vmem:[%s13279_s1 + $0x195c] ss:$24 sps:$4 sm:$0xff]   ;;  %v6489_v15 = vrot.slane %v6475_v26, %v10495_v51 }
 0x2de   : > { %6283 = vmatpush1.bf16.msra.mxu1 %v9996_v27  ;;  %6243 = vmatprep.subr.bf16.mxu0 %v10001_v47  ;;  %v10076_v27 = vld [vmem:[%s13279_s1 + $0x1694] ss:$24 sps:$4 sm:$0xff]   ;;  %v10071_v47 = vld [vmem:[%s13279_s1 + $0x1688] ss:$24 sps:$4 sm:$0xff]  }
 0x2df   : > { %6284 = vmatprep.subr.bf16.mxu1 %v10004_v61  ;;  %v4030_v12 = vadd.f32 %v4028_v31, %v3257_v38  ;;  %v10074_v61 = vld [vmem:[%s13279_s1 + $0x1690] ss:$24 sps:$4 sm:$0xff]   ;;  %v10088_v38 = vld [vmem:[%s13279_s1 + $0x192c] ss:$24 sps:$4 sm:$0xff]  }
 0x2e0   : > { %v10077_v31 = vld [vmem:[%s13279_s1 + $0x1950] ss:$24 sps:$4 sm:$0xff]   ;;  %v10136_v26 = vld [vmem:[%s13279_s1 + $0x1aac] ss:$24 sps:$4 sm:$0xff]  }
 0x2e1   : > { %4031 = vst.msk [vmem:[#allocation2] sm:$0x3f] %vm10997_vm0, %v4030_v12  ;;  %6244 = vmatpush1.bf16.msra.mxu0 %v9999_v33  ;;  %v10080_v33 = vld [vmem:[%s13279_s1 + $0x1958] ss:$24 sps:$4 sm:$0xff]  }
 0x2e2   : > { %6285 = vmatpush1.bf16.msra.mxu1 %v10002_v63  ;;  %6245 = vmatprep.subr.bf16.mxu0 %v10007_v1  ;;  %v10085_v63 = vld [vmem:[%s13279_s1 + $0x1924] ss:$24 sps:$4 sm:$0xff]   ;;  %v12912_v1 = vshrl.u32 %v6489_v15, 16  ;;  %v10137_v15 = vld [vmem:[%s13279_s1 + $0x1a70] ss:$24 sps:$4 sm:$0xff]  }
 0x2e3   : > { %6286 = vmatprep.subr.bf16.mxu1 %v10010_v3 }
 0x2e5   : > { %6246 = vmatpush1.bf16.msra.mxu0 %v10005_v34  ;;  %v10083_v34 = vld [vmem:[%s13279_s1 + $0x1920] ss:$24 sps:$4 sm:$0xff]  }
 0x2e6   : > { %6287 = vmatpush1.bf16.msra.mxu1 %v10008_v35  ;;  %6247 = vmatprep.subr.bf16.mxu0 %v10013_v37  ;;  %v10086_v35 = vld [vmem:[%s13279_s1 + $0x1928] ss:$24 sps:$4 sm:$0xff]  }
 0x2e7   : > { %6288 = vmatprep.subr.bf16.mxu1 %v10016_v39 }
 0x2e9   : > { %6248 = vmatpush1.bf16.msra.mxu0 %v10011_v62  ;;  %v10091_v62 = vld [vmem:[%s13279_s1 + $0x18f4] ss:$24 sps:$4 sm:$0xff]  }
 0x2ea   : > { %6289 = vmatpush1.bf16.msra.mxu1 %v10014_v2  ;;  %6249 = vmatprep.subr.bf16.mxu0 %v10019_v41 }
 0x2eb   : > { %6290 = vmatprep.subr.bf16.mxu1 %v10022_v42 }
 0x2ed   : > { %6250 = vmatpush1.bf16.msra.mxu0 %v10017_v6 }
 0x2ee   : > { %6291 = vmatpush1.bf16.msra.mxu1 %v10020_v13  ;;  %6251 = vmatprep.subr.bf16.mxu0 %v10025_v14  ;;  %v4780_v13 = vrot.slane %v4771_v22, %v10495_v51 }
 0x2ef   : > { %6292 = vmatprep.subr.bf16.mxu1 %v10028_v8 }
 0x2f1   : > { %6252 = vmatpush1.bf16.msra.mxu0 %v10023_v45  ;;  %v10089_v45 = vld [vmem:[%s13279_s1 + $0x18f0] ss:$24 sps:$4 sm:$0xff]  }
 0x2f2   : > { %6293 = vmatpush1.bf16.msra.mxu1 %v10026_v46  ;;  %6253 = vmatprep.subr.bf16.mxu0 %v10031_v53  ;;  %v10092_v46 = vld [vmem:[%s13279_s1 + $0x18f8] ss:$24 sps:$4 sm:$0xff]  }
 0x2f3   : > { %6294 = vmatprep.subr.bf16.mxu1 %v10034_v48 }
 0x2f5   : > { %6254 = vmatpush2.bf16.msra.mxu0 %v10029_v49 }
 0x2f6   : > { %6295 = vmatpush2.bf16.msra.mxu1 %v10032_v50  ;;  %6255 = vmatprep.subr.bf16.mxu0 %v10037_v52  ;;  %v10095_v52 = vld [vmem:[%s13279_s1 + $0x18c0] ss:$24 sps:$4 sm:$0xff]  }
 0x2f7   : > { %6296 = vmatprep.subr.bf16.mxu1 %v10040_v55  ;;  %v10098_v55 = vld [vmem:[%s13279_s1 + $0x18c8] ss:$24 sps:$4 sm:$0xff]  }
 0x2f9   : > { %6256 = vmatpush2.bf16.msra.mxu0 %v10035_v28  ;;  %v10103_v28 = vld [vmem:[%s13279_s1 + $0x1894] ss:$24 sps:$4 sm:$0xff]  }
 0x2fa   : > { %6297 = vmatpush2.bf16.msra.mxu1 %v10038_v57  ;;  %6257 = vmatprep.subr.bf16.mxu0 %v10043_v59  ;;  %v10106_v57 = vld [vmem:[%s13279_s1 + $0x189c] ss:$24 sps:$4 sm:$0xff]  }
 0x2fb   : > { %6298 = vmatprep.subr.bf16.mxu1 %v10046_v60  ;;  %v4033_v60 = vld [vmem:[#allocation2] sm:$0x3f] }
 0x2fd   : > { %6258 = vmatpush2.bf16.msra.mxu0 %v10041_v29 }
 0x2fe   : > { %6299 = vmatpush2.bf16.msra.mxu1 %v10044_v0  ;;  %6259 = vmatprep.subr.bf16.mxu0 %v10049_v54  ;;  %v10101_v0 = vld [vmem:[%s13279_s1 + $0x1890] ss:$24 sps:$4 sm:$0xff]  }
 0x2ff   : > { %6300 = vmatprep.subr.bf16.mxu1 %v10052_v4  ;;  %v10104_v54 = vld [vmem:[%s13279_s1 + $0x1898] ss:$24 sps:$4 sm:$0xff]   ;;  %v10109_v4 = vld [vmem:[%s13279_s1 + $0x1864] ss:$24 sps:$4 sm:$0xff]  }
 0x301   : > { %6260 = vmatpush2.bf16.msra.mxu0 %v10047_v56  ;;  %v10112_v56 = vld [vmem:[%s13279_s1 + $0x186c] ss:$24 sps:$4 sm:$0xff]  }
 0x302   : > { %6301 = vmatpush2.bf16.msra.mxu1 %v10050_v9  ;;  %6261 = vmatprep.subr.bf16.mxu0 %v10055_v10  ;;  %v10107_v9 = vld [vmem:[%s13279_s1 + $0x1860] ss:$24 sps:$4 sm:$0xff]  }
 0x303   : > { %6302 = vmatprep.subr.bf16.mxu1 %v10058_v40  ;;  %v10110_v10 = vld [vmem:[%s13279_s1 + $0x1868] ss:$24 sps:$4 sm:$0xff]   ;;  %v10115_v40 = vld [vmem:[%s13279_s1 + $0x1834] ss:$24 sps:$4 sm:$0xff]  }
 0x305   : > { %6262 = vmatpush2.bf16.msra.mxu0 %v10053_v5  ;;  %v10118_v5 = vld [vmem:[%s13279_s1 + $0x183c] ss:$24 sps:$4 sm:$0xff]  }
 0x306   : > { %6303 = vmatpush2.bf16.msra.mxu1 %v10056_v36  ;;  %6263 = vmatprep.subr.bf16.mxu0 %v10061_v17  ;;  %v10113_v36 = vld [vmem:[%s13279_s1 + $0x1830] ss:$24 sps:$4 sm:$0xff]  }
 0x307   : > { %6304 = vmatprep.subr.bf16.mxu1 %v10064_v19  ;;  %v10116_v17 = vld [vmem:[%s13279_s1 + $0x1838] ss:$24 sps:$4 sm:$0xff]   ;;  %v10121_v19 = vld [vmem:[%s13279_s1 + $0x1804] ss:$24 sps:$4 sm:$0xff]  }
 0x309   : > { %6264 = vmatpush2.bf16.msra.mxu0 %v10059_v20  ;;  %v10124_v20 = vld [vmem:[%s13279_s1 + $0x180c] ss:$24 sps:$4 sm:$0xff]  }
 0x30a   : > { %6305 = vmatpush2.bf16.msra.mxu1 %v10062_v43  ;;  %6265 = vmatprep.subr.bf16.mxu0 %v10067_v58  ;;  %v10119_v43 = vld [vmem:[%s13279_s1 + $0x1800] ss:$24 sps:$4 sm:$0xff]  }
 0x30b   : > { %6306 = vmatprep.subr.bf16.mxu1 %v10070_v21  ;;  %v10122_v58 = vld [vmem:[%s13279_s1 + $0x1808] ss:$24 sps:$4 sm:$0xff]   ;;  %v10127_v21 = vld [vmem:[%s13279_s1 + $0x1ad4] ss:$24 sps:$4 sm:$0xff]  }
 0x30d   : > { %6266 = vmatpush2.bf16.msra.mxu0 %v10065_v24  ;;  %v10130_v24 = vld [vmem:[%s13279_s1 + $0x1adc] ss:$24 sps:$4 sm:$0xff]  }
 0x30e   : > { %6307 = vmatpush2.bf16.msra.mxu1 %v10068_v25  ;;  %6267 = vmatprep.subr.bf16.mxu0 %v10073_v11  ;;  %v10125_v25 = vld [vmem:[%s13279_s1 + $0x1ad0] ss:$24 sps:$4 sm:$0xff]  }
 0x30f   : > { %6308 = vmatprep.subr.bf16.mxu1 %v10076_v27  ;;  %v10128_v11 = vld [vmem:[%s13279_s1 + $0x1ad8] ss:$24 sps:$4 sm:$0xff]   ;;  %v10133_v27 = vld [vmem:[%s13279_s1 + $0x1aa4] ss:$24 sps:$4 sm:$0xff]  }
 0x311   : > { %6268 = vmatpush2.bf16.msra.mxu0 %v10071_v47  ;;  %v10131_v47 = vld [vmem:[%s13279_s1 + $0x1aa0] ss:$24 sps:$4 sm:$0xff]  }
 0x312   : > { %6309 = vmatpush2.bf16.msra.mxu1 %v10074_v61  ;;  %6978 = vmatprep.subr.bf16.mxu0 %v10079_v18  ;;  %v10134_v61 = vld [vmem:[%s13279_s1 + $0x1aa8] ss:$24 sps:$4 sm:$0xff]   ;;  %v10139_v18 = vld [vmem:[%s13279_s1 + $0x1a74] ss:$24 sps:$4 sm:$0xff]  }
 0x313   : > { %7019 = vmatprep.subr.bf16.mxu1 %v10082_v30  ;;  %v10142_v30 = vld [vmem:[%s13279_s1 + $0x1a7c] ss:$24 sps:$4 sm:$0xff]  }
 0x314   : > { %v4717_v3 = vpop.f32.mrf.mxu0  ;;  %6270 = vmatmul.mubr.bf16.vlgmr.msra.gmra.mxu0 %v12682_v7 }
 0x315   : > { %6311 = vmatmul.mubr.bf16.vlgmr.msra.gmra.mxu1 %v12682_v7  ;;  %v4758_v12 = vpop.f32.mrf.mxu1  ;;  %6979 = vmatpush1.bf16.msra.mxu0 %v10077_v31  ;;  %v10094_v7 = vld [vmem:[%s13279_s1 + $0x18fc] ss:$24 sps:$4 sm:$0xff]   ;;  %v10140_v31 = vld [vmem:[%s13279_s1 + $0x1a78] ss:$24 sps:$4 sm:$0xff]  }
 0x316   : > { %7020 = vmatpush1.bf16.msra.mxu1 %v10080_v33  ;;  %v4719_v37 = vpop.f32.mrf.mxu0  ;;  %6980 = vmatprep.subr.bf16.mxu0 %v10085_v63  ;;  %v10145_v33 = vld [vmem:[%s13279_s1 + $0x1a44] ss:$24 sps:$4 sm:$0xff]  }
 0x317   : > { %v4760_v39 = vpop.f32.mrf.mxu1  ;;  %7021 = vmatprep.subr.bf16.mxu1 %v10088_v38  ;;  %v4772_v2 = vcombine.low %v4717_v3, %v4719_v37  ;;  %7010 = vmatprep.mubr.bf16.mxu0 %v12912_v1  ;;  %v10148_v63 = vld [vmem:[%s13279_s1 + $0x1a4c] ss:$24 sps:$4 sm:$0xff]   ;;  %v10143_v38 = vld [vmem:[%s13279_s1 + $0x1a40] ss:$24 sps:$4 sm:$0xff]  }
 0x318   : > { %v4773_v41 = vcombine.low %v4758_v12, %v4760_v39  ;;  %7051 = vmatprep.mubr.bf16.mxu1 %v12912_v1  ;;  %v4721_v42 = vpop.f32.mrf.mxu0  ;;  %v10146_v3 = vld [vmem:[%s13279_s1 + $0x1a48] ss:$24 sps:$4 sm:$0xff]   ;;  %v10151_v12 = vld [vmem:[%s13279_s1 + $0x1a14] ss:$24 sps:$4 sm:$0xff]   ;;  %v10152_v37 = vld [vmem:[%s13279_s1 + $0x1a18] ss:$24 sps:$4 sm:$0xff]  }
 0x319   : > { %v4762_v6 = vpop.f32.mrf.mxu1  ;;  %v4787_v14 = vrot.slane %v4772_v2, %v10495_v51  ;;  %6981 = vmatpush1.bf16.msra.mxu0 %v10083_v34  ;;  %v10154_v34 = vld [vmem:[%s13279_s1 + $0x1a1c] ss:$24 sps:$4 sm:$0xff]   ;;  %v10158_v2 = vld [vmem:[%s13279_s1 + $0x19e8] ss:$24 sps:$4 sm:$0xff]  }
 0x31a   : > { %v4794_v8 = vrot.slane %v4773_v41, %v10495_v51  ;;  %7022 = vmatpush1.bf16.msra.mxu1 %v10086_v35  ;;  %v4722_v53 = vpop.f32.mrf.mxu0  ;;  %6982 = vmatprep.subr.bf16.mxu0 %v10091_v62  ;;  %v10149_v35 = vld [vmem:[%s13279_s1 + $0x1a10] ss:$24 sps:$4 sm:$0xff]   ;;  %v10157_v39 = vld [vmem:[%s13279_s1 + $0x19e4] ss:$24 sps:$4 sm:$0xff]   ;;  %v10163_v41 = vld [vmem:[%s13279_s1 + $0x19b4] ss:$24 sps:$4 sm:$0xff]  }
 0x31b   : > { %7023 = vmatprep.subr.bf16.mxu1 %v10094_v7  ;;  %v4763_v22 = vpop.f32.mrf.mxu1  ;;  %v4795_v48 = vcombine.low %v4780_v13, %v4787_v14  ;;  %v10160_v62 = vld [vmem:[%s13279_s1 + $0x19ec] ss:$24 sps:$4 sm:$0xff]   ;;  %v10155_v7 = vld [vmem:[%s13279_s1 + $0x19e0] ss:$24 sps:$4 sm:$0xff]   ;;  %v10166_v42 = vld [vmem:[%s13279_s1 + $0x19bc] ss:$24 sps:$4 sm:$0xff]  }
 0x31c   : > { %v4809_v49 = vrot.slane %v4794_v8, %v10495_v51  ;;  %v10161_v6 = vld [vmem:[%s13279_s1 + $0x19b0] ss:$24 sps:$4 sm:$0xff]   ;;  %v10169_v14 = vld [vmem:[%s13279_s1 + $0x1984] ss:$24 sps:$4 sm:$0xff]   ;;  %v10178_v22 = vld [vmem:[%s13279_s1 + $0x1934] ss:$24 sps:$4 sm:$0xff]  }
 0x31d   : > { %v4802_v50 = vrot.slane %v4795_v48, %v10495_v51  ;;  %6983 = vmatpush1.bf16.msra.mxu0 %v10089_v45  ;;  %v10164_v13 = vld [vmem:[%s13279_s1 + $0x19b8] ss:$24 sps:$4 sm:$0xff]   ;;  %v10172_v8 = vld [vmem:[%s13279_s1 + $0x198c] ss:$24 sps:$4 sm:$0xff]   ;;  %v6482_v45 = vrot.slane %v12871_v23, %v10495_v51  ;;  %v10170_v53 = vld [vmem:[%s13279_s1 + $0x1988] ss:$24 sps:$4 sm:$0xff]  }
 0x31e   : > { %7024 = vmatpush1.bf16.msra.mxu1 %v10092_v46  ;;  %6984 = vmatprep.subr.bf16.mxu0 %v10097_v16  ;;  %v10167_v46 = vld [vmem:[%s13279_s1 + $0x1980] ss:$24 sps:$4 sm:$0xff]   ;;  %v10175_v16 = vld [vmem:[%s13279_s1 + $0x1964] ss:$24 sps:$4 sm:$0xff]  }
 0x31f   : > { %7025 = vmatprep.subr.bf16.mxu1 %v10100_v44  ;;  %v4810_v59 = vcombine.low %v4802_v50, %v4809_v49  ;;  %v13107_v44 = vshrl.u32 %v6482_v45, 16  ;;  %v10173_v23 = vld [vmem:[%s13279_s1 + $0x1960] ss:$24 sps:$4 sm:$0xff]   ;;  %v10176_v50 = vld [vmem:[%s13279_s1 + $0x1930] ss:$24 sps:$4 sm:$0xff]  }
 0x321   : > { %v4812_v29 = vadd.f32 %v4810_v59, %v4033_v60  ;;  %6985 = vmatpush1.bf16.msra.mxu0 %v10095_v52 }
 0x322   : > { %7026 = vmatpush1.bf16.msra.mxu1 %v10098_v55  ;;  %6986 = vmatprep.subr.bf16.mxu0 %v10103_v28  ;;  %v10181_v28 = vld [vmem:[%s13279_s1 + $0x1904] ss:$24 sps:$4 sm:$0xff]  }
 0x323   : > { %7027 = vmatprep.subr.bf16.mxu1 %v10106_v57  ;;  %4813 = vst.msk [vmem:[#allocation2] sm:$0x3f] %vm10997_vm0, %v4812_v29 }
 0x325   : > { %6987 = vmatpush1.bf16.msra.mxu0 %v10101_v0 }
 0x326   : > { %7028 = vmatpush1.bf16.msra.mxu1 %v10104_v54  ;;  %6988 = vmatprep.subr.bf16.mxu0 %v10109_v4 }
 0x327   : > { %7029 = vmatprep.subr.bf16.mxu1 %v10112_v56  ;;  %v10184_v56 = vld [vmem:[%s13279_s1 + $0x18d4] ss:$24 sps:$4 sm:$0xff]  }
 0x329   : > { %6989 = vmatpush1.bf16.msra.mxu0 %v10107_v9 }
 0x32a   : > { %7030 = vmatpush1.bf16.msra.mxu1 %v10110_v10  ;;  %6990 = vmatprep.subr.bf16.mxu0 %v10115_v40  ;;  %v10182_v40 = vld [vmem:[%s13279_s1 + $0x18d0] ss:$24 sps:$4 sm:$0xff]  }
 0x32b   : > { %7031 = vmatprep.subr.bf16.mxu1 %v10118_v5  ;;  %v10187_v5 = vld [vmem:[%s13279_s1 + $0x18a4] ss:$24 sps:$4 sm:$0xff]  }
 0x32d   : > { %6991 = vmatpush1.bf16.msra.mxu0 %v10113_v36  ;;  %v10185_v36 = vld [vmem:[%s13279_s1 + $0x18a0] ss:$24 sps:$4 sm:$0xff]  }
 0x32e   : > { %7032 = vmatpush1.bf16.msra.mxu1 %v10116_v17  ;;  %6992 = vmatprep.subr.bf16.mxu0 %v10121_v19  ;;  %v10190_v17 = vld [vmem:[%s13279_s1 + $0x1874] ss:$24 sps:$4 sm:$0xff]   ;;  %v10188_v19 = vld [vmem:[%s13279_s1 + $0x1870] ss:$24 sps:$4 sm:$0xff]  }
 0x32f   : > { %7033 = vmatprep.subr.bf16.mxu1 %v10124_v20  ;;  %v10193_v20 = vld [vmem:[%s13279_s1 + $0x1844] ss:$24 sps:$4 sm:$0xff]  }
 0x331   : > { %6993 = vmatpush1.bf16.msra.mxu0 %v10119_v43  ;;  %v10191_v43 = vld [vmem:[%s13279_s1 + $0x1840] ss:$24 sps:$4 sm:$0xff]  }
 0x332   : > { %7034 = vmatpush1.bf16.msra.mxu1 %v10122_v58  ;;  %6994 = vmatprep.subr.bf16.mxu0 %v10127_v21  ;;  %v10196_v58 = vld [vmem:[%s13279_s1 + $0x1814] ss:$24 sps:$4 sm:$0xff]   ;;  %v10194_v21 = vld [vmem:[%s13279_s1 + $0x1810] ss:$24 sps:$4 sm:$0xff]  }
 0x333   : > { %7035 = vmatprep.subr.bf16.mxu1 %v10130_v24  ;;  %v10199_v24 = vld [vmem:[%s13279_s1 + $0x1ae4] ss:$24 sps:$4 sm:$0xff]  }
 0x335   : > { %6995 = vmatpush2.bf16.msra.mxu0 %v10125_v25  ;;  %v10197_v25 = vld [vmem:[%s13279_s1 + $0x1ae0] ss:$24 sps:$4 sm:$0xff]  }
 0x336   : > { %7036 = vmatpush2.bf16.msra.mxu1 %v10128_v11  ;;  %6996 = vmatprep.subr.bf16.mxu0 %v10133_v27  ;;  %v10202_v11 = vld [vmem:[%s13279_s1 + $0x1ab4] ss:$24 sps:$4 sm:$0xff]   ;;  %v10200_v27 = vld [vmem:[%s13279_s1 + $0x1ab0] ss:$24 sps:$4 sm:$0xff]  }
 0x337   : > { %7037 = vmatprep.subr.bf16.mxu1 %v10136_v26  ;;  %v10205_v26 = vld [vmem:[%s13279_s1 + $0x1a84] ss:$24 sps:$4 sm:$0xff]  }
 0x339   : > { %6997 = vmatpush2.bf16.msra.mxu0 %v10131_v47  ;;  %v10203_v47 = vld [vmem:[%s13279_s1 + $0x1a80] ss:$24 sps:$4 sm:$0xff]  }
 0x33a   : > { %7038 = vmatpush2.bf16.msra.mxu1 %v10134_v61  ;;  %6998 = vmatprep.subr.bf16.mxu0 %v10139_v18  ;;  %v10208_v61 = vld [vmem:[%s13279_s1 + $0x1a54] ss:$24 sps:$4 sm:$0xff]   ;;  %v10206_v18 = vld [vmem:[%s13279_s1 + $0x1a50] ss:$24 sps:$4 sm:$0xff]  }
 0x33b   : > { %7039 = vmatprep.subr.bf16.mxu1 %v10142_v30  ;;  %v10211_v30 = vld [vmem:[%s13279_s1 + $0x1a24] ss:$24 sps:$4 sm:$0xff]  }
 0x33d   : > { %6999 = vmatpush2.bf16.msra.mxu0 %v10137_v15  ;;  %v10209_v15 = vld [vmem:[%s13279_s1 + $0x1a20] ss:$24 sps:$4 sm:$0xff]  }
 0x33e   : > { %7040 = vmatpush2.bf16.msra.mxu1 %v10140_v31  ;;  %7000 = vmatprep.subr.bf16.mxu0 %v10145_v33  ;;  %v10214_v31 = vld [vmem:[%s13279_s1 + $0x19f4] ss:$24 sps:$4 sm:$0xff]   ;;  %v10212_v33 = vld [vmem:[%s13279_s1 + $0x19f0] ss:$24 sps:$4 sm:$0xff]  }
 0x33f   : > { %7041 = vmatprep.subr.bf16.mxu1 %v10148_v63  ;;  %v10217_v63 = vld [vmem:[%s13279_s1 + $0x19c4] ss:$24 sps:$4 sm:$0xff]  }
 0x341   : > { %7001 = vmatpush2.bf16.msra.mxu0 %v10143_v38  ;;  %v10215_v38 = vld [vmem:[%s13279_s1 + $0x19c0] ss:$24 sps:$4 sm:$0xff]  }
 0x342   : > { %7042 = vmatpush2.bf16.msra.mxu1 %v10146_v3  ;;  %7002 = vmatprep.subr.bf16.mxu0 %v10151_v12  ;;  %v10220_v3 = vld [vmem:[%s13279_s1 + $0x1994] ss:$24 sps:$4 sm:$0xff]   ;;  %v10218_v12 = vld [vmem:[%s13279_s1 + $0x1990] ss:$24 sps:$4 sm:$0xff]  }
 0x343   : > { %7043 = vmatprep.subr.bf16.mxu1 %v10154_v34 }
 0x345   : > { %7003 = vmatpush2.bf16.msra.mxu0 %v10149_v35 }
 0x346   : > { %7044 = vmatpush2.bf16.msra.mxu1 %v10152_v37  ;;  %7004 = vmatprep.subr.bf16.mxu0 %v10157_v39 }
 0x347   : > { %7045 = vmatprep.subr.bf16.mxu1 %v10160_v62 }
 0x349   : > { %7005 = vmatpush2.bf16.msra.mxu0 %v10155_v7 }
 0x34a   : > { %7046 = vmatpush2.bf16.msra.mxu1 %v10158_v2  ;;  %7006 = vmatprep.subr.bf16.mxu0 %v10163_v41 }
 0x34b   : > { %7047 = vmatprep.subr.bf16.mxu1 %v10166_v42 }
 0x34d   : > { %7007 = vmatpush2.bf16.msra.mxu0 %v10161_v6 }
 0x34e   : > { %7048 = vmatpush2.bf16.msra.mxu1 %v10164_v13  ;;  %7008 = vmatprep.subr.bf16.mxu0 %v10169_v14 }
 0x34f   : > { %7049 = vmatprep.subr.bf16.mxu1 %v10172_v8 }
 0x351   : > { %7009 = vmatpush2.bf16.msra.mxu0 %v10167_v46  ;;  %v4816_v46 = vld [vmem:[#allocation2] sm:$0x3f] }
 0x352   : > { %7050 = vmatpush2.bf16.msra.mxu1 %v10170_v53  ;;  %7060 = vmatprep.subr.bf16.mxu0 %v10175_v16 }
 0x354   : > { %v5453_v48 = vpop.f32.mrf.mxu0  ;;  %7011 = vmatmul.mubr.bf16.vlgmr.msra.gmra.mxu0 %v13107_v44 }
 0x355   : > { %v5494_v49 = vpop.f32.mrf.mxu1  ;;  %7052 = vmatmul.mubr.bf16.vlgmr.msra.gmra.mxu1 %v13107_v44  ;;  %7061 = vmatpush1.bf16.msra.mxu0 %v10173_v23 }
 0x356   : > { %7092 = vmatprep.mubr.bf16.mxu0 %v12912_v1  ;;  %v5455_v52 = vpop.f32.mrf.mxu0  ;;  %7062 = vmatprep.subr.bf16.mxu0 %v10178_v22  ;;  %v10179_v1 = vld [vmem:[%s13279_s1 + $0x1900] ss:$24 sps:$4 sm:$0xff]  }
 0x357   : > { %v5496_v55 = vpop.f32.mrf.mxu1  ;;  %v5548_v57 = vcombine.low %v5453_v48, %v5455_v52 }
 0x358   : > { %v5549_v59 = vcombine.low %v5494_v49, %v5496_v55  ;;  %v5457_v60 = vpop.f32.mrf.mxu0 }
 0x359   : > { %v5498_v29 = vpop.f32.mrf.mxu1  ;;  %v13125_v0 = vrot.slane %v5548_v57, %v10495_v51  ;;  %7063 = vmatpush1.bf16.msra.mxu0 %v10176_v50 }
 0x35a   : > { %v13128_v54 = vrot.slane %v5549_v59, %v10495_v51  ;;  %v5458_v4 = vpop.f32.mrf.mxu0  ;;  %7064 = vmatprep.subr.bf16.mxu0 %v10181_v28 }
 0x35b   : > { %v5499_v9 = vpop.f32.mrf.mxu1 }
 0x35c   : > { %v5572_v10 = vcombine.low %v13125_v0, %v13128_v54 }
 0x35d   : > { %7065 = vmatpush1.bf16.msra.mxu0 %v10179_v1 }
 0x35e   : > { %7066 = vmatprep.subr.bf16.mxu0 %v10184_v56  ;;  %v5579_v14 = vrot.slane %v5572_v10, %v10495_v51 }
 0x361   : > { %7067 = vmatpush1.bf16.msra.mxu0 %v10182_v40 }
 0x362   : > { %7068 = vmatprep.subr.bf16.mxu0 %v10187_v5 }
 0x365   : > { %7069 = vmatpush1.bf16.msra.mxu0 %v10185_v36 }
 0x366   : > { %7070 = vmatprep.subr.bf16.mxu0 %v10190_v17 }
 0x369   : > { %7071 = vmatpush1.bf16.msra.mxu0 %v10188_v19 }
 0x36a   : > { %7072 = vmatprep.subr.bf16.mxu0 %v10193_v20 }
 0x36d   : > { %7073 = vmatpush1.bf16.msra.mxu0 %v10191_v43 }
 0x36e   : > { %7074 = vmatprep.subr.bf16.mxu0 %v10196_v58 }
 0x371   : > { %7075 = vmatpush1.bf16.msra.mxu0 %v10194_v21 }
 0x372   : > { %7076 = vmatprep.subr.bf16.mxu0 %v10199_v24 }
 0x375   : > { %7077 = vmatpush2.bf16.msra.mxu0 %v10197_v25 }
 0x376   : > { %7078 = vmatprep.subr.bf16.mxu0 %v10202_v11 }
 0x379   : > { %7079 = vmatpush2.bf16.msra.mxu0 %v10200_v27 }
 0x37a   : > { %7080 = vmatprep.subr.bf16.mxu0 %v10205_v26 }
 0x37d   : > { %7081 = vmatpush2.bf16.msra.mxu0 %v10203_v47 }
 0x37e   : > { %7082 = vmatprep.subr.bf16.mxu0 %v10208_v61 }
 0x381   : > { %7083 = vmatpush2.bf16.msra.mxu0 %v10206_v18 }
 0x382   : > { %7084 = vmatprep.subr.bf16.mxu0 %v10211_v30 }
 0x385   : > { %7085 = vmatpush2.bf16.msra.mxu0 %v10209_v15 }
 0x386   : > { %7086 = vmatprep.subr.bf16.mxu0 %v10214_v31 }
 0x389   : > { %7087 = vmatpush2.bf16.msra.mxu0 %v10212_v33 }
 0x38a   : > { %7088 = vmatprep.subr.bf16.mxu0 %v10217_v63 }
 0x38d   : > { %7089 = vmatpush2.bf16.msra.mxu0 %v10215_v38 }
 0x38e   : > { %7090 = vmatprep.subr.bf16.mxu0 %v10220_v3 }
 0x391   : > { %7091 = vmatpush2.bf16.msra.mxu0 %v10218_v12 }
 0x394   : > { %v5535_v34 = vpop.f32.mrf.mxu0  ;;  %7093 = vmatmul.mubr.bf16.vlgmr.msra.gmra.mxu0 %v13107_v44 }
 0x395   : > { %v6230_v35 = vpop.f32.mrf.mxu1 }
 0x396   : > { %v5537_v37 = vpop.f32.mrf.mxu0 }
 0x397   : > { %v6232_v39 = vpop.f32.mrf.mxu1  ;;  %v5550_v62 = vcombine.low %v5535_v34, %v5537_v37 }
 0x398   : > { %v6325_v7 = vcombine.low %v6230_v35, %v6232_v39  ;;  %v5539_v2 = vpop.f32.mrf.mxu0 }
 0x399   : > { %v6234_v41 = vpop.f32.mrf.mxu1  ;;  %v5571_v42 = vrot.slane %v5550_v62, %v10495_v51 }
 0x39a   : > { %v5540_v6 = vpop.f32.mrf.mxu0  ;;  %v6334_v55 = vrot.slane %v6325_v7, %v10495_v51 }
 0x39b   : > { %v6235_v13 = vpop.f32.mrf.mxu1  ;;  %v5586_v8 = vrot.slane %v5571_v42, %v10495_v51 }
 0x39d   : > { %v5587_v45 = vcombine.low %v5579_v14, %v5586_v8 }
 0x39f   : > { %v5589_v53 = vadd.f32 %v5587_v45, %v4816_v46 }
 0x3a1   : > { %5590 = vst.msk [vmem:[#allocation2] sm:$0x3f] %vm10997_vm0, %v5589_v53 }
 0x3a8   : > { %v5593_v4 = vld [vmem:[#allocation2] sm:$0x3f] }
 0x3d4   : > { %v6271_v16 = vpop.f32.mrf.mxu0 }
 0x3d5   : > { %v6312_v44 = vpop.f32.mrf.mxu1 }
 0x3d6   : > { %v6273_v23 = vpop.f32.mrf.mxu0 }
 0x3d7   : > { %v6314_v22 = vpop.f32.mrf.mxu1  ;;  %v6326_v48 = vcombine.low %v6271_v16, %v6273_v23 }
 0x3d8   : > { %v6327_v49 = vcombine.low %v6312_v44, %v6314_v22  ;;  %v6275_v50 = vpop.f32.mrf.mxu0 }
 0x3d9   : > { %v6316_v52 = vpop.f32.mrf.mxu1  ;;  %v6341_v28 = vrot.slane %v6326_v48, %v10495_v51 }
 0x3da   : > { %v6348_v57 = vrot.slane %v6327_v49, %v10495_v51  ;;  %v6276_v59 = vpop.f32.mrf.mxu0 }
 0x3db   : > { %v6317_v60 = vpop.f32.mrf.mxu1  ;;  %v6349_v29 = vcombine.low %v6334_v55, %v6341_v28 }
 0x3dc   : > { %v6363_v0 = vrot.slane %v6348_v57, %v10495_v51 }
 0x3dd   : > { %v6356_v54 = vrot.slane %v6349_v29, %v10495_v51 }
 0x3df   : > { %v6364_v1 = vcombine.low %v6356_v54, %v6363_v0 }
 0x3e1   : > { %v6366_v56 = vadd.f32 %v6364_v1, %v5593_v4 }
 0x3e3   : > { %6367 = vst.msk [vmem:[#allocation2] sm:$0x3f] %vm10997_vm0, %v6366_v56 }
 0x3ea   : > { %v6369_v33 = vld [vmem:[#allocation2] sm:$0x3f] }
 0x414   : > { %v7012_v9 = vpop.f32.mrf.mxu0 }
 0x415   : > { %v7053_v10 = vpop.f32.mrf.mxu1 }
 0x416   : > { %v7014_v40 = vpop.f32.mrf.mxu0 }
 0x417   : > { %v7055_v5 = vpop.f32.mrf.mxu1  ;;  %v7107_v36 = vcombine.low %v7012_v9, %v7014_v40 }
 0x418   : > { %v7108_v17 = vcombine.low %v7053_v10, %v7055_v5  ;;  %v7016_v19 = vpop.f32.mrf.mxu0 }
 0x419   : > { %v7057_v20 = vpop.f32.mrf.mxu1  ;;  %v7116_v43 = vrot.slane %v7107_v36, %v10495_v51 }
 0x41a   : > { %v7123_v58 = vrot.slane %v7108_v17, %v10495_v51  ;;  %v7017_v21 = vpop.f32.mrf.mxu0 }
 0x41b   : > { %v7058_v24 = vpop.f32.mrf.mxu1 }
 0x41c   : > { %v7131_v25 = vcombine.low %v7116_v43, %v7123_v58 }
 0x41e   : > { %v7138_v30 = vrot.slane %v7131_v25, %v10495_v51 }
 0x454   : > { %v7094_v11 = vpop.f32.mrf.mxu0 }
 0x456   : > { %v7096_v27 = vpop.f32.mrf.mxu0 }
 0x457   : > { %v7109_v26 = vcombine.low %v7094_v11, %v7096_v27 }
 0x458   : > { %v7098_v47 = vpop.f32.mrf.mxu0 }
 0x459   : > { %v7130_v61 = vrot.slane %v7109_v26, %v10495_v51 }
 0x45a   : > { %v7099_v18 = vpop.f32.mrf.mxu0 }
 0x45b   : > { %v7145_v15 = vrot.slane %v7130_v61, %v10495_v51 }
 0x45d   : > { %v7146_v31 = vcombine.low %v7138_v30, %v7145_v15 }
 0x45f   : > { %v7148_v63 = vadd.f32 %v7146_v31, %v6369_v33 }
 0x461   : > { %7149 = vst.msk [vmem:[#allocation2] sm:$0x3f] %vm10997_vm0, %v7148_v63 }
 0x468   : > { %v7150_v38 = vld [vmem:[#allocation2] sm:$0x3f] }
 0x469   : > { %7151 = vst.msk [vmem:[%s134_s3] sm:$0x3f] %vm10997_vm0, %v7150_v38 }
 0x46a   : > { %10234 = shalt.err (!%p10231_p3)
}
 0x46b   : > { %s10235_s22 = scalar_lea.hbm %s13241_s7, 96  ;;  %s10239_s24 = scalar_lea.hbm %s13280_s2, 192 }
 0x46c   : > { %p10236_p4 = scmp.ne.s32.totalorder %s13241_s7, %s10235_s22  ;;  %p10240_p9 = scmp.lt.s32.totalorder %s13241_s7, %s13280_s2 }
 0x46d   : > { %p10241_p10 = scmp.lt.s32.totalorder %s10239_s24, %s10235_s22 }
 0x46e   : > { %p10237_p7 = pnand %p10236_p4, %p10339_p5 }
 0x46f   : > { %p10242_p11 = por %p10241_p10, %p10240_p9 }
 0x470   : > { %p10238_p8 = pneg %p10237_p7 }
 0x472   : > { %p10243_p12 = pnand %p10242_p11, %p10238_p8 }
 0x474   : > { %10246 = shalt.err (!%p10243_p12)
}
 0x475   : > { %8884 = dma.vmem_to_hbm [thread:$0]  (%p10339_p5), %s7168_s4, 96, %s13241_s7, %s7153_s8  }
 0x476 PF: > { %p8890_p13 = scmp.ge.s32.totalorder %s10281_s12, 2  ;;  %s7179_s27 = sand.u32 1, %s10269_s9  }
 0x477   : > { %s7180_s28 = scalar_lea.sflag [#allocation4], %s7179_s27 }
 0x478   : > { %p8887_p0 = pnand %p8890_p13, %p10343_p6 }
 0x47a   : > { %p8888_p1 = pneg %p8887_p0 }
 0x47c   : > { %10264 = dma.done.wait (%p8888_p1), %s7180_s28, 96  }
 0x47d   : > { %10266 = vsyncadd (%p8888_p1), %s7180_s28, 4294967200  ;;  %p12_p2 = scmp.ge.s32.totalorder %s10326_s15, 4   ;;  %s13285_s9 = smov %s10273_s10 }
 0x47e   : > { %s13286_s10 = smov %s10277_s11  ;;  %s13287_s11 = smov %s10337_s18 }
 0x47f   : > { %s13288_s12 = smov %s10326_s15  ;;  %14 = sbr.rel (!%p12_p2) target bundleno = 3 (0x3), region = 76 }
 0x484   :  { %7185 = vsyncpa [#allocation4], 1 }
 0x485   :  { %7187 = vsyncpa [#allocation4 + $0x1], 1 }

</bundles_post_ra>
